<compile_context>
chip_gen: v7x
topology: tpu7x:2x2x1
jax: 0.10.0
libtpu: 0.0.40
codegen_flags: <defaults>
</compile_context>

<pallas_src>
import math

import jax
import jax.numpy as jnp
from jax import lax
from jax.experimental import pallas as pl
from jax.experimental.pallas import tpu as pltpu

VMEM_SPEC = pl.BlockSpec(memory_space=pltpu.MemorySpace.VMEM)
NEG_BIG = -1e30


def _idiv(x, d):
    if d & (d - 1) == 0:
        return jnp.right_shift(x, int(d).bit_length() - 1)
    return lax.div(x, jnp.int32(d))


def _imod(x, d):
    if d & (d - 1) == 0:
        return jnp.bitwise_and(x, d - 1)
    return lax.rem(x, jnp.int32(d))


# ----------------------------------------------------------------------------
# Fused forward kernel factory.
# ----------------------------------------------------------------------------
def make_fused_kernel(spec, *, B, Bp, T, H, D, NH, HD):
    TB = T * Bp
    G6 = 6 * H
    att_scale = 1.0 / math.sqrt(float(HD))

    def kernel(sf_ref, x_ref, len_ref, wbuf_ref, bbuf_ref,
               out_a_ref, out_s_ref, seq_ref, xp_ref, mcat_ref):

        def getw(name):
            r0, rows, cols, brow = spec[name]
            return (wbuf_ref[r0:r0 + rows, 0:cols],
                    bbuf_ref[brow:brow + 1, 0:cols])

        def dense(x, name, relu=True):
            w, b = getw(name)
            y = jnp.dot(x, w, preferred_element_type=jnp.float32) + b
            return jnp.maximum(y, 0.0) if relu else y

        # ---------------- per-step GRU length masks, built once from lengths ----------------
        # mcat[i*Bp + b, 0:H]  = 1.0 if  i        < len[b]   (forward direction at time i)
        # mcat[i*Bp + b, H:2H] = 1.0 if (T-1-i)   < len[b]   (backward direction at time T-1-i)
        r_i = lax.broadcasted_iota(jnp.int32, (TB, D), 0)
        c_i = lax.broadcasted_iota(jnp.int32, (TB, D), 1)
        step_i = _idiv(r_i, Bp)
        t_eff = jnp.where(c_i < H, step_i, (T - 1) - step_i)
        mcat_ref[...] = (t_eff < len_ref[...]).astype(jnp.float32)

        # ---------------- static feature MLP (BN folded into following linears) ------------
        static_out = dense(dense(dense(sf_ref[...], "s0"), "s1"), "s2")     # (B, hidden//2)

        # ---------------- 3-layer bidirectional GRU ----------------
        # Flat time-major layout: row = t * Bp + b (rows with b >= B carry zero length).
        # Gate column order (both xp and gh): [fw r | bw r | fw z | bw z | fw n | bw n].
        dirsel = _imod(_idiv(lax.broadcasted_iota(jnp.int32, (Bp, G6), 1), H), 2) == 0

        for li in range(3):
            wi, bi = getw(f"gi{li}")
            wh, bh = getw(f"gh{li}")
            xin = x_ref[...] if li == 0 else seq_ref[...]                    # (TB, in)
            # Hoisted input projection for BOTH directions and all timesteps.
            xp_ref[...] = jnp.dot(xin, wi, preferred_element_type=jnp.float32) + bi
            h_cat = jnp.zeros((Bp, D), jnp.float32)                          # [h_fw | h_bw]
            for i in range(T):                                               # fully unrolled
                rf, rb = i * Bp, (T - 1 - i) * Bp                            # fw/bw time rows
                # forward gate columns come from time i, backward ones from time T-1-i
                xcomb = jnp.where(dirsel, xp_ref[rf:rf + Bp, :], xp_ref[rb:rb + Bp, :])
                # ONE block-diagonal recurrent matmul for both directions.
                gh = jnp.dot(h_cat, wh, preferred_element_type=jnp.float32) + bh
                rz = jax.nn.sigmoid(xcomb[:, 0:4 * H] + gh[:, 0:4 * H])      # one sigmoid
                r = rz[:, 0:D]                                               # [r_fw | r_bw]
                z = rz[:, 2 * H:4 * H]                                       # [z_fw | z_bw]
                n = jnp.tanh(xcomb[:, 4 * H:G6] + r * gh[:, 4 * H:G6])       # one tanh
                h_new = (1.0 - z) * n + z * h_cat
                m = mcat_ref[i * Bp:(i + 1) * Bp, :]                         # (Bp, 2H) mask
                masked = m * h_new
                h_cat = masked + (1.0 - m) * h_cat                           # freeze when padded
                seq_ref[rf:rf + Bp, 0:H] = masked[:, 0:H]                    # padded outputs = 0
                seq_ref[rb:rb + Bp, H:D] = masked[:, H:D]

        # ---------------- multi-head self-attention (heads stacked on sublanes) -------------
        xseq = seq_ref[...]                                                  # (TB, D)
        wqkv, bqkv = getw("qkv")
        qkv = jnp.dot(xseq, wqkv, preferred_element_type=jnp.float32) + bqkv
        q, k, v = qkv[:, 0:D], qkv[:, D:2 * D], qkv[:, 2 * D:3 * D]

        # hmask[h, d] = 1.0 iff feature d belongs to head h
        hmask = (_idiv(lax.broadcasted_iota(jnp.int32, (NH, D), 1), HD) ==
                 lax.broadcasted_iota(jnp.int32, (NH, D), 0)).astype(jnp.float32)
        # Head-masked queries stacked along sublanes -> all heads share ONE QK^T matmul.
        q_big = jnp.concatenate([q * hmask[hh:hh + 1, :] for hh in range(NH)], axis=0)

        s = lax.dot_general(q_big, k, (((1,), (1,)), ((), ())),
                            preferred_element_type=jnp.float32) * att_scale   # (NH*TB, TB)
        # additive same-batch mask built from iota (row/col % Bp gives the batch index)
        ri = lax.broadcasted_iota(jnp.int32, (NH * TB, TB), 0)
        ci = lax.broadcasted_iota(jnp.int32, (NH * TB, TB), 1)
        s = jnp.where(_imod(ri, Bp) == _imod(ci, Bp), s, NEG_BIG)
        # ONE softmax pass for all heads.
        s = s - jnp.max(s, axis=-1, keepdims=True)
        e = jnp.exp(s)
        prob = e * pl.reciprocal(jnp.sum(e, axis=-1, keepdims=True), approx=True)
        ctx = jnp.dot(prob, v, preferred_element_type=jnp.float32)            # (NH*TB, D)

        # merge heads: head h's output lives in row block h and column block h.
        attn = ctx[0:TB, :] * hmask[0:1, :]
        for hh in range(1, NH):
            attn = attn + ctx[hh * TB:(hh + 1) * TB, :] * hmask[hh:hh + 1, :]  # (TB, D)

        # mean over time (commutes with the linear out_proj -> average first).
        seq_sum = attn[0:Bp, :]
        for t in range(1, T):
            seq_sum = seq_sum + attn[t * Bp:(t + 1) * Bp, :]
        wo, bo = getw("o")
        seq_out = jnp.dot(seq_sum * (1.0 / T), wo,
                          preferred_element_type=jnp.float32) + bo             # (Bp, D)

        # ---------------- decision layers + heads ----------------
        combined = jnp.concatenate([static_out, seq_out[0:B, :]], axis=1)      # (B, h//2 + D)
        feats = dense(dense(dense(combined, "d0"), "d1"), "d2")                # (B, h//2)
        out_a_ref[...] = dense(dense(feats, "a0"), "a1", relu=False)           # (B, 8)
        raw = dense(dense(dense(feats, "z0"), "z1"), "z2", relu=False)         # (B, 1)
        # stable softplus, then the +1.0 from PokerNet.forward
        out_s_ref[...] = 1.0 + (jnp.maximum(raw, 0.0)
                                + jnp.log(1.0 + jnp.exp(-jnp.abs(raw))))

    return kernel


# ----------------------------------------------------------------------------
# Full forward pass wrapper (one pallas_call, 5 inputs).
# ----------------------------------------------------------------------------
def poker_net_forward(packed, static_features, action_sequence, sequence_lengths,
                      *, gru_hidden_dim=16, num_heads=8):
    wbuf, bbuf, spec = packed
    B, T, A = action_sequence.shape
    H = gru_hidden_dim
    D = 2 * H
    HD = D // num_heads
    Bp = ((B + 7) // 8) * 8                 # pad batch to a sublane multiple
    TB = T * Bp

    # flat time-major, batch-padded layout: row = t * Bp + b
    x_tbd = jnp.transpose(action_sequence, (1, 0, 2)).astype(jnp.float32)      # (T, B, A)
    x2d = jnp.zeros((T, Bp, A), jnp.float32).at[:, :B, :].set(x_tbd).reshape(TB, A)

    lengths = jnp.clip(sequence_lengths.astype(jnp.int32), 0, T)
    lenrow = jnp.tile(jnp.zeros((Bp,), jnp.int32).at[:B].set(lengths), T).reshape(TB, 1)

    kernel = make_fused_kernel(spec, B=B, Bp=Bp, T=T, H=H, D=D, NH=num_heads, HD=HD)
    action_logits, size_pred = pl.pallas_call(
        kernel,
        out_shape=(jax.ShapeDtypeStruct((B, 8), jnp.float32),
                   jax.ShapeDtypeStruct((B, 1), jnp.float32)),
        in_specs=[VMEM_SPEC] * 5,
        out_specs=(VMEM_SPEC, VMEM_SPEC),
        scratch_shapes=[pltpu.VMEM((TB, D), jnp.float32),        # GRU layer outputs [fw|bw]
                        pltpu.VMEM((TB, 6 * H), jnp.float32),    # hoisted input projection
                        pltpu.VMEM((TB, D), jnp.float32)],       # per-step length masks
    )(static_features.astype(jnp.float32), x2d, lenrow, wbuf, bbuf)
    return action_logits, size_pred


# ----------------------------------------------------------------------------
# Parameter construction (PyTorch-like uniform init) and packing.
# ----------------------------------------------------------------------------
def init_params(key, static_dim=29, action_dim=4, hidden_dim=32, gru_hidden_dim=16):
    keys = iter(jax.random.split(key, 128))

    def u(shape, bound):
        return jax.random.uniform(next(keys), shape, jnp.float32, -bound, bound)

    def linear(i, o):
        b = 1.0 / math.sqrt(i)
        return {"w": u((i, o), b), "b": u((o,), b)}

    def bn(d, eps=1e-5):
        # fresh BatchNorm1d running stats, eval mode: y = x / sqrt(1 + eps)
        return {"scale": jnp.full((d,), 1.0 / math.sqrt(1.0 + eps), jnp.float32),
                "shift": jnp.zeros((d,), jnp.float32)}

    h, h2, h4, h8 = hidden_dim, hidden_dim // 2, hidden_dim // 4, hidden_dim // 8
    g, D = gru_hidden_dim, 2 * gru_hidden_dim

    p = {
        "static": [{"lin": linear(static_dim, h), "bn": bn(h)},
                   {"lin": linear(h, h), "bn": bn(h)},
                   {"lin": linear(h, h2), "bn": bn(h2)}],
        "decision": [{"lin": linear(h2 + D, h), "bn": bn(h)},
                     {"lin": linear(h, h), "bn": bn(h)},
                     {"lin": linear(h, h2), "bn": bn(h2)}],
        "action": [{"lin": linear(h2, h4), "bn": bn(h4)},
                   {"lin": linear(h4, 8), "bn": None}],
        "size": [{"lin": linear(h2, h4), "bn": bn(h4)},
                 {"lin": linear(h4, h8), "bn": bn(h8)},
                 {"lin": linear(h8, 1), "bn": None}],
        "attn": {"q": linear(D, D), "k": linear(D, D), "v": linear(D, D), "o": linear(D, D)},
    }

    gru = []
    in_d = action_dim
    kb = 1.0 / math.sqrt(g)
    for _ in range(3):
        layer = {}
        for dname in ("fw", "bw"):
            layer[dname] = {
                "w_ir": u((in_d, g), kb), "w_iz": u((in_d, g), kb), "w_in": u((in_d, g), kb),
                "w_hr": u((g, g), kb), "w_hz": u((g, g), kb), "w_hn": u((g, g), kb),
                "b_ir": u((g,), kb), "b_iz": u((g,), kb), "b_in": u((g,), kb),
                "b_hr": u((g,), kb), "b_hz": u((g,), kb), "b_hn": u((g,), kb),
            }
        gru.append(layer)
        in_d = D
    p["gru"] = gru
    return p


def pack_params(p, *, gru_hidden_dim=16):
    g = gru_hidden_dim
    D = 2 * g

    def fold(lin, scale, shift):
        # Input BN affine y = scale*a + shift feeding this linear:
        #   (scale*a + shift) @ w + b  ==  a @ (scale[:,None]*w) + (shift @ w + b)
        w, b = lin["w"], lin["b"]
        if scale is None:
            return w, b
        return w * scale[:, None], b + shift @ w

    entries = []  # (name, weight (in,out), bias (out,))

    def chain(prefix, layers, in_scale=None, in_shift=None):
        s, t = in_scale, in_shift
        for idx, layer in enumerate(layers):
            w, b = fold(layer["lin"], s, t)
            entries.append((f"{prefix}{idx}", w, b))
            bn = layer["bn"]
            s, t = (bn["scale"], bn["shift"]) if bn is not None else (None, None)
        return s, t  # trailing BN of the chain (folded into the next consumer)

    s_scale, s_shift = chain("s", p["static"])
    # decision L1 input = [static_out (with trailing static BN pending) | attention out (no BN)]
    dsc = jnp.concatenate([s_scale, jnp.ones((D,), jnp.float32)])
    dsh = jnp.concatenate([s_shift, jnp.zeros((D,), jnp.float32)])
    d_scale, d_shift = chain("d", p["decision"], dsc, dsh)
    chain("a", p["action"], d_scale, d_shift)
    chain("z", p["size"], d_scale, d_shift)

    # GRU: gate columns ordered [fw r | bw r | fw z | bw z | fw n | bw n]; both directions'
    # recurrent weights merged into one block-diagonal (2H, 6H) matrix.
    for li, layer in enumerate(p["gru"]):
        f, b = layer["fw"], layer["bw"]
        wi = jnp.concatenate([f["w_ir"], b["w_ir"], f["w_iz"], b["w_iz"],
                              f["w_in"], b["w_in"]], axis=1)
        bi = jnp.concatenate([f["b_ir"], b["b_ir"], f["b_iz"], b["b_iz"],
                              f["b_in"], b["b_in"]])
        wh = jnp.zeros((D, 6 * g), jnp.float32)
        wh = wh.at[0:g, 0:g].set(f["w_hr"]).at[g:D, g:2 * g].set(b["w_hr"])
        wh = wh.at[0:g, 2 * g:3 * g].set(f["w_hz"]).at[g:D, 3 * g:4 * g].set(b["w_hz"])
        wh = wh.at[0:g, 4 * g:5 * g].set(f["w_hn"]).at[g:D, 5 * g:6 * g].set(b["w_hn"])
        bh = jnp.concatenate([f["b_hr"], b["b_hr"], f["b_hz"], b["b_hz"],
                              f["b_hn"], b["b_hn"]])
        entries.append((f"gi{li}", wi, bi))
        entries.append((f"gh{li}", wh, bh))

    # Attention: fused QKV projection, columns [Q | K | V], heads contiguous within each.
    a = p["attn"]
    entries.append(("qkv",
                    jnp.concatenate([a["q"]["w"], a["k"]["w"], a["v"]["w"]], axis=1),
                    jnp.concatenate([a["q"]["b"], a["k"]["b"], a["v"]["b"]])))
    entries.append(("o", a["o"]["w"], a["o"]["b"]))

    # Pack all weights into ONE buffer (each block's rows padded to a sublane multiple) and
    # all biases into ONE buffer (each on an 8-aligned row) -> 2 DMAs instead of ~55.
    wcols = max(w.shape[1] for _, w, _ in entries)
    wblocks, bblocks, spec, row = [], [], {}, 0
    for name, w, b in entries:
        r, c = w.shape
        rpad = ((r + 7) // 8) * 8
        wblocks.append(jnp.zeros((rpad, wcols), jnp.float32).at[:r, :c].set(w))
        bblocks.append(jnp.zeros((8, wcols), jnp.float32).at[0, :c].set(b))
        spec[name] = (row, r, c, (len(bblocks) - 1) * 8)
        row += rpad
    return jnp.concatenate(wblocks, axis=0), jnp.concatenate(bblocks, axis=0), spec


if __name__ == "__main__":
    B, T = 2, 8
    static_dim, action_dim, hidden_dim, gru_hidden_dim = 29, 4, 32, 16

    key = jax.random.PRNGKey(0)
    pk, sk, ak = jax.random.split(key, 3)
    params = init_params(pk, static_dim, action_dim, hidden_dim, gru_hidden_dim)
    packed = pack_params(params, gru_hidden_dim=gru_hidden_dim)

    static_features = jax.random.normal(sk, (B, static_dim), jnp.float32)
    action_sequence = jax.random.normal(ak, (B, T, action_dim), jnp.float32)
    # sorted descending (enforce_sorted=True); max length == T (see TODO above)
    sequence_lengths = jnp.array([8, 5], dtype=jnp.int32)

    fwd = jax.jit(lambda s, a, l: poker_net_forward(
        packed, s, a, l, gru_hidden_dim=gru_hidden_dim))
    action_logits, size_pred = fwd(static_features, action_sequence, sequence_lengths)
    jax.block_until_ready((action_logits, size_pred))

    assert action_logits.shape == (B, 8)
    assert size_pred.shape == (B, 1)
    assert bool(jnp.all(jnp.isfinite(action_logits)))
    assert bool(jnp.all(jnp.isfinite(size_pred)))
    assert bool(jnp.all(size_pred >= 1.0))
    print("KERNEL_OK")
</pallas_src>

<mosaic_0001>
module attributes {stable_mosaic.version = 11 : i64} {
  func.func @kernel(%arg0: memref<2x29xf32, #tpu.memory_space<vmem>>, %arg1: memref<64x4xf32, #tpu.memory_space<vmem>>, %arg2: memref<64x1xi32, #tpu.memory_space<vmem>>, %arg3: memref<496x96xf32, #tpu.memory_space<vmem>>, %arg4: memref<152x96xf32, #tpu.memory_space<vmem>>, %arg5: memref<2x8xf32, #tpu.memory_space<vmem>>, %arg6: memref<2x1xf32, #tpu.memory_space<vmem>>, %arg7: memref<64x32xf32, #tpu.memory_space<vmem>>, %arg8: memref<64x96xf32, #tpu.memory_space<vmem>>, %arg9: memref<64x32xf32, #tpu.memory_space<vmem>>) attributes {dimension_semantics = [], scalar_prefetch = 0 : i64, scratch_operands = 3 : i64, tpu.core_type = #tpu.core_type<tc>} {
    %0 = tpu.iota {dimensions = array<i32: 0>} : vector<64x32xi32>
    %1 = tpu.iota {dimensions = array<i32: 1>} : vector<64x32xi32>
    %c3_i32 = arith.constant 3 : i32
    %2 = vector.broadcast %c3_i32 : i32 to vector<64x32xi32>
    %3 = arith.shrsi %0, %2 : vector<64x32xi32>
    %c16_i32 = arith.constant 16 : i32
    %4 = vector.broadcast %c16_i32 : i32 to vector<64x32xi32>
    %5 = arith.cmpi slt, %1, %4 : vector<64x32xi32>
    %c7_i32 = arith.constant 7 : i32
    %6 = vector.broadcast %c7_i32 : i32 to vector<64x32xi32>
    %7 = arith.subi %6, %3 : vector<64x32xi32>
    %8 = arith.select %5, %3, %7 : vector<64x32xi1>, vector<64x32xi32>
    %c0 = arith.constant 0 : index
    %c0_0 = arith.constant 0 : index
    %9 = vector.load %arg2[%c0, %c0_0] : memref<64x1xi32, #tpu.memory_space<vmem>>, vector<64x1xi32>
    %10 = vector.broadcast %9 : vector<64x1xi32> to vector<64x32xi32>
    %11 = arith.cmpi slt, %8, %10 : vector<64x32xi32>
    %12 = arith.extui %11 : vector<64x32xi1> to vector<64x32xi32>
    %13 = arith.sitofp %12 : vector<64x32xi32> to vector<64x32xf32>
    %c0_1 = arith.constant 0 : index
    %c0_2 = arith.constant 0 : index
    %14 = vector.load %arg9[%c0_1, %c0_2] : memref<64x32xf32, #tpu.memory_space<vmem>>, vector<64x32xf32>
    tpu.vector_store %arg9[%c0_1, %c0_2], %13 {strides = array<i32>} : memref<64x32xf32, #tpu.memory_space<vmem>>, vector<64x32xf32>,
    %c0_3 = arith.constant 0 : index
    %c0_4 = arith.constant 0 : index
    %15 = vector.load %arg0[%c0_3, %c0_4] : memref<2x29xf32, #tpu.memory_space<vmem>>, vector<2x29xf32>
    %c0_5 = arith.constant 0 : index
    %c0_6 = arith.constant 0 : index
    %16 = vector.load %arg3[%c0_5, %c0_6] : memref<496x96xf32, #tpu.memory_space<vmem>>, vector<29x32xf32>
    %c0_7 = arith.constant 0 : index
    %c0_8 = arith.constant 0 : index
    %17 = vector.load %arg4[%c0_7, %c0_8] : memref<152x96xf32, #tpu.memory_space<vmem>>, vector<1x32xf32>
    %cst = arith.constant dense<0.000000e+00> : vector<2x32xf32>
    %18 = tpu.matmul %15, %16, %cst {dimension_numbers = #tpu.dot_dimension_numbers<[1], [0], [0], [1], [0, 0, 1, 1], [], []>} : vector<2x29xf32>, vector<29x32xf32>, vector<2x32xf32> -> vector<2x32xf32>
    %19 = vector.broadcast %17 : vector<1x32xf32> to vector<2x32xf32>
    %20 = arith.addf %18, %19 : vector<2x32xf32>
    %cst_9 = arith.constant 0.000000e+00 : f32
    %21 = vector.broadcast %cst_9 : f32 to vector<2x32xf32>
    %22 = arith.maximumf %20, %21 : vector<2x32xf32>
    %c32 = arith.constant 32 : index
    %c0_10 = arith.constant 0 : index
    %23 = vector.load %arg3[%c32, %c0_10] : memref<496x96xf32, #tpu.memory_space<vmem>>, vector<32x32xf32>
    %c8 = arith.constant 8 : index
    %c0_11 = arith.constant 0 : index
    %24 = vector.load %arg4[%c8, %c0_11] : memref<152x96xf32, #tpu.memory_space<vmem>>, vector<1x32xf32>
    %cst_12 = arith.constant dense<0.000000e+00> : vector<2x32xf32>
    %25 = tpu.matmul %22, %23, %cst_12 {dimension_numbers = #tpu.dot_dimension_numbers<[1], [0], [0], [1], [0, 0, 1, 1], [], []>} : vector<2x32xf32>, vector<32x32xf32>, vector<2x32xf32> -> vector<2x32xf32>
    %26 = vector.broadcast %24 : vector<1x32xf32> to vector<2x32xf32>
    %27 = arith.addf %25, %26 : vector<2x32xf32>
    %cst_13 = arith.constant 0.000000e+00 : f32
    %28 = vector.broadcast %cst_13 : f32 to vector<2x32xf32>
    %29 = arith.maximumf %27, %28 : vector<2x32xf32>
    %c64 = arith.constant 64 : index
    %c0_14 = arith.constant 0 : index
    %30 = vector.load %arg3[%c64, %c0_14] : memref<496x96xf32, #tpu.memory_space<vmem>>, vector<32x16xf32>
    %c16 = arith.constant 16 : index
    %c0_15 = arith.constant 0 : index
    %31 = vector.load %arg4[%c16, %c0_15] : memref<152x96xf32, #tpu.memory_space<vmem>>, vector<1x16xf32>
    %cst_16 = arith.constant dense<0.000000e+00> : vector<2x16xf32>
    %32 = tpu.matmul %29, %30, %cst_16 {dimension_numbers = #tpu.dot_dimension_numbers<[1], [0], [0], [1], [0, 0, 1, 1], [], []>} : vector<2x32xf32>, vector<32x16xf32>, vector<2x16xf32> -> vector<2x16xf32>
    %33 = vector.broadcast %31 : vector<1x16xf32> to vector<2x16xf32>
    %34 = arith.addf %32, %33 : vector<2x16xf32>
    %cst_17 = arith.constant 0.000000e+00 : f32
    %35 = vector.broadcast %cst_17 : f32 to vector<2x16xf32>
    %36 = arith.maximumf %34, %35 : vector<2x16xf32>
    %37 = tpu.iota {dimensions = array<i32: 1>} : vector<8x96xi32>
    %c4_i32 = arith.constant 4 : i32
    %38 = vector.broadcast %c4_i32 : i32 to vector<8x96xi32>
    %39 = arith.shrsi %37, %38 : vector<8x96xi32>
    %c1_i32 = arith.constant 1 : i32
    %40 = vector.broadcast %c1_i32 : i32 to vector<8x96xi32>
    %41 = arith.andi %39, %40 : vector<8x96xi32>
    %c0_i32 = arith.constant 0 : i32
    %42 = vector.broadcast %c0_i32 : i32 to vector<8x96xi32>
    %43 = arith.cmpi eq, %41, %42 : vector<8x96xi32>
    %c264 = arith.constant 264 : index
    %c0_18 = arith.constant 0 : index
    %44 = vector.load %arg3[%c264, %c0_18] : memref<496x96xf32, #tpu.memory_space<vmem>>, vector<4x96xf32>
    %c88 = arith.constant 88 : index
    %c0_19 = arith.constant 0 : index
    %45 = vector.load %arg4[%c88, %c0_19] : memref<152x96xf32, #tpu.memory_space<vmem>>, vector<1x96xf32>
    %c272 = arith.constant 272 : index
    %c0_20 = arith.constant 0 : index
    %46 = vector.load %arg3[%c272, %c0_20] : memref<496x96xf32, #tpu.memory_space<vmem>>, vector<32x96xf32>
    %c96 = arith.constant 96 : index
    %c0_21 = arith.constant 0 : index
    %47 = vector.load %arg4[%c96, %c0_21] : memref<152x96xf32, #tpu.memory_space<vmem>>, vector<1x96xf32>
    %c0_22 = arith.constant 0 : index
    %c0_23 = arith.constant 0 : index
    %48 = vector.load %arg1[%c0_22, %c0_23] : memref<64x4xf32, #tpu.memory_space<vmem>>, vector<64x4xf32>
    %cst_24 = arith.constant dense<0.000000e+00> : vector<64x96xf32>
    %49 = tpu.matmul %48, %44, %cst_24 {dimension_numbers = #tpu.dot_dimension_numbers<[1], [0], [0], [1], [0, 0, 1, 1], [], []>} : vector<64x4xf32>, vector<4x96xf32>, vector<64x96xf32> -> vector<64x96xf32>
    %50 = vector.broadcast %45 : vector<1x96xf32> to vector<64x96xf32>
    %51 = arith.addf %49, %50 : vector<64x96xf32>
    %c0_25 = arith.constant 0 : index
    %c0_26 = arith.constant 0 : index
    %52 = vector.load %arg8[%c0_25, %c0_26] : memref<64x96xf32, #tpu.memory_space<vmem>>, vector<64x96xf32>
    tpu.vector_store %arg8[%c0_25, %c0_26], %51 {strides = array<i32>} : memref<64x96xf32, #tpu.memory_space<vmem>>, vector<64x96xf32>,
    %cst_27 = arith.constant 0.000000e+00 : f32
    %53 = vector.broadcast %cst_27 : f32 to vector<8x32xf32>
    %c0_28 = arith.constant 0 : index
    %c0_29 = arith.constant 0 : index
    %54 = vector.load %arg8[%c0_28, %c0_29] : memref<64x96xf32, #tpu.memory_space<vmem>>, vector<8x96xf32>
    %c56 = arith.constant 56 : index
    %c0_30 = arith.constant 0 : index
    %55 = vector.load %arg8[%c56, %c0_30] : memref<64x96xf32, #tpu.memory_space<vmem>>, vector<8x96xf32>
    %56 = arith.select %43, %54, %55 : vector<8x96xi1>, vector<8x96xf32>
    %cst_31 = arith.constant dense<0.000000e+00> : vector<8x96xf32>
    %57 = tpu.matmul %53, %46, %cst_31 {dimension_numbers = #tpu.dot_dimension_numbers<[1], [0], [0], [1], [0, 0, 1, 1], [], []>} : vector<8x32xf32>, vector<32x96xf32>, vector<8x96xf32> -> vector<8x96xf32>
    %58 = vector.broadcast %47 : vector<1x96xf32> to vector<8x96xf32>
    %59 = arith.addf %57, %58 : vector<8x96xf32>
    %60 = vector.extract_strided_slice %56 {offsets = [0, 0], sizes = [8, 64], strides = [1, 1]} : vector<8x96xf32> to vector<8x64xf32>
    %61 = vector.extract_strided_slice %59 {offsets = [0, 0], sizes = [8, 64], strides = [1, 1]} : vector<8x96xf32> to vector<8x64xf32>
    %62 = arith.addf %60, %61 : vector<8x64xf32>
    %63 = arith.negf %62 : vector<8x64xf32>
    %64 = math.exp %63 : vector<8x64xf32>
    %cst_32 = arith.constant 1.000000e+00 : f32
    %65 = vector.broadcast %cst_32 : f32 to vector<8x64xf32>
    %66 = arith.addf %65, %64 : vector<8x64xf32>
    %67 = arith.divf %65, %66 : vector<8x64xf32>
    %68 = vector.extract_strided_slice %67 {offsets = [0, 0], sizes = [8, 32], strides = [1, 1]} : vector<8x64xf32> to vector<8x32xf32>
    %69 = vector.extract_strided_slice %67 {offsets = [0, 32], sizes = [8, 32], strides = [1, 1]} : vector<8x64xf32> to vector<8x32xf32>
    %70 = vector.extract_strided_slice %56 {offsets = [0, 64], sizes = [8, 32], strides = [1, 1]} : vector<8x96xf32> to vector<8x32xf32>
    %71 = vector.extract_strided_slice %59 {offsets = [0, 64], sizes = [8, 32], strides = [1, 1]} : vector<8x96xf32> to vector<8x32xf32>
    %72 = arith.mulf %68, %71 : vector<8x32xf32>
    %73 = arith.addf %70, %72 : vector<8x32xf32>
    %74 = math.tanh %73 : vector<8x32xf32>
    %cst_33 = arith.constant 1.000000e+00 : f32
    %75 = vector.broadcast %cst_33 : f32 to vector<8x32xf32>
    %76 = arith.subf %75, %69 : vector<8x32xf32>
    %77 = arith.mulf %76, %74 : vector<8x32xf32>
    %78 = arith.mulf %69, %53 : vector<8x32xf32>
    %79 = arith.addf %77, %78 : vector<8x32xf32>
    %c0_34 = arith.constant 0 : index
    %c0_35 = arith.constant 0 : index
    %80 = vector.load %arg9[%c0_34, %c0_35] : memref<64x32xf32, #tpu.memory_space<vmem>>, vector<8x32xf32>
    %81 = arith.mulf %80, %79 : vector<8x32xf32>
    %cst_36 = arith.constant 1.000000e+00 : f32
    %82 = vector.broadcast %cst_36 : f32 to vector<8x32xf32>
    %83 = arith.subf %82, %80 : vector<8x32xf32>
    %84 = arith.mulf %83, %53 : vector<8x32xf32>
    %85 = arith.addf %81, %84 : vector<8x32xf32>
    %86 = vector.extract_strided_slice %81 {offsets = [0, 0], sizes = [8, 16], strides = [1, 1]} : vector<8x32xf32> to vector<8x16xf32>
    %c0_37 = arith.constant 0 : index
    %c0_38 = arith.constant 0 : index
    %87 = vector.load %arg7[%c0_37, %c0_38] : memref<64x32xf32, #tpu.memory_space<vmem>>, vector<8x16xf32>
    tpu.vector_store %arg7[%c0_37, %c0_38], %86 {strides = array<i32>} : memref<64x32xf32, #tpu.memory_space<vmem>>, vector<8x16xf32>,
    %88 = vector.extract_strided_slice %81 {offsets = [0, 16], sizes = [8, 16], strides = [1, 1]} : vector<8x32xf32> to vector<8x16xf32>
    %c56_39 = arith.constant 56 : index
    %c16_40 = arith.constant 16 : index
    %89 = vector.load %arg7[%c56_39, %c16_40] : memref<64x32xf32, #tpu.memory_space<vmem>>, vector<8x16xf32>
    tpu.vector_store %arg7[%c56_39, %c16_40], %88 {strides = array<i32>} : memref<64x32xf32, #tpu.memory_space<vmem>>, vector<8x16xf32>,
    %c8_41 = arith.constant 8 : index
    %c0_42 = arith.constant 0 : index
    %90 = vector.load %arg8[%c8_41, %c0_42] : memref<64x96xf32, #tpu.memory_space<vmem>>, vector<8x96xf32>
    %c48 = arith.constant 48 : index
    %c0_43 = arith.constant 0 : index
    %91 = vector.load %arg8[%c48, %c0_43] : memref<64x96xf32, #tpu.memory_space<vmem>>, vector<8x96xf32>
    %92 = arith.select %43, %90, %91 : vector<8x96xi1>, vector<8x96xf32>
    %cst_44 = arith.constant dense<0.000000e+00> : vector<8x96xf32>
    %93 = tpu.matmul %85, %46, %cst_44 {dimension_numbers = #tpu.dot_dimension_numbers<[1], [0], [0], [1], [0, 0, 1, 1], [], []>} : vector<8x32xf32>, vector<32x96xf32>, vector<8x96xf32> -> vector<8x96xf32>
    %94 = vector.broadcast %47 : vector<1x96xf32> to vector<8x96xf32>
    %95 = arith.addf %93, %94 : vector<8x96xf32>
    %96 = vector.extract_strided_slice %92 {offsets = [0, 0], sizes = [8, 64], strides = [1, 1]} : vector<8x96xf32> to vector<8x64xf32>
    %97 = vector.extract_strided_slice %95 {offsets = [0, 0], sizes = [8, 64], strides = [1, 1]} : vector<8x96xf32> to vector<8x64xf32>
    %98 = arith.addf %96, %97 : vector<8x64xf32>
    %99 = arith.negf %98 : vector<8x64xf32>
    %100 = math.exp %99 : vector<8x64xf32>
    %cst_45 = arith.constant 1.000000e+00 : f32
    %101 = vector.broadcast %cst_45 : f32 to vector<8x64xf32>
    %102 = arith.addf %101, %100 : vector<8x64xf32>
    %103 = arith.divf %101, %102 : vector<8x64xf32>
    %104 = vector.extract_strided_slice %103 {offsets = [0, 0], sizes = [8, 32], strides = [1, 1]} : vector<8x64xf32> to vector<8x32xf32>
    %105 = vector.extract_strided_slice %103 {offsets = [0, 32], sizes = [8, 32], strides = [1, 1]} : vector<8x64xf32> to vector<8x32xf32>
    %106 = vector.extract_strided_slice %92 {offsets = [0, 64], sizes = [8, 32], strides = [1, 1]} : vector<8x96xf32> to vector<8x32xf32>
    %107 = vector.extract_strided_slice %95 {offsets = [0, 64], sizes = [8, 32], strides = [1, 1]} : vector<8x96xf32> to vector<8x32xf32>
    %108 = arith.mulf %104, %107 : vector<8x32xf32>
    %109 = arith.addf %106, %108 : vector<8x32xf32>
    %110 = math.tanh %109 : vector<8x32xf32>
    %cst_46 = arith.constant 1.000000e+00 : f32
    %111 = vector.broadcast %cst_46 : f32 to vector<8x32xf32>
    %112 = arith.subf %111, %105 : vector<8x32xf32>
    %113 = arith.mulf %112, %110 : vector<8x32xf32>
    %114 = arith.mulf %105, %85 : vector<8x32xf32>
    %115 = arith.addf %113, %114 : vector<8x32xf32>
    %c8_47 = arith.constant 8 : index
    %c0_48 = arith.constant 0 : index
    %116 = vector.load %arg9[%c8_47, %c0_48] : memref<64x32xf32, #tpu.memory_space<vmem>>, vector<8x32xf32>
    %117 = arith.mulf %116, %115 : vector<8x32xf32>
    %cst_49 = arith.constant 1.000000e+00 : f32
    %118 = vector.broadcast %cst_49 : f32 to vector<8x32xf32>
    %119 = arith.subf %118, %116 : vector<8x32xf32>
    %120 = arith.mulf %119, %85 : vector<8x32xf32>
    %121 = arith.addf %117, %120 : vector<8x32xf32>
    %122 = vector.extract_strided_slice %117 {offsets = [0, 0], sizes = [8, 16], strides = [1, 1]} : vector<8x32xf32> to vector<8x16xf32>
    %c8_50 = arith.constant 8 : index
    %c0_51 = arith.constant 0 : index
    %123 = vector.load %arg7[%c8_50, %c0_51] : memref<64x32xf32, #tpu.memory_space<vmem>>, vector<8x16xf32>
    tpu.vector_store %arg7[%c8_50, %c0_51], %122 {strides = array<i32>} : memref<64x32xf32, #tpu.memory_space<vmem>>, vector<8x16xf32>,
    %124 = vector.extract_strided_slice %117 {offsets = [0, 16], sizes = [8, 16], strides = [1, 1]} : vector<8x32xf32> to vector<8x16xf32>
    %c48_52 = arith.constant 48 : index
    %c16_53 = arith.constant 16 : index
    %125 = vector.load %arg7[%c48_52, %c16_53] : memref<64x32xf32, #tpu.memory_space<vmem>>, vector<8x16xf32>
    tpu.vector_store %arg7[%c48_52, %c16_53], %124 {strides = array<i32>} : memref<64x32xf32, #tpu.memory_space<vmem>>, vector<8x16xf32>,
    %c16_54 = arith.constant 16 : index
    %c0_55 = arith.constant 0 : index
    %126 = vector.load %arg8[%c16_54, %c0_55] : memref<64x96xf32, #tpu.memory_space<vmem>>, vector<8x96xf32>
    %c40 = arith.constant 40 : index
    %c0_56 = arith.constant 0 : index
    %127 = vector.load %arg8[%c40, %c0_56] : memref<64x96xf32, #tpu.memory_space<vmem>>, vector<8x96xf32>
    %128 = arith.select %43, %126, %127 : vector<8x96xi1>, vector<8x96xf32>
    %cst_57 = arith.constant dense<0.000000e+00> : vector<8x96xf32>
    %129 = tpu.matmul %121, %46, %cst_57 {dimension_numbers = #tpu.dot_dimension_numbers<[1], [0], [0], [1], [0, 0, 1, 1], [], []>} : vector<8x32xf32>, vector<32x96xf32>, vector<8x96xf32> -> vector<8x96xf32>
    %130 = vector.broadcast %47 : vector<1x96xf32> to vector<8x96xf32>
    %131 = arith.addf %129, %130 : vector<8x96xf32>
    %132 = vector.extract_strided_slice %128 {offsets = [0, 0], sizes = [8, 64], strides = [1, 1]} : vector<8x96xf32> to vector<8x64xf32>
    %133 = vector.extract_strided_slice %131 {offsets = [0, 0], sizes = [8, 64], strides = [1, 1]} : vector<8x96xf32> to vector<8x64xf32>
    %134 = arith.addf %132, %133 : vector<8x64xf32>
    %135 = arith.negf %134 : vector<8x64xf32>
    %136 = math.exp %135 : vector<8x64xf32>
    %cst_58 = arith.constant 1.000000e+00 : f32
    %137 = vector.broadcast %cst_58 : f32 to vector<8x64xf32>
    %138 = arith.addf %137, %136 : vector<8x64xf32>
    %139 = arith.divf %137, %138 : vector<8x64xf32>
    %140 = vector.extract_strided_slice %139 {offsets = [0, 0], sizes = [8, 32], strides = [1, 1]} : vector<8x64xf32> to vector<8x32xf32>
    %141 = vector.extract_strided_slice %139 {offsets = [0, 32], sizes = [8, 32], strides = [1, 1]} : vector<8x64xf32> to vector<8x32xf32>
    %142 = vector.extract_strided_slice %128 {offsets = [0, 64], sizes = [8, 32], strides = [1, 1]} : vector<8x96xf32> to vector<8x32xf32>
    %143 = vector.extract_strided_slice %131 {offsets = [0, 64], sizes = [8, 32], strides = [1, 1]} : vector<8x96xf32> to vector<8x32xf32>
    %144 = arith.mulf %140, %143 : vector<8x32xf32>
    %145 = arith.addf %142, %144 : vector<8x32xf32>
    %146 = math.tanh %145 : vector<8x32xf32>
    %cst_59 = arith.constant 1.000000e+00 : f32
    %147 = vector.broadcast %cst_59 : f32 to vector<8x32xf32>
    %148 = arith.subf %147, %141 : vector<8x32xf32>
    %149 = arith.mulf %148, %146 : vector<8x32xf32>
    %150 = arith.mulf %141, %121 : vector<8x32xf32>
    %151 = arith.addf %149, %150 : vector<8x32xf32>
    %c16_60 = arith.constant 16 : index
    %c0_61 = arith.constant 0 : index
    %152 = vector.load %arg9[%c16_60, %c0_61] : memref<64x32xf32, #tpu.memory_space<vmem>>, vector<8x32xf32>
    %153 = arith.mulf %152, %151 : vector<8x32xf32>
    %cst_62 = arith.constant 1.000000e+00 : f32
    %154 = vector.broadcast %cst_62 : f32 to vector<8x32xf32>
    %155 = arith.subf %154, %152 : vector<8x32xf32>
    %156 = arith.mulf %155, %121 : vector<8x32xf32>
    %157 = arith.addf %153, %156 : vector<8x32xf32>
    %158 = vector.extract_strided_slice %153 {offsets = [0, 0], sizes = [8, 16], strides = [1, 1]} : vector<8x32xf32> to vector<8x16xf32>
    %c16_63 = arith.constant 16 : index
    %c0_64 = arith.constant 0 : index
    %159 = vector.load %arg7[%c16_63, %c0_64] : memref<64x32xf32, #tpu.memory_space<vmem>>, vector<8x16xf32>
    tpu.vector_store %arg7[%c16_63, %c0_64], %158 {strides = array<i32>} : memref<64x32xf32, #tpu.memory_space<vmem>>, vector<8x16xf32>,
    %160 = vector.extract_strided_slice %153 {offsets = [0, 16], sizes = [8, 16], strides = [1, 1]} : vector<8x32xf32> to vector<8x16xf32>
    %c40_65 = arith.constant 40 : index
    %c16_66 = arith.constant 16 : index
    %161 = vector.load %arg7[%c40_65, %c16_66] : memref<64x32xf32, #tpu.memory_space<vmem>>, vector<8x16xf32>
    tpu.vector_store %arg7[%c40_65, %c16_66], %160 {strides = array<i32>} : memref<64x32xf32, #tpu.memory_space<vmem>>, vector<8x16xf32>,
    %c24 = arith.constant 24 : index
    %c0_67 = arith.constant 0 : index
    %162 = vector.load %arg8[%c24, %c0_67] : memref<64x96xf32, #tpu.memory_space<vmem>>, vector<8x96xf32>
    %c32_68 = arith.constant 32 : index
    %c0_69 = arith.constant 0 : index
    %163 = vector.load %arg8[%c32_68, %c0_69] : memref<64x96xf32, #tpu.memory_space<vmem>>, vector<8x96xf32>
    %164 = arith.select %43, %162, %163 : vector<8x96xi1>, vector<8x96xf32>
    %cst_70 = arith.constant dense<0.000000e+00> : vector<8x96xf32>
    %165 = tpu.matmul %157, %46, %cst_70 {dimension_numbers = #tpu.dot_dimension_numbers<[1], [0], [0], [1], [0, 0, 1, 1], [], []>} : vector<8x32xf32>, vector<32x96xf32>, vector<8x96xf32> -> vector<8x96xf32>
    %166 = vector.broadcast %47 : vector<1x96xf32> to vector<8x96xf32>
    %167 = arith.addf %165, %166 : vector<8x96xf32>
    %168 = vector.extract_strided_slice %164 {offsets = [0, 0], sizes = [8, 64], strides = [1, 1]} : vector<8x96xf32> to vector<8x64xf32>
    %169 = vector.extract_strided_slice %167 {offsets = [0, 0], sizes = [8, 64], strides = [1, 1]} : vector<8x96xf32> to vector<8x64xf32>
    %170 = arith.addf %168, %169 : vector<8x64xf32>
    %171 = arith.negf %170 : vector<8x64xf32>
    %172 = math.exp %171 : vector<8x64xf32>
    %cst_71 = arith.constant 1.000000e+00 : f32
    %173 = vector.broadcast %cst_71 : f32 to vector<8x64xf32>
    %174 = arith.addf %173, %172 : vector<8x64xf32>
    %175 = arith.divf %173, %174 : vector<8x64xf32>
    %176 = vector.extract_strided_slice %175 {offsets = [0, 0], sizes = [8, 32], strides = [1, 1]} : vector<8x64xf32> to vector<8x32xf32>
    %177 = vector.extract_strided_slice %175 {offsets = [0, 32], sizes = [8, 32], strides = [1, 1]} : vector<8x64xf32> to vector<8x32xf32>
    %178 = vector.extract_strided_slice %164 {offsets = [0, 64], sizes = [8, 32], strides = [1, 1]} : vector<8x96xf32> to vector<8x32xf32>
    %179 = vector.extract_strided_slice %167 {offsets = [0, 64], sizes = [8, 32], strides = [1, 1]} : vector<8x96xf32> to vector<8x32xf32>
    %180 = arith.mulf %176, %179 : vector<8x32xf32>
    %181 = arith.addf %178, %180 : vector<8x32xf32>
    %182 = math.tanh %181 : vector<8x32xf32>
    %cst_72 = arith.constant 1.000000e+00 : f32
    %183 = vector.broadcast %cst_72 : f32 to vector<8x32xf32>
    %184 = arith.subf %183, %177 : vector<8x32xf32>
    %185 = arith.mulf %184, %182 : vector<8x32xf32>
    %186 = arith.mulf %177, %157 : vector<8x32xf32>
    %187 = arith.addf %185, %186 : vector<8x32xf32>
    %c24_73 = arith.constant 24 : index
    %c0_74 = arith.constant 0 : index
    %188 = vector.load %arg9[%c24_73, %c0_74] : memref<64x32xf32, #tpu.memory_space<vmem>>, vector<8x32xf32>
    %189 = arith.mulf %188, %187 : vector<8x32xf32>
    %cst_75 = arith.constant 1.000000e+00 : f32
    %190 = vector.broadcast %cst_75 : f32 to vector<8x32xf32>
    %191 = arith.subf %190, %188 : vector<8x32xf32>
    %192 = arith.mulf %191, %157 : vector<8x32xf32>
    %193 = arith.addf %189, %192 : vector<8x32xf32>
    %194 = vector.extract_strided_slice %189 {offsets = [0, 0], sizes = [8, 16], strides = [1, 1]} : vector<8x32xf32> to vector<8x16xf32>
    %c24_76 = arith.constant 24 : index
    %c0_77 = arith.constant 0 : index
    %195 = vector.load %arg7[%c24_76, %c0_77] : memref<64x32xf32, #tpu.memory_space<vmem>>, vector<8x16xf32>
    tpu.vector_store %arg7[%c24_76, %c0_77], %194 {strides = array<i32>} : memref<64x32xf32, #tpu.memory_space<vmem>>, vector<8x16xf32>,
    %196 = vector.extract_strided_slice %189 {offsets = [0, 16], sizes = [8, 16], strides = [1, 1]} : vector<8x32xf32> to vector<8x16xf32>
    %c32_78 = arith.constant 32 : index
    %c16_79 = arith.constant 16 : index
    %197 = vector.load %arg7[%c32_78, %c16_79] : memref<64x32xf32, #tpu.memory_space<vmem>>, vector<8x16xf32>
    tpu.vector_store %arg7[%c32_78, %c16_79], %196 {strides = array<i32>} : memref<64x32xf32, #tpu.memory_space<vmem>>, vector<8x16xf32>,
    %c32_80 = arith.constant 32 : index
    %c0_81 = arith.constant 0 : index
    %198 = vector.load %arg8[%c32_80, %c0_81] : memref<64x96xf32, #tpu.memory_space<vmem>>, vector<8x96xf32>
    %c24_82 = arith.constant 24 : index
    %c0_83 = arith.constant 0 : index
    %199 = vector.load %arg8[%c24_82, %c0_83] : memref<64x96xf32, #tpu.memory_space<vmem>>, vector<8x96xf32>
    %200 = arith.select %43, %198, %199 : vector<8x96xi1>, vector<8x96xf32>
    %cst_84 = arith.constant dense<0.000000e+00> : vector<8x96xf32>
    %201 = tpu.matmul %193, %46, %cst_84 {dimension_numbers = #tpu.dot_dimension_numbers<[1], [0], [0], [1], [0, 0, 1, 1], [], []>} : vector<8x32xf32>, vector<32x96xf32>, vector<8x96xf32> -> vector<8x96xf32>
    %202 = vector.broadcast %47 : vector<1x96xf32> to vector<8x96xf32>
    %203 = arith.addf %201, %202 : vector<8x96xf32>
    %204 = vector.extract_strided_slice %200 {offsets = [0, 0], sizes = [8, 64], strides = [1, 1]} : vector<8x96xf32> to vector<8x64xf32>
    %205 = vector.extract_strided_slice %203 {offsets = [0, 0], sizes = [8, 64], strides = [1, 1]} : vector<8x96xf32> to vector<8x64xf32>
    %206 = arith.addf %204, %205 : vector<8x64xf32>
    %207 = arith.negf %206 : vector<8x64xf32>
    %208 = math.exp %207 : vector<8x64xf32>
    %cst_85 = arith.constant 1.000000e+00 : f32
    %209 = vector.broadcast %cst_85 : f32 to vector<8x64xf32>
    %210 = arith.addf %209, %208 : vector<8x64xf32>
    %211 = arith.divf %209, %210 : vector<8x64xf32>
    %212 = vector.extract_strided_slice %211 {offsets = [0, 0], sizes = [8, 32], strides = [1, 1]} : vector<8x64xf32> to vector<8x32xf32>
    %213 = vector.extract_strided_slice %211 {offsets = [0, 32], sizes = [8, 32], strides = [1, 1]} : vector<8x64xf32> to vector<8x32xf32>
    %214 = vector.extract_strided_slice %200 {offsets = [0, 64], sizes = [8, 32], strides = [1, 1]} : vector<8x96xf32> to vector<8x32xf32>
    %215 = vector.extract_strided_slice %203 {offsets = [0, 64], sizes = [8, 32], strides = [1, 1]} : vector<8x96xf32> to vector<8x32xf32>
    %216 = arith.mulf %212, %215 : vector<8x32xf32>
    %217 = arith.addf %214, %216 : vector<8x32xf32>
    %218 = math.tanh %217 : vector<8x32xf32>
    %cst_86 = arith.constant 1.000000e+00 : f32
    %219 = vector.broadcast %cst_86 : f32 to vector<8x32xf32>
    %220 = arith.subf %219, %213 : vector<8x32xf32>
    %221 = arith.mulf %220, %218 : vector<8x32xf32>
    %222 = arith.mulf %213, %193 : vector<8x32xf32>
    %223 = arith.addf %221, %222 : vector<8x32xf32>
    %c32_87 = arith.constant 32 : index
    %c0_88 = arith.constant 0 : index
    %224 = vector.load %arg9[%c32_87, %c0_88] : memref<64x32xf32, #tpu.memory_space<vmem>>, vector<8x32xf32>
    %225 = arith.mulf %224, %223 : vector<8x32xf32>
    %cst_89 = arith.constant 1.000000e+00 : f32
    %226 = vector.broadcast %cst_89 : f32 to vector<8x32xf32>
    %227 = arith.subf %226, %224 : vector<8x32xf32>
    %228 = arith.mulf %227, %193 : vector<8x32xf32>
    %229 = arith.addf %225, %228 : vector<8x32xf32>
    %230 = vector.extract_strided_slice %225 {offsets = [0, 0], sizes = [8, 16], strides = [1, 1]} : vector<8x32xf32> to vector<8x16xf32>
    %c32_90 = arith.constant 32 : index
    %c0_91 = arith.constant 0 : index
    %231 = vector.load %arg7[%c32_90, %c0_91] : memref<64x32xf32, #tpu.memory_space<vmem>>, vector<8x16xf32>
    tpu.vector_store %arg7[%c32_90, %c0_91], %230 {strides = array<i32>} : memref<64x32xf32, #tpu.memory_space<vmem>>, vector<8x16xf32>,
    %232 = vector.extract_strided_slice %225 {offsets = [0, 16], sizes = [8, 16], strides = [1, 1]} : vector<8x32xf32> to vector<8x16xf32>
    %c24_92 = arith.constant 24 : index
    %c16_93 = arith.constant 16 : index
    %233 = vector.load %arg7[%c24_92, %c16_93] : memref<64x32xf32, #tpu.memory_space<vmem>>, vector<8x16xf32>
    tpu.vector_store %arg7[%c24_92, %c16_93], %232 {strides = array<i32>} : memref<64x32xf32, #tpu.memory_space<vmem>>, vector<8x16xf32>,
    %c40_94 = arith.constant 40 : index
    %c0_95 = arith.constant 0 : index
    %234 = vector.load %arg8[%c40_94, %c0_95] : memref<64x96xf32, #tpu.memory_space<vmem>>, vector<8x96xf32>
    %c16_96 = arith.constant 16 : index
    %c0_97 = arith.constant 0 : index
    %235 = vector.load %arg8[%c16_96, %c0_97] : memref<64x96xf32, #tpu.memory_space<vmem>>, vector<8x96xf32>
    %236 = arith.select %43, %234, %235 : vector<8x96xi1>, vector<8x96xf32>
    %cst_98 = arith.constant dense<0.000000e+00> : vector<8x96xf32>
    %237 = tpu.matmul %229, %46, %cst_98 {dimension_numbers = #tpu.dot_dimension_numbers<[1], [0], [0], [1], [0, 0, 1, 1], [], []>} : vector<8x32xf32>, vector<32x96xf32>, vector<8x96xf32> -> vector<8x96xf32>
    %238 = vector.broadcast %47 : vector<1x96xf32> to vector<8x96xf32>
    %239 = arith.addf %237, %238 : vector<8x96xf32>
    %240 = vector.extract_strided_slice %236 {offsets = [0, 0], sizes = [8, 64], strides = [1, 1]} : vector<8x96xf32> to vector<8x64xf32>
    %241 = vector.extract_strided_slice %239 {offsets = [0, 0], sizes = [8, 64], strides = [1, 1]} : vector<8x96xf32> to vector<8x64xf32>
    %242 = arith.addf %240, %241 : vector<8x64xf32>
    %243 = arith.negf %242 : vector<8x64xf32>
    %244 = math.exp %243 : vector<8x64xf32>
    %cst_99 = arith.constant 1.000000e+00 : f32
    %245 = vector.broadcast %cst_99 : f32 to vector<8x64xf32>
    %246 = arith.addf %245, %244 : vector<8x64xf32>
    %247 = arith.divf %245, %246 : vector<8x64xf32>
    %248 = vector.extract_strided_slice %247 {offsets = [0, 0], sizes = [8, 32], strides = [1, 1]} : vector<8x64xf32> to vector<8x32xf32>
    %249 = vector.extract_strided_slice %247 {offsets = [0, 32], sizes = [8, 32], strides = [1, 1]} : vector<8x64xf32> to vector<8x32xf32>
    %250 = vector.extract_strided_slice %236 {offsets = [0, 64], sizes = [8, 32], strides = [1, 1]} : vector<8x96xf32> to vector<8x32xf32>
    %251 = vector.extract_strided_slice %239 {offsets = [0, 64], sizes = [8, 32], strides = [1, 1]} : vector<8x96xf32> to vector<8x32xf32>
    %252 = arith.mulf %248, %251 : vector<8x32xf32>
    %253 = arith.addf %250, %252 : vector<8x32xf32>
    %254 = math.tanh %253 : vector<8x32xf32>
    %cst_100 = arith.constant 1.000000e+00 : f32
    %255 = vector.broadcast %cst_100 : f32 to vector<8x32xf32>
    %256 = arith.subf %255, %249 : vector<8x32xf32>
    %257 = arith.mulf %256, %254 : vector<8x32xf32>
    %258 = arith.mulf %249, %229 : vector<8x32xf32>
    %259 = arith.addf %257, %258 : vector<8x32xf32>
    %c40_101 = arith.constant 40 : index
    %c0_102 = arith.constant 0 : index
    %260 = vector.load %arg9[%c40_101, %c0_102] : memref<64x32xf32, #tpu.memory_space<vmem>>, vector<8x32xf32>
    %261 = arith.mulf %260, %259 : vector<8x32xf32>
    %cst_103 = arith.constant 1.000000e+00 : f32
    %262 = vector.broadcast %cst_103 : f32 to vector<8x32xf32>
    %263 = arith.subf %262, %260 : vector<8x32xf32>
    %264 = arith.mulf %263, %229 : vector<8x32xf32>
    %265 = arith.addf %261, %264 : vector<8x32xf32>
    %266 = vector.extract_strided_slice %261 {offsets = [0, 0], sizes = [8, 16], strides = [1, 1]} : vector<8x32xf32> to vector<8x16xf32>
    %c40_104 = arith.constant 40 : index
    %c0_105 = arith.constant 0 : index
    %267 = vector.load %arg7[%c40_104, %c0_105] : memref<64x32xf32, #tpu.memory_space<vmem>>, vector<8x16xf32>
    tpu.vector_store %arg7[%c40_104, %c0_105], %266 {strides = array<i32>} : memref<64x32xf32, #tpu.memory_space<vmem>>, vector<8x16xf32>,
    %268 = vector.extract_strided_slice %261 {offsets = [0, 16], sizes = [8, 16], strides = [1, 1]} : vector<8x32xf32> to vector<8x16xf32>
    %c16_106 = arith.constant 16 : index
    %c16_107 = arith.constant 16 : index
    %269 = vector.load %arg7[%c16_106, %c16_107] : memref<64x32xf32, #tpu.memory_space<vmem>>, vector<8x16xf32>
    tpu.vector_store %arg7[%c16_106, %c16_107], %268 {strides = array<i32>} : memref<64x32xf32, #tpu.memory_space<vmem>>, vector<8x16xf32>,
    %c48_108 = arith.constant 48 : index
    %c0_109 = arith.constant 0 : index
    %270 = vector.load %arg8[%c48_108, %c0_109] : memref<64x96xf32, #tpu.memory_space<vmem>>, vector<8x96xf32>
    %c8_110 = arith.constant 8 : index
    %c0_111 = arith.constant 0 : index
    %271 = vector.load %arg8[%c8_110, %c0_111] : memref<64x96xf32, #tpu.memory_space<vmem>>, vector<8x96xf32>
    %272 = arith.select %43, %270, %271 : vector<8x96xi1>, vector<8x96xf32>
    %cst_112 = arith.constant dense<0.000000e+00> : vector<8x96xf32>
    %273 = tpu.matmul %265, %46, %cst_112 {dimension_numbers = #tpu.dot_dimension_numbers<[1], [0], [0], [1], [0, 0, 1, 1], [], []>} : vector<8x32xf32>, vector<32x96xf32>, vector<8x96xf32> -> vector<8x96xf32>
    %274 = vector.broadcast %47 : vector<1x96xf32> to vector<8x96xf32>
    %275 = arith.addf %273, %274 : vector<8x96xf32>
    %276 = vector.extract_strided_slice %272 {offsets = [0, 0], sizes = [8, 64], strides = [1, 1]} : vector<8x96xf32> to vector<8x64xf32>
    %277 = vector.extract_strided_slice %275 {offsets = [0, 0], sizes = [8, 64], strides = [1, 1]} : vector<8x96xf32> to vector<8x64xf32>
    %278 = arith.addf %276, %277 : vector<8x64xf32>
    %279 = arith.negf %278 : vector<8x64xf32>
    %280 = math.exp %279 : vector<8x64xf32>
    %cst_113 = arith.constant 1.000000e+00 : f32
    %281 = vector.broadcast %cst_113 : f32 to vector<8x64xf32>
    %282 = arith.addf %281, %280 : vector<8x64xf32>
    %283 = arith.divf %281, %282 : vector<8x64xf32>
    %284 = vector.extract_strided_slice %283 {offsets = [0, 0], sizes = [8, 32], strides = [1, 1]} : vector<8x64xf32> to vector<8x32xf32>
    %285 = vector.extract_strided_slice %283 {offsets = [0, 32], sizes = [8, 32], strides = [1, 1]} : vector<8x64xf32> to vector<8x32xf32>
    %286 = vector.extract_strided_slice %272 {offsets = [0, 64], sizes = [8, 32], strides = [1, 1]} : vector<8x96xf32> to vector<8x32xf32>
    %287 = vector.extract_strided_slice %275 {offsets = [0, 64], sizes = [8, 32], strides = [1, 1]} : vector<8x96xf32> to vector<8x32xf32>
    %288 = arith.mulf %284, %287 : vector<8x32xf32>
    %289 = arith.addf %286, %288 : vector<8x32xf32>
    %290 = math.tanh %289 : vector<8x32xf32>
    %cst_114 = arith.constant 1.000000e+00 : f32
    %291 = vector.broadcast %cst_114 : f32 to vector<8x32xf32>
    %292 = arith.subf %291, %285 : vector<8x32xf32>
    %293 = arith.mulf %292, %290 : vector<8x32xf32>
    %294 = arith.mulf %285, %265 : vector<8x32xf32>
    %295 = arith.addf %293, %294 : vector<8x32xf32>
    %c48_115 = arith.constant 48 : index
    %c0_116 = arith.constant 0 : index
    %296 = vector.load %arg9[%c48_115, %c0_116] : memref<64x32xf32, #tpu.memory_space<vmem>>, vector<8x32xf32>
    %297 = arith.mulf %296, %295 : vector<8x32xf32>
    %cst_117 = arith.constant 1.000000e+00 : f32
    %298 = vector.broadcast %cst_117 : f32 to vector<8x32xf32>
    %299 = arith.subf %298, %296 : vector<8x32xf32>
    %300 = arith.mulf %299, %265 : vector<8x32xf32>
    %301 = arith.addf %297, %300 : vector<8x32xf32>
    %302 = vector.extract_strided_slice %297 {offsets = [0, 0], sizes = [8, 16], strides = [1, 1]} : vector<8x32xf32> to vector<8x16xf32>
    %c48_118 = arith.constant 48 : index
    %c0_119 = arith.constant 0 : index
    %303 = vector.load %arg7[%c48_118, %c0_119] : memref<64x32xf32, #tpu.memory_space<vmem>>, vector<8x16xf32>
    tpu.vector_store %arg7[%c48_118, %c0_119], %302 {strides = array<i32>} : memref<64x32xf32, #tpu.memory_space<vmem>>, vector<8x16xf32>,
    %304 = vector.extract_strided_slice %297 {offsets = [0, 16], sizes = [8, 16], strides = [1, 1]} : vector<8x32xf32> to vector<8x16xf32>
    %c8_120 = arith.constant 8 : index
    %c16_121 = arith.constant 16 : index
    %305 = vector.load %arg7[%c8_120, %c16_121] : memref<64x32xf32, #tpu.memory_space<vmem>>, vector<8x16xf32>
    tpu.vector_store %arg7[%c8_120, %c16_121], %304 {strides = array<i32>} : memref<64x32xf32, #tpu.memory_space<vmem>>, vector<8x16xf32>,
    %c56_122 = arith.constant 56 : index
    %c0_123 = arith.constant 0 : index
    %306 = vector.load %arg8[%c56_122, %c0_123] : memref<64x96xf32, #tpu.memory_space<vmem>>, vector<8x96xf32>
    %c0_124 = arith.constant 0 : index
    %c0_125 = arith.constant 0 : index
    %307 = vector.load %arg8[%c0_124, %c0_125] : memref<64x96xf32, #tpu.memory_space<vmem>>, vector<8x96xf32>
    %308 = arith.select %43, %306, %307 : vector<8x96xi1>, vector<8x96xf32>
    %cst_126 = arith.constant dense<0.000000e+00> : vector<8x96xf32>
    %309 = tpu.matmul %301, %46, %cst_126 {dimension_numbers = #tpu.dot_dimension_numbers<[1], [0], [0], [1], [0, 0, 1, 1], [], []>} : vector<8x32xf32>, vector<32x96xf32>, vector<8x96xf32> -> vector<8x96xf32>
    %310 = vector.broadcast %47 : vector<1x96xf32> to vector<8x96xf32>
    %311 = arith.addf %309, %310 : vector<8x96xf32>
    %312 = vector.extract_strided_slice %308 {offsets = [0, 0], sizes = [8, 64], strides = [1, 1]} : vector<8x96xf32> to vector<8x64xf32>
    %313 = vector.extract_strided_slice %311 {offsets = [0, 0], sizes = [8, 64], strides = [1, 1]} : vector<8x96xf32> to vector<8x64xf32>
    %314 = arith.addf %312, %313 : vector<8x64xf32>
    %315 = arith.negf %314 : vector<8x64xf32>
    %316 = math.exp %315 : vector<8x64xf32>
    %cst_127 = arith.constant 1.000000e+00 : f32
    %317 = vector.broadcast %cst_127 : f32 to vector<8x64xf32>
    %318 = arith.addf %317, %316 : vector<8x64xf32>
    %319 = arith.divf %317, %318 : vector<8x64xf32>
    %320 = vector.extract_strided_slice %319 {offsets = [0, 0], sizes = [8, 32], strides = [1, 1]} : vector<8x64xf32> to vector<8x32xf32>
    %321 = vector.extract_strided_slice %319 {offsets = [0, 32], sizes = [8, 32], strides = [1, 1]} : vector<8x64xf32> to vector<8x32xf32>
    %322 = vector.extract_strided_slice %308 {offsets = [0, 64], sizes = [8, 32], strides = [1, 1]} : vector<8x96xf32> to vector<8x32xf32>
    %323 = vector.extract_strided_slice %311 {offsets = [0, 64], sizes = [8, 32], strides = [1, 1]} : vector<8x96xf32> to vector<8x32xf32>
    %324 = arith.mulf %320, %323 : vector<8x32xf32>
    %325 = arith.addf %322, %324 : vector<8x32xf32>
    %326 = math.tanh %325 : vector<8x32xf32>
    %cst_128 = arith.constant 1.000000e+00 : f32
    %327 = vector.broadcast %cst_128 : f32 to vector<8x32xf32>
    %328 = arith.subf %327, %321 : vector<8x32xf32>
    %329 = arith.mulf %328, %326 : vector<8x32xf32>
    %330 = arith.mulf %321, %301 : vector<8x32xf32>
    %331 = arith.addf %329, %330 : vector<8x32xf32>
    %c56_129 = arith.constant 56 : index
    %c0_130 = arith.constant 0 : index
    %332 = vector.load %arg9[%c56_129, %c0_130] : memref<64x32xf32, #tpu.memory_space<vmem>>, vector<8x32xf32>
    %333 = arith.mulf %332, %331 : vector<8x32xf32>
    %334 = vector.extract_strided_slice %333 {offsets = [0, 0], sizes = [8, 16], strides = [1, 1]} : vector<8x32xf32> to vector<8x16xf32>
    %c56_131 = arith.constant 56 : index
    %c0_132 = arith.constant 0 : index
    %335 = vector.load %arg7[%c56_131, %c0_132] : memref<64x32xf32, #tpu.memory_space<vmem>>, vector<8x16xf32>
    tpu.vector_store %arg7[%c56_131, %c0_132], %334 {strides = array<i32>} : memref<64x32xf32, #tpu.memory_space<vmem>>, vector<8x16xf32>,
    %336 = vector.extract_strided_slice %333 {offsets = [0, 16], sizes = [8, 16], strides = [1, 1]} : vector<8x32xf32> to vector<8x16xf32>
    %c0_133 = arith.constant 0 : index
    %c16_134 = arith.constant 16 : index
    %337 = vector.load %arg7[%c0_133, %c16_134] : memref<64x32xf32, #tpu.memory_space<vmem>>, vector<8x16xf32>
    tpu.vector_store %arg7[%c0_133, %c16_134], %336 {strides = array<i32>} : memref<64x32xf32, #tpu.memory_space<vmem>>, vector<8x16xf32>,
    %c304 = arith.constant 304 : index
    %c0_135 = arith.constant 0 : index
    %338 = vector.load %arg3[%c304, %c0_135] : memref<496x96xf32, #tpu.memory_space<vmem>>, vector<32x96xf32>
    %c104 = arith.constant 104 : index
    %c0_136 = arith.constant 0 : index
    %339 = vector.load %arg4[%c104, %c0_136] : memref<152x96xf32, #tpu.memory_space<vmem>>, vector<1x96xf32>
    %c336 = arith.constant 336 : index
    %c0_137 = arith.constant 0 : index
    %340 = vector.load %arg3[%c336, %c0_137] : memref<496x96xf32, #tpu.memory_space<vmem>>, vector<32x96xf32>
    %c112 = arith.constant 112 : index
    %c0_138 = arith.constant 0 : index
    %341 = vector.load %arg4[%c112, %c0_138] : memref<152x96xf32, #tpu.memory_space<vmem>>, vector<1x96xf32>
    %c0_139 = arith.constant 0 : index
    %c0_140 = arith.constant 0 : index
    %342 = vector.load %arg7[%c0_139, %c0_140] : memref<64x32xf32, #tpu.memory_space<vmem>>, vector<64x32xf32>
    %cst_141 = arith.constant dense<0.000000e+00> : vector<64x96xf32>
    %343 = tpu.matmul %342, %338, %cst_141 {dimension_numbers = #tpu.dot_dimension_numbers<[1], [0], [0], [1], [0, 0, 1, 1], [], []>} : vector<64x32xf32>, vector<32x96xf32>, vector<64x96xf32> -> vector<64x96xf32>
    %344 = vector.broadcast %339 : vector<1x96xf32> to vector<64x96xf32>
    %345 = arith.addf %343, %344 : vector<64x96xf32>
    %c0_142 = arith.constant 0 : index
    %c0_143 = arith.constant 0 : index
    %346 = vector.load %arg8[%c0_142, %c0_143] : memref<64x96xf32, #tpu.memory_space<vmem>>, vector<64x96xf32>
    tpu.vector_store %arg8[%c0_142, %c0_143], %345 {strides = array<i32>} : memref<64x96xf32, #tpu.memory_space<vmem>>, vector<64x96xf32>,
    %cst_144 = arith.constant 0.000000e+00 : f32
    %347 = vector.broadcast %cst_144 : f32 to vector<8x32xf32>
    %c0_145 = arith.constant 0 : index
    %c0_146 = arith.constant 0 : index
    %348 = vector.load %arg8[%c0_145, %c0_146] : memref<64x96xf32, #tpu.memory_space<vmem>>, vector<8x96xf32>
    %c56_147 = arith.constant 56 : index
    %c0_148 = arith.constant 0 : index
    %349 = vector.load %arg8[%c56_147, %c0_148] : memref<64x96xf32, #tpu.memory_space<vmem>>, vector<8x96xf32>
    %350 = arith.select %43, %348, %349 : vector<8x96xi1>, vector<8x96xf32>
    %cst_149 = arith.constant dense<0.000000e+00> : vector<8x96xf32>
    %351 = tpu.matmul %347, %340, %cst_149 {dimension_numbers = #tpu.dot_dimension_numbers<[1], [0], [0], [1], [0, 0, 1, 1], [], []>} : vector<8x32xf32>, vector<32x96xf32>, vector<8x96xf32> -> vector<8x96xf32>
    %352 = vector.broadcast %341 : vector<1x96xf32> to vector<8x96xf32>
    %353 = arith.addf %351, %352 : vector<8x96xf32>
    %354 = vector.extract_strided_slice %350 {offsets = [0, 0], sizes = [8, 64], strides = [1, 1]} : vector<8x96xf32> to vector<8x64xf32>
    %355 = vector.extract_strided_slice %353 {offsets = [0, 0], sizes = [8, 64], strides = [1, 1]} : vector<8x96xf32> to vector<8x64xf32>
    %356 = arith.addf %354, %355 : vector<8x64xf32>
    %357 = arith.negf %356 : vector<8x64xf32>
    %358 = math.exp %357 : vector<8x64xf32>
    %cst_150 = arith.constant 1.000000e+00 : f32
    %359 = vector.broadcast %cst_150 : f32 to vector<8x64xf32>
    %360 = arith.addf %359, %358 : vector<8x64xf32>
    %361 = arith.divf %359, %360 : vector<8x64xf32>
    %362 = vector.extract_strided_slice %361 {offsets = [0, 0], sizes = [8, 32], strides = [1, 1]} : vector<8x64xf32> to vector<8x32xf32>
    %363 = vector.extract_strided_slice %361 {offsets = [0, 32], sizes = [8, 32], strides = [1, 1]} : vector<8x64xf32> to vector<8x32xf32>
    %364 = vector.extract_strided_slice %350 {offsets = [0, 64], sizes = [8, 32], strides = [1, 1]} : vector<8x96xf32> to vector<8x32xf32>
    %365 = vector.extract_strided_slice %353 {offsets = [0, 64], sizes = [8, 32], strides = [1, 1]} : vector<8x96xf32> to vector<8x32xf32>
    %366 = arith.mulf %362, %365 : vector<8x32xf32>
    %367 = arith.addf %364, %366 : vector<8x32xf32>
    %368 = math.tanh %367 : vector<8x32xf32>
    %cst_151 = arith.constant 1.000000e+00 : f32
    %369 = vector.broadcast %cst_151 : f32 to vector<8x32xf32>
    %370 = arith.subf %369, %363 : vector<8x32xf32>
    %371 = arith.mulf %370, %368 : vector<8x32xf32>
    %372 = arith.mulf %363, %347 : vector<8x32xf32>
    %373 = arith.addf %371, %372 : vector<8x32xf32>
    %c0_152 = arith.constant 0 : index
    %c0_153 = arith.constant 0 : index
    %374 = vector.load %arg9[%c0_152, %c0_153] : memref<64x32xf32, #tpu.memory_space<vmem>>, vector<8x32xf32>
    %375 = arith.mulf %374, %373 : vector<8x32xf32>
    %cst_154 = arith.constant 1.000000e+00 : f32
    %376 = vector.broadcast %cst_154 : f32 to vector<8x32xf32>
    %377 = arith.subf %376, %374 : vector<8x32xf32>
    %378 = arith.mulf %377, %347 : vector<8x32xf32>
    %379 = arith.addf %375, %378 : vector<8x32xf32>
    %380 = vector.extract_strided_slice %375 {offsets = [0, 0], sizes = [8, 16], strides = [1, 1]} : vector<8x32xf32> to vector<8x16xf32>
    %c0_155 = arith.constant 0 : index
    %c0_156 = arith.constant 0 : index
    %381 = vector.load %arg7[%c0_155, %c0_156] : memref<64x32xf32, #tpu.memory_space<vmem>>, vector<8x16xf32>
    tpu.vector_store %arg7[%c0_155, %c0_156], %380 {strides = array<i32>} : memref<64x32xf32, #tpu.memory_space<vmem>>, vector<8x16xf32>,
    %382 = vector.extract_strided_slice %375 {offsets = [0, 16], sizes = [8, 16], strides = [1, 1]} : vector<8x32xf32> to vector<8x16xf32>
    %c56_157 = arith.constant 56 : index
    %c16_158 = arith.constant 16 : index
    %383 = vector.load %arg7[%c56_157, %c16_158] : memref<64x32xf32, #tpu.memory_space<vmem>>, vector<8x16xf32>
    tpu.vector_store %arg7[%c56_157, %c16_158], %382 {strides = array<i32>} : memref<64x32xf32, #tpu.memory_space<vmem>>, vector<8x16xf32>,
    %c8_159 = arith.constant 8 : index
    %c0_160 = arith.constant 0 : index
    %384 = vector.load %arg8[%c8_159, %c0_160] : memref<64x96xf32, #tpu.memory_space<vmem>>, vector<8x96xf32>
    %c48_161 = arith.constant 48 : index
    %c0_162 = arith.constant 0 : index
    %385 = vector.load %arg8[%c48_161, %c0_162] : memref<64x96xf32, #tpu.memory_space<vmem>>, vector<8x96xf32>
    %386 = arith.select %43, %384, %385 : vector<8x96xi1>, vector<8x96xf32>
    %cst_163 = arith.constant dense<0.000000e+00> : vector<8x96xf32>
    %387 = tpu.matmul %379, %340, %cst_163 {dimension_numbers = #tpu.dot_dimension_numbers<[1], [0], [0], [1], [0, 0, 1, 1], [], []>} : vector<8x32xf32>, vector<32x96xf32>, vector<8x96xf32> -> vector<8x96xf32>
    %388 = vector.broadcast %341 : vector<1x96xf32> to vector<8x96xf32>
    %389 = arith.addf %387, %388 : vector<8x96xf32>
    %390 = vector.extract_strided_slice %386 {offsets = [0, 0], sizes = [8, 64], strides = [1, 1]} : vector<8x96xf32> to vector<8x64xf32>
    %391 = vector.extract_strided_slice %389 {offsets = [0, 0], sizes = [8, 64], strides = [1, 1]} : vector<8x96xf32> to vector<8x64xf32>
    %392 = arith.addf %390, %391 : vector<8x64xf32>
    %393 = arith.negf %392 : vector<8x64xf32>
    %394 = math.exp %393 : vector<8x64xf32>
    %cst_164 = arith.constant 1.000000e+00 : f32
    %395 = vector.broadcast %cst_164 : f32 to vector<8x64xf32>
    %396 = arith.addf %395, %394 : vector<8x64xf32>
    %397 = arith.divf %395, %396 : vector<8x64xf32>
    %398 = vector.extract_strided_slice %397 {offsets = [0, 0], sizes = [8, 32], strides = [1, 1]} : vector<8x64xf32> to vector<8x32xf32>
    %399 = vector.extract_strided_slice %397 {offsets = [0, 32], sizes = [8, 32], strides = [1, 1]} : vector<8x64xf32> to vector<8x32xf32>
    %400 = vector.extract_strided_slice %386 {offsets = [0, 64], sizes = [8, 32], strides = [1, 1]} : vector<8x96xf32> to vector<8x32xf32>
    %401 = vector.extract_strided_slice %389 {offsets = [0, 64], sizes = [8, 32], strides = [1, 1]} : vector<8x96xf32> to vector<8x32xf32>
    %402 = arith.mulf %398, %401 : vector<8x32xf32>
    %403 = arith.addf %400, %402 : vector<8x32xf32>
    %404 = math.tanh %403 : vector<8x32xf32>
    %cst_165 = arith.constant 1.000000e+00 : f32
    %405 = vector.broadcast %cst_165 : f32 to vector<8x32xf32>
    %406 = arith.subf %405, %399 : vector<8x32xf32>
    %407 = arith.mulf %406, %404 : vector<8x32xf32>
    %408 = arith.mulf %399, %379 : vector<8x32xf32>
    %409 = arith.addf %407, %408 : vector<8x32xf32>
    %c8_166 = arith.constant 8 : index
    %c0_167 = arith.constant 0 : index
    %410 = vector.load %arg9[%c8_166, %c0_167] : memref<64x32xf32, #tpu.memory_space<vmem>>, vector<8x32xf32>
    %411 = arith.mulf %410, %409 : vector<8x32xf32>
    %cst_168 = arith.constant 1.000000e+00 : f32
    %412 = vector.broadcast %cst_168 : f32 to vector<8x32xf32>
    %413 = arith.subf %412, %410 : vector<8x32xf32>
    %414 = arith.mulf %413, %379 : vector<8x32xf32>
    %415 = arith.addf %411, %414 : vector<8x32xf32>
    %416 = vector.extract_strided_slice %411 {offsets = [0, 0], sizes = [8, 16], strides = [1, 1]} : vector<8x32xf32> to vector<8x16xf32>
    %c8_169 = arith.constant 8 : index
    %c0_170 = arith.constant 0 : index
    %417 = vector.load %arg7[%c8_169, %c0_170] : memref<64x32xf32, #tpu.memory_space<vmem>>, vector<8x16xf32>
    tpu.vector_store %arg7[%c8_169, %c0_170], %416 {strides = array<i32>} : memref<64x32xf32, #tpu.memory_space<vmem>>, vector<8x16xf32>,
    %418 = vector.extract_strided_slice %411 {offsets = [0, 16], sizes = [8, 16], strides = [1, 1]} : vector<8x32xf32> to vector<8x16xf32>
    %c48_171 = arith.constant 48 : index
    %c16_172 = arith.constant 16 : index
    %419 = vector.load %arg7[%c48_171, %c16_172] : memref<64x32xf32, #tpu.memory_space<vmem>>, vector<8x16xf32>
    tpu.vector_store %arg7[%c48_171, %c16_172], %418 {strides = array<i32>} : memref<64x32xf32, #tpu.memory_space<vmem>>, vector<8x16xf32>,
    %c16_173 = arith.constant 16 : index
    %c0_174 = arith.constant 0 : index
    %420 = vector.load %arg8[%c16_173, %c0_174] : memref<64x96xf32, #tpu.memory_space<vmem>>, vector<8x96xf32>
    %c40_175 = arith.constant 40 : index
    %c0_176 = arith.constant 0 : index
    %421 = vector.load %arg8[%c40_175, %c0_176] : memref<64x96xf32, #tpu.memory_space<vmem>>, vector<8x96xf32>
    %422 = arith.select %43, %420, %421 : vector<8x96xi1>, vector<8x96xf32>
    %cst_177 = arith.constant dense<0.000000e+00> : vector<8x96xf32>
    %423 = tpu.matmul %415, %340, %cst_177 {dimension_numbers = #tpu.dot_dimension_numbers<[1], [0], [0], [1], [0, 0, 1, 1], [], []>} : vector<8x32xf32>, vector<32x96xf32>, vector<8x96xf32> -> vector<8x96xf32>
    %424 = vector.broadcast %341 : vector<1x96xf32> to vector<8x96xf32>
    %425 = arith.addf %423, %424 : vector<8x96xf32>
    %426 = vector.extract_strided_slice %422 {offsets = [0, 0], sizes = [8, 64], strides = [1, 1]} : vector<8x96xf32> to vector<8x64xf32>
    %427 = vector.extract_strided_slice %425 {offsets = [0, 0], sizes = [8, 64], strides = [1, 1]} : vector<8x96xf32> to vector<8x64xf32>
    %428 = arith.addf %426, %427 : vector<8x64xf32>
    %429 = arith.negf %428 : vector<8x64xf32>
    %430 = math.exp %429 : vector<8x64xf32>
    %cst_178 = arith.constant 1.000000e+00 : f32
    %431 = vector.broadcast %cst_178 : f32 to vector<8x64xf32>
    %432 = arith.addf %431, %430 : vector<8x64xf32>
    %433 = arith.divf %431, %432 : vector<8x64xf32>
    %434 = vector.extract_strided_slice %433 {offsets = [0, 0], sizes = [8, 32], strides = [1, 1]} : vector<8x64xf32> to vector<8x32xf32>
    %435 = vector.extract_strided_slice %433 {offsets = [0, 32], sizes = [8, 32], strides = [1, 1]} : vector<8x64xf32> to vector<8x32xf32>
    %436 = vector.extract_strided_slice %422 {offsets = [0, 64], sizes = [8, 32], strides = [1, 1]} : vector<8x96xf32> to vector<8x32xf32>
    %437 = vector.extract_strided_slice %425 {offsets = [0, 64], sizes = [8, 32], strides = [1, 1]} : vector<8x96xf32> to vector<8x32xf32>
    %438 = arith.mulf %434, %437 : vector<8x32xf32>
    %439 = arith.addf %436, %438 : vector<8x32xf32>
    %440 = math.tanh %439 : vector<8x32xf32>
    %cst_179 = arith.constant 1.000000e+00 : f32
    %441 = vector.broadcast %cst_179 : f32 to vector<8x32xf32>
    %442 = arith.subf %441, %435 : vector<8x32xf32>
    %443 = arith.mulf %442, %440 : vector<8x32xf32>
    %444 = arith.mulf %435, %415 : vector<8x32xf32>
    %445 = arith.addf %443, %444 : vector<8x32xf32>
    %c16_180 = arith.constant 16 : index
    %c0_181 = arith.constant 0 : index
    %446 = vector.load %arg9[%c16_180, %c0_181] : memref<64x32xf32, #tpu.memory_space<vmem>>, vector<8x32xf32>
    %447 = arith.mulf %446, %445 : vector<8x32xf32>
    %cst_182 = arith.constant 1.000000e+00 : f32
    %448 = vector.broadcast %cst_182 : f32 to vector<8x32xf32>
    %449 = arith.subf %448, %446 : vector<8x32xf32>
    %450 = arith.mulf %449, %415 : vector<8x32xf32>
    %451 = arith.addf %447, %450 : vector<8x32xf32>
    %452 = vector.extract_strided_slice %447 {offsets = [0, 0], sizes = [8, 16], strides = [1, 1]} : vector<8x32xf32> to vector<8x16xf32>
    %c16_183 = arith.constant 16 : index
    %c0_184 = arith.constant 0 : index
    %453 = vector.load %arg7[%c16_183, %c0_184] : memref<64x32xf32, #tpu.memory_space<vmem>>, vector<8x16xf32>
    tpu.vector_store %arg7[%c16_183, %c0_184], %452 {strides = array<i32>} : memref<64x32xf32, #tpu.memory_space<vmem>>, vector<8x16xf32>,
    %454 = vector.extract_strided_slice %447 {offsets = [0, 16], sizes = [8, 16], strides = [1, 1]} : vector<8x32xf32> to vector<8x16xf32>
    %c40_185 = arith.constant 40 : index
    %c16_186 = arith.constant 16 : index
    %455 = vector.load %arg7[%c40_185, %c16_186] : memref<64x32xf32, #tpu.memory_space<vmem>>, vector<8x16xf32>
    tpu.vector_store %arg7[%c40_185, %c16_186], %454 {strides = array<i32>} : memref<64x32xf32, #tpu.memory_space<vmem>>, vector<8x16xf32>,
    %c24_187 = arith.constant 24 : index
    %c0_188 = arith.constant 0 : index
    %456 = vector.load %arg8[%c24_187, %c0_188] : memref<64x96xf32, #tpu.memory_space<vmem>>, vector<8x96xf32>
    %c32_189 = arith.constant 32 : index
    %c0_190 = arith.constant 0 : index
    %457 = vector.load %arg8[%c32_189, %c0_190] : memref<64x96xf32, #tpu.memory_space<vmem>>, vector<8x96xf32>
    %458 = arith.select %43, %456, %457 : vector<8x96xi1>, vector<8x96xf32>
    %cst_191 = arith.constant dense<0.000000e+00> : vector<8x96xf32>
    %459 = tpu.matmul %451, %340, %cst_191 {dimension_numbers = #tpu.dot_dimension_numbers<[1], [0], [0], [1], [0, 0, 1, 1], [], []>} : vector<8x32xf32>, vector<32x96xf32>, vector<8x96xf32> -> vector<8x96xf32>
    %460 = vector.broadcast %341 : vector<1x96xf32> to vector<8x96xf32>
    %461 = arith.addf %459, %460 : vector<8x96xf32>
    %462 = vector.extract_strided_slice %458 {offsets = [0, 0], sizes = [8, 64], strides = [1, 1]} : vector<8x96xf32> to vector<8x64xf32>
    %463 = vector.extract_strided_slice %461 {offsets = [0, 0], sizes = [8, 64], strides = [1, 1]} : vector<8x96xf32> to vector<8x64xf32>
    %464 = arith.addf %462, %463 : vector<8x64xf32>
    %465 = arith.negf %464 : vector<8x64xf32>
    %466 = math.exp %465 : vector<8x64xf32>
    %cst_192 = arith.constant 1.000000e+00 : f32
    %467 = vector.broadcast %cst_192 : f32 to vector<8x64xf32>
    %468 = arith.addf %467, %466 : vector<8x64xf32>
    %469 = arith.divf %467, %468 : vector<8x64xf32>
    %470 = vector.extract_strided_slice %469 {offsets = [0, 0], sizes = [8, 32], strides = [1, 1]} : vector<8x64xf32> to vector<8x32xf32>
    %471 = vector.extract_strided_slice %469 {offsets = [0, 32], sizes = [8, 32], strides = [1, 1]} : vector<8x64xf32> to vector<8x32xf32>
    %472 = vector.extract_strided_slice %458 {offsets = [0, 64], sizes = [8, 32], strides = [1, 1]} : vector<8x96xf32> to vector<8x32xf32>
    %473 = vector.extract_strided_slice %461 {offsets = [0, 64], sizes = [8, 32], strides = [1, 1]} : vector<8x96xf32> to vector<8x32xf32>
    %474 = arith.mulf %470, %473 : vector<8x32xf32>
    %475 = arith.addf %472, %474 : vector<8x32xf32>
    %476 = math.tanh %475 : vector<8x32xf32>
    %cst_193 = arith.constant 1.000000e+00 : f32
    %477 = vector.broadcast %cst_193 : f32 to vector<8x32xf32>
    %478 = arith.subf %477, %471 : vector<8x32xf32>
    %479 = arith.mulf %478, %476 : vector<8x32xf32>
    %480 = arith.mulf %471, %451 : vector<8x32xf32>
    %481 = arith.addf %479, %480 : vector<8x32xf32>
    %c24_194 = arith.constant 24 : index
    %c0_195 = arith.constant 0 : index
    %482 = vector.load %arg9[%c24_194, %c0_195] : memref<64x32xf32, #tpu.memory_space<vmem>>, vector<8x32xf32>
    %483 = arith.mulf %482, %481 : vector<8x32xf32>
    %cst_196 = arith.constant 1.000000e+00 : f32
    %484 = vector.broadcast %cst_196 : f32 to vector<8x32xf32>
    %485 = arith.subf %484, %482 : vector<8x32xf32>
    %486 = arith.mulf %485, %451 : vector<8x32xf32>
    %487 = arith.addf %483, %486 : vector<8x32xf32>
    %488 = vector.extract_strided_slice %483 {offsets = [0, 0], sizes = [8, 16], strides = [1, 1]} : vector<8x32xf32> to vector<8x16xf32>
    %c24_197 = arith.constant 24 : index
    %c0_198 = arith.constant 0 : index
    %489 = vector.load %arg7[%c24_197, %c0_198] : memref<64x32xf32, #tpu.memory_space<vmem>>, vector<8x16xf32>
    tpu.vector_store %arg7[%c24_197, %c0_198], %488 {strides = array<i32>} : memref<64x32xf32, #tpu.memory_space<vmem>>, vector<8x16xf32>,
    %490 = vector.extract_strided_slice %483 {offsets = [0, 16], sizes = [8, 16], strides = [1, 1]} : vector<8x32xf32> to vector<8x16xf32>
    %c32_199 = arith.constant 32 : index
    %c16_200 = arith.constant 16 : index
    %491 = vector.load %arg7[%c32_199, %c16_200] : memref<64x32xf32, #tpu.memory_space<vmem>>, vector<8x16xf32>
    tpu.vector_store %arg7[%c32_199, %c16_200], %490 {strides = array<i32>} : memref<64x32xf32, #tpu.memory_space<vmem>>, vector<8x16xf32>,
    %c32_201 = arith.constant 32 : index
    %c0_202 = arith.constant 0 : index
    %492 = vector.load %arg8[%c32_201, %c0_202] : memref<64x96xf32, #tpu.memory_space<vmem>>, vector<8x96xf32>
    %c24_203 = arith.constant 24 : index
    %c0_204 = arith.constant 0 : index
    %493 = vector.load %arg8[%c24_203, %c0_204] : memref<64x96xf32, #tpu.memory_space<vmem>>, vector<8x96xf32>
    %494 = arith.select %43, %492, %493 : vector<8x96xi1>, vector<8x96xf32>
    %cst_205 = arith.constant dense<0.000000e+00> : vector<8x96xf32>
    %495 = tpu.matmul %487, %340, %cst_205 {dimension_numbers = #tpu.dot_dimension_numbers<[1], [0], [0], [1], [0, 0, 1, 1], [], []>} : vector<8x32xf32>, vector<32x96xf32>, vector<8x96xf32> -> vector<8x96xf32>
    %496 = vector.broadcast %341 : vector<1x96xf32> to vector<8x96xf32>
    %497 = arith.addf %495, %496 : vector<8x96xf32>
    %498 = vector.extract_strided_slice %494 {offsets = [0, 0], sizes = [8, 64], strides = [1, 1]} : vector<8x96xf32> to vector<8x64xf32>
    %499 = vector.extract_strided_slice %497 {offsets = [0, 0], sizes = [8, 64], strides = [1, 1]} : vector<8x96xf32> to vector<8x64xf32>
    %500 = arith.addf %498, %499 : vector<8x64xf32>
    %501 = arith.negf %500 : vector<8x64xf32>
    %502 = math.exp %501 : vector<8x64xf32>
    %cst_206 = arith.constant 1.000000e+00 : f32
    %503 = vector.broadcast %cst_206 : f32 to vector<8x64xf32>
    %504 = arith.addf %503, %502 : vector<8x64xf32>
    %505 = arith.divf %503, %504 : vector<8x64xf32>
    %506 = vector.extract_strided_slice %505 {offsets = [0, 0], sizes = [8, 32], strides = [1, 1]} : vector<8x64xf32> to vector<8x32xf32>
    %507 = vector.extract_strided_slice %505 {offsets = [0, 32], sizes = [8, 32], strides = [1, 1]} : vector<8x64xf32> to vector<8x32xf32>
    %508 = vector.extract_strided_slice %494 {offsets = [0, 64], sizes = [8, 32], strides = [1, 1]} : vector<8x96xf32> to vector<8x32xf32>
    %509 = vector.extract_strided_slice %497 {offsets = [0, 64], sizes = [8, 32], strides = [1, 1]} : vector<8x96xf32> to vector<8x32xf32>
    %510 = arith.mulf %506, %509 : vector<8x32xf32>
    %511 = arith.addf %508, %510 : vector<8x32xf32>
    %512 = math.tanh %511 : vector<8x32xf32>
    %cst_207 = arith.constant 1.000000e+00 : f32
    %513 = vector.broadcast %cst_207 : f32 to vector<8x32xf32>
    %514 = arith.subf %513, %507 : vector<8x32xf32>
    %515 = arith.mulf %514, %512 : vector<8x32xf32>
    %516 = arith.mulf %507, %487 : vector<8x32xf32>
    %517 = arith.addf %515, %516 : vector<8x32xf32>
    %c32_208 = arith.constant 32 : index
    %c0_209 = arith.constant 0 : index
    %518 = vector.load %arg9[%c32_208, %c0_209] : memref<64x32xf32, #tpu.memory_space<vmem>>, vector<8x32xf32>
    %519 = arith.mulf %518, %517 : vector<8x32xf32>
    %cst_210 = arith.constant 1.000000e+00 : f32
    %520 = vector.broadcast %cst_210 : f32 to vector<8x32xf32>
    %521 = arith.subf %520, %518 : vector<8x32xf32>
    %522 = arith.mulf %521, %487 : vector<8x32xf32>
    %523 = arith.addf %519, %522 : vector<8x32xf32>
    %524 = vector.extract_strided_slice %519 {offsets = [0, 0], sizes = [8, 16], strides = [1, 1]} : vector<8x32xf32> to vector<8x16xf32>
    %c32_211 = arith.constant 32 : index
    %c0_212 = arith.constant 0 : index
    %525 = vector.load %arg7[%c32_211, %c0_212] : memref<64x32xf32, #tpu.memory_space<vmem>>, vector<8x16xf32>
    tpu.vector_store %arg7[%c32_211, %c0_212], %524 {strides = array<i32>} : memref<64x32xf32, #tpu.memory_space<vmem>>, vector<8x16xf32>,
    %526 = vector.extract_strided_slice %519 {offsets = [0, 16], sizes = [8, 16], strides = [1, 1]} : vector<8x32xf32> to vector<8x16xf32>
    %c24_213 = arith.constant 24 : index
    %c16_214 = arith.constant 16 : index
    %527 = vector.load %arg7[%c24_213, %c16_214] : memref<64x32xf32, #tpu.memory_space<vmem>>, vector<8x16xf32>
    tpu.vector_store %arg7[%c24_213, %c16_214], %526 {strides = array<i32>} : memref<64x32xf32, #tpu.memory_space<vmem>>, vector<8x16xf32>,
    %c40_215 = arith.constant 40 : index
    %c0_216 = arith.constant 0 : index
    %528 = vector.load %arg8[%c40_215, %c0_216] : memref<64x96xf32, #tpu.memory_space<vmem>>, vector<8x96xf32>
    %c16_217 = arith.constant 16 : index
    %c0_218 = arith.constant 0 : index
    %529 = vector.load %arg8[%c16_217, %c0_218] : memref<64x96xf32, #tpu.memory_space<vmem>>, vector<8x96xf32>
    %530 = arith.select %43, %528, %529 : vector<8x96xi1>, vector<8x96xf32>
    %cst_219 = arith.constant dense<0.000000e+00> : vector<8x96xf32>
    %531 = tpu.matmul %523, %340, %cst_219 {dimension_numbers = #tpu.dot_dimension_numbers<[1], [0], [0], [1], [0, 0, 1, 1], [], []>} : vector<8x32xf32>, vector<32x96xf32>, vector<8x96xf32> -> vector<8x96xf32>
    %532 = vector.broadcast %341 : vector<1x96xf32> to vector<8x96xf32>
    %533 = arith.addf %531, %532 : vector<8x96xf32>
    %534 = vector.extract_strided_slice %530 {offsets = [0, 0], sizes = [8, 64], strides = [1, 1]} : vector<8x96xf32> to vector<8x64xf32>
    %535 = vector.extract_strided_slice %533 {offsets = [0, 0], sizes = [8, 64], strides = [1, 1]} : vector<8x96xf32> to vector<8x64xf32>
    %536 = arith.addf %534, %535 : vector<8x64xf32>
    %537 = arith.negf %536 : vector<8x64xf32>
    %538 = math.exp %537 : vector<8x64xf32>
    %cst_220 = arith.constant 1.000000e+00 : f32
    %539 = vector.broadcast %cst_220 : f32 to vector<8x64xf32>
    %540 = arith.addf %539, %538 : vector<8x64xf32>
    %541 = arith.divf %539, %540 : vector<8x64xf32>
    %542 = vector.extract_strided_slice %541 {offsets = [0, 0], sizes = [8, 32], strides = [1, 1]} : vector<8x64xf32> to vector<8x32xf32>
    %543 = vector.extract_strided_slice %541 {offsets = [0, 32], sizes = [8, 32], strides = [1, 1]} : vector<8x64xf32> to vector<8x32xf32>
    %544 = vector.extract_strided_slice %530 {offsets = [0, 64], sizes = [8, 32], strides = [1, 1]} : vector<8x96xf32> to vector<8x32xf32>
    %545 = vector.extract_strided_slice %533 {offsets = [0, 64], sizes = [8, 32], strides = [1, 1]} : vector<8x96xf32> to vector<8x32xf32>
    %546 = arith.mulf %542, %545 : vector<8x32xf32>
    %547 = arith.addf %544, %546 : vector<8x32xf32>
    %548 = math.tanh %547 : vector<8x32xf32>
    %cst_221 = arith.constant 1.000000e+00 : f32
    %549 = vector.broadcast %cst_221 : f32 to vector<8x32xf32>
    %550 = arith.subf %549, %543 : vector<8x32xf32>
    %551 = arith.mulf %550, %548 : vector<8x32xf32>
    %552 = arith.mulf %543, %523 : vector<8x32xf32>
    %553 = arith.addf %551, %552 : vector<8x32xf32>
    %c40_222 = arith.constant 40 : index
    %c0_223 = arith.constant 0 : index
    %554 = vector.load %arg9[%c40_222, %c0_223] : memref<64x32xf32, #tpu.memory_space<vmem>>, vector<8x32xf32>
    %555 = arith.mulf %554, %553 : vector<8x32xf32>
    %cst_224 = arith.constant 1.000000e+00 : f32
    %556 = vector.broadcast %cst_224 : f32 to vector<8x32xf32>
    %557 = arith.subf %556, %554 : vector<8x32xf32>
    %558 = arith.mulf %557, %523 : vector<8x32xf32>
    %559 = arith.addf %555, %558 : vector<8x32xf32>
    %560 = vector.extract_strided_slice %555 {offsets = [0, 0], sizes = [8, 16], strides = [1, 1]} : vector<8x32xf32> to vector<8x16xf32>
    %c40_225 = arith.constant 40 : index
    %c0_226 = arith.constant 0 : index
    %561 = vector.load %arg7[%c40_225, %c0_226] : memref<64x32xf32, #tpu.memory_space<vmem>>, vector<8x16xf32>
    tpu.vector_store %arg7[%c40_225, %c0_226], %560 {strides = array<i32>} : memref<64x32xf32, #tpu.memory_space<vmem>>, vector<8x16xf32>,
    %562 = vector.extract_strided_slice %555 {offsets = [0, 16], sizes = [8, 16], strides = [1, 1]} : vector<8x32xf32> to vector<8x16xf32>
    %c16_227 = arith.constant 16 : index
    %c16_228 = arith.constant 16 : index
    %563 = vector.load %arg7[%c16_227, %c16_228] : memref<64x32xf32, #tpu.memory_space<vmem>>, vector<8x16xf32>
    tpu.vector_store %arg7[%c16_227, %c16_228], %562 {strides = array<i32>} : memref<64x32xf32, #tpu.memory_space<vmem>>, vector<8x16xf32>,
    %c48_229 = arith.constant 48 : index
    %c0_230 = arith.constant 0 : index
    %564 = vector.load %arg8[%c48_229, %c0_230] : memref<64x96xf32, #tpu.memory_space<vmem>>, vector<8x96xf32>
    %c8_231 = arith.constant 8 : index
    %c0_232 = arith.constant 0 : index
    %565 = vector.load %arg8[%c8_231, %c0_232] : memref<64x96xf32, #tpu.memory_space<vmem>>, vector<8x96xf32>
    %566 = arith.select %43, %564, %565 : vector<8x96xi1>, vector<8x96xf32>
    %cst_233 = arith.constant dense<0.000000e+00> : vector<8x96xf32>
    %567 = tpu.matmul %559, %340, %cst_233 {dimension_numbers = #tpu.dot_dimension_numbers<[1], [0], [0], [1], [0, 0, 1, 1], [], []>} : vector<8x32xf32>, vector<32x96xf32>, vector<8x96xf32> -> vector<8x96xf32>
    %568 = vector.broadcast %341 : vector<1x96xf32> to vector<8x96xf32>
    %569 = arith.addf %567, %568 : vector<8x96xf32>
    %570 = vector.extract_strided_slice %566 {offsets = [0, 0], sizes = [8, 64], strides = [1, 1]} : vector<8x96xf32> to vector<8x64xf32>
    %571 = vector.extract_strided_slice %569 {offsets = [0, 0], sizes = [8, 64], strides = [1, 1]} : vector<8x96xf32> to vector<8x64xf32>
    %572 = arith.addf %570, %571 : vector<8x64xf32>
    %573 = arith.negf %572 : vector<8x64xf32>
    %574 = math.exp %573 : vector<8x64xf32>
    %cst_234 = arith.constant 1.000000e+00 : f32
    %575 = vector.broadcast %cst_234 : f32 to vector<8x64xf32>
    %576 = arith.addf %575, %574 : vector<8x64xf32>
    %577 = arith.divf %575, %576 : vector<8x64xf32>
    %578 = vector.extract_strided_slice %577 {offsets = [0, 0], sizes = [8, 32], strides = [1, 1]} : vector<8x64xf32> to vector<8x32xf32>
    %579 = vector.extract_strided_slice %577 {offsets = [0, 32], sizes = [8, 32], strides = [1, 1]} : vector<8x64xf32> to vector<8x32xf32>
    %580 = vector.extract_strided_slice %566 {offsets = [0, 64], sizes = [8, 32], strides = [1, 1]} : vector<8x96xf32> to vector<8x32xf32>
    %581 = vector.extract_strided_slice %569 {offsets = [0, 64], sizes = [8, 32], strides = [1, 1]} : vector<8x96xf32> to vector<8x32xf32>
    %582 = arith.mulf %578, %581 : vector<8x32xf32>
    %583 = arith.addf %580, %582 : vector<8x32xf32>
    %584 = math.tanh %583 : vector<8x32xf32>
    %cst_235 = arith.constant 1.000000e+00 : f32
    %585 = vector.broadcast %cst_235 : f32 to vector<8x32xf32>
    %586 = arith.subf %585, %579 : vector<8x32xf32>
    %587 = arith.mulf %586, %584 : vector<8x32xf32>
    %588 = arith.mulf %579, %559 : vector<8x32xf32>
    %589 = arith.addf %587, %588 : vector<8x32xf32>
    %c48_236 = arith.constant 48 : index
    %c0_237 = arith.constant 0 : index
    %590 = vector.load %arg9[%c48_236, %c0_237] : memref<64x32xf32, #tpu.memory_space<vmem>>, vector<8x32xf32>
    %591 = arith.mulf %590, %589 : vector<8x32xf32>
    %cst_238 = arith.constant 1.000000e+00 : f32
    %592 = vector.broadcast %cst_238 : f32 to vector<8x32xf32>
    %593 = arith.subf %592, %590 : vector<8x32xf32>
    %594 = arith.mulf %593, %559 : vector<8x32xf32>
    %595 = arith.addf %591, %594 : vector<8x32xf32>
    %596 = vector.extract_strided_slice %591 {offsets = [0, 0], sizes = [8, 16], strides = [1, 1]} : vector<8x32xf32> to vector<8x16xf32>
    %c48_239 = arith.constant 48 : index
    %c0_240 = arith.constant 0 : index
    %597 = vector.load %arg7[%c48_239, %c0_240] : memref<64x32xf32, #tpu.memory_space<vmem>>, vector<8x16xf32>
    tpu.vector_store %arg7[%c48_239, %c0_240], %596 {strides = array<i32>} : memref<64x32xf32, #tpu.memory_space<vmem>>, vector<8x16xf32>,
    %598 = vector.extract_strided_slice %591 {offsets = [0, 16], sizes = [8, 16], strides = [1, 1]} : vector<8x32xf32> to vector<8x16xf32>
    %c8_241 = arith.constant 8 : index
    %c16_242 = arith.constant 16 : index
    %599 = vector.load %arg7[%c8_241, %c16_242] : memref<64x32xf32, #tpu.memory_space<vmem>>, vector<8x16xf32>
    tpu.vector_store %arg7[%c8_241, %c16_242], %598 {strides = array<i32>} : memref<64x32xf32, #tpu.memory_space<vmem>>, vector<8x16xf32>,
    %c56_243 = arith.constant 56 : index
    %c0_244 = arith.constant 0 : index
    %600 = vector.load %arg8[%c56_243, %c0_244] : memref<64x96xf32, #tpu.memory_space<vmem>>, vector<8x96xf32>
    %c0_245 = arith.constant 0 : index
    %c0_246 = arith.constant 0 : index
    %601 = vector.load %arg8[%c0_245, %c0_246] : memref<64x96xf32, #tpu.memory_space<vmem>>, vector<8x96xf32>
    %602 = arith.select %43, %600, %601 : vector<8x96xi1>, vector<8x96xf32>
    %cst_247 = arith.constant dense<0.000000e+00> : vector<8x96xf32>
    %603 = tpu.matmul %595, %340, %cst_247 {dimension_numbers = #tpu.dot_dimension_numbers<[1], [0], [0], [1], [0, 0, 1, 1], [], []>} : vector<8x32xf32>, vector<32x96xf32>, vector<8x96xf32> -> vector<8x96xf32>
    %604 = vector.broadcast %341 : vector<1x96xf32> to vector<8x96xf32>
    %605 = arith.addf %603, %604 : vector<8x96xf32>
    %606 = vector.extract_strided_slice %602 {offsets = [0, 0], sizes = [8, 64], strides = [1, 1]} : vector<8x96xf32> to vector<8x64xf32>
    %607 = vector.extract_strided_slice %605 {offsets = [0, 0], sizes = [8, 64], strides = [1, 1]} : vector<8x96xf32> to vector<8x64xf32>
    %608 = arith.addf %606, %607 : vector<8x64xf32>
    %609 = arith.negf %608 : vector<8x64xf32>
    %610 = math.exp %609 : vector<8x64xf32>
    %cst_248 = arith.constant 1.000000e+00 : f32
    %611 = vector.broadcast %cst_248 : f32 to vector<8x64xf32>
    %612 = arith.addf %611, %610 : vector<8x64xf32>
    %613 = arith.divf %611, %612 : vector<8x64xf32>
    %614 = vector.extract_strided_slice %613 {offsets = [0, 0], sizes = [8, 32], strides = [1, 1]} : vector<8x64xf32> to vector<8x32xf32>
    %615 = vector.extract_strided_slice %613 {offsets = [0, 32], sizes = [8, 32], strides = [1, 1]} : vector<8x64xf32> to vector<8x32xf32>
    %616 = vector.extract_strided_slice %602 {offsets = [0, 64], sizes = [8, 32], strides = [1, 1]} : vector<8x96xf32> to vector<8x32xf32>
    %617 = vector.extract_strided_slice %605 {offsets = [0, 64], sizes = [8, 32], strides = [1, 1]} : vector<8x96xf32> to vector<8x32xf32>
    %618 = arith.mulf %614, %617 : vector<8x32xf32>
    %619 = arith.addf %616, %618 : vector<8x32xf32>
    %620 = math.tanh %619 : vector<8x32xf32>
    %cst_249 = arith.constant 1.000000e+00 : f32
    %621 = vector.broadcast %cst_249 : f32 to vector<8x32xf32>
    %622 = arith.subf %621, %615 : vector<8x32xf32>
    %623 = arith.mulf %622, %620 : vector<8x32xf32>
    %624 = arith.mulf %615, %595 : vector<8x32xf32>
    %625 = arith.addf %623, %624 : vector<8x32xf32>
    %c56_250 = arith.constant 56 : index
    %c0_251 = arith.constant 0 : index
    %626 = vector.load %arg9[%c56_250, %c0_251] : memref<64x32xf32, #tpu.memory_space<vmem>>, vector<8x32xf32>
    %627 = arith.mulf %626, %625 : vector<8x32xf32>
    %628 = vector.extract_strided_slice %627 {offsets = [0, 0], sizes = [8, 16], strides = [1, 1]} : vector<8x32xf32> to vector<8x16xf32>
    %c56_252 = arith.constant 56 : index
    %c0_253 = arith.constant 0 : index
    %629 = vector.load %arg7[%c56_252, %c0_253] : memref<64x32xf32, #tpu.memory_space<vmem>>, vector<8x16xf32>
    tpu.vector_store %arg7[%c56_252, %c0_253], %628 {strides = array<i32>} : memref<64x32xf32, #tpu.memory_space<vmem>>, vector<8x16xf32>,
    %630 = vector.extract_strided_slice %627 {offsets = [0, 16], sizes = [8, 16], strides = [1, 1]} : vector<8x32xf32> to vector<8x16xf32>
    %c0_254 = arith.constant 0 : index
    %c16_255 = arith.constant 16 : index
    %631 = vector.load %arg7[%c0_254, %c16_255] : memref<64x32xf32, #tpu.memory_space<vmem>>, vector<8x16xf32>
    tpu.vector_store %arg7[%c0_254, %c16_255], %630 {strides = array<i32>} : memref<64x32xf32, #tpu.memory_space<vmem>>, vector<8x16xf32>,
    %c368 = arith.constant 368 : index
    %c0_256 = arith.constant 0 : index
    %632 = vector.load %arg3[%c368, %c0_256] : memref<496x96xf32, #tpu.memory_space<vmem>>, vector<32x96xf32>
    %c120 = arith.constant 120 : index
    %c0_257 = arith.constant 0 : index
    %633 = vector.load %arg4[%c120, %c0_257] : memref<152x96xf32, #tpu.memory_space<vmem>>, vector<1x96xf32>
    %c400 = arith.constant 400 : index
    %c0_258 = arith.constant 0 : index
    %634 = vector.load %arg3[%c400, %c0_258] : memref<496x96xf32, #tpu.memory_space<vmem>>, vector<32x96xf32>
    %c128 = arith.constant 128 : index
    %c0_259 = arith.constant 0 : index
    %635 = vector.load %arg4[%c128, %c0_259] : memref<152x96xf32, #tpu.memory_space<vmem>>, vector<1x96xf32>
    %c0_260 = arith.constant 0 : index
    %c0_261 = arith.constant 0 : index
    %636 = vector.load %arg7[%c0_260, %c0_261] : memref<64x32xf32, #tpu.memory_space<vmem>>, vector<64x32xf32>
    %cst_262 = arith.constant dense<0.000000e+00> : vector<64x96xf32>
    %637 = tpu.matmul %636, %632, %cst_262 {dimension_numbers = #tpu.dot_dimension_numbers<[1], [0], [0], [1], [0, 0, 1, 1], [], []>} : vector<64x32xf32>, vector<32x96xf32>, vector<64x96xf32> -> vector<64x96xf32>
    %638 = vector.broadcast %633 : vector<1x96xf32> to vector<64x96xf32>
    %639 = arith.addf %637, %638 : vector<64x96xf32>
    %c0_263 = arith.constant 0 : index
    %c0_264 = arith.constant 0 : index
    %640 = vector.load %arg8[%c0_263, %c0_264] : memref<64x96xf32, #tpu.memory_space<vmem>>, vector<64x96xf32>
    tpu.vector_store %arg8[%c0_263, %c0_264], %639 {strides = array<i32>} : memref<64x96xf32, #tpu.memory_space<vmem>>, vector<64x96xf32>,
    %cst_265 = arith.constant 0.000000e+00 : f32
    %641 = vector.broadcast %cst_265 : f32 to vector<8x32xf32>
    %c0_266 = arith.constant 0 : index
    %c0_267 = arith.constant 0 : index
    %642 = vector.load %arg8[%c0_266, %c0_267] : memref<64x96xf32, #tpu.memory_space<vmem>>, vector<8x96xf32>
    %c56_268 = arith.constant 56 : index
    %c0_269 = arith.constant 0 : index
    %643 = vector.load %arg8[%c56_268, %c0_269] : memref<64x96xf32, #tpu.memory_space<vmem>>, vector<8x96xf32>
    %644 = arith.select %43, %642, %643 : vector<8x96xi1>, vector<8x96xf32>
    %cst_270 = arith.constant dense<0.000000e+00> : vector<8x96xf32>
    %645 = tpu.matmul %641, %634, %cst_270 {dimension_numbers = #tpu.dot_dimension_numbers<[1], [0], [0], [1], [0, 0, 1, 1], [], []>} : vector<8x32xf32>, vector<32x96xf32>, vector<8x96xf32> -> vector<8x96xf32>
    %646 = vector.broadcast %635 : vector<1x96xf32> to vector<8x96xf32>
    %647 = arith.addf %645, %646 : vector<8x96xf32>
    %648 = vector.extract_strided_slice %644 {offsets = [0, 0], sizes = [8, 64], strides = [1, 1]} : vector<8x96xf32> to vector<8x64xf32>
    %649 = vector.extract_strided_slice %647 {offsets = [0, 0], sizes = [8, 64], strides = [1, 1]} : vector<8x96xf32> to vector<8x64xf32>
    %650 = arith.addf %648, %649 : vector<8x64xf32>
    %651 = arith.negf %650 : vector<8x64xf32>
    %652 = math.exp %651 : vector<8x64xf32>
    %cst_271 = arith.constant 1.000000e+00 : f32
    %653 = vector.broadcast %cst_271 : f32 to vector<8x64xf32>
    %654 = arith.addf %653, %652 : vector<8x64xf32>
    %655 = arith.divf %653, %654 : vector<8x64xf32>
    %656 = vector.extract_strided_slice %655 {offsets = [0, 0], sizes = [8, 32], strides = [1, 1]} : vector<8x64xf32> to vector<8x32xf32>
    %657 = vector.extract_strided_slice %655 {offsets = [0, 32], sizes = [8, 32], strides = [1, 1]} : vector<8x64xf32> to vector<8x32xf32>
    %658 = vector.extract_strided_slice %644 {offsets = [0, 64], sizes = [8, 32], strides = [1, 1]} : vector<8x96xf32> to vector<8x32xf32>
    %659 = vector.extract_strided_slice %647 {offsets = [0, 64], sizes = [8, 32], strides = [1, 1]} : vector<8x96xf32> to vector<8x32xf32>
    %660 = arith.mulf %656, %659 : vector<8x32xf32>
    %661 = arith.addf %658, %660 : vector<8x32xf32>
    %662 = math.tanh %661 : vector<8x32xf32>
    %cst_272 = arith.constant 1.000000e+00 : f32
    %663 = vector.broadcast %cst_272 : f32 to vector<8x32xf32>
    %664 = arith.subf %663, %657 : vector<8x32xf32>
    %665 = arith.mulf %664, %662 : vector<8x32xf32>
    %666 = arith.mulf %657, %641 : vector<8x32xf32>
    %667 = arith.addf %665, %666 : vector<8x32xf32>
    %c0_273 = arith.constant 0 : index
    %c0_274 = arith.constant 0 : index
    %668 = vector.load %arg9[%c0_273, %c0_274] : memref<64x32xf32, #tpu.memory_space<vmem>>, vector<8x32xf32>
    %669 = arith.mulf %668, %667 : vector<8x32xf32>
    %cst_275 = arith.constant 1.000000e+00 : f32
    %670 = vector.broadcast %cst_275 : f32 to vector<8x32xf32>
    %671 = arith.subf %670, %668 : vector<8x32xf32>
    %672 = arith.mulf %671, %641 : vector<8x32xf32>
    %673 = arith.addf %669, %672 : vector<8x32xf32>
    %674 = vector.extract_strided_slice %669 {offsets = [0, 0], sizes = [8, 16], strides = [1, 1]} : vector<8x32xf32> to vector<8x16xf32>
    %c0_276 = arith.constant 0 : index
    %c0_277 = arith.constant 0 : index
    %675 = vector.load %arg7[%c0_276, %c0_277] : memref<64x32xf32, #tpu.memory_space<vmem>>, vector<8x16xf32>
    tpu.vector_store %arg7[%c0_276, %c0_277], %674 {strides = array<i32>} : memref<64x32xf32, #tpu.memory_space<vmem>>, vector<8x16xf32>,
    %676 = vector.extract_strided_slice %669 {offsets = [0, 16], sizes = [8, 16], strides = [1, 1]} : vector<8x32xf32> to vector<8x16xf32>
    %c56_278 = arith.constant 56 : index
    %c16_279 = arith.constant 16 : index
    %677 = vector.load %arg7[%c56_278, %c16_279] : memref<64x32xf32, #tpu.memory_space<vmem>>, vector<8x16xf32>
    tpu.vector_store %arg7[%c56_278, %c16_279], %676 {strides = array<i32>} : memref<64x32xf32, #tpu.memory_space<vmem>>, vector<8x16xf32>,
    %c8_280 = arith.constant 8 : index
    %c0_281 = arith.constant 0 : index
    %678 = vector.load %arg8[%c8_280, %c0_281] : memref<64x96xf32, #tpu.memory_space<vmem>>, vector<8x96xf32>
    %c48_282 = arith.constant 48 : index
    %c0_283 = arith.constant 0 : index
    %679 = vector.load %arg8[%c48_282, %c0_283] : memref<64x96xf32, #tpu.memory_space<vmem>>, vector<8x96xf32>
    %680 = arith.select %43, %678, %679 : vector<8x96xi1>, vector<8x96xf32>
    %cst_284 = arith.constant dense<0.000000e+00> : vector<8x96xf32>
    %681 = tpu.matmul %673, %634, %cst_284 {dimension_numbers = #tpu.dot_dimension_numbers<[1], [0], [0], [1], [0, 0, 1, 1], [], []>} : vector<8x32xf32>, vector<32x96xf32>, vector<8x96xf32> -> vector<8x96xf32>
    %682 = vector.broadcast %635 : vector<1x96xf32> to vector<8x96xf32>
    %683 = arith.addf %681, %682 : vector<8x96xf32>
    %684 = vector.extract_strided_slice %680 {offsets = [0, 0], sizes = [8, 64], strides = [1, 1]} : vector<8x96xf32> to vector<8x64xf32>
    %685 = vector.extract_strided_slice %683 {offsets = [0, 0], sizes = [8, 64], strides = [1, 1]} : vector<8x96xf32> to vector<8x64xf32>
    %686 = arith.addf %684, %685 : vector<8x64xf32>
    %687 = arith.negf %686 : vector<8x64xf32>
    %688 = math.exp %687 : vector<8x64xf32>
    %cst_285 = arith.constant 1.000000e+00 : f32
    %689 = vector.broadcast %cst_285 : f32 to vector<8x64xf32>
    %690 = arith.addf %689, %688 : vector<8x64xf32>
    %691 = arith.divf %689, %690 : vector<8x64xf32>
    %692 = vector.extract_strided_slice %691 {offsets = [0, 0], sizes = [8, 32], strides = [1, 1]} : vector<8x64xf32> to vector<8x32xf32>
    %693 = vector.extract_strided_slice %691 {offsets = [0, 32], sizes = [8, 32], strides = [1, 1]} : vector<8x64xf32> to vector<8x32xf32>
    %694 = vector.extract_strided_slice %680 {offsets = [0, 64], sizes = [8, 32], strides = [1, 1]} : vector<8x96xf32> to vector<8x32xf32>
    %695 = vector.extract_strided_slice %683 {offsets = [0, 64], sizes = [8, 32], strides = [1, 1]} : vector<8x96xf32> to vector<8x32xf32>
    %696 = arith.mulf %692, %695 : vector<8x32xf32>
    %697 = arith.addf %694, %696 : vector<8x32xf32>
    %698 = math.tanh %697 : vector<8x32xf32>
    %cst_286 = arith.constant 1.000000e+00 : f32
    %699 = vector.broadcast %cst_286 : f32 to vector<8x32xf32>
    %700 = arith.subf %699, %693 : vector<8x32xf32>
    %701 = arith.mulf %700, %698 : vector<8x32xf32>
    %702 = arith.mulf %693, %673 : vector<8x32xf32>
    %703 = arith.addf %701, %702 : vector<8x32xf32>
    %c8_287 = arith.constant 8 : index
    %c0_288 = arith.constant 0 : index
    %704 = vector.load %arg9[%c8_287, %c0_288] : memref<64x32xf32, #tpu.memory_space<vmem>>, vector<8x32xf32>
    %705 = arith.mulf %704, %703 : vector<8x32xf32>
    %cst_289 = arith.constant 1.000000e+00 : f32
    %706 = vector.broadcast %cst_289 : f32 to vector<8x32xf32>
    %707 = arith.subf %706, %704 : vector<8x32xf32>
    %708 = arith.mulf %707, %673 : vector<8x32xf32>
    %709 = arith.addf %705, %708 : vector<8x32xf32>
    %710 = vector.extract_strided_slice %705 {offsets = [0, 0], sizes = [8, 16], strides = [1, 1]} : vector<8x32xf32> to vector<8x16xf32>
    %c8_290 = arith.constant 8 : index
    %c0_291 = arith.constant 0 : index
    %711 = vector.load %arg7[%c8_290, %c0_291] : memref<64x32xf32, #tpu.memory_space<vmem>>, vector<8x16xf32>
    tpu.vector_store %arg7[%c8_290, %c0_291], %710 {strides = array<i32>} : memref<64x32xf32, #tpu.memory_space<vmem>>, vector<8x16xf32>,
    %712 = vector.extract_strided_slice %705 {offsets = [0, 16], sizes = [8, 16], strides = [1, 1]} : vector<8x32xf32> to vector<8x16xf32>
    %c48_292 = arith.constant 48 : index
    %c16_293 = arith.constant 16 : index
    %713 = vector.load %arg7[%c48_292, %c16_293] : memref<64x32xf32, #tpu.memory_space<vmem>>, vector<8x16xf32>
    tpu.vector_store %arg7[%c48_292, %c16_293], %712 {strides = array<i32>} : memref<64x32xf32, #tpu.memory_space<vmem>>, vector<8x16xf32>,
    %c16_294 = arith.constant 16 : index
    %c0_295 = arith.constant 0 : index
    %714 = vector.load %arg8[%c16_294, %c0_295] : memref<64x96xf32, #tpu.memory_space<vmem>>, vector<8x96xf32>
    %c40_296 = arith.constant 40 : index
    %c0_297 = arith.constant 0 : index
    %715 = vector.load %arg8[%c40_296, %c0_297] : memref<64x96xf32, #tpu.memory_space<vmem>>, vector<8x96xf32>
    %716 = arith.select %43, %714, %715 : vector<8x96xi1>, vector<8x96xf32>
    %cst_298 = arith.constant dense<0.000000e+00> : vector<8x96xf32>
    %717 = tpu.matmul %709, %634, %cst_298 {dimension_numbers = #tpu.dot_dimension_numbers<[1], [0], [0], [1], [0, 0, 1, 1], [], []>} : vector<8x32xf32>, vector<32x96xf32>, vector<8x96xf32> -> vector<8x96xf32>
    %718 = vector.broadcast %635 : vector<1x96xf32> to vector<8x96xf32>
    %719 = arith.addf %717, %718 : vector<8x96xf32>
    %720 = vector.extract_strided_slice %716 {offsets = [0, 0], sizes = [8, 64], strides = [1, 1]} : vector<8x96xf32> to vector<8x64xf32>
    %721 = vector.extract_strided_slice %719 {offsets = [0, 0], sizes = [8, 64], strides = [1, 1]} : vector<8x96xf32> to vector<8x64xf32>
    %722 = arith.addf %720, %721 : vector<8x64xf32>
    %723 = arith.negf %722 : vector<8x64xf32>
    %724 = math.exp %723 : vector<8x64xf32>
    %cst_299 = arith.constant 1.000000e+00 : f32
    %725 = vector.broadcast %cst_299 : f32 to vector<8x64xf32>
    %726 = arith.addf %725, %724 : vector<8x64xf32>
    %727 = arith.divf %725, %726 : vector<8x64xf32>
    %728 = vector.extract_strided_slice %727 {offsets = [0, 0], sizes = [8, 32], strides = [1, 1]} : vector<8x64xf32> to vector<8x32xf32>
    %729 = vector.extract_strided_slice %727 {offsets = [0, 32], sizes = [8, 32], strides = [1, 1]} : vector<8x64xf32> to vector<8x32xf32>
    %730 = vector.extract_strided_slice %716 {offsets = [0, 64], sizes = [8, 32], strides = [1, 1]} : vector<8x96xf32> to vector<8x32xf32>
    %731 = vector.extract_strided_slice %719 {offsets = [0, 64], sizes = [8, 32], strides = [1, 1]} : vector<8x96xf32> to vector<8x32xf32>
    %732 = arith.mulf %728, %731 : vector<8x32xf32>
    %733 = arith.addf %730, %732 : vector<8x32xf32>
    %734 = math.tanh %733 : vector<8x32xf32>
    %cst_300 = arith.constant 1.000000e+00 : f32
    %735 = vector.broadcast %cst_300 : f32 to vector<8x32xf32>
    %736 = arith.subf %735, %729 : vector<8x32xf32>
    %737 = arith.mulf %736, %734 : vector<8x32xf32>
    %738 = arith.mulf %729, %709 : vector<8x32xf32>
    %739 = arith.addf %737, %738 : vector<8x32xf32>
    %c16_301 = arith.constant 16 : index
    %c0_302 = arith.constant 0 : index
    %740 = vector.load %arg9[%c16_301, %c0_302] : memref<64x32xf32, #tpu.memory_space<vmem>>, vector<8x32xf32>
    %741 = arith.mulf %740, %739 : vector<8x32xf32>
    %cst_303 = arith.constant 1.000000e+00 : f32
    %742 = vector.broadcast %cst_303 : f32 to vector<8x32xf32>
    %743 = arith.subf %742, %740 : vector<8x32xf32>
    %744 = arith.mulf %743, %709 : vector<8x32xf32>
    %745 = arith.addf %741, %744 : vector<8x32xf32>
    %746 = vector.extract_strided_slice %741 {offsets = [0, 0], sizes = [8, 16], strides = [1, 1]} : vector<8x32xf32> to vector<8x16xf32>
    %c16_304 = arith.constant 16 : index
    %c0_305 = arith.constant 0 : index
    %747 = vector.load %arg7[%c16_304, %c0_305] : memref<64x32xf32, #tpu.memory_space<vmem>>, vector<8x16xf32>
    tpu.vector_store %arg7[%c16_304, %c0_305], %746 {strides = array<i32>} : memref<64x32xf32, #tpu.memory_space<vmem>>, vector<8x16xf32>,
    %748 = vector.extract_strided_slice %741 {offsets = [0, 16], sizes = [8, 16], strides = [1, 1]} : vector<8x32xf32> to vector<8x16xf32>
    %c40_306 = arith.constant 40 : index
    %c16_307 = arith.constant 16 : index
    %749 = vector.load %arg7[%c40_306, %c16_307] : memref<64x32xf32, #tpu.memory_space<vmem>>, vector<8x16xf32>
    tpu.vector_store %arg7[%c40_306, %c16_307], %748 {strides = array<i32>} : memref<64x32xf32, #tpu.memory_space<vmem>>, vector<8x16xf32>,
    %c24_308 = arith.constant 24 : index
    %c0_309 = arith.constant 0 : index
    %750 = vector.load %arg8[%c24_308, %c0_309] : memref<64x96xf32, #tpu.memory_space<vmem>>, vector<8x96xf32>
    %c32_310 = arith.constant 32 : index
    %c0_311 = arith.constant 0 : index
    %751 = vector.load %arg8[%c32_310, %c0_311] : memref<64x96xf32, #tpu.memory_space<vmem>>, vector<8x96xf32>
    %752 = arith.select %43, %750, %751 : vector<8x96xi1>, vector<8x96xf32>
    %cst_312 = arith.constant dense<0.000000e+00> : vector<8x96xf32>
    %753 = tpu.matmul %745, %634, %cst_312 {dimension_numbers = #tpu.dot_dimension_numbers<[1], [0], [0], [1], [0, 0, 1, 1], [], []>} : vector<8x32xf32>, vector<32x96xf32>, vector<8x96xf32> -> vector<8x96xf32>
    %754 = vector.broadcast %635 : vector<1x96xf32> to vector<8x96xf32>
    %755 = arith.addf %753, %754 : vector<8x96xf32>
    %756 = vector.extract_strided_slice %752 {offsets = [0, 0], sizes = [8, 64], strides = [1, 1]} : vector<8x96xf32> to vector<8x64xf32>
    %757 = vector.extract_strided_slice %755 {offsets = [0, 0], sizes = [8, 64], strides = [1, 1]} : vector<8x96xf32> to vector<8x64xf32>
    %758 = arith.addf %756, %757 : vector<8x64xf32>
    %759 = arith.negf %758 : vector<8x64xf32>
    %760 = math.exp %759 : vector<8x64xf32>
    %cst_313 = arith.constant 1.000000e+00 : f32
    %761 = vector.broadcast %cst_313 : f32 to vector<8x64xf32>
    %762 = arith.addf %761, %760 : vector<8x64xf32>
    %763 = arith.divf %761, %762 : vector<8x64xf32>
    %764 = vector.extract_strided_slice %763 {offsets = [0, 0], sizes = [8, 32], strides = [1, 1]} : vector<8x64xf32> to vector<8x32xf32>
    %765 = vector.extract_strided_slice %763 {offsets = [0, 32], sizes = [8, 32], strides = [1, 1]} : vector<8x64xf32> to vector<8x32xf32>
    %766 = vector.extract_strided_slice %752 {offsets = [0, 64], sizes = [8, 32], strides = [1, 1]} : vector<8x96xf32> to vector<8x32xf32>
    %767 = vector.extract_strided_slice %755 {offsets = [0, 64], sizes = [8, 32], strides = [1, 1]} : vector<8x96xf32> to vector<8x32xf32>
    %768 = arith.mulf %764, %767 : vector<8x32xf32>
    %769 = arith.addf %766, %768 : vector<8x32xf32>
    %770 = math.tanh %769 : vector<8x32xf32>
    %cst_314 = arith.constant 1.000000e+00 : f32
    %771 = vector.broadcast %cst_314 : f32 to vector<8x32xf32>
    %772 = arith.subf %771, %765 : vector<8x32xf32>
    %773 = arith.mulf %772, %770 : vector<8x32xf32>
    %774 = arith.mulf %765, %745 : vector<8x32xf32>
    %775 = arith.addf %773, %774 : vector<8x32xf32>
    %c24_315 = arith.constant 24 : index
    %c0_316 = arith.constant 0 : index
    %776 = vector.load %arg9[%c24_315, %c0_316] : memref<64x32xf32, #tpu.memory_space<vmem>>, vector<8x32xf32>
    %777 = arith.mulf %776, %775 : vector<8x32xf32>
    %cst_317 = arith.constant 1.000000e+00 : f32
    %778 = vector.broadcast %cst_317 : f32 to vector<8x32xf32>
    %779 = arith.subf %778, %776 : vector<8x32xf32>
    %780 = arith.mulf %779, %745 : vector<8x32xf32>
    %781 = arith.addf %777, %780 : vector<8x32xf32>
    %782 = vector.extract_strided_slice %777 {offsets = [0, 0], sizes = [8, 16], strides = [1, 1]} : vector<8x32xf32> to vector<8x16xf32>
    %c24_318 = arith.constant 24 : index
    %c0_319 = arith.constant 0 : index
    %783 = vector.load %arg7[%c24_318, %c0_319] : memref<64x32xf32, #tpu.memory_space<vmem>>, vector<8x16xf32>
    tpu.vector_store %arg7[%c24_318, %c0_319], %782 {strides = array<i32>} : memref<64x32xf32, #tpu.memory_space<vmem>>, vector<8x16xf32>,
    %784 = vector.extract_strided_slice %777 {offsets = [0, 16], sizes = [8, 16], strides = [1, 1]} : vector<8x32xf32> to vector<8x16xf32>
    %c32_320 = arith.constant 32 : index
    %c16_321 = arith.constant 16 : index
    %785 = vector.load %arg7[%c32_320, %c16_321] : memref<64x32xf32, #tpu.memory_space<vmem>>, vector<8x16xf32>
    tpu.vector_store %arg7[%c32_320, %c16_321], %784 {strides = array<i32>} : memref<64x32xf32, #tpu.memory_space<vmem>>, vector<8x16xf32>,
    %c32_322 = arith.constant 32 : index
    %c0_323 = arith.constant 0 : index
    %786 = vector.load %arg8[%c32_322, %c0_323] : memref<64x96xf32, #tpu.memory_space<vmem>>, vector<8x96xf32>
    %c24_324 = arith.constant 24 : index
    %c0_325 = arith.constant 0 : index
    %787 = vector.load %arg8[%c24_324, %c0_325] : memref<64x96xf32, #tpu.memory_space<vmem>>, vector<8x96xf32>
    %788 = arith.select %43, %786, %787 : vector<8x96xi1>, vector<8x96xf32>
    %cst_326 = arith.constant dense<0.000000e+00> : vector<8x96xf32>
    %789 = tpu.matmul %781, %634, %cst_326 {dimension_numbers = #tpu.dot_dimension_numbers<[1], [0], [0], [1], [0, 0, 1, 1], [], []>} : vector<8x32xf32>, vector<32x96xf32>, vector<8x96xf32> -> vector<8x96xf32>
    %790 = vector.broadcast %635 : vector<1x96xf32> to vector<8x96xf32>
    %791 = arith.addf %789, %790 : vector<8x96xf32>
    %792 = vector.extract_strided_slice %788 {offsets = [0, 0], sizes = [8, 64], strides = [1, 1]} : vector<8x96xf32> to vector<8x64xf32>
    %793 = vector.extract_strided_slice %791 {offsets = [0, 0], sizes = [8, 64], strides = [1, 1]} : vector<8x96xf32> to vector<8x64xf32>
    %794 = arith.addf %792, %793 : vector<8x64xf32>
    %795 = arith.negf %794 : vector<8x64xf32>
    %796 = math.exp %795 : vector<8x64xf32>
    %cst_327 = arith.constant 1.000000e+00 : f32
    %797 = vector.broadcast %cst_327 : f32 to vector<8x64xf32>
    %798 = arith.addf %797, %796 : vector<8x64xf32>
    %799 = arith.divf %797, %798 : vector<8x64xf32>
    %800 = vector.extract_strided_slice %799 {offsets = [0, 0], sizes = [8, 32], strides = [1, 1]} : vector<8x64xf32> to vector<8x32xf32>
    %801 = vector.extract_strided_slice %799 {offsets = [0, 32], sizes = [8, 32], strides = [1, 1]} : vector<8x64xf32> to vector<8x32xf32>
    %802 = vector.extract_strided_slice %788 {offsets = [0, 64], sizes = [8, 32], strides = [1, 1]} : vector<8x96xf32> to vector<8x32xf32>
    %803 = vector.extract_strided_slice %791 {offsets = [0, 64], sizes = [8, 32], strides = [1, 1]} : vector<8x96xf32> to vector<8x32xf32>
    %804 = arith.mulf %800, %803 : vector<8x32xf32>
    %805 = arith.addf %802, %804 : vector<8x32xf32>
    %806 = math.tanh %805 : vector<8x32xf32>
    %cst_328 = arith.constant 1.000000e+00 : f32
    %807 = vector.broadcast %cst_328 : f32 to vector<8x32xf32>
    %808 = arith.subf %807, %801 : vector<8x32xf32>
    %809 = arith.mulf %808, %806 : vector<8x32xf32>
    %810 = arith.mulf %801, %781 : vector<8x32xf32>
    %811 = arith.addf %809, %810 : vector<8x32xf32>
    %c32_329 = arith.constant 32 : index
    %c0_330 = arith.constant 0 : index
    %812 = vector.load %arg9[%c32_329, %c0_330] : memref<64x32xf32, #tpu.memory_space<vmem>>, vector<8x32xf32>
    %813 = arith.mulf %812, %811 : vector<8x32xf32>
    %cst_331 = arith.constant 1.000000e+00 : f32
    %814 = vector.broadcast %cst_331 : f32 to vector<8x32xf32>
    %815 = arith.subf %814, %812 : vector<8x32xf32>
    %816 = arith.mulf %815, %781 : vector<8x32xf32>
    %817 = arith.addf %813, %816 : vector<8x32xf32>
    %818 = vector.extract_strided_slice %813 {offsets = [0, 0], sizes = [8, 16], strides = [1, 1]} : vector<8x32xf32> to vector<8x16xf32>
    %c32_332 = arith.constant 32 : index
    %c0_333 = arith.constant 0 : index
    %819 = vector.load %arg7[%c32_332, %c0_333] : memref<64x32xf32, #tpu.memory_space<vmem>>, vector<8x16xf32>
    tpu.vector_store %arg7[%c32_332, %c0_333], %818 {strides = array<i32>} : memref<64x32xf32, #tpu.memory_space<vmem>>, vector<8x16xf32>,
    %820 = vector.extract_strided_slice %813 {offsets = [0, 16], sizes = [8, 16], strides = [1, 1]} : vector<8x32xf32> to vector<8x16xf32>
    %c24_334 = arith.constant 24 : index
    %c16_335 = arith.constant 16 : index
    %821 = vector.load %arg7[%c24_334, %c16_335] : memref<64x32xf32, #tpu.memory_space<vmem>>, vector<8x16xf32>
    tpu.vector_store %arg7[%c24_334, %c16_335], %820 {strides = array<i32>} : memref<64x32xf32, #tpu.memory_space<vmem>>, vector<8x16xf32>,
    %c40_336 = arith.constant 40 : index
    %c0_337 = arith.constant 0 : index
    %822 = vector.load %arg8[%c40_336, %c0_337] : memref<64x96xf32, #tpu.memory_space<vmem>>, vector<8x96xf32>
    %c16_338 = arith.constant 16 : index
    %c0_339 = arith.constant 0 : index
    %823 = vector.load %arg8[%c16_338, %c0_339] : memref<64x96xf32, #tpu.memory_space<vmem>>, vector<8x96xf32>
    %824 = arith.select %43, %822, %823 : vector<8x96xi1>, vector<8x96xf32>
    %cst_340 = arith.constant dense<0.000000e+00> : vector<8x96xf32>
    %825 = tpu.matmul %817, %634, %cst_340 {dimension_numbers = #tpu.dot_dimension_numbers<[1], [0], [0], [1], [0, 0, 1, 1], [], []>} : vector<8x32xf32>, vector<32x96xf32>, vector<8x96xf32> -> vector<8x96xf32>
    %826 = vector.broadcast %635 : vector<1x96xf32> to vector<8x96xf32>
    %827 = arith.addf %825, %826 : vector<8x96xf32>
    %828 = vector.extract_strided_slice %824 {offsets = [0, 0], sizes = [8, 64], strides = [1, 1]} : vector<8x96xf32> to vector<8x64xf32>
    %829 = vector.extract_strided_slice %827 {offsets = [0, 0], sizes = [8, 64], strides = [1, 1]} : vector<8x96xf32> to vector<8x64xf32>
    %830 = arith.addf %828, %829 : vector<8x64xf32>
    %831 = arith.negf %830 : vector<8x64xf32>
    %832 = math.exp %831 : vector<8x64xf32>
    %cst_341 = arith.constant 1.000000e+00 : f32
    %833 = vector.broadcast %cst_341 : f32 to vector<8x64xf32>
    %834 = arith.addf %833, %832 : vector<8x64xf32>
    %835 = arith.divf %833, %834 : vector<8x64xf32>
    %836 = vector.extract_strided_slice %835 {offsets = [0, 0], sizes = [8, 32], strides = [1, 1]} : vector<8x64xf32> to vector<8x32xf32>
    %837 = vector.extract_strided_slice %835 {offsets = [0, 32], sizes = [8, 32], strides = [1, 1]} : vector<8x64xf32> to vector<8x32xf32>
    %838 = vector.extract_strided_slice %824 {offsets = [0, 64], sizes = [8, 32], strides = [1, 1]} : vector<8x96xf32> to vector<8x32xf32>
    %839 = vector.extract_strided_slice %827 {offsets = [0, 64], sizes = [8, 32], strides = [1, 1]} : vector<8x96xf32> to vector<8x32xf32>
    %840 = arith.mulf %836, %839 : vector<8x32xf32>
    %841 = arith.addf %838, %840 : vector<8x32xf32>
    %842 = math.tanh %841 : vector<8x32xf32>
    %cst_342 = arith.constant 1.000000e+00 : f32
    %843 = vector.broadcast %cst_342 : f32 to vector<8x32xf32>
    %844 = arith.subf %843, %837 : vector<8x32xf32>
    %845 = arith.mulf %844, %842 : vector<8x32xf32>
    %846 = arith.mulf %837, %817 : vector<8x32xf32>
    %847 = arith.addf %845, %846 : vector<8x32xf32>
    %c40_343 = arith.constant 40 : index
    %c0_344 = arith.constant 0 : index
    %848 = vector.load %arg9[%c40_343, %c0_344] : memref<64x32xf32, #tpu.memory_space<vmem>>, vector<8x32xf32>
    %849 = arith.mulf %848, %847 : vector<8x32xf32>
    %cst_345 = arith.constant 1.000000e+00 : f32
    %850 = vector.broadcast %cst_345 : f32 to vector<8x32xf32>
    %851 = arith.subf %850, %848 : vector<8x32xf32>
    %852 = arith.mulf %851, %817 : vector<8x32xf32>
    %853 = arith.addf %849, %852 : vector<8x32xf32>
    %854 = vector.extract_strided_slice %849 {offsets = [0, 0], sizes = [8, 16], strides = [1, 1]} : vector<8x32xf32> to vector<8x16xf32>
    %c40_346 = arith.constant 40 : index
    %c0_347 = arith.constant 0 : index
    %855 = vector.load %arg7[%c40_346, %c0_347] : memref<64x32xf32, #tpu.memory_space<vmem>>, vector<8x16xf32>
    tpu.vector_store %arg7[%c40_346, %c0_347], %854 {strides = array<i32>} : memref<64x32xf32, #tpu.memory_space<vmem>>, vector<8x16xf32>,
    %856 = vector.extract_strided_slice %849 {offsets = [0, 16], sizes = [8, 16], strides = [1, 1]} : vector<8x32xf32> to vector<8x16xf32>
    %c16_348 = arith.constant 16 : index
    %c16_349 = arith.constant 16 : index
    %857 = vector.load %arg7[%c16_348, %c16_349] : memref<64x32xf32, #tpu.memory_space<vmem>>, vector<8x16xf32>
    tpu.vector_store %arg7[%c16_348, %c16_349], %856 {strides = array<i32>} : memref<64x32xf32, #tpu.memory_space<vmem>>, vector<8x16xf32>,
    %c48_350 = arith.constant 48 : index
    %c0_351 = arith.constant 0 : index
    %858 = vector.load %arg8[%c48_350, %c0_351] : memref<64x96xf32, #tpu.memory_space<vmem>>, vector<8x96xf32>
    %c8_352 = arith.constant 8 : index
    %c0_353 = arith.constant 0 : index
    %859 = vector.load %arg8[%c8_352, %c0_353] : memref<64x96xf32, #tpu.memory_space<vmem>>, vector<8x96xf32>
    %860 = arith.select %43, %858, %859 : vector<8x96xi1>, vector<8x96xf32>
    %cst_354 = arith.constant dense<0.000000e+00> : vector<8x96xf32>
    %861 = tpu.matmul %853, %634, %cst_354 {dimension_numbers = #tpu.dot_dimension_numbers<[1], [0], [0], [1], [0, 0, 1, 1], [], []>} : vector<8x32xf32>, vector<32x96xf32>, vector<8x96xf32> -> vector<8x96xf32>
    %862 = vector.broadcast %635 : vector<1x96xf32> to vector<8x96xf32>
    %863 = arith.addf %861, %862 : vector<8x96xf32>
    %864 = vector.extract_strided_slice %860 {offsets = [0, 0], sizes = [8, 64], strides = [1, 1]} : vector<8x96xf32> to vector<8x64xf32>
    %865 = vector.extract_strided_slice %863 {offsets = [0, 0], sizes = [8, 64], strides = [1, 1]} : vector<8x96xf32> to vector<8x64xf32>
    %866 = arith.addf %864, %865 : vector<8x64xf32>
    %867 = arith.negf %866 : vector<8x64xf32>
    %868 = math.exp %867 : vector<8x64xf32>
    %cst_355 = arith.constant 1.000000e+00 : f32
    %869 = vector.broadcast %cst_355 : f32 to vector<8x64xf32>
    %870 = arith.addf %869, %868 : vector<8x64xf32>
    %871 = arith.divf %869, %870 : vector<8x64xf32>
    %872 = vector.extract_strided_slice %871 {offsets = [0, 0], sizes = [8, 32], strides = [1, 1]} : vector<8x64xf32> to vector<8x32xf32>
    %873 = vector.extract_strided_slice %871 {offsets = [0, 32], sizes = [8, 32], strides = [1, 1]} : vector<8x64xf32> to vector<8x32xf32>
    %874 = vector.extract_strided_slice %860 {offsets = [0, 64], sizes = [8, 32], strides = [1, 1]} : vector<8x96xf32> to vector<8x32xf32>
    %875 = vector.extract_strided_slice %863 {offsets = [0, 64], sizes = [8, 32], strides = [1, 1]} : vector<8x96xf32> to vector<8x32xf32>
    %876 = arith.mulf %872, %875 : vector<8x32xf32>
    %877 = arith.addf %874, %876 : vector<8x32xf32>
    %878 = math.tanh %877 : vector<8x32xf32>
    %cst_356 = arith.constant 1.000000e+00 : f32
    %879 = vector.broadcast %cst_356 : f32 to vector<8x32xf32>
    %880 = arith.subf %879, %873 : vector<8x32xf32>
    %881 = arith.mulf %880, %878 : vector<8x32xf32>
    %882 = arith.mulf %873, %853 : vector<8x32xf32>
    %883 = arith.addf %881, %882 : vector<8x32xf32>
    %c48_357 = arith.constant 48 : index
    %c0_358 = arith.constant 0 : index
    %884 = vector.load %arg9[%c48_357, %c0_358] : memref<64x32xf32, #tpu.memory_space<vmem>>, vector<8x32xf32>
    %885 = arith.mulf %884, %883 : vector<8x32xf32>
    %cst_359 = arith.constant 1.000000e+00 : f32
    %886 = vector.broadcast %cst_359 : f32 to vector<8x32xf32>
    %887 = arith.subf %886, %884 : vector<8x32xf32>
    %888 = arith.mulf %887, %853 : vector<8x32xf32>
    %889 = arith.addf %885, %888 : vector<8x32xf32>
    %890 = vector.extract_strided_slice %885 {offsets = [0, 0], sizes = [8, 16], strides = [1, 1]} : vector<8x32xf32> to vector<8x16xf32>
    %c48_360 = arith.constant 48 : index
    %c0_361 = arith.constant 0 : index
    %891 = vector.load %arg7[%c48_360, %c0_361] : memref<64x32xf32, #tpu.memory_space<vmem>>, vector<8x16xf32>
    tpu.vector_store %arg7[%c48_360, %c0_361], %890 {strides = array<i32>} : memref<64x32xf32, #tpu.memory_space<vmem>>, vector<8x16xf32>,
    %892 = vector.extract_strided_slice %885 {offsets = [0, 16], sizes = [8, 16], strides = [1, 1]} : vector<8x32xf32> to vector<8x16xf32>
    %c8_362 = arith.constant 8 : index
    %c16_363 = arith.constant 16 : index
    %893 = vector.load %arg7[%c8_362, %c16_363] : memref<64x32xf32, #tpu.memory_space<vmem>>, vector<8x16xf32>
    tpu.vector_store %arg7[%c8_362, %c16_363], %892 {strides = array<i32>} : memref<64x32xf32, #tpu.memory_space<vmem>>, vector<8x16xf32>,
    %c56_364 = arith.constant 56 : index
    %c0_365 = arith.constant 0 : index
    %894 = vector.load %arg8[%c56_364, %c0_365] : memref<64x96xf32, #tpu.memory_space<vmem>>, vector<8x96xf32>
    %c0_366 = arith.constant 0 : index
    %c0_367 = arith.constant 0 : index
    %895 = vector.load %arg8[%c0_366, %c0_367] : memref<64x96xf32, #tpu.memory_space<vmem>>, vector<8x96xf32>
    %896 = arith.select %43, %894, %895 : vector<8x96xi1>, vector<8x96xf32>
    %cst_368 = arith.constant dense<0.000000e+00> : vector<8x96xf32>
    %897 = tpu.matmul %889, %634, %cst_368 {dimension_numbers = #tpu.dot_dimension_numbers<[1], [0], [0], [1], [0, 0, 1, 1], [], []>} : vector<8x32xf32>, vector<32x96xf32>, vector<8x96xf32> -> vector<8x96xf32>
    %898 = vector.broadcast %635 : vector<1x96xf32> to vector<8x96xf32>
    %899 = arith.addf %897, %898 : vector<8x96xf32>
    %900 = vector.extract_strided_slice %896 {offsets = [0, 0], sizes = [8, 64], strides = [1, 1]} : vector<8x96xf32> to vector<8x64xf32>
    %901 = vector.extract_strided_slice %899 {offsets = [0, 0], sizes = [8, 64], strides = [1, 1]} : vector<8x96xf32> to vector<8x64xf32>
    %902 = arith.addf %900, %901 : vector<8x64xf32>
    %903 = arith.negf %902 : vector<8x64xf32>
    %904 = math.exp %903 : vector<8x64xf32>
    %cst_369 = arith.constant 1.000000e+00 : f32
    %905 = vector.broadcast %cst_369 : f32 to vector<8x64xf32>
    %906 = arith.addf %905, %904 : vector<8x64xf32>
    %907 = arith.divf %905, %906 : vector<8x64xf32>
    %908 = vector.extract_strided_slice %907 {offsets = [0, 0], sizes = [8, 32], strides = [1, 1]} : vector<8x64xf32> to vector<8x32xf32>
    %909 = vector.extract_strided_slice %907 {offsets = [0, 32], sizes = [8, 32], strides = [1, 1]} : vector<8x64xf32> to vector<8x32xf32>
    %910 = vector.extract_strided_slice %896 {offsets = [0, 64], sizes = [8, 32], strides = [1, 1]} : vector<8x96xf32> to vector<8x32xf32>
    %911 = vector.extract_strided_slice %899 {offsets = [0, 64], sizes = [8, 32], strides = [1, 1]} : vector<8x96xf32> to vector<8x32xf32>
    %912 = arith.mulf %908, %911 : vector<8x32xf32>
    %913 = arith.addf %910, %912 : vector<8x32xf32>
    %914 = math.tanh %913 : vector<8x32xf32>
    %cst_370 = arith.constant 1.000000e+00 : f32
    %915 = vector.broadcast %cst_370 : f32 to vector<8x32xf32>
    %916 = arith.subf %915, %909 : vector<8x32xf32>
    %917 = arith.mulf %916, %914 : vector<8x32xf32>
    %918 = arith.mulf %909, %889 : vector<8x32xf32>
    %919 = arith.addf %917, %918 : vector<8x32xf32>
    %c56_371 = arith.constant 56 : index
    %c0_372 = arith.constant 0 : index
    %920 = vector.load %arg9[%c56_371, %c0_372] : memref<64x32xf32, #tpu.memory_space<vmem>>, vector<8x32xf32>
    %921 = arith.mulf %920, %919 : vector<8x32xf32>
    %922 = vector.extract_strided_slice %921 {offsets = [0, 0], sizes = [8, 16], strides = [1, 1]} : vector<8x32xf32> to vector<8x16xf32>
    %c56_373 = arith.constant 56 : index
    %c0_374 = arith.constant 0 : index
    %923 = vector.load %arg7[%c56_373, %c0_374] : memref<64x32xf32, #tpu.memory_space<vmem>>, vector<8x16xf32>
    tpu.vector_store %arg7[%c56_373, %c0_374], %922 {strides = array<i32>} : memref<64x32xf32, #tpu.memory_space<vmem>>, vector<8x16xf32>,
    %924 = vector.extract_strided_slice %921 {offsets = [0, 16], sizes = [8, 16], strides = [1, 1]} : vector<8x32xf32> to vector<8x16xf32>
    %c0_375 = arith.constant 0 : index
    %c16_376 = arith.constant 16 : index
    %925 = vector.load %arg7[%c0_375, %c16_376] : memref<64x32xf32, #tpu.memory_space<vmem>>, vector<8x16xf32>
    tpu.vector_store %arg7[%c0_375, %c16_376], %924 {strides = array<i32>} : memref<64x32xf32, #tpu.memory_space<vmem>>, vector<8x16xf32>,
    %c0_377 = arith.constant 0 : index
    %c0_378 = arith.constant 0 : index
    %926 = vector.load %arg7[%c0_377, %c0_378] : memref<64x32xf32, #tpu.memory_space<vmem>>, vector<64x32xf32>
    %c432 = arith.constant 432 : index
    %c0_379 = arith.constant 0 : index
    %927 = vector.load %arg3[%c432, %c0_379] : memref<496x96xf32, #tpu.memory_space<vmem>>, vector<32x96xf32>
    %c136 = arith.constant 136 : index
    %c0_380 = arith.constant 0 : index
    %928 = vector.load %arg4[%c136, %c0_380] : memref<152x96xf32, #tpu.memory_space<vmem>>, vector<1x96xf32>
    %cst_381 = arith.constant dense<0.000000e+00> : vector<64x96xf32>
    %929 = tpu.matmul %926, %927, %cst_381 {dimension_numbers = #tpu.dot_dimension_numbers<[1], [0], [0], [1], [0, 0, 1, 1], [], []>} : vector<64x32xf32>, vector<32x96xf32>, vector<64x96xf32> -> vector<64x96xf32>
    %930 = vector.broadcast %928 : vector<1x96xf32> to vector<64x96xf32>
    %931 = arith.addf %929, %930 : vector<64x96xf32>
    %932 = vector.extract_strided_slice %931 {offsets = [0, 0], sizes = [64, 32], strides = [1, 1]} : vector<64x96xf32> to vector<64x32xf32>
    %933 = vector.extract_strided_slice %931 {offsets = [0, 32], sizes = [64, 32], strides = [1, 1]} : vector<64x96xf32> to vector<64x32xf32>
    %934 = vector.extract_strided_slice %931 {offsets = [0, 64], sizes = [64, 32], strides = [1, 1]} : vector<64x96xf32> to vector<64x32xf32>
    %935 = tpu.iota {dimensions = array<i32: 1>} : vector<8x32xi32>
    %c2_i32 = arith.constant 2 : i32
    %936 = vector.broadcast %c2_i32 : i32 to vector<8x32xi32>
    %937 = arith.shrsi %935, %936 : vector<8x32xi32>
    %938 = tpu.iota {dimensions = array<i32: 0>} : vector<8x32xi32>
    %939 = arith.cmpi eq, %937, %938 : vector<8x32xi32>
    %940 = arith.extui %939 : vector<8x32xi1> to vector<8x32xi32>
    %941 = arith.sitofp %940 : vector<8x32xi32> to vector<8x32xf32>
    %942 = vector.extract_strided_slice %941 {offsets = [0, 0], sizes = [1, 32], strides = [1, 1]} : vector<8x32xf32> to vector<1x32xf32>
    %943 = vector.broadcast %942 : vector<1x32xf32> to vector<64x32xf32>
    %944 = arith.mulf %932, %943 : vector<64x32xf32>
    %945 = vector.extract_strided_slice %941 {offsets = [1, 0], sizes = [1, 32], strides = [1, 1]} : vector<8x32xf32> to vector<1x32xf32>
    %946 = vector.broadcast %945 : vector<1x32xf32> to vector<64x32xf32>
    %947 = arith.mulf %932, %946 : vector<64x32xf32>
    %948 = vector.extract_strided_slice %941 {offsets = [2, 0], sizes = [1, 32], strides = [1, 1]} : vector<8x32xf32> to vector<1x32xf32>
    %949 = vector.broadcast %948 : vector<1x32xf32> to vector<64x32xf32>
    %950 = arith.mulf %932, %949 : vector<64x32xf32>
    %951 = vector.extract_strided_slice %941 {offsets = [3, 0], sizes = [1, 32], strides = [1, 1]} : vector<8x32xf32> to vector<1x32xf32>
    %952 = vector.broadcast %951 : vector<1x32xf32> to vector<64x32xf32>
    %953 = arith.mulf %932, %952 : vector<64x32xf32>
    %954 = vector.extract_strided_slice %941 {offsets = [4, 0], sizes = [1, 32], strides = [1, 1]} : vector<8x32xf32> to vector<1x32xf32>
    %955 = vector.broadcast %954 : vector<1x32xf32> to vector<64x32xf32>
    %956 = arith.mulf %932, %955 : vector<64x32xf32>
    %957 = vector.extract_strided_slice %941 {offsets = [5, 0], sizes = [1, 32], strides = [1, 1]} : vector<8x32xf32> to vector<1x32xf32>
    %958 = vector.broadcast %957 : vector<1x32xf32> to vector<64x32xf32>
    %959 = arith.mulf %932, %958 : vector<64x32xf32>
    %960 = vector.extract_strided_slice %941 {offsets = [6, 0], sizes = [1, 32], strides = [1, 1]} : vector<8x32xf32> to vector<1x32xf32>
    %961 = vector.broadcast %960 : vector<1x32xf32> to vector<64x32xf32>
    %962 = arith.mulf %932, %961 : vector<64x32xf32>
    %963 = vector.extract_strided_slice %941 {offsets = [7, 0], sizes = [1, 32], strides = [1, 1]} : vector<8x32xf32> to vector<1x32xf32>
    %964 = vector.broadcast %963 : vector<1x32xf32> to vector<64x32xf32>
    %965 = arith.mulf %932, %964 : vector<64x32xf32>
    %966 = tpu.concatenate %944, %947, %950, %953, %956, %959, %962, %965 in 0 : vector<64x32xf32>, vector<64x32xf32>, vector<64x32xf32>, vector<64x32xf32>, vector<64x32xf32>, vector<64x32xf32>, vector<64x32xf32>, vector<64x32xf32> -> vector<512x32xf32>
    %cst_382 = arith.constant dense<0.000000e+00> : vector<512x64xf32>
    %967 = tpu.matmul %966, %933, %cst_382 {dimension_numbers = #tpu.dot_dimension_numbers<[1], [1], [0], [0], [0, 0, 1, 0], [], []>} : vector<512x32xf32>, vector<64x32xf32>, vector<512x64xf32> -> vector<512x64xf32>
    %cst_383 = arith.constant 5.000000e-01 : f32
    %968 = vector.broadcast %cst_383 : f32 to vector<512x64xf32>
    %969 = arith.mulf %967, %968 : vector<512x64xf32>
    %970 = tpu.iota {dimensions = array<i32: 0>} : vector<512x64xi32>
    %971 = tpu.iota {dimensions = array<i32: 1>} : vector<512x64xi32>
    %c7_i32_384 = arith.constant 7 : i32
    %972 = vector.broadcast %c7_i32_384 : i32 to vector<512x64xi32>
    %973 = arith.andi %970, %972 : vector<512x64xi32>
    %c7_i32_385 = arith.constant 7 : i32
    %974 = vector.broadcast %c7_i32_385 : i32 to vector<512x64xi32>
    %975 = arith.andi %971, %974 : vector<512x64xi32>
    %976 = arith.cmpi eq, %973, %975 : vector<512x64xi32>
    %cst_386 = arith.constant -1.000000e+30 : f32
    %977 = vector.broadcast %cst_386 : f32 to vector<512x64xf32>
    %978 = arith.select %976, %969, %977 : vector<512x64xi1>, vector<512x64xf32>
    %cst_387 = arith.constant dense<0xFF800000> : vector<512xf32>
    %979 = vector.multi_reduction <maximumf>, %978, %cst_387 [1] : vector<512x64xf32> to vector<512xf32>
    %980 = vector.shape_cast %979 : vector<512xf32> to vector<512x1xf32>
    %981 = vector.broadcast %980 : vector<512x1xf32> to vector<512x64xf32>
    %982 = arith.subf %978, %981 : vector<512x64xf32>
    %983 = math.exp %982 : vector<512x64xf32>
    %cst_388 = arith.constant dense<0.000000e+00> : vector<512xf32>
    %984 = vector.multi_reduction <add>, %983, %cst_388 [1] : vector<512x64xf32> to vector<512xf32>
    %985 = vector.shape_cast %984 : vector<512xf32> to vector<512x1xf32>
    %986 = tpu.reciprocal %985 {approx = true} : vector<512x1xf32> -> vector<512x1xf32>
    %987 = vector.broadcast %986 : vector<512x1xf32> to vector<512x64xf32>
    %988 = arith.mulf %983, %987 : vector<512x64xf32>
    %cst_389 = arith.constant dense<0.000000e+00> : vector<512x32xf32>
    %989 = tpu.matmul %988, %934, %cst_389 {dimension_numbers = #tpu.dot_dimension_numbers<[1], [0], [0], [1], [0, 0, 1, 1], [], []>} : vector<512x64xf32>, vector<64x32xf32>, vector<512x32xf32> -> vector<512x32xf32>
    %990 = vector.extract_strided_slice %989 {offsets = [0, 0], sizes = [64, 32], strides = [1, 1]} : vector<512x32xf32> to vector<64x32xf32>
    %991 = vector.extract_strided_slice %941 {offsets = [0, 0], sizes = [1, 32], strides = [1, 1]} : vector<8x32xf32> to vector<1x32xf32>
    %992 = vector.broadcast %991 : vector<1x32xf32> to vector<64x32xf32>
    %993 = arith.mulf %990, %992 : vector<64x32xf32>
    %994 = vector.extract_strided_slice %989 {offsets = [64, 0], sizes = [64, 32], strides = [1, 1]} : vector<512x32xf32> to vector<64x32xf32>
    %995 = vector.extract_strided_slice %941 {offsets = [1, 0], sizes = [1, 32], strides = [1, 1]} : vector<8x32xf32> to vector<1x32xf32>
    %996 = vector.broadcast %995 : vector<1x32xf32> to vector<64x32xf32>
    %997 = arith.mulf %994, %996 : vector<64x32xf32>
    %998 = arith.addf %993, %997 : vector<64x32xf32>
    %999 = vector.extract_strided_slice %989 {offsets = [128, 0], sizes = [64, 32], strides = [1, 1]} : vector<512x32xf32> to vector<64x32xf32>
    %1000 = vector.extract_strided_slice %941 {offsets = [2, 0], sizes = [1, 32], strides = [1, 1]} : vector<8x32xf32> to vector<1x32xf32>
    %1001 = vector.broadcast %1000 : vector<1x32xf32> to vector<64x32xf32>
    %1002 = arith.mulf %999, %1001 : vector<64x32xf32>
    %1003 = arith.addf %998, %1002 : vector<64x32xf32>
    %1004 = vector.extract_strided_slice %989 {offsets = [192, 0], sizes = [64, 32], strides = [1, 1]} : vector<512x32xf32> to vector<64x32xf32>
    %1005 = vector.extract_strided_slice %941 {offsets = [3, 0], sizes = [1, 32], strides = [1, 1]} : vector<8x32xf32> to vector<1x32xf32>
    %1006 = vector.broadcast %1005 : vector<1x32xf32> to vector<64x32xf32>
    %1007 = arith.mulf %1004, %1006 : vector<64x32xf32>
    %1008 = arith.addf %1003, %1007 : vector<64x32xf32>
    %1009 = vector.extract_strided_slice %989 {offsets = [256, 0], sizes = [64, 32], strides = [1, 1]} : vector<512x32xf32> to vector<64x32xf32>
    %1010 = vector.extract_strided_slice %941 {offsets = [4, 0], sizes = [1, 32], strides = [1, 1]} : vector<8x32xf32> to vector<1x32xf32>
    %1011 = vector.broadcast %1010 : vector<1x32xf32> to vector<64x32xf32>
    %1012 = arith.mulf %1009, %1011 : vector<64x32xf32>
    %1013 = arith.addf %1008, %1012 : vector<64x32xf32>
    %1014 = vector.extract_strided_slice %989 {offsets = [320, 0], sizes = [64, 32], strides = [1, 1]} : vector<512x32xf32> to vector<64x32xf32>
    %1015 = vector.extract_strided_slice %941 {offsets = [5, 0], sizes = [1, 32], strides = [1, 1]} : vector<8x32xf32> to vector<1x32xf32>
    %1016 = vector.broadcast %1015 : vector<1x32xf32> to vector<64x32xf32>
    %1017 = arith.mulf %1014, %1016 : vector<64x32xf32>
    %1018 = arith.addf %1013, %1017 : vector<64x32xf32>
    %1019 = vector.extract_strided_slice %989 {offsets = [384, 0], sizes = [64, 32], strides = [1, 1]} : vector<512x32xf32> to vector<64x32xf32>
    %1020 = vector.extract_strided_slice %941 {offsets = [6, 0], sizes = [1, 32], strides = [1, 1]} : vector<8x32xf32> to vector<1x32xf32>
    %1021 = vector.broadcast %1020 : vector<1x32xf32> to vector<64x32xf32>
    %1022 = arith.mulf %1019, %1021 : vector<64x32xf32>
    %1023 = arith.addf %1018, %1022 : vector<64x32xf32>
    %1024 = vector.extract_strided_slice %989 {offsets = [448, 0], sizes = [64, 32], strides = [1, 1]} : vector<512x32xf32> to vector<64x32xf32>
    %1025 = vector.extract_strided_slice %941 {offsets = [7, 0], sizes = [1, 32], strides = [1, 1]} : vector<8x32xf32> to vector<1x32xf32>
    %1026 = vector.broadcast %1025 : vector<1x32xf32> to vector<64x32xf32>
    %1027 = arith.mulf %1024, %1026 : vector<64x32xf32>
    %1028 = arith.addf %1023, %1027 : vector<64x32xf32>
    %1029 = vector.extract_strided_slice %1028 {offsets = [0, 0], sizes = [8, 32], strides = [1, 1]} : vector<64x32xf32> to vector<8x32xf32>
    %1030 = vector.extract_strided_slice %1028 {offsets = [8, 0], sizes = [8, 32], strides = [1, 1]} : vector<64x32xf32> to vector<8x32xf32>
    %1031 = arith.addf %1029, %1030 : vector<8x32xf32>
    %1032 = vector.extract_strided_slice %1028 {offsets = [16, 0], sizes = [8, 32], strides = [1, 1]} : vector<64x32xf32> to vector<8x32xf32>
    %1033 = arith.addf %1031, %1032 : vector<8x32xf32>
    %1034 = vector.extract_strided_slice %1028 {offsets = [24, 0], sizes = [8, 32], strides = [1, 1]} : vector<64x32xf32> to vector<8x32xf32>
    %1035 = arith.addf %1033, %1034 : vector<8x32xf32>
    %1036 = vector.extract_strided_slice %1028 {offsets = [32, 0], sizes = [8, 32], strides = [1, 1]} : vector<64x32xf32> to vector<8x32xf32>
    %1037 = arith.addf %1035, %1036 : vector<8x32xf32>
    %1038 = vector.extract_strided_slice %1028 {offsets = [40, 0], sizes = [8, 32], strides = [1, 1]} : vector<64x32xf32> to vector<8x32xf32>
    %1039 = arith.addf %1037, %1038 : vector<8x32xf32>
    %1040 = vector.extract_strided_slice %1028 {offsets = [48, 0], sizes = [8, 32], strides = [1, 1]} : vector<64x32xf32> to vector<8x32xf32>
    %1041 = arith.addf %1039, %1040 : vector<8x32xf32>
    %1042 = vector.extract_strided_slice %1028 {offsets = [56, 0], sizes = [8, 32], strides = [1, 1]} : vector<64x32xf32> to vector<8x32xf32>
    %1043 = arith.addf %1041, %1042 : vector<8x32xf32>
    %c464 = arith.constant 464 : index
    %c0_390 = arith.constant 0 : index
    %1044 = vector.load %arg3[%c464, %c0_390] : memref<496x96xf32, #tpu.memory_space<vmem>>, vector<32x32xf32>
    %c144 = arith.constant 144 : index
    %c0_391 = arith.constant 0 : index
    %1045 = vector.load %arg4[%c144, %c0_391] : memref<152x96xf32, #tpu.memory_space<vmem>>, vector<1x32xf32>
    %cst_392 = arith.constant 1.250000e-01 : f32
    %1046 = vector.broadcast %cst_392 : f32 to vector<8x32xf32>
    %1047 = arith.mulf %1043, %1046 : vector<8x32xf32>
    %cst_393 = arith.constant dense<0.000000e+00> : vector<8x32xf32>
    %1048 = tpu.matmul %1047, %1044, %cst_393 {dimension_numbers = #tpu.dot_dimension_numbers<[1], [0], [0], [1], [0, 0, 1, 1], [], []>} : vector<8x32xf32>, vector<32x32xf32>, vector<8x32xf32> -> vector<8x32xf32>
    %1049 = vector.broadcast %1045 : vector<1x32xf32> to vector<8x32xf32>
    %1050 = arith.addf %1048, %1049 : vector<8x32xf32>
    %1051 = vector.extract_strided_slice %1050 {offsets = [0, 0], sizes = [2, 32], strides = [1, 1]} : vector<8x32xf32> to vector<2x32xf32>
    %1052 = tpu.concatenate %36, %1051 in 1 : vector<2x16xf32>, vector<2x32xf32> -> vector<2x48xf32>
    %c96_394 = arith.constant 96 : index
    %c0_395 = arith.constant 0 : index
    %1053 = vector.load %arg3[%c96_394, %c0_395] : memref<496x96xf32, #tpu.memory_space<vmem>>, vector<48x32xf32>
    %c24_396 = arith.constant 24 : index
    %c0_397 = arith.constant 0 : index
    %1054 = vector.load %arg4[%c24_396, %c0_397] : memref<152x96xf32, #tpu.memory_space<vmem>>, vector<1x32xf32>
    %cst_398 = arith.constant dense<0.000000e+00> : vector<2x32xf32>
    %1055 = tpu.matmul %1052, %1053, %cst_398 {dimension_numbers = #tpu.dot_dimension_numbers<[1], [0], [0], [1], [0, 0, 1, 1], [], []>} : vector<2x48xf32>, vector<48x32xf32>, vector<2x32xf32> -> vector<2x32xf32>
    %1056 = vector.broadcast %1054 : vector<1x32xf32> to vector<2x32xf32>
    %1057 = arith.addf %1055, %1056 : vector<2x32xf32>
    %cst_399 = arith.constant 0.000000e+00 : f32
    %1058 = vector.broadcast %cst_399 : f32 to vector<2x32xf32>
    %1059 = arith.maximumf %1057, %1058 : vector<2x32xf32>
    %c144_400 = arith.constant 144 : index
    %c0_401 = arith.constant 0 : index
    %1060 = vector.load %arg3[%c144_400, %c0_401] : memref<496x96xf32, #tpu.memory_space<vmem>>, vector<32x32xf32>
    %c32_402 = arith.constant 32 : index
    %c0_403 = arith.constant 0 : index
    %1061 = vector.load %arg4[%c32_402, %c0_403] : memref<152x96xf32, #tpu.memory_space<vmem>>, vector<1x32xf32>
    %cst_404 = arith.constant dense<0.000000e+00> : vector<2x32xf32>
    %1062 = tpu.matmul %1059, %1060, %cst_404 {dimension_numbers = #tpu.dot_dimension_numbers<[1], [0], [0], [1], [0, 0, 1, 1], [], []>} : vector<2x32xf32>, vector<32x32xf32>, vector<2x32xf32> -> vector<2x32xf32>
    %1063 = vector.broadcast %1061 : vector<1x32xf32> to vector<2x32xf32>
    %1064 = arith.addf %1062, %1063 : vector<2x32xf32>
    %cst_405 = arith.constant 0.000000e+00 : f32
    %1065 = vector.broadcast %cst_405 : f32 to vector<2x32xf32>
    %1066 = arith.maximumf %1064, %1065 : vector<2x32xf32>
    %c176 = arith.constant 176 : index
    %c0_406 = arith.constant 0 : index
    %1067 = vector.load %arg3[%c176, %c0_406] : memref<496x96xf32, #tpu.memory_space<vmem>>, vector<32x16xf32>
    %c40_407 = arith.constant 40 : index
    %c0_408 = arith.constant 0 : index
    %1068 = vector.load %arg4[%c40_407, %c0_408] : memref<152x96xf32, #tpu.memory_space<vmem>>, vector<1x16xf32>
    %cst_409 = arith.constant dense<0.000000e+00> : vector<2x16xf32>
    %1069 = tpu.matmul %1066, %1067, %cst_409 {dimension_numbers = #tpu.dot_dimension_numbers<[1], [0], [0], [1], [0, 0, 1, 1], [], []>} : vector<2x32xf32>, vector<32x16xf32>, vector<2x16xf32> -> vector<2x16xf32>
    %1070 = vector.broadcast %1068 : vector<1x16xf32> to vector<2x16xf32>
    %1071 = arith.addf %1069, %1070 : vector<2x16xf32>
    %cst_410 = arith.constant 0.000000e+00 : f32
    %1072 = vector.broadcast %cst_410 : f32 to vector<2x16xf32>
    %1073 = arith.maximumf %1071, %1072 : vector<2x16xf32>
    %c208 = arith.constant 208 : index
    %c0_411 = arith.constant 0 : index
    %1074 = vector.load %arg3[%c208, %c0_411] : memref<496x96xf32, #tpu.memory_space<vmem>>, vector<16x8xf32>
    %c48_412 = arith.constant 48 : index
    %c0_413 = arith.constant 0 : index
    %1075 = vector.load %arg4[%c48_412, %c0_413] : memref<152x96xf32, #tpu.memory_space<vmem>>, vector<1x8xf32>
    %cst_414 = arith.constant dense<0.000000e+00> : vector<2x8xf32>
    %1076 = tpu.matmul %1073, %1074, %cst_414 {dimension_numbers = #tpu.dot_dimension_numbers<[1], [0], [0], [1], [0, 0, 1, 1], [], []>} : vector<2x16xf32>, vector<16x8xf32>, vector<2x8xf32> -> vector<2x8xf32>
    %1077 = vector.broadcast %1075 : vector<1x8xf32> to vector<2x8xf32>
    %1078 = arith.addf %1076, %1077 : vector<2x8xf32>
    %cst_415 = arith.constant 0.000000e+00 : f32
    %1079 = vector.broadcast %cst_415 : f32 to vector<2x8xf32>
    %1080 = arith.maximumf %1078, %1079 : vector<2x8xf32>
    %c224 = arith.constant 224 : index
    %c0_416 = arith.constant 0 : index
    %1081 = vector.load %arg3[%c224, %c0_416] : memref<496x96xf32, #tpu.memory_space<vmem>>, vector<8x8xf32>
    %c56_417 = arith.constant 56 : index
    %c0_418 = arith.constant 0 : index
    %1082 = vector.load %arg4[%c56_417, %c0_418] : memref<152x96xf32, #tpu.memory_space<vmem>>, vector<1x8xf32>
    %cst_419 = arith.constant dense<0.000000e+00> : vector<2x8xf32>
    %1083 = tpu.matmul %1080, %1081, %cst_419 {dimension_numbers = #tpu.dot_dimension_numbers<[1], [0], [0], [1], [0, 0, 1, 1], [], []>} : vector<2x8xf32>, vector<8x8xf32>, vector<2x8xf32> -> vector<2x8xf32>
    %1084 = vector.broadcast %1082 : vector<1x8xf32> to vector<2x8xf32>
    %1085 = arith.addf %1083, %1084 : vector<2x8xf32>
    %c0_420 = arith.constant 0 : index
    %c0_421 = arith.constant 0 : index
    %1086 = vector.load %arg5[%c0_420, %c0_421] : memref<2x8xf32, #tpu.memory_space<vmem>>, vector<2x8xf32>
    tpu.vector_store %arg5[%c0_420, %c0_421], %1085 {strides = array<i32>} : memref<2x8xf32, #tpu.memory_space<vmem>>, vector<2x8xf32>,
    %c232 = arith.constant 232 : index
    %c0_422 = arith.constant 0 : index
    %1087 = vector.load %arg3[%c232, %c0_422] : memref<496x96xf32, #tpu.memory_space<vmem>>, vector<16x8xf32>
    %c64_423 = arith.constant 64 : index
    %c0_424 = arith.constant 0 : index
    %1088 = vector.load %arg4[%c64_423, %c0_424] : memref<152x96xf32, #tpu.memory_space<vmem>>, vector<1x8xf32>
    %cst_425 = arith.constant dense<0.000000e+00> : vector<2x8xf32>
    %1089 = tpu.matmul %1073, %1087, %cst_425 {dimension_numbers = #tpu.dot_dimension_numbers<[1], [0], [0], [1], [0, 0, 1, 1], [], []>} : vector<2x16xf32>, vector<16x8xf32>, vector<2x8xf32> -> vector<2x8xf32>
    %1090 = vector.broadcast %1088 : vector<1x8xf32> to vector<2x8xf32>
    %1091 = arith.addf %1089, %1090 : vector<2x8xf32>
    %cst_426 = arith.constant 0.000000e+00 : f32
    %1092 = vector.broadcast %cst_426 : f32 to vector<2x8xf32>
    %1093 = arith.maximumf %1091, %1092 : vector<2x8xf32>
    %c248 = arith.constant 248 : index
    %c0_427 = arith.constant 0 : index
    %1094 = vector.load %arg3[%c248, %c0_427] : memref<496x96xf32, #tpu.memory_space<vmem>>, vector<8x4xf32>
    %c72 = arith.constant 72 : index
    %c0_428 = arith.constant 0 : index
    %1095 = vector.load %arg4[%c72, %c0_428] : memref<152x96xf32, #tpu.memory_space<vmem>>, vector<1x4xf32>
    %cst_429 = arith.constant dense<0.000000e+00> : vector<2x4xf32>
    %1096 = tpu.matmul %1093, %1094, %cst_429 {dimension_numbers = #tpu.dot_dimension_numbers<[1], [0], [0], [1], [0, 0, 1, 1], [], []>} : vector<2x8xf32>, vector<8x4xf32>, vector<2x4xf32> -> vector<2x4xf32>
    %1097 = vector.broadcast %1095 : vector<1x4xf32> to vector<2x4xf32>
    %1098 = arith.addf %1096, %1097 : vector<2x4xf32>
    %cst_430 = arith.constant 0.000000e+00 : f32
    %1099 = vector.broadcast %cst_430 : f32 to vector<2x4xf32>
    %1100 = arith.maximumf %1098, %1099 : vector<2x4xf32>
    %c256 = arith.constant 256 : index
    %c0_431 = arith.constant 0 : index
    %1101 = vector.load %arg3[%c256, %c0_431] : memref<496x96xf32, #tpu.memory_space<vmem>>, vector<4x1xf32>
    %c80 = arith.constant 80 : index
    %c0_432 = arith.constant 0 : index
    %1102 = vector.load %arg4[%c80, %c0_432] : memref<152x96xf32, #tpu.memory_space<vmem>>, vector<1x1xf32>
    %cst_433 = arith.constant dense<0.000000e+00> : vector<2x1xf32>
    %1103 = tpu.matmul %1100, %1101, %cst_433 {dimension_numbers = #tpu.dot_dimension_numbers<[1], [0], [0], [1], [0, 0, 1, 1], [], []>} : vector<2x4xf32>, vector<4x1xf32>, vector<2x1xf32> -> vector<2x1xf32>
    %1104 = vector.broadcast %1102 : vector<1x1xf32> to vector<2x1xf32>
    %1105 = arith.addf %1103, %1104 : vector<2x1xf32>
    %cst_434 = arith.constant 0.000000e+00 : f32
    %1106 = vector.broadcast %cst_434 : f32 to vector<2x1xf32>
    %1107 = arith.maximumf %1105, %1106 : vector<2x1xf32>
    %1108 = math.absf %1105 : vector<2x1xf32>
    %cst_435 = arith.constant 0.000000e+00 : f32
    %1109 = vector.broadcast %cst_435 : f32 to vector<2x1xf32>
    %1110 = arith.subf %1109, %1108 : vector<2x1xf32>
    %1111 = math.exp %1110 : vector<2x1xf32>
    %cst_436 = arith.constant 1.000000e+00 : f32
    %1112 = vector.broadcast %cst_436 : f32 to vector<2x1xf32>
    %1113 = arith.addf %1112, %1111 : vector<2x1xf32>
    %1114 = math.log %1113 : vector<2x1xf32>
    %1115 = arith.addf %1107, %1114 : vector<2x1xf32>
    %cst_437 = arith.constant 1.000000e+00 : f32
    %1116 = vector.broadcast %cst_437 : f32 to vector<2x1xf32>
    %1117 = arith.addf %1116, %1115 : vector<2x1xf32>
    %c0_438 = arith.constant 0 : index
    %c0_439 = arith.constant 0 : index
    %1118 = vector.load %arg6[%c0_438, %c0_439] : memref<2x1xf32, #tpu.memory_space<vmem>>, vector<2x1xf32>
    tpu.vector_store %arg6[%c0_438, %c0_439], %1117 {strides = array<i32>} : memref<2x1xf32, #tpu.memory_space<vmem>>, vector<2x1xf32>,
    return
  }
}

</mosaic_0001>

<bundles_post_ra>
// kernel: tile.8
= control target key start
LH: loop header
LB: loop body
LE: loop exit
PB: predicated region body
PF: predicated region fallthrough
CT: control target
= control target key end

     0   :  { %s22_s0 = inlined_call_operand.vmem [shape: s32[8], index: 0, kind: input, shape index: {}]   ;;  %s23_s1 = inlined_call_operand.vmem [shape: s32[8,8], index: 1, kind: output, shape index: {}]  }
   0x1   :  { %v4_v0 = vld [vmem:[%s22_s0] ss:$0 sm:$0xff] }
   0x2   :  { %5 = vst [vmem:[%s23_s1] sm:$0xff] %v4_v0 }

// kernel: tile.0
= control target key start
LH: loop header
LB: loop body
LE: loop exit
PB: predicated region body
PF: predicated region fallthrough
CT: control target
= control target key end

     0   :  { %vm3_vm0 = vcmask 7168   ;;  %s84_s8 = smov 125   ;;  %s85_s13 = smov 126   ;;  %s167_s0 = inlined_call_operand.vmem [shape: s32[8,8], index: 0, kind: input, shape index: {}]   ;;  %s168_s1 = inlined_call_operand.vmem [shape: s32[64,1], index: 1, kind: output, shape index: {}]  }
   0x1   :  { %v6_v0 = vld [vmem:[%s167_s0] sm:$0xff]   ;;  %s83_s0 = smov 127   ;;  %s86_s14 = smov 124  }
   0x2   :  { %7 = vrot.lane.b32.xlu0 %v6_v0, %s83_s0  ;;  %23 = vrot.lane.b32.xlu1 %v6_v0, %s84_s8  ;;  %4 = vst.msk [vmem:[%s168_s1] ss:$8 sm:$0xf] %vm3_vm0, %v6_v0   ;;  %5 = vst.msk [vmem:[%s168_s1] ss:$8 sm:$0xf0] %vm3_vm0, %v6_v0  }
   0x3   :  { %s87_s15 = smov 123   ;;  %s88_s16 = smov 122  }
   0x4   :  { %s89_s17 = smov 121  }
   0x6   :  { %15 = vrot.lane.b32.xlu0 %v6_v0, %s85_s13  ;;  %31 = vrot.lane.b32.xlu1 %v6_v0, %s86_s14 }
   0xa   :  { %39 = vrot.lane.b32.xlu0 %v6_v0, %s87_s15  ;;  %47 = vrot.lane.b32.xlu1 %v6_v0, %s88_s16 }
   0xe   :  { %55 = vrot.lane.b32.xlu0 %v6_v0, %s89_s17 }
  0x74   :  { %v8_v1 = vpop.permute.xlu0 %7   ;;  %v24_v2 = vpop.permute.xlu1 %23  }
  0x75   :  { %62 = vst.msk [vmem:[%s168_s1 + $0x1] ss:$8 sm:$0xf] %vm3_vm0, %v8_v1   ;;  %63 = vst.msk [vmem:[%s168_s1 + $0x1] ss:$8 sm:$0xf0] %vm3_vm0, %v8_v1  }
  0x76   :  { %66 = vst.msk [vmem:[%s168_s1 + $0x3] ss:$8 sm:$0xf] %vm3_vm0, %v24_v2   ;;  %67 = vst.msk [vmem:[%s168_s1 + $0x3] ss:$8 sm:$0xf0] %vm3_vm0, %v24_v2  }
  0x78   :  { %v16_v3 = vpop.permute.xlu0 %15   ;;  %v32_v4 = vpop.permute.xlu1 %31  }
  0x79   :  { %64 = vst.msk [vmem:[%s168_s1 + $0x2] ss:$8 sm:$0xf] %vm3_vm0, %v16_v3   ;;  %65 = vst.msk [vmem:[%s168_s1 + $0x2] ss:$8 sm:$0xf0] %vm3_vm0, %v16_v3  }
  0x7a   :  { %68 = vst.msk [vmem:[%s168_s1 + $0x4] ss:$8 sm:$0xf] %vm3_vm0, %v32_v4   ;;  %69 = vst.msk [vmem:[%s168_s1 + $0x4] ss:$8 sm:$0xf0] %vm3_vm0, %v32_v4  }
  0x7c   :  { %v40_v5 = vpop.permute.xlu0 %39   ;;  %v48_v6 = vpop.permute.xlu1 %47  }
  0x7d   :  { %70 = vst.msk [vmem:[%s168_s1 + $0x5] ss:$8 sm:$0xf] %vm3_vm0, %v40_v5   ;;  %71 = vst.msk [vmem:[%s168_s1 + $0x5] ss:$8 sm:$0xf0] %vm3_vm0, %v40_v5  }
  0x7e   :  { %72 = vst.msk [vmem:[%s168_s1 + $0x6] ss:$8 sm:$0xf] %vm3_vm0, %v48_v6   ;;  %73 = vst.msk [vmem:[%s168_s1 + $0x6] ss:$8 sm:$0xf0] %vm3_vm0, %v48_v6  }
  0x80   :  { %v56_v7 = vpop.permute.xlu0 %55  }
  0x81   :  { %74 = vst.msk [vmem:[%s168_s1 + $0x7] ss:$8 sm:$0xf] %vm3_vm0, %v56_v7   ;;  %75 = vst.msk [vmem:[%s168_s1 + $0x7] ss:$8 sm:$0xf0] %vm3_vm0, %v56_v7  }

// kernel: _lambda_.1
= control target key start
LH: loop header
LB: loop body
LE: loop exit
PB: predicated region body
PF: predicated region fallthrough
CT: control target
= control target key end

     0   :  { %12 = vsyncpa [#allocation6], 0  ;;  %s11258_s0 = inlined_call_operand.vmem [shape: f32[2,29], index: 0, kind: input, shape index: {}]   ;;  %s11259_s1 = inlined_call_operand.vmem [shape: f32[64,4], index: 1, kind: input, shape index: {}]   ;;  %s11260_s2 = inlined_call_operand.vmem [shape: s32[64,1], index: 2, kind: input, shape index: {}]   ;;  %s11261_s3 = inlined_call_operand.hbm [shape: f32[496,96], index: 3, kind: input, shape index: {}]   ;;  %s11262_s4 = inlined_call_operand.vmem [shape: f32[152,96], index: 4, kind: input, shape index: {}]   ;;  %s11263_s5 = inlined_call_operand.hbm [shape: f32[2,8], index: 5, kind: output, shape index: {0}]   ;;  %s11264_s6 = inlined_call_operand.vmem [shape: f32[2,1], index: 6, kind: output, shape index: {1}]  }
   0x1   :  { %13 = vsyncpa [#allocation7], 0  ;;  %s9086_s21 = smov [#allocation5]   ;;  %s9038_s25 = scalar_lea.hbm %s11261_s3, 7936 }
   0x2   :  { %s25_s22 = sshll.u32 %s9086_s21, 4  ;;  %p9039_p0 = scmp.ne.s32.totalorder %s11261_s3, %s9038_s25  ;;  %s26_s22 = int_to_ptr.vmem [resolvable:$true] %s25_s22 }
   0x3   :  { %p9042_p1 = scmp.lt.u32.totalorder %s9038_s25, %s11261_s3 }
   0x5   :  { %p9044_p2 = pnand %p9042_p1, %p9039_p0 }
   0x7   :  { %9047 = shalt.err (!%p9044_p2)
}
   0x8   :  { %s9048_s30 = scalar_lea.vmem %s26_s22, 7936  ;;  %p9053_p4 = scmp.lt.s32.totalorder %s26_s22, %s26_s22 }
   0x9   :  { %p9049_p3 = scmp.ne.s32.totalorder %s26_s22, %s9048_s30  ;;  %p9054_p5 = scmp.lt.s32.totalorder %s9048_s30, %s9048_s30 }
   0xb   :  { %p9055_p6 = por %p9054_p5, %p9053_p4 }
   0xd   :  { %p9056_p7 = pnand %p9055_p6, %p9049_p3 }
   0xf   :  { %9059 = shalt.err (!%p9056_p7)
}
  0x10   :  { %s9087_s7 = smov 128   ;;  %s9088_s8 = smov 8  }
  0x11   :  { %31 = dma.hbm_to_vmem [thread:$0]  %s11261_s3, 7936, %s26_s22, [#allocation6], %s9087_s7, %s9087_s7, %s9088_s8  }
  0x12   :  { %9082 = dma.done.wait [#allocation6], 7936  }
  0x13   :  { %9083 = vsyncadd [#allocation6], 4294959360  ;;  %v11267_v0 = vmov 0.0|0.0   ;;  %vm9090_vm0 = vmmov 0   ;;  %v11265_v1 = vmov 0.0   ;;  %v139_v2 = vld [vmem:[#allocation5] sm:$0xff] }
  0x14   :  { %8319 = vmatprep.subr.bf16.mxu0 %v11267_v0  ;;  %8326 = vmatprep.subr.bf16.mxu1 %v11267_v0  ;;  %v140_v3 = vld [vmem:[#allocation5 + $0x8] sm:$0xff]  ;;  %v141_v4 = vld [vmem:[#allocation5 + $0x10] sm:$0xff]  ;;  %v142_v6 = vld [vmem:[#allocation5 + $0x18] sm:$0x1f]  ;;  %vm152_vm1 = vcmask 1044480   ;;  %vm9092_vm2 = vmmov 1  }
  0x15   :  { %7655 = vmatprep.mubr.msk.f32.mxu0 %vm9090_vm0, %v11265_v1  ;;  %7666 = vmatprep.mubr.msk.f32.mxu1 %vm9090_vm0, %v11265_v1  ;;  %v8320_v5 = vpack.c.bf16 %v140_v3, %v139_v2  ;;  %v227_v7 = vld [vmem:[#allocation5 + $0x20] sm:$0xff]  ;;  %v228_v8 = vld [vmem:[#allocation5 + $0x28] sm:$0xff]  ;;  %v8323_v9 = vpack.c.bf16 %v142_v6, %v141_v4  ;;  %vm8324_vm3 = vmpackc.low %vm152_vm1, %vm9092_vm2  ;;  %vm148_vm4 = vcmask 236544   ;;  %vm440_vm5 = vcmask 1043456   ;;  %s9093_s10 = smov 64   ;;  %s9095_s3 = smov 96  }
  0x16   :  { %v8327_v10 = vpack.c.bf16 %v228_v8, %v227_v7  ;;  %v138_v11 = vld [vmem:[%s11258_s0] sm:$0x3]  ;;  %v229_v12 = vld [vmem:[#allocation5 + $0x30] sm:$0xff]  ;;  %v230_v13 = vld [vmem:[#allocation5 + $0x38] sm:$0xff]  ;;  %vm129_vm6 = vcmask 261120   ;;  %vm415_vm7 = vcmask 31744   ;;  %v37_v7 = vlaneseq }
  0x17   :  { %8321 = vmatpush3.bf16.msra.mxu0 %v8320_v5  ;;  %v8330_v14 = vpack.c.bf16 %v230_v13, %v229_v12  ;;  %v396_v15 = vld [vmem:[#allocation5 + $0x108] sm:$0xf]  ;;  %v310_v16 = vld [vmem:[#allocation5 + $0x40] sm:$0xff]  ;;  %v405_v26 = vld [vmem:[%s11259_s1 + $0x10] sm:$0xff]  ;;  %vm549_vm8 = vcmask 785408   ;;  %vm673_vm12 = vcmask 130048  }
  0x18   :  { %8322 = vmatprep.subr.bf16.mxu0 %v11267_v0  ;;  %8328 = vmatpush3.bf16.msra.mxu1 %v8327_v10  ;;  %v311_v17 = vld [vmem:[#allocation5 + $0x48] sm:$0xff]  ;;  %v7041_v19 = vld [vmem:[%s11262_s4] ss:$0 sm:$0xff]  ;;  %v406_v27 = vld [vmem:[%s11259_s1 + $0x18] sm:$0xff]  ;;  %v9248_v8 = vand.u32 127, %v37_v7  ;;  %vm675_vm13 = vcmask 261248  }
  0x19   :  { %8329 = vmatprep.subr.bf16.mxu1 %v11267_v0  ;;  %v8333_v18 = vpack.c.bf16 %v311_v17, %v310_v16  ;;  %v403_v24 = vld [vmem:[%s11259_s1] sm:$0xff]  ;;  %v404_v25 = vld [vmem:[%s11259_s1 + $0x8] sm:$0xff]  ;;  %v312_v30 = vld [vmem:[#allocation5 + $0x50] sm:$0xff]  ;;  %s9096_s12 = smov 32   ;;  %s9097_s0 = smov 16  }
  0x1a   :  { %v407_v28 = vld [vmem:[%s11259_s1 + $0x20] sm:$0xff]  ;;  %v408_v29 = vld [vmem:[%s11259_s1 + $0x28] sm:$0xff]  ;;  %v313_v31 = vld [vmem:[#allocation5 + $0x58] sm:$0xff]  ;;  %vm56_vm10 = vcmp.lt.s32.totalorder %v9248_v8, 16  ;;  %s9098_s27 = smov [#allocation8]  }
  0x1b   :  { %8325 = vmatpush3.bf16.msk.msra.mxu0 %vm8324_vm3, %v8323_v9  ;;  %v8336_v32 = vpack.c.bf16 %v313_v31, %v312_v30  ;;  %v409_v33 = vld [vmem:[%s11259_s1 + $0x30] sm:$0xff]  ;;  %v410_v34 = vld [vmem:[%s11259_s1 + $0x38] sm:$0xff]  ;;  %v400_v38 = vld [vmem:[#allocation5 + $0x120] sm:$0xff]  ;;  %v393_v9 = vshra.s32 %v9248_v8, 4  ;;  %v9267_v30 = vshrl.u32 %v37_v7, 7  ;;  %s7020_s28 = sshll.u32 %s9098_s27, 4  ;;  %s7021_s28 = int_to_ptr.vmem [resolvable:$true] %s7020_s28 }
  0x1c   :  { %8332 = vmatprep.subr.bf16.mxu0 %v11267_v0  ;;  %8331 = vmatpush3.bf16.msra.mxu1 %v8330_v14  ;;  %v398_v35 = vld [vmem:[#allocation5 + $0x110] sm:$0xff]  ;;  %v399_v36 = vld [vmem:[#allocation5 + $0x118] sm:$0xff]  ;;  %v401_v39 = vld [vmem:[#allocation5 + $0x128] sm:$0xff]  ;;  %s9060_s1 = scalar_lea.vmem %s7021_s28, 32  ;;  %p9065_p9 = scmp.lt.s32.totalorder %s7021_s28, %s7021_s28 }
  0x1d   :  { %7680 = vmatprep.subr.msk.mxu1 %vm440_vm5, %v396_v15  ;;  %v9201_v37 = vpack.c.bf16 %v399_v36, %v398_v35  ;;  %v9207_v40 = vpack.c.bf16 %v401_v39, %v400_v38  ;;  %v7044_v41 = vld [vmem:[%s11262_s4 + $0x8] ss:$0 sm:$0xff]  ;;  %v7048_v46 = vld [vmem:[%s11262_s4 + $0x58] ss:$0 sm:$0xff]  ;;  %v9244_v3 = vld [vmem:[%s11262_s4 + $0x60] ss:$0 sm:$0xff]  ;;  %p9061_p8 = scmp.ne.s32.totalorder %s7021_s28, %s9060_s1  ;;  %p9066_p10 = scmp.lt.s32.totalorder %s9060_s1, %s9060_s1 }
  0x1e   :  { %7656 = vmatmul.mubr.msk.f32.vlgmr.msra.gmra.mrb[0].mxu0 %vm148_vm4, %v138_v11  ;;  %v9251_v10 = vand.u32 1, %v393_v9  ;;  %v9309_v9 = vadd.s32 8, %v9267_v30 }
  0x1f   :  { %7677 = vmatprep.mubr.msk.f32.mxu0 %vm9090_vm0, %v11265_v1  ;;  %8334 = vmatpush3.bf16.msra.mxu0 %v8333_v18  ;;  %p9067_p11 = por %p9066_p10, %p9065_p9 }
  0x20   :  { %8335 = vmatprep.subr.bf16.mxu0 %v11267_v0  ;;  %vm395_vm9 = vcmp.eq.s32.totalorder %v9251_v10, 0 }
  0x21   :  { %p9068_p12 = pnand %p9067_p11, %p9061_p8 }
  0x23   :  { %8337 = vmatpush3.bf16.msra.mxu0 %v8336_v32  ;;  %v48_v32 = vshra.s32 %v9267_v30, 3 }
  0x24   :  { %8338 = vmatprep.subr.bf16.mxu0 %v11267_v0 }
  0xf1   :  { %v222_v20 = vpop.f32.mrb[0].mxu0 }
  0xf2   :  { %v223_v21 = vadd.f32 %v7041_v19, %v222_v20  ;;  %v7657_v22 = vpop.f32.mrb[1].mxu0 }
  0xf4   :  { %v226_v23 = vmax.f32 %v223_v21, 0.0  ;;  %v9094_v21 = vmov 0  }
  0xf5   :  { %8592 = vset.pattern.permute.xlu1 %v9094_v21  ;;  %8633 = vset.pattern.permute.xlu0 %v9094_v21 }
  0xf6   :  { %7667 = vmatmul.mubr.msk.f32.vlgmr.msra.gmra.mrb[0].mxu1 %vm129_vm6, %v226_v23 }
  0xf7   :  { %7681 = vmatpush3.msk.msra.mxu1 %vm440_vm5, %v396_v15  ;;  %7682 = vmatprep.mubr.msk.f32.mxu1 %vm415_vm7, %v403_v24 }
  0xf8   :  { %8344 = vmatprep.subr.bf16.mxu1 %v11267_v0 }
  0xfa   :  { %7683 = vmatmul.mubr.msk.f32.vlgmr.msra.gmra.mrb[2].mxu1 %vm415_vm7, %v404_v25  ;;  %v73_v25 = vld [vmem:[%s11260_s2] sm:$0xff] }
  0xfb   :  { %7685 = vmatprep.mubr.msk.f32.mxu1 %vm415_vm7, %v405_v26  ;;  %8346 = vmatpush3.bf16.msra.mxu1 %v9201_v37 }
  0xfc   :  { %8347 = vmatprep.subr.bf16.mxu1 %v11267_v0 }
  0xfe   :  { %7686 = vmatmul.mubr.msk.f32.gmra.mrb[4].mxu1 %vm415_vm7, %v406_v27 }
  0xff   :  { %7688 = vmatprep.mubr.msk.f32.mxu1 %vm415_vm7, %v407_v28  ;;  %8349 = vmatpush3.bf16.msra.mxu1 %v9207_v40 }
 0x100   :  { %8356 = vmatprep.subr.bf16.mxu1 %v11267_v0 }
 0x102   :  { %7689 = vmatmul.mubr.msk.f32.gmra.mrb[6].mxu1 %vm415_vm7, %v408_v29 }
 0x103   :  { %7691 = vmatprep.mubr.msk.f32.mxu1 %vm415_vm7, %v409_v33  ;;  %v57_v33 = vsub.s32 7, %v48_v32 }
 0x106   :  { %7692 = vmatmul.mubr.msk.f32.gmra.mrb[8].mxu1 %vm415_vm7, %v410_v34  ;;  %v65_v34 = vsel %vm56_vm10, %v48_v32, %v57_v33 }
 0x107   :  { %7713 = vmatprep.mubr.msk.f32.mxu1 %vm9090_vm0, %v11265_v1 }
 0x1c9   :  { %v305_v42 = vpop.f32.mrb[0].mxu1 }
 0x1ca   :  { %v306_v43 = vadd.f32 %v7044_v41, %v305_v42  ;;  %v7668_v44 = vpop.f32.mrb[1].mxu1 }
 0x1cc   :  { %v309_v45 = vmax.f32 %v306_v43, 0.0 }
 0x1cd   :  { %v7684_v47 = vpop.f32.mrb[2].mxu1 }
 0x1ce   :  { %7678 = vmatmul.mubr.msk.f32.vlgmr.msra.gmra.mrb[2].mxu0 %vm129_vm6, %v309_v45  ;;  %v516_v48 = vadd.f32 %v7684_v47, %v7048_v46  ;;  %v510_v49 = vpop.f32.mrb[3].mxu1 }
 0x1cf   :  { %8340 = vmatpush3.bf16.msra.mxu0 %v9201_v37  ;;  %7702 = vmatprep.mubr.msk.f32.mxu0 %vm9090_vm0, %v11265_v1  ;;  %v511_v50 = vadd.f32 %v7048_v46, %v510_v49 }
 0x1d0   :  { %8341 = vmatprep.subr.bf16.mxu0 %v11267_v0  ;;  %551 = vst.msk [vmem:[#allocation3 + $0x8] sm:$0xff] %vm549_vm8, %v516_v48 }
 0x1d1   :  { %550 = vst.msk [vmem:[#allocation3] sm:$0xff] %vm549_vm8, %v511_v50  ;;  %v7687_v51 = vpop.f32.mrb[4].mxu1 }
 0x1d2   :  { %v526_v52 = vadd.f32 %v7687_v51, %v7048_v46  ;;  %v520_v53 = vpop.f32.mrb[5].mxu1 }
 0x1d3   :  { %8343 = vmatpush3.bf16.msra.mxu0 %v9207_v40  ;;  %v521_v54 = vadd.f32 %v7048_v46, %v520_v53 }
 0x1d4   :  { %553 = vst.msk [vmem:[#allocation3 + $0x18] sm:$0xff] %vm549_vm8, %v526_v52  ;;  %8350 = vmatprep.subr.bf16.mxu0 %v11267_v0 }
 0x1d5   :  { %552 = vst.msk [vmem:[#allocation3 + $0x10] sm:$0xff] %vm549_vm8, %v521_v54  ;;  %v7690_v55 = vpop.f32.mrb[6].mxu1 }
 0x1d6   :  { %7703 = vmatmul.mubr.f32.vlgmr.msra.gmra.mrb[4].mxu0 %v11265_v1  ;;  %v536_v56 = vadd.f32 %v7690_v55, %v7048_v46  ;;  %v530_v57 = vpop.f32.mrb[7].mxu1 }
 0x1d7   :  { %v531_v58 = vadd.f32 %v7048_v46, %v530_v57  ;;  %8352 = vmatpush3.bf16.msra.mxu0 %v9201_v37  ;;  %7724 = vmatprep.mubr.msk.f32.mxu0 %vm9090_vm0, %v11265_v1  ;;  %v9294_v48 = vld [vmem:[#allocation3 + $0x8] sm:$0xff] }
 0x1d8   :  { %555 = vst.msk [vmem:[#allocation3 + $0x28] sm:$0xff] %vm549_vm8, %v536_v56  ;;  %8353 = vmatprep.subr.bf16.mxu0 %v11267_v0  ;;  %v9254_v11 = vld [vmem:[#allocation3] sm:$0xff] }
 0x1d9   :  { %554 = vst.msk [vmem:[#allocation3 + $0x20] sm:$0xff] %vm549_vm8, %v531_v58  ;;  %v7693_v59 = vpop.f32.mrb[8].mxu1 }
 0x1da   :  { %v546_v60 = vadd.f32 %v7693_v59, %v7048_v46  ;;  %v540_v61 = vpop.f32.mrb[9].mxu1 }
 0x1db   :  { %8355 = vmatpush3.bf16.msra.mxu0 %v9207_v40  ;;  %v541_v62 = vadd.f32 %v7048_v46, %v540_v61  ;;  %v74_v61 = vld [vmem:[%s11260_s2 + $0x8] sm:$0xff] }
 0x1dc   :  { %8362 = vmatprep.subr.bf16.mxu0 %v11267_v0  ;;  %557 = vst.msk [vmem:[#allocation3 + $0x38] sm:$0xff] %vm549_vm8, %v546_v60 }
 0x1dd   :  { %556 = vst.msk [vmem:[#allocation3 + $0x30] sm:$0xff] %vm549_vm8, %v541_v62 }
 0x1e3   :  { %v9256_v12 = vld [vmem:[#allocation3 + $0x38] sm:$0xff] }
 0x1e4   :  { %v560_v13 = vsel %vm395_vm9, %v9254_v11, %v9256_v12  ;;  %v9296_v49 = vld [vmem:[#allocation3 + $0x30] sm:$0xff] }
 0x1e5   :  { %v679_v50 = vsel %vm395_vm9, %v9294_v48, %v9296_v49 }
 0x2a1   :  { %v9239_v63 = vpop.f32.mrb[2].mxu0 }
 0x2a2   :  { %11314 = vst [vmem:[#allocation11_spill] sm:$0xff] %v9239_v63  ;;  %v7679_v2 = vpop.f32.mrb[3].mxu0  ;;  %v4614_v63 = vadd.s32 360, %v9267_v30 }
 0x2a9   :  { %v634_v4 = vpop.f32.mrb[4].mxu0 }
 0x2aa   :  { %v635_v5 = vadd.f32 %v9244_v3, %v634_v4  ;;  %v7704_v6 = vpop.f32.mrb[5].mxu0 }
 0x2ac   :  { %646 = vrot.lane.b32.xlu0 %v635_v5, %s9093_s10  ;;  %v638_v14 = vadd.f32 %v635_v5, %v560_v13 }
 0x2ae   :  { %v7059_v15 = vmul.f32 -1.442695, %v638_v14 }
 0x2b0   :  { %8634 = vpow2.f32 %v7059_v15 }
 0x2ba   :  { %v8635_v16 = vpop.eup %8634 }
 0x2bb   :  { %v642_v17 = vadd.f32 1.0, %v8635_v16 }
 0x2bd   :  { %8636 = vrcp.f32 %v642_v17 }
 0x2c7   :  { %v8637_v18 = vpop.eup %8636 }
 0x2c8   :  { %v656_v26 = vsub.f32 1.0, %v8637_v18  ;;  %v662_v28 = vmul.f32 0.0, %v8637_v18 }
 0x31e   :  { %v647_v19 = vpop.permute.xlu0 %646 }
 0x31f   :  { %v649_v20 = vmul.f32 %v8637_v18, %v647_v19 }
 0x321   :  { %651 = vrot.lane.b32.xlu0 %v649_v20, %s9093_s10 }
 0x393   :  { %v652_v22 = vpop.permute.xlu0 %651 }
 0x394   :  { %v654_v23 = vadd.f32 %v652_v22, %v560_v13  ;;  %v49_v13 = vshra.s32 %v9309_v9, 3 }
 0x396   :  { %8638 = vtanh.f32 %v654_v23  ;;  %v58_v14 = vsub.s32 7, %v49_v13 }
 0x398   :  { %v66_v15 = vsel %vm56_vm10, %v49_v13, %v58_v14  ;;  %v909_v14 = vld [vmem:[#allocation3 + $0x18] sm:$0xff] }
 0x3a0   :  { %v8639_v24 = vpop.eup %8638 }
 0x3a1   :  { %658 = vrot.lane.b32.xlu1 %v8639_v24, %s9095_s3 }
 0x3a5   :  { %82 = vperm.xlu1 %8592, %v73_v25  }
 0x413   :  { %v659_v27 = vpop.permute.xlu1 %658 }
 0x414   :  { %v661_v29 = vmul.f32 %v659_v27, %v656_v26  ;;  %v9334_v27 = vld [vmem:[#allocation3 + $0x10] sm:$0xff] }
 0x416   :  { %v663_v31 = vadd.f32 %v662_v28, %v661_v29  ;;  %v9336_v28 = vld [vmem:[#allocation3 + $0x28] sm:$0xff] }
 0x417   :  { %v795_v29 = vsel %vm395_vm9, %v9334_v27, %v9336_v28 }
 0x418   :  { %666 = vrot.lane.b32.xlu0 %v663_v31, %s9095_s3 }
 0x424   :  { %v83_v35 = vpop.permute.xlu1 %82 }
 0x425   :  { %vm105_vm11 = vcmp.lt.s32.totalorder %v65_v34, %v83_v35 }
 0x426   :  { %v7033_v36 = vsel %vm105_vm11, 1.0, %v11265_v1 }
 0x427   :  { %130 = vst.msk [vmem:[#allocation4] sm:$0xff] %vm129_vm6, %v7033_v36 }
 0x42e   :  { %v9276_v38 = vld [vmem:[#allocation4] sm:$0xff] }
 0x42f   :  { %v670_v39 = vsub.f32 1.0, %v9276_v38 }
 0x431   :  { %v9279_v41 = vmul.f32 0.0, %v670_v39 }
 0x48a   :  { %v667_v42 = vpop.permute.xlu0 %666 }
 0x48b   :  { %v669_v43 = vmul.f32 %v667_v42, %v9276_v38 }
 0x48d   :  { %v672_v44 = vadd.f32 %v9279_v41, %v669_v43  ;;  %674 = vst.msk [vmem:[#allocation2] sm:$0xff] %vm673_vm12, %v669_v43 }
 0x48e   :  { %676 = vst.msk [vmem:[#allocation2 + $0x38] sm:$0xff] %vm675_vm13, %v669_v43 }
 0x48f   :  { %7714 = vmatmul.mubr.msk.f32.vlgmr.msra.gmra.mrb[10].mxu1 %vm129_vm6, %v672_v44 }
 0x490   :  { %8358 = vmatpush3.bf16.msra.mxu1 %v9201_v37  ;;  %7735 = vmatprep.mubr.msk.f32.mxu1 %vm9090_vm0, %v11265_v1 }
 0x491   :  { %8359 = vmatprep.subr.bf16.mxu1 %v11267_v0 }
 0x494   :  { %8361 = vmatpush3.bf16.msra.mxu1 %v9207_v40 }
 0x495   :  { %8368 = vmatprep.subr.bf16.mxu1 %v11267_v0 }
 0x562   :  { %v749_v45 = vpop.f32.mrb[10].mxu1 }
 0x563   :  { %v750_v46 = vadd.f32 %v9244_v3, %v749_v45  ;;  %v7715_v47 = vpop.f32.mrb[11].mxu1  ;;  %v75_v45 = vld [vmem:[%s11260_s2 + $0x10] sm:$0xff] }
 0x565   :  { %761 = vrot.lane.b32.xlu1 %v750_v46, %s9093_s10  ;;  %v753_v51 = vadd.f32 %v750_v46, %v679_v50 }
 0x567   :  { %v7061_v52 = vmul.f32 -1.442695, %v753_v51 }
 0x569   :  { %8640 = vpow2.f32 %v7061_v52 }
 0x573   :  { %v8641_v53 = vpop.eup %8640 }
 0x574   :  { %v757_v54 = vadd.f32 1.0, %v8641_v53 }
 0x576   :  { %8642 = vrcp.f32 %v757_v54  ;;  %v9349_v54 = vadd.s32 16, %v9267_v30 }
 0x580   :  { %v8643_v55 = vpop.eup %8642 }
 0x581   :  { %v771_v2 = vsub.f32 1.0, %v8643_v55 }
 0x5d7   :  { %v762_v56 = vpop.permute.xlu1 %761 }
 0x5d8   :  { %v764_v57 = vmul.f32 %v8643_v55, %v762_v56 }
 0x5da   :  { %766 = vrot.lane.b32.xlu0 %v764_v57, %s9093_s10 }
 0x5de   :  { %777 = vrot.lane.b32.xlu0 %v672_v44, %s9096_s12 }
 0x64c   :  { %v767_v58 = vpop.permute.xlu0 %766 }
 0x64d   :  { %v769_v59 = vadd.f32 %v767_v58, %v679_v50 }
 0x64f   :  { %8644 = vtanh.f32 %v769_v59 }
 0x650   :  { %v778_v62 = vpop.permute.xlu0 %777 }
 0x651   :  { %v780_v5 = vmul.f32 %v8643_v55, %v778_v62  ;;  %v50_v55 = vshra.s32 %v9349_v54, 3 }
 0x653   :  { %v59_v56 = vsub.s32 7, %v50_v55 }
 0x655   :  { %v67_v57 = vsel %vm56_vm10, %v50_v55, %v59_v56 }
 0x659   :  { %v8645_v60 = vpop.eup %8644 }
 0x65a   :  { %773 = vrot.lane.b32.xlu1 %v8645_v60, %s9095_s3 }
 0x65e   :  { %85 = vperm.xlu1 %8592, %v74_v61  }
 0x6cc   :  { %v774_v4 = vpop.permute.xlu1 %773 }
 0x6cd   :  { %v776_v6 = vmul.f32 %v774_v4, %v771_v2 }
 0x6cf   :  { %v781_v7 = vadd.f32 %v780_v5, %v776_v6 }
 0x6d1   :  { %784 = vrot.lane.b32.xlu0 %v781_v7, %s9095_s3 }
 0x6dd   :  { %v86_v16 = vpop.permute.xlu1 %85 }
 0x6de   :  { %vm106_vm14 = vcmp.lt.s32.totalorder %v66_v15, %v86_v16  ;;  %v910_v15 = vld [vmem:[#allocation3 + $0x20] sm:$0xff] }
 0x6df   :  { %v7034_v17 = vsel %vm106_vm14, 1.0, %v11265_v1  ;;  %v911_v16 = vsel %vm395_vm9, %v909_v14, %v910_v15  ;;  %vm4826_vm14 = vcmask 523264  }
 0x6e0   :  { %131 = vst.msk [vmem:[#allocation4 + $0x8] sm:$0xff] %vm129_vm6, %v7034_v17 }
 0x6e7   :  { %v9317_v18 = vld [vmem:[#allocation4 + $0x8] sm:$0xff] }
 0x6e8   :  { %v788_v19 = vsub.f32 1.0, %v9317_v18 }
 0x6ea   :  { %v789_v21 = vmul.f32 %v788_v19, %v672_v44 }
 0x743   :  { %v785_v20 = vpop.permute.xlu0 %784 }
 0x744   :  { %v787_v22 = vmul.f32 %v785_v20, %v9317_v18 }
 0x746   :  { %v790_v23 = vadd.f32 %v789_v21, %v787_v22  ;;  %791 = vst.msk [vmem:[#allocation2 + $0x8] sm:$0xff] %vm673_vm12, %v787_v22 }
 0x747   :  { %792 = vst.msk [vmem:[#allocation2 + $0x30] sm:$0xff] %vm675_vm13, %v787_v22 }
 0x748   :  { %7725 = vmatmul.mubr.msk.f32.vlgmr.msra.gmra.mrb[6].mxu0 %vm129_vm6, %v790_v23 }
 0x749   :  { %8364 = vmatpush3.bf16.msra.mxu0 %v9201_v37  ;;  %7746 = vmatprep.mubr.msk.f32.mxu0 %vm9090_vm0, %v11265_v1 }
 0x74a   :  { %8365 = vmatprep.subr.bf16.mxu0 %v11267_v0 }
 0x74d   :  { %8367 = vmatpush3.bf16.msra.mxu0 %v9207_v40 }
 0x74e   :  { %8374 = vmatprep.subr.bf16.mxu0 %v11267_v0 }
 0x81b   :  { %v865_v24 = vpop.f32.mrb[6].mxu0 }
 0x81c   :  { %v866_v25 = vadd.f32 %v9244_v3, %v865_v24  ;;  %v7726_v26 = vpop.f32.mrb[7].mxu0 }
 0x81e   :  { %877 = vrot.lane.b32.xlu1 %v866_v25, %s9093_s10  ;;  %v869_v31 = vadd.f32 %v866_v25, %v795_v29 }
 0x820   :  { %v7063_v32 = vmul.f32 -1.442695, %v869_v31 }
 0x822   :  { %8646 = vpow2.f32 %v7063_v32  ;;  %v76_v32 = vld [vmem:[%s11260_s2 + $0x18] sm:$0xff] }
 0x82c   :  { %v8647_v33 = vpop.eup %8646 }
 0x82d   :  { %v873_v34 = vadd.f32 1.0, %v8647_v33 }
 0x82f   :  { %8648 = vrcp.f32 %v873_v34 }
 0x839   :  { %v8649_v35 = vpop.eup %8648 }
 0x83a   :  { %v887_v47 = vsub.f32 1.0, %v8649_v35 }
 0x890   :  { %v878_v36 = vpop.permute.xlu1 %877 }
 0x891   :  { %v880_v39 = vmul.f32 %v8649_v35, %v878_v36 }
 0x893   :  { %882 = vrot.lane.b32.xlu0 %v880_v39, %s9093_s10 }
 0x897   :  { %893 = vrot.lane.b32.xlu0 %v790_v23, %s9096_s12 }
 0x905   :  { %v883_v42 = vpop.permute.xlu0 %882 }
 0x906   :  { %v885_v43 = vadd.f32 %v883_v42, %v795_v29 }
 0x908   :  { %8650 = vtanh.f32 %v885_v43  ;;  %v9383_v43 = vadd.s32 24, %v9267_v30 }
 0x909   :  { %v894_v46 = vpop.permute.xlu0 %893 }
 0x90a   :  { %v896_v51 = vmul.f32 %v8649_v35, %v894_v46 }
 0x912   :  { %v8651_v44 = vpop.eup %8650 }
 0x913   :  { %889 = vrot.lane.b32.xlu1 %v8651_v44, %s9095_s3  ;;  %v51_v44 = vshra.s32 %v9383_v43, 3 }
 0x917   :  { %88 = vperm.xlu1 %8592, %v75_v45   ;;  %v60_v45 = vsub.s32 7, %v51_v44 }
 0x919   :  { %v68_v46 = vsel %vm56_vm10, %v51_v44, %v60_v45 }
 0x985   :  { %v890_v50 = vpop.permute.xlu1 %889 }
 0x986   :  { %v892_v52 = vmul.f32 %v890_v50, %v887_v47 }
 0x988   :  { %v897_v53 = vadd.f32 %v896_v51, %v892_v52 }
 0x98a   :  { %900 = vrot.lane.b32.xlu0 %v897_v53, %s9095_s3 }
 0x996   :  { %v89_v58 = vpop.permute.xlu1 %88 }
 0x997   :  { %vm107_vm15 = vcmp.lt.s32.totalorder %v67_v57, %v89_v58 }
 0x998   :  { %v7035_v59 = vsel %vm107_vm15, 1.0, %v11265_v1 }
 0x999   :  { %132 = vst.msk [vmem:[#allocation4 + $0x10] sm:$0xff] %vm129_vm6, %v7035_v59 }
 0x9a0   :  { %v9357_v60 = vld [vmem:[#allocation4 + $0x10] sm:$0xff] }
 0x9a1   :  { %v904_v61 = vsub.f32 1.0, %v9357_v60 }
 0x9a3   :  { %v905_v2 = vmul.f32 %v904_v61, %v790_v23 }
 0x9fc   :  { %v901_v62 = vpop.permute.xlu0 %900 }
 0x9fd   :  { %v903_v4 = vmul.f32 %v901_v62, %v9357_v60 }
 0x9ff   :  { %v906_v5 = vadd.f32 %v905_v2, %v903_v4  ;;  %907 = vst.msk [vmem:[#allocation2 + $0x10] sm:$0xff] %vm673_vm12, %v903_v4  ;;  %v1027_v2 = vsel %vm395_vm9, %v910_v15, %v909_v14  ;;  %v77_v14 = vld [vmem:[%s11260_s2 + $0x20] sm:$0xff] }
 0xa00   :  { %908 = vst.msk [vmem:[#allocation2 + $0x28] sm:$0xff] %vm675_vm13, %v903_v4 }
 0xa01   :  { %7736 = vmatmul.mubr.msk.f32.vlgmr.msra.gmra.mrb[12].mxu1 %vm129_vm6, %v906_v5 }
 0xa02   :  { %8370 = vmatpush3.bf16.msra.mxu1 %v9201_v37  ;;  %7757 = vmatprep.mubr.msk.f32.mxu1 %vm9090_vm0, %v11265_v1 }
 0xa03   :  { %8371 = vmatprep.subr.bf16.mxu1 %v11267_v0 }
 0xa06   :  { %8373 = vmatpush3.bf16.msra.mxu1 %v9207_v40 }
 0xa07   :  { %8380 = vmatprep.subr.bf16.mxu1 %v11267_v0 }
 0xad4   :  { %v981_v6 = vpop.f32.mrb[12].mxu1 }
 0xad5   :  { %v982_v7 = vadd.f32 %v9244_v3, %v981_v6  ;;  %v7737_v13 = vpop.f32.mrb[13].mxu1 }
 0xad7   :  { %993 = vrot.lane.b32.xlu1 %v982_v7, %s9093_s10  ;;  %v985_v17 = vadd.f32 %v982_v7, %v911_v16 }
 0xad9   :  { %v7065_v20 = vmul.f32 -1.442695, %v985_v17 }
 0xadb   :  { %8652 = vpow2.f32 %v7065_v20 }
 0xae5   :  { %v8653_v21 = vpop.eup %8652 }
 0xae6   :  { %v989_v22 = vadd.f32 1.0, %v8653_v21 }
 0xae8   :  { %8654 = vrcp.f32 %v989_v22 }
 0xaf2   :  { %v8655_v23 = vpop.eup %8654 }
 0xaf3   :  { %v1003_v34 = vsub.f32 1.0, %v8655_v23 }
 0xb49   :  { %v994_v24 = vpop.permute.xlu1 %993 }
 0xb4a   :  { %v996_v25 = vmul.f32 %v8655_v23, %v994_v24 }
 0xb4c   :  { %998 = vrot.lane.b32.xlu0 %v996_v25, %s9093_s10 }
 0xb50   :  { %1009 = vrot.lane.b32.xlu0 %v906_v5, %s9096_s12 }
 0xbbe   :  { %v999_v26 = vpop.permute.xlu0 %998 }
 0xbbf   :  { %v1001_v29 = vadd.f32 %v999_v26, %v911_v16 }
 0xbc1   :  { %8656 = vtanh.f32 %v1001_v29 }
 0xbc2   :  { %v1010_v33 = vpop.permute.xlu0 %1009 }
 0xbc3   :  { %v1012_v36 = vmul.f32 %v8655_v23, %v1010_v33 }
 0xbcb   :  { %v8657_v31 = vpop.eup %8656 }
 0xbcc   :  { %1005 = vrot.lane.b32.xlu1 %v8657_v31, %s9095_s3  ;;  %v9416_v31 = vadd.s32 32, %v9267_v30 }
 0xbd0   :  { %91 = vperm.xlu1 %8592, %v76_v32   ;;  %v52_v32 = vshra.s32 %v9416_v31, 3 }
 0xbd2   :  { %v61_v33 = vsub.s32 7, %v52_v32 }
 0xc3e   :  { %v1006_v35 = vpop.permute.xlu1 %1005 }
 0xc3f   :  { %v1008_v39 = vmul.f32 %v1006_v35, %v1003_v34  ;;  %v69_v34 = vsel %vm56_vm10, %v52_v32, %v61_v33 }
 0xc41   :  { %v1013_v42 = vadd.f32 %v1012_v36, %v1008_v39 }
 0xc43   :  { %1016 = vrot.lane.b32.xlu0 %v1013_v42, %s9095_s3 }
 0xc4f   :  { %v92_v47 = vpop.permute.xlu1 %91 }
 0xc50   :  { %vm108_vm1 = vcmp.lt.s32.totalorder %v68_v46, %v92_v47 }
 0xc51   :  { %v7036_v50 = vsel %vm108_vm1, 1.0, %v11265_v1 }
 0xc52   :  { %133 = vst.msk [vmem:[#allocation4 + $0x18] sm:$0xff] %vm129_vm6, %v7036_v50 }
 0xc59   :  { %v9391_v51 = vld [vmem:[#allocation4 + $0x18] sm:$0xff] }
 0xc5a   :  { %v1020_v52 = vsub.f32 1.0, %v9391_v51 }
 0xc5c   :  { %v1021_v55 = vmul.f32 %v1020_v52, %v906_v5 }
 0xcb5   :  { %v1017_v53 = vpop.permute.xlu0 %1016 }
 0xcb6   :  { %v1019_v56 = vmul.f32 %v1017_v53, %v9391_v51 }
 0xcb8   :  { %v1022_v57 = vadd.f32 %v1021_v55, %v1019_v56  ;;  %1023 = vst.msk [vmem:[#allocation2 + $0x18] sm:$0xff] %vm673_vm12, %v1019_v56 }
 0xcb9   :  { %1024 = vst.msk [vmem:[#allocation2 + $0x20] sm:$0xff] %vm675_vm13, %v1019_v56 }
 0xcba   :  { %7747 = vmatmul.mubr.msk.f32.vlgmr.msra.gmra.mrb[8].mxu0 %vm129_vm6, %v1022_v57 }
 0xcbb   :  { %8376 = vmatpush3.bf16.msra.mxu0 %v9201_v37  ;;  %7768 = vmatprep.mubr.msk.f32.mxu0 %vm9090_vm0, %v11265_v1 }
 0xcbc   :  { %8377 = vmatprep.subr.bf16.mxu0 %v11267_v0 }
 0xcbf   :  { %8379 = vmatpush3.bf16.msra.mxu0 %v9207_v40 }
 0xd8d   :  { %v1097_v58 = vpop.f32.mrb[8].mxu0 }
 0xd8e   :  { %v1098_v59 = vadd.f32 %v9244_v3, %v1097_v58  ;;  %v7748_v62 = vpop.f32.mrb[9].mxu0 }
 0xd90   :  { %1109 = vrot.lane.b32.xlu1 %v1098_v59, %s9093_s10  ;;  %v1101_v4 = vadd.f32 %v1098_v59, %v1027_v2 }
 0xd92   :  { %v7067_v5 = vmul.f32 -1.442695, %v1101_v4 }
 0xd94   :  { %8658 = vpow2.f32 %v7067_v5 }
 0xd9e   :  { %v8659_v6 = vpop.eup %8658 }
 0xd9f   :  { %v1105_v7 = vadd.f32 1.0, %v8659_v6 }
 0xda1   :  { %8660 = vrcp.f32 %v1105_v7 }
 0xdab   :  { %v8661_v13 = vpop.eup %8660 }
 0xdac   :  { %v1119_v23 = vsub.f32 1.0, %v8661_v13 }
 0xe02   :  { %v1110_v16 = vpop.permute.xlu1 %1109 }
 0xe03   :  { %v1112_v17 = vmul.f32 %v8661_v13, %v1110_v16 }
 0xe05   :  { %1114 = vrot.lane.b32.xlu0 %v1112_v17, %s9093_s10 }
 0xe09   :  { %1125 = vrot.lane.b32.xlu0 %v1022_v57, %s9096_s12 }
 0xe77   :  { %v1115_v20 = vpop.permute.xlu0 %1114 }
 0xe78   :  { %v1117_v21 = vadd.f32 %v1115_v20, %v1027_v2 }
 0xe7a   :  { %8662 = vtanh.f32 %v1117_v21  ;;  %v9452_v21 = vadd.s32 40, %v9267_v30 }
 0xe7b   :  { %v1126_v15 = vpop.permute.xlu0 %1125 }
 0xe7c   :  { %v1128_v25 = vmul.f32 %v8661_v13, %v1126_v15 }
 0xe84   :  { %v8663_v22 = vpop.eup %8662 }
 0xe85   :  { %1121 = vrot.lane.b32.xlu1 %v8663_v22, %s9095_s3  ;;  %v53_v22 = vshra.s32 %v9452_v21, 3 }
 0xe89   :  { %94 = vperm.xlu1 %8592, %v77_v14   ;;  %v62_v14 = vsub.s32 7, %v53_v22 }
 0xe8b   :  { %v70_v15 = vsel %vm56_vm10, %v53_v22, %v62_v14 }
 0xef7   :  { %v1122_v24 = vpop.permute.xlu1 %1121 }
 0xef8   :  { %v1124_v26 = vmul.f32 %v1122_v24, %v1119_v23 }
 0xefa   :  { %v1129_v29 = vadd.f32 %v1128_v25, %v1124_v26 }
 0xefc   :  { %1132 = vrot.lane.b32.xlu0 %v1129_v29, %s9095_s3 }
 0xf08   :  { %v95_v35 = vpop.permute.xlu1 %94 }
 0xf09   :  { %vm109_vm2 = vcmp.lt.s32.totalorder %v69_v34, %v95_v35 }
 0xf0a   :  { %v7037_v36 = vsel %vm109_vm2, 1.0, %v11265_v1 }
 0xf0b   :  { %134 = vst.msk [vmem:[#allocation4 + $0x20] sm:$0xff] %vm129_vm6, %v7037_v36 }
 0xf12   :  { %v9424_v39 = vld [vmem:[#allocation4 + $0x20] sm:$0xff] }
 0xf13   :  { %v1136_v42 = vsub.f32 1.0, %v9424_v39 }
 0xf15   :  { %v1137_v45 = vmul.f32 %v1136_v42, %v1022_v57 }
 0xf6e   :  { %v1133_v44 = vpop.permute.xlu0 %1132 }
 0xf6f   :  { %v1135_v46 = vmul.f32 %v1133_v44, %v9424_v39 }
 0xf71   :  { %v1138_v47 = vadd.f32 %v1137_v45, %v1135_v46  ;;  %1139 = vst.msk [vmem:[#allocation2 + $0x20] sm:$0xff] %vm673_vm12, %v1135_v46  ;;  %v1259_v45 = vsel %vm395_vm9, %v9296_v49, %v9294_v48  ;;  %v79_v48 = vld [vmem:[%s11260_s2 + $0x30] sm:$0xff] }
 0xf72   :  { %1140 = vst.msk [vmem:[#allocation2 + $0x18] sm:$0xff] %vm675_vm13, %v1135_v46 }
 0xf73   :  { %7758 = vmatmul.mubr.msk.f32.vlgmr.msra.gmra.mrb[14].mxu1 %vm129_vm6, %v1138_v47 }
 0xf74   :  { %8382 = vmatpush3.bf16.msra.mxu1 %v9201_v37  ;;  %7779 = vmatprep.mubr.msk.f32.mxu1 %vm9090_vm0, %v11265_v1  ;;  %v1143_v37 = vsel %vm395_vm9, %v9336_v28, %v9334_v27  ;;  %v78_v27 = vld [vmem:[%s11260_s2 + $0x28] sm:$0xff] }
 0xf75   :  { %8383 = vmatprep.subr.bf16.mxu1 %v11267_v0 }
 0xf78   :  { %8385 = vmatpush3.bf16.msra.mxu1 %v9207_v40 }
 0xf79   :  { %8394 = vmatprep.subr.bf16.mxu1 %v11267_v0 }
0x1046   :  { %v1213_v50 = vpop.f32.mrb[14].mxu1 }
0x1047   :  { %v1214_v53 = vadd.f32 %v9244_v3, %v1213_v50  ;;  %v7759_v55 = vpop.f32.mrb[15].mxu1 }
0x1049   :  { %1225 = vrot.lane.b32.xlu1 %v1214_v53, %s9093_s10  ;;  %v1217_v56 = vadd.f32 %v1214_v53, %v1143_v37 }
0x104b   :  { %v7069_v57 = vmul.f32 -1.442695, %v1217_v56 }
0x104d   :  { %8664 = vpow2.f32 %v7069_v57 }
0x1057   :  { %v8665_v58 = vpop.eup %8664 }
0x1058   :  { %v1221_v59 = vadd.f32 1.0, %v8665_v58 }
0x105a   :  { %8666 = vrcp.f32 %v1221_v59 }
0x1064   :  { %v8667_v40 = vpop.eup %8666 }
0x1065   :  { %v1235_v7 = vsub.f32 1.0, %v8667_v40 }
0x10bb   :  { %v1226_v62 = vpop.permute.xlu1 %1225 }
0x10bc   :  { %v1228_v2 = vmul.f32 %v8667_v40, %v1226_v62 }
0x10be   :  { %1230 = vrot.lane.b32.xlu0 %v1228_v2, %s9093_s10 }
0x10c2   :  { %1241 = vrot.lane.b32.xlu0 %v1138_v47, %s9096_s12 }
0x1130   :  { %v1231_v4 = vpop.permute.xlu0 %1230 }
0x1131   :  { %v1233_v5 = vadd.f32 %v1231_v4, %v1143_v37 }
0x1133   :  { %8668 = vtanh.f32 %v1233_v5 }
0x1134   :  { %v1242_v28 = vpop.permute.xlu0 %1241 }
0x1135   :  { %v1244_v16 = vmul.f32 %v8667_v40, %v1242_v28 }
0x113d   :  { %v8669_v6 = vpop.eup %8668 }
0x113e   :  { %1237 = vrot.lane.b32.xlu1 %v8669_v6, %s9095_s3  ;;  %v9482_v6 = vadd.s32 48, %v9267_v30 }
0x1142   :  { %97 = vperm.xlu1 %8592, %v78_v27   ;;  %v54_v27 = vshra.s32 %v9482_v6, 3 }
0x1144   :  { %v63_v28 = vsub.s32 7, %v54_v27 }
0x11b0   :  { %v1238_v13 = vpop.permute.xlu1 %1237 }
0x11b1   :  { %v1240_v17 = vmul.f32 %v1238_v13, %v1235_v7  ;;  %v71_v7 = vsel %vm56_vm10, %v54_v27, %v63_v28 }
0x11b3   :  { %v1245_v20 = vadd.f32 %v1244_v16, %v1240_v17 }
0x11b5   :  { %1248 = vrot.lane.b32.xlu0 %v1245_v20, %s9095_s3 }
0x11c1   :  { %v98_v23 = vpop.permute.xlu1 %97 }
0x11c2   :  { %vm110_vm3 = vcmp.lt.s32.totalorder %v70_v15, %v98_v23 }
0x11c3   :  { %v7038_v24 = vsel %vm110_vm3, 1.0, %v11265_v1 }
0x11c4   :  { %135 = vst.msk [vmem:[#allocation4 + $0x28] sm:$0xff] %vm129_vm6, %v7038_v24 }
0x11cb   :  { %v9460_v25 = vld [vmem:[#allocation4 + $0x28] sm:$0xff] }
0x11cc   :  { %v1252_v26 = vsub.f32 1.0, %v9460_v25 }
0x11ce   :  { %v1253_v32 = vmul.f32 %v1252_v26, %v1138_v47 }
0x1227   :  { %v1249_v29 = vpop.permute.xlu0 %1248 }
0x1228   :  { %v1251_v33 = vmul.f32 %v1249_v29, %v9460_v25 }
0x122a   :  { %v1254_v34 = vadd.f32 %v1253_v32, %v1251_v33  ;;  %1255 = vst.msk [vmem:[#allocation2 + $0x28] sm:$0xff] %vm673_vm12, %v1251_v33 }
0x122b   :  { %1256 = vst.msk [vmem:[#allocation2 + $0x10] sm:$0xff] %vm675_vm13, %v1251_v33  ;;  %v1375_v33 = vsel %vm395_vm9, %v9256_v12, %v9254_v11  ;;  %v80_v11 = vld [vmem:[%s11260_s2 + $0x38] sm:$0xff]  ;;  %v1491_v12 = vld [vmem:[#allocation5 + $0x150] sm:$0xff] }
0x122c   :  { %7769 = vmatmul.mubr.msk.f32.vlgmr.msra.gmra.mrb[10].mxu0 %vm129_vm6, %v1254_v34 }
0x12ff   :  { %v1329_v35 = vpop.f32.mrb[10].mxu0 }
0x1300   :  { %v1330_v36 = vadd.f32 %v9244_v3, %v1329_v35  ;;  %v7770_v44 = vpop.f32.mrb[11].mxu0 }
0x1302   :  { %1341 = vrot.lane.b32.xlu1 %v1330_v36, %s9093_s10  ;;  %v1333_v46 = vadd.f32 %v1330_v36, %v1259_v45 }
0x1304   :  { %v7071_v47 = vmul.f32 -1.442695, %v1333_v46 }
0x1306   :  { %8670 = vpow2.f32 %v7071_v47 }
0x1310   :  { %v8671_v50 = vpop.eup %8670 }
0x1311   :  { %v1337_v53 = vadd.f32 1.0, %v8671_v50 }
0x1313   :  { %8672 = vrcp.f32 %v1337_v53 }
0x131d   :  { %v8673_v55 = vpop.eup %8672 }
0x131e   :  { %v1351_v40 = vsub.f32 1.0, %v8673_v55 }
0x1374   :  { %v1342_v37 = vpop.permute.xlu1 %1341 }
0x1375   :  { %v1344_v56 = vmul.f32 %v8673_v55, %v1342_v37  ;;  %v1493_v37 = vld [vmem:[#allocation5 + $0x160] sm:$0xff] }
0x1377   :  { %1346 = vrot.lane.b32.xlu0 %v1344_v56, %s9093_s10 }
0x137b   :  { %1357 = vrot.lane.b32.xlu0 %v1254_v34, %s9096_s12 }
0x13e9   :  { %v1347_v57 = vpop.permute.xlu0 %1346 }
0x13ea   :  { %v1349_v58 = vadd.f32 %v1347_v57, %v1259_v45  ;;  %v1494_v57 = vld [vmem:[#allocation5 + $0x168] sm:$0xff] }
0x13ec   :  { %8674 = vtanh.f32 %v1349_v58  ;;  %v9516_v58 = vpack.c.bf16 %v1494_v57, %v1493_v37 }
0x13ed   :  { %v1358_v49 = vpop.permute.xlu0 %1357 }
0x13ee   :  { %v1360_v2 = vmul.f32 %v8673_v55, %v1358_v49  ;;  %v1492_v55 = vld [vmem:[#allocation5 + $0x158] sm:$0xff] }
0x13ef   :  { %v9513_v56 = vpack.c.bf16 %v1492_v55, %v1491_v12  ;;  %v7074_v55 = vld [vmem:[%s11262_s4 + $0x68] ss:$0 sm:$0xff] }
0x13f6   :  { %v8675_v59 = vpop.eup %8674 }
0x13f7   :  { %1353 = vrot.lane.b32.xlu1 %v8675_v59, %s9095_s3  ;;  %v1486_v59 = vld [vmem:[#allocation5 + $0x130] sm:$0xff] }
0x13fb   :  { %100 = vperm.xlu1 %8592, %v79_v48   ;;  %v1487_v48 = vld [vmem:[#allocation5 + $0x138] sm:$0xff] }
0x13fc   :  { %v8386_v49 = vpack.c.bf16 %v1487_v48, %v1486_v59 }
0x13fe   :  { %8387 = vmatprep.subr.bf16.mxu0 %v8386_v49 }
0x13ff   :  { %8389 = vmatpush3.bf16.msra.mxu0 %v8386_v49 }
0x1469   :  { %v1354_v62 = vpop.permute.xlu1 %1353 }
0x146a   :  { %v1356_v4 = vmul.f32 %v1354_v62, %v1351_v40  ;;  %v1488_v40 = vld [vmem:[#allocation5 + $0x140] sm:$0xff]  ;;  %v1489_v62 = vld [vmem:[#allocation5 + $0x148] sm:$0xff] }
0x146c   :  { %v1361_v5 = vadd.f32 %v1360_v2, %v1356_v4  ;;  %v8390_v2 = vpack.c.bf16 %v1489_v62, %v1488_v40 }
0x146e   :  { %1364 = vrot.lane.b32.xlu0 %v1361_v5, %s9095_s3  ;;  %8391 = vmatprep.subr.bf16.mxu0 %v8390_v2 }
0x146f   :  { %8393 = vmatpush3.bf16.msra.mxu0 %v8390_v2 }
0x1470   :  { %8406 = vmatprep.subr.bf16.mxu0 %v11267_v0 }
0x147a   :  { %v101_v13 = vpop.permute.xlu1 %100 }
0x147b   :  { %vm111_vm4 = vcmp.lt.s32.totalorder %v71_v7, %v101_v13 }
0x147c   :  { %v7039_v16 = vsel %vm111_vm4, 1.0, %v11265_v1 }
0x147d   :  { %136 = vst.msk [vmem:[#allocation4 + $0x30] sm:$0xff] %vm129_vm6, %v7039_v16  ;;  %v9530_v16 = vadd.s32 56, %v9267_v30 }
0x1484   :  { %v9490_v17 = vld [vmem:[#allocation4 + $0x30] sm:$0xff] }
0x1485   :  { %v1368_v20 = vsub.f32 1.0, %v9490_v17 }
0x1487   :  { %v1369_v14 = vmul.f32 %v1368_v20, %v1254_v34 }
0x14e0   :  { %v1365_v22 = vpop.permute.xlu0 %1364 }
0x14e1   :  { %v1367_v15 = vmul.f32 %v1365_v22, %v9490_v17  ;;  %v55_v22 = vshra.s32 %v9530_v16, 3 }
0x14e3   :  { %v1370_v23 = vadd.f32 %v1369_v14, %v1367_v15  ;;  %1371 = vst.msk [vmem:[#allocation2 + $0x30] sm:$0xff] %vm673_vm12, %v1367_v15  ;;  %v64_v14 = vsub.s32 7, %v55_v22 }
0x14e4   :  { %1372 = vst.msk [vmem:[#allocation2 + $0x8] sm:$0xff] %vm675_vm13, %v1367_v15 }
0x14e5   :  { %7780 = vmatmul.mubr.msk.f32.vlgmr.msra.gmra.mrb[16].mxu1 %vm129_vm6, %v1370_v23  ;;  %v72_v15 = vsel %vm56_vm10, %v55_v22, %v64_v14 }
0x14e6   :  { %7810 = vmatprep.mubr.msk.f32.mxu1 %vm9090_vm0, %v11265_v1  ;;  %8396 = vmatpush3.bf16.msra.mxu1 %v9513_v56 }
0x14e7   :  { %8397 = vmatprep.subr.bf16.mxu1 %v11267_v0 }
0x14ea   :  { %8399 = vmatpush3.bf16.msra.mxu1 %v9516_v58 }
0x14eb   :  { %8400 = vmatprep.subr.bf16.mxu1 %v11267_v0 }
0x14ed   :  { %7811 = vmatmul.mubr.f32.vlgmr.msra.gmra.mrb[18].mxu1 %v11265_v1 }
0x14ee   :  { %8402 = vmatpush3.bf16.msra.mxu1 %v9513_v56  ;;  %7821 = vmatprep.mubr.msk.f32.mxu1 %vm9090_vm0, %v11265_v1 }
0x14ef   :  { %8403 = vmatprep.subr.bf16.mxu1 %v11267_v0 }
0x14f2   :  { %8405 = vmatpush3.bf16.msra.mxu1 %v9516_v58 }
0x14f3   :  { %8412 = vmatprep.subr.bf16.mxu1 %v11267_v0 }
0x15b8   :  { %v1445_v24 = vpop.f32.mrb[16].mxu1 }
0x15b9   :  { %v1446_v29 = vadd.f32 %v9244_v3, %v1445_v24  ;;  %v7781_v32 = vpop.f32.mrb[17].mxu1 }
0x15bb   :  { %1457 = vrot.lane.b32.xlu1 %v1446_v29, %s9093_s10  ;;  %v1449_v34 = vadd.f32 %v1446_v29, %v1375_v33  ;;  %v9541_v29 = vld [vmem:[%s11262_s4 + $0x70] ss:$0 sm:$0xff] }
0x15bd   :  { %v7073_v35 = vmul.f32 -1.442695, %v1449_v34 }
0x15bf   :  { %8676 = vpow2.f32 %v7073_v35 }
0x15c0   :  { %v1718_v32 = vpop.f32.mrb[18].mxu1 }
0x15c1   :  { %v7812_v34 = vpop.f32.mrb[19].mxu1 }
0x15c9   :  { %v8677_v36 = vpop.eup %8676 }
0x15ca   :  { %v1453_v44 = vadd.f32 1.0, %v8677_v36 }
0x15cc   :  { %8678 = vrcp.f32 %v1453_v44 }
0x15d6   :  { %v8679_v45 = vpop.eup %8678 }
0x15d7   :  { %v1467_v5 = vsub.f32 1.0, %v8679_v45 }
0x162d   :  { %v1458_v46 = vpop.permute.xlu1 %1457 }
0x162e   :  { %v1460_v47 = vmul.f32 %v8679_v45, %v1458_v46  ;;  %v1497_v46 = vld [vmem:[#allocation2 + $0x8] sm:$0xff] }
0x1630   :  { %1462 = vrot.lane.b32.xlu0 %v1460_v47, %s9093_s10  ;;  %v1498_v47 = vld [vmem:[#allocation2 + $0x10] sm:$0xff] }
0x1634   :  { %1473 = vrot.lane.b32.xlu0 %v1370_v23, %s9096_s12 }
0x16a2   :  { %v1463_v3 = vpop.permute.xlu0 %1462 }
0x16a3   :  { %v1465_v50 = vadd.f32 %v1463_v3, %v1375_v33  ;;  %v1719_v33 = vadd.f32 %v9541_v29, %v1718_v32  ;;  %v1499_v3 = vld [vmem:[#allocation2 + $0x18] sm:$0xff] }
0x16a5   :  { %8680 = vtanh.f32 %v1465_v50  ;;  %v1500_v50 = vld [vmem:[#allocation2 + $0x20] sm:$0xff] }
0x16a6   :  { %v1474_v4 = vpop.permute.xlu0 %1473 }
0x16a7   :  { %v1476_v28 = vmul.f32 %v8679_v45, %v1474_v4 }
0x16af   :  { %v8681_v53 = vpop.eup %8680 }
0x16b0   :  { %1469 = vrot.lane.b32.xlu1 %v8681_v53, %s9095_s3  ;;  %v1501_v53 = vld [vmem:[#allocation2 + $0x28] sm:$0xff] }
0x16b4   :  { %103 = vperm.xlu1 %8592, %v80_v11   ;;  %v1502_v11 = vld [vmem:[#allocation2 + $0x30] sm:$0xff] }
0x16b8   :  { %1730 = vrot.lane.b32.xlu1 %v1719_v33, %s9093_s10 }
0x1722   :  { %v1470_v27 = vpop.permute.xlu1 %1469 }
0x1723   :  { %v1472_v7 = vmul.f32 %v1470_v27, %v1467_v5 }
0x1725   :  { %v1477_v13 = vadd.f32 %v1476_v28, %v1472_v7 }
0x1727   :  { %1480 = vrot.lane.b32.xlu0 %v1477_v13, %s9095_s3 }
0x1733   :  { %v104_v23 = vpop.permute.xlu1 %103 }
0x1734   :  { %vm112_vm11 = vcmp.lt.s32.totalorder %v72_v15, %v104_v23 }
0x1735   :  { %v7040_v24 = vsel %vm112_vm11, 1.0, %v11265_v1 }
0x1736   :  { %137 = vst.msk [vmem:[#allocation4 + $0x38] sm:$0xff] %vm129_vm6, %v7040_v24 }
0x173d   :  { %v9545_v35 = vld [vmem:[#allocation4 + $0x38] sm:$0xff] }
0x1799   :  { %v1481_v36 = vpop.permute.xlu0 %1480 }
0x179a   :  { %v1483_v44 = vmul.f32 %v1481_v36, %v9545_v35 }
0x179c   :  { %1484 = vst.msk [vmem:[#allocation2 + $0x38] sm:$0xff] %vm673_vm12, %v1483_v44 }
0x179d   :  { %1485 = vst.msk [vmem:[#allocation2] sm:$0xff] %vm675_vm13, %v1483_v44 }
0x17a3   :  { %v1503_v12 = vld [vmem:[#allocation2 + $0x38] sm:$0xff] }
0x17a4   :  { %v1496_v45 = vld [vmem:[#allocation2] sm:$0xff] }
0x17a5   :  { %7790 = vmatprep.mubr.msk.f32.mxu0 %vm129_vm6, %v1496_v45  ;;  %v1731_v45 = vpop.permute.xlu1 %1730 }
0x17a6   :  { %7791 = vmatmul.mubr.msk.f32.vlgmr.msra.gmra.mrb[12].mxu0 %vm129_vm6, %v1497_v46 }
0x17a7   :  { %7793 = vmatprep.mubr.msk.f32.mxu0 %vm129_vm6, %v1498_v47  ;;  %8408 = vmatpush3.bf16.msra.mxu0 %v9513_v56 }
0x17a8   :  { %8409 = vmatprep.subr.bf16.mxu0 %v11267_v0 }
0x17aa   :  { %7794 = vmatmul.mubr.msk.f32.gmra.mrb[14].mxu0 %vm129_vm6, %v1499_v3 }
0x17ab   :  { %7796 = vmatprep.mubr.msk.f32.mxu0 %vm129_vm6, %v1500_v50  ;;  %8411 = vmatpush3.bf16.msra.mxu0 %v9516_v58 }
0x17ac   :  { %8418 = vmatprep.subr.bf16.mxu0 %v11267_v0 }
0x17ae   :  { %7797 = vmatmul.mubr.msk.f32.gmra.mrb[16].mxu0 %vm129_vm6, %v1501_v53 }
0x17af   :  { %7799 = vmatprep.mubr.msk.f32.mxu0 %vm129_vm6, %v1502_v11 }
0x17b2   :  { %7800 = vmatmul.mubr.msk.f32.gmra.mrb[18].mxu0 %vm129_vm6, %v1503_v12 }
0x17b3   :  { %7832 = vmatprep.mubr.msk.f32.mxu0 %vm9090_vm0, %v11265_v1 }
0x1879   :  { %v7792_v37 = vpop.f32.mrb[12].mxu0 }
0x187a   :  { %v1604_v57 = vadd.f32 %v7792_v37, %v7074_v55  ;;  %v1598_v59 = vpop.f32.mrb[13].mxu0 }
0x187b   :  { %v1599_v48 = vadd.f32 %v7074_v55, %v1598_v59 }
0x187c   :  { %1638 = vst.msk [vmem:[#allocation3 + $0x8] sm:$0xff] %vm549_vm8, %v1604_v57 }
0x187d   :  { %1637 = vst.msk [vmem:[#allocation3] sm:$0xff] %vm549_vm8, %v1599_v48  ;;  %v7795_v49 = vpop.f32.mrb[14].mxu0 }
0x187e   :  { %v1614_v40 = vadd.f32 %v7795_v49, %v7074_v55  ;;  %v1608_v62 = vpop.f32.mrb[15].mxu0 }
0x187f   :  { %v1609_v2 = vadd.f32 %v7074_v55, %v1608_v62 }
0x1880   :  { %1640 = vst.msk [vmem:[#allocation3 + $0x18] sm:$0xff] %vm549_vm8, %v1614_v40 }
0x1881   :  { %1639 = vst.msk [vmem:[#allocation3 + $0x10] sm:$0xff] %vm549_vm8, %v1609_v2  ;;  %v7798_v4 = vpop.f32.mrb[16].mxu0 }
0x1882   :  { %v1624_v5 = vadd.f32 %v7798_v4, %v7074_v55  ;;  %v1618_v27 = vpop.f32.mrb[17].mxu0 }
0x1883   :  { %v1619_v28 = vadd.f32 %v7074_v55, %v1618_v27  ;;  %v9601_v62 = vld [vmem:[#allocation3 + $0x8] sm:$0xff] }
0x1884   :  { %1642 = vst.msk [vmem:[#allocation3 + $0x28] sm:$0xff] %vm549_vm8, %v1624_v5  ;;  %v9575_v15 = vld [vmem:[#allocation3] sm:$0xff] }
0x1885   :  { %1641 = vst.msk [vmem:[#allocation3 + $0x20] sm:$0xff] %vm549_vm8, %v1619_v28  ;;  %v7801_v7 = vpop.f32.mrb[18].mxu0 }
0x1886   :  { %v1634_v13 = vadd.f32 %v7801_v7, %v7074_v55  ;;  %v1628_v22 = vpop.f32.mrb[19].mxu0 }
0x1887   :  { %v1629_v14 = vadd.f32 %v7074_v55, %v1628_v22 }
0x1888   :  { %1644 = vst.msk [vmem:[#allocation3 + $0x38] sm:$0xff] %vm549_vm8, %v1634_v13 }
0x1889   :  { %1643 = vst.msk [vmem:[#allocation3 + $0x30] sm:$0xff] %vm549_vm8, %v1629_v14 }
0x188f   :  { %v9577_v23 = vld [vmem:[#allocation3 + $0x38] sm:$0xff] }
0x1890   :  { %v1647_v24 = vsel %vm395_vm9, %v9575_v15, %v9577_v23  ;;  %v9599_v40 = vld [vmem:[#allocation3 + $0x30] sm:$0xff] }
0x1891   :  { %v1722_v32 = vadd.f32 %v1719_v33, %v1647_v24  ;;  %v1761_v2 = vsel %vm395_vm9, %v9601_v62, %v9599_v40 }
0x1893   :  { %v7084_v34 = vmul.f32 -1.442695, %v1722_v32 }
0x1895   :  { %8682 = vpow2.f32 %v7084_v34 }
0x189f   :  { %v8683_v36 = vpop.eup %8682 }
0x18a0   :  { %v1726_v44 = vadd.f32 1.0, %v8683_v36 }
0x18a2   :  { %8684 = vrcp.f32 %v1726_v44 }
0x18ac   :  { %v8685_v46 = vpop.eup %8684 }
0x18ad   :  { %v1733_v47 = vmul.f32 %v8685_v46, %v1731_v45  ;;  %v1740_v11 = vsub.f32 1.0, %v8685_v46  ;;  %v1746_v55 = vmul.f32 0.0, %v8685_v46 }
0x18af   :  { %1735 = vrot.lane.b32.xlu0 %v1733_v47, %s9093_s10 }
0x1921   :  { %v1736_v3 = vpop.permute.xlu0 %1735 }
0x1922   :  { %v1738_v50 = vadd.f32 %v1736_v3, %v1647_v24 }
0x1924   :  { %8686 = vtanh.f32 %v1738_v50 }
0x192e   :  { %v8687_v53 = vpop.eup %8686 }
0x192f   :  { %1742 = vrot.lane.b32.xlu1 %v8687_v53, %s9095_s3 }
0x19a1   :  { %v1743_v12 = vpop.permute.xlu1 %1742 }
0x19a2   :  { %v1745_v33 = vmul.f32 %v1743_v12, %v1740_v11 }
0x19a4   :  { %v1747_v37 = vadd.f32 %v1746_v55, %v1745_v33  ;;  %v9625_v55 = vld [vmem:[#allocation3 + $0x28] sm:$0xff]  ;;  %v9627_v33 = vld [vmem:[#allocation3 + $0x10] sm:$0xff] }
0x19a6   :  { %1750 = vrot.lane.b32.xlu0 %v1747_v37, %s9095_s3  ;;  %v1877_v37 = vsel %vm395_vm9, %v9627_v33, %v9625_v55 }
0x1a18   :  { %v1751_v57 = vpop.permute.xlu0 %1750 }
0x1a19   :  { %v1753_v59 = vmul.f32 %v1751_v57, %v9276_v38 }
0x1a1b   :  { %v1756_v48 = vadd.f32 %v1753_v59, %v9279_v41  ;;  %1757 = vst.msk [vmem:[#allocation2] sm:$0xff] %vm673_vm12, %v1753_v59 }
0x1a1c   :  { %1758 = vst.msk [vmem:[#allocation2 + $0x38] sm:$0xff] %vm675_vm13, %v1753_v59 }
0x1a1d   :  { %7822 = vmatmul.mubr.msk.f32.vlgmr.msra.gmra.mrb[20].mxu1 %vm129_vm6, %v1756_v48  ;;  %v1871_v50 = vmul.f32 %v1756_v48, %v788_v19 }
0x1a1e   :  { %8414 = vmatpush3.bf16.msra.mxu1 %v9513_v56  ;;  %7843 = vmatprep.mubr.msk.f32.mxu1 %vm9090_vm0, %v11265_v1 }
0x1a1f   :  { %8415 = vmatprep.subr.bf16.mxu1 %v11267_v0 }
0x1a22   :  { %8417 = vmatpush3.bf16.msra.mxu1 %v9516_v58 }
0x1a23   :  { %8424 = vmatprep.subr.bf16.mxu1 %v11267_v0 }
0x1af0   :  { %v1831_v38 = vpop.f32.mrb[20].mxu1 }
0x1af1   :  { %v1832_v41 = vadd.f32 %v9541_v29, %v1831_v38  ;;  %v7823_v49 = vpop.f32.mrb[21].mxu1 }
0x1af3   :  { %1843 = vrot.lane.b32.xlu1 %v1832_v41, %s9093_s10  ;;  %v1835_v4 = vadd.f32 %v1832_v41, %v1761_v2 }
0x1af5   :  { %v7086_v5 = vmul.f32 -1.442695, %v1835_v4 }
0x1af7   :  { %8688 = vpow2.f32 %v7086_v5 }
0x1b01   :  { %v8689_v27 = vpop.eup %8688 }
0x1b02   :  { %v1839_v28 = vadd.f32 1.0, %v8689_v27 }
0x1b04   :  { %8690 = vrcp.f32 %v1839_v28 }
0x1b0e   :  { %v8691_v7 = vpop.eup %8690 }
0x1b0f   :  { %v1853_v36 = vsub.f32 1.0, %v8691_v7 }
0x1b65   :  { %v1844_v13 = vpop.permute.xlu1 %1843 }
0x1b66   :  { %v1846_v22 = vmul.f32 %v8691_v7, %v1844_v13 }
0x1b68   :  { %1848 = vrot.lane.b32.xlu0 %v1846_v22, %s9093_s10 }
0x1b6c   :  { %1859 = vrot.lane.b32.xlu0 %v1756_v48, %s9096_s12 }
0x1bda   :  { %v1849_v14 = vpop.permute.xlu0 %1848 }
0x1bdb   :  { %v1851_v24 = vadd.f32 %v1849_v14, %v1761_v2 }
0x1bdd   :  { %8692 = vtanh.f32 %v1851_v24 }
0x1bde   :  { %v1860_v34 = vpop.permute.xlu0 %1859 }
0x1bdf   :  { %v1862_v45 = vmul.f32 %v8691_v7, %v1860_v34 }
0x1be7   :  { %v8693_v32 = vpop.eup %8692 }
0x1be8   :  { %1855 = vrot.lane.b32.xlu1 %v8693_v32, %s9095_s3 }
0x1c5a   :  { %v1856_v44 = vpop.permute.xlu1 %1855 }
0x1c5b   :  { %v1858_v46 = vmul.f32 %v1856_v44, %v1853_v36 }
0x1c5d   :  { %v1863_v47 = vadd.f32 %v1862_v45, %v1858_v46  ;;  %v1992_v46 = vld [vmem:[#allocation3 + $0x20] sm:$0xff] }
0x1c5f   :  { %1866 = vrot.lane.b32.xlu1 %v1863_v47, %s9095_s3  ;;  %v1991_v47 = vld [vmem:[#allocation3 + $0x18] sm:$0xff] }
0x1cd1   :  { %v1867_v3 = vpop.permute.xlu1 %1866 }
0x1cd2   :  { %v1869_v53 = vmul.f32 %v1867_v3, %v9317_v18  ;;  %v1993_v3 = vsel %vm395_vm9, %v1991_v47, %v1992_v46 }
0x1cd4   :  { %v1872_v11 = vadd.f32 %v1871_v50, %v1869_v53  ;;  %1873 = vst.msk [vmem:[#allocation2 + $0x8] sm:$0xff] %vm673_vm12, %v1869_v53 }
0x1cd5   :  { %1874 = vst.msk [vmem:[#allocation2 + $0x30] sm:$0xff] %vm675_vm13, %v1869_v53 }
0x1cd6   :  { %7833 = vmatmul.mubr.msk.f32.vlgmr.msra.gmra.mrb[20].mxu0 %vm129_vm6, %v1872_v11  ;;  %v1987_v34 = vmul.f32 %v1872_v11, %v904_v61 }
0x1cd7   :  { %8420 = vmatpush3.bf16.msra.mxu0 %v9513_v56  ;;  %7854 = vmatprep.mubr.msk.f32.mxu0 %vm9090_vm0, %v11265_v1 }
0x1cd8   :  { %8421 = vmatprep.subr.bf16.mxu0 %v11267_v0 }
0x1cdb   :  { %8423 = vmatpush3.bf16.msra.mxu0 %v9516_v58 }
0x1cdc   :  { %8430 = vmatprep.subr.bf16.mxu0 %v11267_v0 }
0x1da9   :  { %v1947_v19 = vpop.f32.mrb[20].mxu0 }
0x1daa   :  { %v1948_v18 = vadd.f32 %v9541_v29, %v1947_v19  ;;  %v7834_v12 = vpop.f32.mrb[21].mxu0 }
0x1dac   :  { %1959 = vrot.lane.b32.xlu0 %v1948_v18, %s9093_s10  ;;  %v1951_v57 = vadd.f32 %v1948_v18, %v1877_v37 }
0x1dae   :  { %v7088_v59 = vmul.f32 -1.442695, %v1951_v57 }
0x1db0   :  { %8694 = vpow2.f32 %v7088_v59 }
0x1dba   :  { %v8695_v48 = vpop.eup %8694 }
0x1dbb   :  { %v1955_v38 = vadd.f32 1.0, %v8695_v48 }
0x1dbd   :  { %8696 = vrcp.f32 %v1955_v38 }
0x1dc7   :  { %v8697_v41 = vpop.eup %8696 }
0x1dc8   :  { %v1969_v7 = vsub.f32 1.0, %v8697_v41 }
0x1e1e   :  { %v1960_v49 = vpop.permute.xlu0 %1959 }
0x1e1f   :  { %v1962_v2 = vmul.f32 %v8697_v41, %v1960_v49 }
0x1e21   :  { %1964 = vrot.lane.b32.xlu1 %v1962_v2, %s9093_s10 }
0x1e25   :  { %1975 = vrot.lane.b32.xlu1 %v1872_v11, %s9096_s12 }
0x1e93   :  { %v1965_v4 = vpop.permute.xlu1 %1964 }
0x1e94   :  { %v1967_v5 = vadd.f32 %v1965_v4, %v1877_v37 }
0x1e96   :  { %8698 = vtanh.f32 %v1967_v5 }
0x1e97   :  { %v1976_v28 = vpop.permute.xlu1 %1975 }
0x1e98   :  { %v1978_v22 = vmul.f32 %v8697_v41, %v1976_v28 }
0x1ea0   :  { %v8699_v27 = vpop.eup %8698 }
0x1ea1   :  { %1971 = vrot.lane.b32.xlu0 %v8699_v27, %s9095_s3 }
0x1f13   :  { %v1972_v13 = vpop.permute.xlu0 %1971 }
0x1f14   :  { %v1974_v14 = vmul.f32 %v1972_v13, %v1969_v7 }
0x1f16   :  { %v1979_v24 = vadd.f32 %v1978_v22, %v1974_v14  ;;  %v2109_v14 = vsel %vm395_vm9, %v1992_v46, %v1991_v47 }
0x1f18   :  { %1982 = vrot.lane.b32.xlu0 %v1979_v24, %s9095_s3 }
0x1f8a   :  { %v1983_v32 = vpop.permute.xlu0 %1982 }
0x1f8b   :  { %v1985_v36 = vmul.f32 %v1983_v32, %v9357_v60 }
0x1f8d   :  { %v1988_v44 = vadd.f32 %v1987_v34, %v1985_v36  ;;  %1989 = vst.msk [vmem:[#allocation2 + $0x10] sm:$0xff] %vm673_vm12, %v1985_v36 }
0x1f8e   :  { %1990 = vst.msk [vmem:[#allocation2 + $0x28] sm:$0xff] %vm675_vm13, %v1985_v36 }
0x1f8f   :  { %7844 = vmatmul.mubr.msk.f32.vlgmr.msra.gmra.mrb[22].mxu1 %vm129_vm6, %v1988_v44  ;;  %v2103_v28 = vmul.f32 %v1988_v44, %v1020_v52 }
0x1f90   :  { %8426 = vmatpush3.bf16.msra.mxu1 %v9513_v56  ;;  %7865 = vmatprep.mubr.msk.f32.mxu1 %vm9090_vm0, %v11265_v1 }
0x1f91   :  { %8427 = vmatprep.subr.bf16.mxu1 %v11267_v0 }
0x1f94   :  { %8429 = vmatpush3.bf16.msra.mxu1 %v9516_v58 }
0x1f95   :  { %8436 = vmatprep.subr.bf16.mxu1 %v11267_v0 }
0x2062   :  { %v2063_v61 = vpop.f32.mrb[22].mxu1 }
0x2063   :  { %v2064_v60 = vadd.f32 %v9541_v29, %v2063_v61  ;;  %v7845_v45 = vpop.f32.mrb[23].mxu1 }
0x2065   :  { %2075 = vrot.lane.b32.xlu1 %v2064_v60, %s9093_s10  ;;  %v2067_v50 = vadd.f32 %v2064_v60, %v1993_v3 }
0x2067   :  { %v7090_v53 = vmul.f32 -1.442695, %v2067_v50 }
0x2069   :  { %8700 = vpow2.f32 %v7090_v53 }
0x2073   :  { %v8701_v11 = vpop.eup %8700 }
0x2074   :  { %v2071_v19 = vadd.f32 1.0, %v8701_v11 }
0x2076   :  { %8702 = vrcp.f32 %v2071_v19 }
0x2080   :  { %v8703_v18 = vpop.eup %8702 }
0x2081   :  { %v2085_v41 = vsub.f32 1.0, %v8703_v18 }
0x20d7   :  { %v2076_v12 = vpop.permute.xlu1 %2075 }
0x20d8   :  { %v2078_v37 = vmul.f32 %v8703_v18, %v2076_v12 }
0x20da   :  { %2080 = vrot.lane.b32.xlu0 %v2078_v37, %s9093_s10 }
0x20de   :  { %2091 = vrot.lane.b32.xlu0 %v1988_v44, %s9096_s12 }
0x214c   :  { %v2081_v57 = vpop.permute.xlu0 %2080 }
0x214d   :  { %v2083_v59 = vadd.f32 %v2081_v57, %v1993_v3 }
0x214f   :  { %8704 = vtanh.f32 %v2083_v59 }
0x2150   :  { %v2092_v38 = vpop.permute.xlu0 %2091 }
0x2151   :  { %v2094_v2 = vmul.f32 %v8703_v18, %v2092_v38 }
0x2159   :  { %v8705_v48 = vpop.eup %8704 }
0x215a   :  { %2087 = vrot.lane.b32.xlu1 %v8705_v48, %s9095_s3 }
0x21cc   :  { %v2088_v49 = vpop.permute.xlu1 %2087 }
0x21cd   :  { %v2090_v4 = vmul.f32 %v2088_v49, %v2085_v41 }
0x21cf   :  { %v2095_v5 = vadd.f32 %v2094_v2, %v2090_v4 }
0x21d1   :  { %2098 = vrot.lane.b32.xlu1 %v2095_v5, %s9095_s3 }
0x2243   :  { %v2099_v27 = vpop.permute.xlu1 %2098 }
0x2244   :  { %v2101_v7 = vmul.f32 %v2099_v27, %v9391_v51 }
0x2246   :  { %v2104_v13 = vadd.f32 %v2103_v28, %v2101_v7  ;;  %2105 = vst.msk [vmem:[#allocation2 + $0x18] sm:$0xff] %vm673_vm12, %v2101_v7 }
0x2247   :  { %2106 = vst.msk [vmem:[#allocation2 + $0x20] sm:$0xff] %vm675_vm13, %v2101_v7 }
0x2248   :  { %7855 = vmatmul.mubr.msk.f32.vlgmr.msra.gmra.mrb[22].mxu0 %vm129_vm6, %v2104_v13  ;;  %v2219_v37 = vmul.f32 %v2104_v13, %v1136_v42 }
0x2249   :  { %8432 = vmatpush3.bf16.msra.mxu0 %v9513_v56  ;;  %7876 = vmatprep.mubr.msk.f32.mxu0 %vm9090_vm0, %v11265_v1 }
0x224a   :  { %8433 = vmatprep.subr.bf16.mxu0 %v11267_v0 }
0x224d   :  { %8435 = vmatpush3.bf16.msra.mxu0 %v9516_v58 }
0x231b   :  { %v2179_v22 = vpop.f32.mrb[22].mxu0 }
0x231c   :  { %v2180_v52 = vadd.f32 %v9541_v29, %v2179_v22  ;;  %v7856_v51 = vpop.f32.mrb[23].mxu0 }
0x231e   :  { %2191 = vrot.lane.b32.xlu0 %v2180_v52, %s9093_s10  ;;  %v2183_v24 = vadd.f32 %v2180_v52, %v2109_v14 }
0x2320   :  { %v7092_v32 = vmul.f32 -1.442695, %v2183_v24 }
0x2322   :  { %8706 = vpow2.f32 %v7092_v32 }
0x232c   :  { %v8707_v34 = vpop.eup %8706 }
0x232d   :  { %v2187_v36 = vadd.f32 1.0, %v8707_v34 }
0x232f   :  { %8708 = vrcp.f32 %v2187_v36 }
0x2339   :  { %v8709_v44 = vpop.eup %8708 }
0x233a   :  { %v2201_v47 = vsub.f32 1.0, %v8709_v44 }
0x2390   :  { %v2192_v61 = vpop.permute.xlu0 %2191 }
0x2391   :  { %v2194_v60 = vmul.f32 %v8709_v44, %v2192_v61 }
0x2393   :  { %2196 = vrot.lane.b32.xlu1 %v2194_v60, %s9093_s10 }
0x2397   :  { %2207 = vrot.lane.b32.xlu1 %v2104_v13, %s9096_s12 }
0x2405   :  { %v2197_v45 = vpop.permute.xlu1 %2196 }
0x2406   :  { %v2199_v3 = vadd.f32 %v2197_v45, %v2109_v14 }
0x2408   :  { %8710 = vtanh.f32 %v2199_v3 }
0x2409   :  { %v2208_v46 = vpop.permute.xlu1 %2207 }
0x240a   :  { %v2210_v11 = vmul.f32 %v8709_v44, %v2208_v46 }
0x2412   :  { %v8711_v50 = vpop.eup %8710 }
0x2413   :  { %2203 = vrot.lane.b32.xlu0 %v8711_v50, %s9095_s3 }
0x2485   :  { %v2204_v53 = vpop.permute.xlu0 %2203 }
0x2486   :  { %v2206_v19 = vmul.f32 %v2204_v53, %v2201_v47 }
0x2488   :  { %v2211_v18 = vadd.f32 %v2210_v11, %v2206_v19 }
0x248a   :  { %2214 = vrot.lane.b32.xlu0 %v2211_v18, %s9095_s3 }
0x24fc   :  { %v2215_v12 = vpop.permute.xlu0 %2214 }
0x24fd   :  { %v2217_v57 = vmul.f32 %v2215_v12, %v9424_v39 }
0x24ff   :  { %v2220_v59 = vadd.f32 %v2219_v37, %v2217_v57  ;;  %2221 = vst.msk [vmem:[#allocation2 + $0x20] sm:$0xff] %vm673_vm12, %v2217_v57 }
0x2500   :  { %2222 = vst.msk [vmem:[#allocation2 + $0x18] sm:$0xff] %vm675_vm13, %v2217_v57 }
0x2501   :  { %7866 = vmatmul.mubr.msk.f32.vlgmr.msra.gmra.mrb[24].mxu1 %vm129_vm6, %v2220_v59  ;;  %v2335_v24 = vmul.f32 %v2220_v59, %v1252_v26  ;;  %v2341_v26 = vsel %vm395_vm9, %v9599_v40, %v9601_v62 }
0x2502   :  { %8438 = vmatpush3.bf16.msra.mxu1 %v9513_v56  ;;  %7887 = vmatprep.mubr.msk.f32.mxu1 %vm9090_vm0, %v11265_v1  ;;  %v2225_v56 = vsel %vm395_vm9, %v9625_v55, %v9627_v33 }
0x2503   :  { %8439 = vmatprep.subr.bf16.mxu1 %v11267_v0 }
0x2506   :  { %8441 = vmatpush3.bf16.msra.mxu1 %v9516_v58 }
0x2507   :  { %8450 = vmatprep.subr.bf16.mxu1 %v11267_v0 }
0x25d4   :  { %v2295_v42 = vpop.f32.mrb[24].mxu1 }
0x25d5   :  { %v2296_v39 = vadd.f32 %v9541_v29, %v2295_v42  ;;  %v7867_v48 = vpop.f32.mrb[25].mxu1 }
0x25d7   :  { %2307 = vrot.lane.b32.xlu1 %v2296_v39, %s9093_s10  ;;  %v2299_v38 = vadd.f32 %v2296_v39, %v2225_v56 }
0x25d9   :  { %v7094_v41 = vmul.f32 -1.442695, %v2299_v38 }
0x25db   :  { %8712 = vpow2.f32 %v7094_v41 }
0x25e5   :  { %v8713_v49 = vpop.eup %8712 }
0x25e6   :  { %v2303_v2 = vadd.f32 1.0, %v8713_v49 }
0x25e8   :  { %8714 = vrcp.f32 %v2303_v2 }
0x25f2   :  { %v8715_v58 = vpop.eup %8714 }
0x25f3   :  { %v2317_v33 = vsub.f32 1.0, %v8715_v58 }
0x2649   :  { %v2308_v4 = vpop.permute.xlu1 %2307 }
0x264a   :  { %v2310_v5 = vmul.f32 %v8715_v58, %v2308_v4 }
0x264c   :  { %2312 = vrot.lane.b32.xlu0 %v2310_v5, %s9093_s10 }
0x2650   :  { %2323 = vrot.lane.b32.xlu0 %v2220_v59, %s9096_s12 }
0x26be   :  { %v2313_v27 = vpop.permute.xlu0 %2312 }
0x26bf   :  { %v2315_v28 = vadd.f32 %v2313_v27, %v2225_v56 }
0x26c1   :  { %8716 = vtanh.f32 %v2315_v28 }
0x26c2   :  { %v2324_v55 = vpop.permute.xlu0 %2323 }
0x26c3   :  { %v2326_v22 = vmul.f32 %v8715_v58, %v2324_v55  ;;  %v2574_v55 = vld [vmem:[#allocation5 + $0x198] sm:$0xff] }
0x26cb   :  { %v8717_v7 = vpop.eup %8716 }
0x26cc   :  { %2319 = vrot.lane.b32.xlu1 %v8717_v7, %s9095_s3  ;;  %v2573_v7 = vld [vmem:[#allocation5 + $0x190] sm:$0xff] }
0x273e   :  { %v2320_v13 = vpop.permute.xlu1 %2319 }
0x273f   :  { %v2322_v52 = vmul.f32 %v2320_v13, %v2317_v33  ;;  %v2575_v33 = vld [vmem:[#allocation5 + $0x1a0] sm:$0xff] }
0x2741   :  { %v2327_v51 = vadd.f32 %v2326_v22, %v2322_v52  ;;  %v2568_v52 = vld [vmem:[#allocation5 + $0x170] sm:$0xff] }
0x2743   :  { %2330 = vrot.lane.b32.xlu1 %v2327_v51, %s9095_s3  ;;  %v2569_v51 = vld [vmem:[#allocation5 + $0x178] sm:$0xff] }
0x27b5   :  { %v2331_v14 = vpop.permute.xlu1 %2330 }
0x27b6   :  { %v2333_v32 = vmul.f32 %v2331_v14, %v9460_v25  ;;  %v8442_v14 = vpack.c.bf16 %v2569_v51, %v2568_v52 }
0x27b8   :  { %v2336_v34 = vadd.f32 %v2335_v24, %v2333_v32  ;;  %2337 = vst.msk [vmem:[#allocation2 + $0x28] sm:$0xff] %vm673_vm12, %v2333_v32  ;;  %v2570_v24 = vld [vmem:[#allocation5 + $0x180] sm:$0xff]  ;;  %8443 = vmatprep.subr.bf16.mxu0 %v8442_v14 }
0x27b9   :  { %2338 = vst.msk [vmem:[#allocation2 + $0x10] sm:$0xff] %vm675_vm13, %v2333_v32  ;;  %v2571_v32 = vld [vmem:[#allocation5 + $0x188] sm:$0xff] }
0x27ba   :  { %7877 = vmatmul.mubr.msk.f32.vlgmr.msra.gmra.mrb[24].mxu0 %vm129_vm6, %v2336_v34  ;;  %v2451_v42 = vmul.f32 %v2336_v34, %v1368_v20 }
0x27bb   :  { %8445 = vmatpush3.bf16.msra.mxu0 %v8442_v14 }
0x288d   :  { %v2411_v36 = vpop.f32.mrb[24].mxu0 }
0x288e   :  { %v2412_v44 = vadd.f32 %v9541_v29, %v2411_v36  ;;  %v7878_v61 = vpop.f32.mrb[25].mxu0 }
0x2890   :  { %2423 = vrot.lane.b32.xlu0 %v2412_v44, %s9093_s10  ;;  %v2415_v60 = vadd.f32 %v2412_v44, %v2341_v26 }
0x2892   :  { %v7096_v25 = vmul.f32 -1.442695, %v2415_v60 }
0x2894   :  { %8718 = vpow2.f32 %v7096_v25 }
0x289e   :  { %v8719_v45 = vpop.eup %8718 }
0x289f   :  { %v2419_v3 = vadd.f32 1.0, %v8719_v45  ;;  %v9751_v45 = vld [vmem:[%s11262_s4 + $0x80] ss:$0 sm:$0xff] }
0x28a1   :  { %8720 = vrcp.f32 %v2419_v3 }
0x28ab   :  { %v8721_v50 = vpop.eup %8720 }
0x28ac   :  { %v2433_v62 = vsub.f32 1.0, %v8721_v50 }
0x2902   :  { %v2424_v46 = vpop.permute.xlu0 %2423 }
0x2903   :  { %v2426_v47 = vmul.f32 %v8721_v50, %v2424_v46 }
0x2905   :  { %2428 = vrot.lane.b32.xlu1 %v2426_v47, %s9093_s10 }
0x2909   :  { %2439 = vrot.lane.b32.xlu1 %v2336_v34, %s9096_s12  ;;  %v8446_v34 = vpack.c.bf16 %v2571_v32, %v2570_v24 }
0x290b   :  { %8447 = vmatprep.subr.bf16.mxu0 %v8446_v34 }
0x290c   :  { %8449 = vmatpush3.bf16.msra.mxu0 %v8446_v34 }
0x290d   :  { %8462 = vmatprep.subr.bf16.mxu0 %v11267_v0 }
0x2977   :  { %v2429_v53 = vpop.permute.xlu1 %2428 }
0x2978   :  { %v2431_v11 = vadd.f32 %v2429_v53, %v2341_v26 }
0x297a   :  { %8722 = vtanh.f32 %v2431_v11 }
0x297b   :  { %v2440_v40 = vpop.permute.xlu1 %2439 }
0x297c   :  { %v2442_v12 = vmul.f32 %v8721_v50, %v2440_v40  ;;  %v2580_v40 = vld [vmem:[#allocation2 + $0x10] sm:$0xff] }
0x2984   :  { %v8723_v19 = vpop.eup %8722 }
0x2985   :  { %2435 = vrot.lane.b32.xlu0 %v8723_v19, %s9095_s3 }
0x29f7   :  { %v2436_v18 = vpop.permute.xlu0 %2435 }
0x29f8   :  { %v2438_v37 = vmul.f32 %v2436_v18, %v2433_v62  ;;  %v2581_v62 = vld [vmem:[#allocation2 + $0x18] sm:$0xff]  ;;  %v2583_v18 = vld [vmem:[#allocation2 + $0x28] sm:$0xff] }
0x29fa   :  { %v2443_v57 = vadd.f32 %v2442_v12, %v2438_v37 }
0x29fc   :  { %2446 = vrot.lane.b32.xlu0 %v2443_v57, %s9095_s3  ;;  %v7099_v57 = vld [vmem:[%s11262_s4 + $0x78] ss:$0 sm:$0xff] }
0x2a6e   :  { %v2447_v59 = vpop.permute.xlu0 %2446 }
0x2a6f   :  { %v2449_v39 = vmul.f32 %v2447_v59, %v9490_v17  ;;  %v2457_v17 = vsel %vm395_vm9, %v9577_v23, %v9575_v15  ;;  %v9730_v15 = vpack.c.bf16 %v2574_v55, %v2573_v7  ;;  %v2576_v23 = vld [vmem:[#allocation5 + $0x1a8] sm:$0xff] }
0x2a70   :  { %v9733_v13 = vpack.c.bf16 %v2576_v23, %v2575_v33 }
0x2a71   :  { %v2452_v48 = vadd.f32 %v2451_v42, %v2449_v39  ;;  %2453 = vst.msk [vmem:[#allocation2 + $0x30] sm:$0xff] %vm673_vm12, %v2449_v39 }
0x2a72   :  { %2454 = vst.msk [vmem:[#allocation2 + $0x8] sm:$0xff] %vm675_vm13, %v2449_v39 }
0x2a73   :  { %7888 = vmatmul.mubr.msk.f32.vlgmr.msra.gmra.mrb[26].mxu1 %vm129_vm6, %v2452_v48 }
0x2a74   :  { %7918 = vmatprep.mubr.msk.f32.mxu1 %vm9090_vm0, %v11265_v1  ;;  %8452 = vmatpush3.bf16.msra.mxu1 %v9730_v15 }
0x2a75   :  { %8453 = vmatprep.subr.bf16.mxu1 %v11267_v0 }
0x2a78   :  { %8455 = vmatpush3.bf16.msra.mxu1 %v9733_v13  ;;  %v2584_v12 = vld [vmem:[#allocation2 + $0x30] sm:$0xff] }
0x2a79   :  { %8456 = vmatprep.subr.bf16.mxu1 %v11267_v0  ;;  %v2579_v19 = vld [vmem:[#allocation2 + $0x8] sm:$0xff] }
0x2a7b   :  { %7919 = vmatmul.mubr.f32.vlgmr.msra.gmra.mrb[28].mxu1 %v11265_v1 }
0x2a7c   :  { %8458 = vmatpush3.bf16.msra.mxu1 %v9730_v15  ;;  %7929 = vmatprep.mubr.msk.f32.mxu1 %vm9090_vm0, %v11265_v1 }
0x2a7d   :  { %8459 = vmatprep.subr.bf16.mxu1 %v11267_v0 }
0x2a80   :  { %8461 = vmatpush3.bf16.msra.mxu1 %v9733_v13 }
0x2a81   :  { %8468 = vmatprep.subr.bf16.mxu1 %v11267_v0 }
0x2b46   :  { %v2527_v56 = vpop.f32.mrb[26].mxu1 }
0x2b47   :  { %v2528_v38 = vadd.f32 %v9541_v29, %v2527_v56  ;;  %v7889_v41 = vpop.f32.mrb[27].mxu1 }
0x2b49   :  { %2539 = vrot.lane.b32.xlu1 %v2528_v38, %s9093_s10  ;;  %v2531_v20 = vadd.f32 %v2528_v38, %v2457_v17 }
0x2b4b   :  { %v7098_v49 = vmul.f32 -1.442695, %v2531_v20 }
0x2b4d   :  { %8724 = vpow2.f32 %v7098_v49 }
0x2b4e   :  { %v2800_v3 = vpop.f32.mrb[28].mxu1 }
0x2b4f   :  { %v9754_v50 = vadd.f32 %v9751_v45, %v2800_v3  ;;  %v7920_v46 = vpop.f32.mrb[29].mxu1 }
0x2b57   :  { %v8725_v2 = vpop.eup %8724 }
0x2b58   :  { %v2535_v58 = vadd.f32 1.0, %v8725_v2 }
0x2b5a   :  { %8726 = vrcp.f32 %v2535_v58 }
0x2b64   :  { %v8727_v4 = vpop.eup %8726 }
0x2b65   :  { %v2549_v44 = vsub.f32 1.0, %v8727_v4 }
0x2bbb   :  { %v2540_v5 = vpop.permute.xlu1 %2539 }
0x2bbc   :  { %v2542_v27 = vmul.f32 %v8727_v4, %v2540_v5 }
0x2bbe   :  { %2544 = vrot.lane.b32.xlu0 %v2542_v27, %s9093_s10 }
0x2bc2   :  { %2555 = vrot.lane.b32.xlu0 %v2452_v48, %s9096_s12 }
0x2bc6   :  { %2812 = vrot.lane.b32.xlu0 %v9754_v50, %s9093_s10 }
0x2c30   :  { %v2545_v29 = vpop.permute.xlu0 %2544 }
0x2c31   :  { %v2547_v28 = vadd.f32 %v2545_v29, %v2457_v17 }
0x2c33   :  { %8728 = vtanh.f32 %v2547_v28 }
0x2c34   :  { %v2556_v36 = vpop.permute.xlu0 %2555 }
0x2c35   :  { %v2558_v26 = vmul.f32 %v8727_v4, %v2556_v36 }
0x2c3d   :  { %v8729_v22 = vpop.eup %8728 }
0x2c3e   :  { %2551 = vrot.lane.b32.xlu1 %v8729_v22, %s9095_s3 }
0x2cb0   :  { %v2552_v61 = vpop.permute.xlu1 %2551 }
0x2cb1   :  { %v2554_v60 = vmul.f32 %v2552_v61, %v2549_v44 }
0x2cb3   :  { %v2559_v25 = vadd.f32 %v2558_v26, %v2554_v60 }
0x2cb5   :  { %2562 = vrot.lane.b32.xlu1 %v2559_v25, %s9095_s3  ;;  %v2813_v25 = vpop.permute.xlu0 %2812 }
0x2d27   :  { %v2563_v47 = vpop.permute.xlu1 %2562 }
0x2d28   :  { %v2565_v53 = vmul.f32 %v2563_v47, %v9545_v35  ;;  %v2582_v35 = vld [vmem:[#allocation2 + $0x20] sm:$0xff] }
0x2d2a   :  { %2566 = vst.msk [vmem:[#allocation2 + $0x38] sm:$0xff] %vm673_vm12, %v2565_v53 }
0x2d2b   :  { %2567 = vst.msk [vmem:[#allocation2] sm:$0xff] %vm675_vm13, %v2565_v53 }
0x2d31   :  { %v2585_v37 = vld [vmem:[#allocation2 + $0x38] sm:$0xff] }
0x2d32   :  { %v2578_v11 = vld [vmem:[#allocation2] sm:$0xff] }
0x2d33   :  { %7898 = vmatprep.mubr.msk.f32.mxu0 %vm129_vm6, %v2578_v11 }
0x2d34   :  { %7899 = vmatmul.mubr.msk.f32.vlgmr.msra.gmra.mrb[26].mxu0 %vm129_vm6, %v2579_v19 }
0x2d35   :  { %7901 = vmatprep.mubr.msk.f32.mxu0 %vm129_vm6, %v2580_v40  ;;  %8464 = vmatpush3.bf16.msra.mxu0 %v9730_v15 }
0x2d36   :  { %8465 = vmatprep.subr.bf16.mxu0 %v11267_v0 }
0x2d38   :  { %7902 = vmatmul.mubr.msk.f32.gmra.mrb[28].mxu0 %vm129_vm6, %v2581_v62 }
0x2d39   :  { %7904 = vmatprep.mubr.msk.f32.mxu0 %vm129_vm6, %v2582_v35  ;;  %8467 = vmatpush3.bf16.msra.mxu0 %v9733_v13 }
0x2d3a   :  { %8474 = vmatprep.subr.bf16.mxu0 %v11267_v0 }
0x2d3c   :  { %7905 = vmatmul.mubr.msk.f32.gmra.mrb[30].mxu0 %vm129_vm6, %v2583_v18  ;;  %v2830_v18 = vld [vmem:[#allocation4] sm:$0xff] }
0x2d3d   :  { %7907 = vmatprep.mubr.msk.f32.mxu0 %vm129_vm6, %v2584_v12  ;;  %v2836_v12 = vsub.f32 1.0, %v2830_v18 }
0x2d40   :  { %7908 = vmatmul.mubr.msk.f32.gmra.mrb[32].mxu0 %vm129_vm6, %v2585_v37 }
0x2d41   :  { %7940 = vmatprep.mubr.msk.f32.mxu0 %vm9090_vm0, %v11265_v1 }
0x2e07   :  { %v7900_v59 = vpop.f32.mrb[26].mxu0 }
0x2e08   :  { %v2686_v42 = vadd.f32 %v7900_v59, %v7099_v57  ;;  %v2680_v39 = vpop.f32.mrb[27].mxu0 }
0x2e09   :  { %v2681_v48 = vadd.f32 %v7099_v57, %v2680_v39 }
0x2e0a   :  { %2720 = vst.msk [vmem:[#allocation3 + $0x8] sm:$0xff] %vm549_vm8, %v2686_v42 }
0x2e0b   :  { %2719 = vst.msk [vmem:[#allocation3] sm:$0xff] %vm549_vm8, %v2681_v48  ;;  %v7903_v56 = vpop.f32.mrb[28].mxu0 }
0x2e0c   :  { %v2696_v38 = vadd.f32 %v7903_v56, %v7099_v57  ;;  %v2690_v41 = vpop.f32.mrb[29].mxu0 }
0x2e0d   :  { %v2691_v17 = vadd.f32 %v7099_v57, %v2690_v41 }
0x2e0e   :  { %2722 = vst.msk [vmem:[#allocation3 + $0x18] sm:$0xff] %vm549_vm8, %v2696_v38 }
0x2e0f   :  { %2721 = vst.msk [vmem:[#allocation3 + $0x10] sm:$0xff] %vm549_vm8, %v2691_v17  ;;  %v7906_v20 = vpop.f32.mrb[30].mxu0 }
0x2e10   :  { %v2706_v49 = vadd.f32 %v7906_v20, %v7099_v57  ;;  %v2700_v2 = vpop.f32.mrb[31].mxu0 }
0x2e11   :  { %v2701_v58 = vadd.f32 %v7099_v57, %v2700_v2  ;;  %v2841_v24 = vld [vmem:[#allocation3 + $0x8] sm:$0xff] }
0x2e12   :  { %2724 = vst.msk [vmem:[#allocation3 + $0x28] sm:$0xff] %vm549_vm8, %v2706_v49  ;;  %v2727_v52 = vld [vmem:[#allocation3] sm:$0xff] }
0x2e13   :  { %2723 = vst.msk [vmem:[#allocation3 + $0x20] sm:$0xff] %vm549_vm8, %v2701_v58  ;;  %v7909_v4 = vpop.f32.mrb[32].mxu0 }
0x2e14   :  { %v2716_v5 = vadd.f32 %v7909_v4, %v7099_v57  ;;  %v2710_v27 = vpop.f32.mrb[33].mxu0 }
0x2e15   :  { %v2711_v29 = vadd.f32 %v7099_v57, %v2710_v27  ;;  %v9790_v55 = vld [vmem:[#allocation3 + $0x18] sm:$0xff]  ;;  %v2837_v57 = vmul.f32 0.0, %v2836_v12 }
0x2e16   :  { %2726 = vst.msk [vmem:[#allocation3 + $0x38] sm:$0xff] %vm549_vm8, %v2716_v5  ;;  %v9786_v28 = vld [vmem:[#allocation3 + $0x10] sm:$0xff] }
0x2e17   :  { %2725 = vst.msk [vmem:[#allocation3 + $0x30] sm:$0xff] %vm549_vm8, %v2711_v29 }
0x2e19   :  { %v9788_v7 = vld [vmem:[#allocation3 + $0x28] sm:$0xff] }
0x2e1a   :  { %v9792_v33 = vld [vmem:[#allocation3 + $0x20] sm:$0xff]  ;;  %v9798_v23 = vsel %vm395_vm9, %v9788_v7, %v9786_v28 }
0x2e1b   :  { %v9804_v22 = vsel %vm395_vm9, %v9792_v33, %v9790_v55 }
0x2e1d   :  { %v2728_v51 = vld [vmem:[#allocation3 + $0x38] sm:$0xff] }
0x2e1e   :  { %v2729_v14 = vsel %vm395_vm9, %v2727_v52, %v2728_v51  ;;  %v2842_v32 = vld [vmem:[#allocation3 + $0x30] sm:$0xff]  ;;  %v9810_v34 = vsel %vm395_vm9, %v2728_v51, %v2727_v52 }
0x2e1f   :  { %v2804_v36 = vadd.f32 %v9754_v50, %v2729_v14  ;;  %v9815_v44 = vsel %vm395_vm9, %v2842_v32, %v2841_v24  ;;  %v2843_v38 = vsel %vm395_vm9, %v2841_v24, %v2842_v32 }
0x2e21   :  { %v7109_v61 = vmul.f32 -1.442695, %v2804_v36 }
0x2e23   :  { %8730 = vpow2.f32 %v7109_v61  ;;  %v2946_v61 = vld [vmem:[#allocation4 + $0x8] sm:$0xff] }
0x2e2d   :  { %v8731_v26 = vpop.eup %8730 }
0x2e2e   :  { %v2808_v60 = vadd.f32 1.0, %v8731_v26  ;;  %v2952_v26 = vsub.f32 1.0, %v2946_v61 }
0x2e30   :  { %8732 = vrcp.f32 %v2808_v60 }
0x2e3a   :  { %v8733_v3 = vpop.eup %8732 }
0x2e3b   :  { %v2815_v46 = vmul.f32 %v8733_v3, %v2813_v25  ;;  %v2822_v50 = vsub.f32 1.0, %v8733_v3  ;;  %v2828_v40 = vmul.f32 0.0, %v8733_v3 }
0x2e3d   :  { %2817 = vrot.lane.b32.xlu1 %v2815_v46, %s9093_s10 }
0x2eaf   :  { %v2818_v47 = vpop.permute.xlu1 %2817 }
0x2eb0   :  { %v2820_v53 = vadd.f32 %v2818_v47, %v2729_v14 }
0x2eb2   :  { %8734 = vtanh.f32 %v2820_v53 }
0x2ebc   :  { %v8735_v11 = vpop.eup %8734 }
0x2ebd   :  { %2824 = vrot.lane.b32.xlu0 %v8735_v11, %s9095_s3 }
0x2f2f   :  { %v2825_v19 = vpop.permute.xlu0 %2824 }
0x2f30   :  { %v2827_v62 = vmul.f32 %v2825_v19, %v2822_v50  ;;  %v2959_v50 = vsel %vm395_vm9, %v9786_v28, %v9788_v7 }
0x2f32   :  { %v2829_v35 = vadd.f32 %v2828_v40, %v2827_v62 }
0x2f34   :  { %2832 = vrot.lane.b32.xlu1 %v2829_v35, %s9095_s3 }
0x2fa6   :  { %v2833_v37 = vpop.permute.xlu1 %2832 }
0x2fa7   :  { %v2835_v59 = vmul.f32 %v2833_v37, %v2830_v18 }
0x2fa9   :  { %v2838_v42 = vadd.f32 %v2837_v57, %v2835_v59  ;;  %2839 = vst.msk [vmem:[#allocation2] sm:$0xff] %vm673_vm12, %v2835_v59 }
0x2faa   :  { %2840 = vst.msk [vmem:[#allocation2 + $0x38] sm:$0xff] %vm675_vm13, %v2835_v59 }
0x2fab   :  { %7930 = vmatmul.mubr.msk.f32.vlgmr.msra.gmra.mrb[30].mxu1 %vm129_vm6, %v2838_v42  ;;  %v2953_v25 = vmul.f32 %v2952_v26, %v2838_v42 }
0x2fac   :  { %8470 = vmatpush3.bf16.msra.mxu1 %v9730_v15  ;;  %7951 = vmatprep.mubr.msk.f32.mxu1 %vm9090_vm0, %v11265_v1 }
0x2fad   :  { %8471 = vmatprep.subr.bf16.mxu1 %v11267_v0 }
0x2fb0   :  { %8473 = vmatpush3.bf16.msra.mxu1 %v9733_v13 }
0x2fb1   :  { %8480 = vmatprep.subr.bf16.mxu1 %v11267_v0 }
0x307e   :  { %v2913_v39 = vpop.f32.mrb[30].mxu1 }
0x307f   :  { %v2914_v48 = vadd.f32 %v9751_v45, %v2913_v39  ;;  %v7931_v56 = vpop.f32.mrb[31].mxu1 }
0x3081   :  { %2925 = vrot.lane.b32.xlu0 %v2914_v48, %s9093_s10  ;;  %v2917_v41 = vadd.f32 %v2914_v48, %v2843_v38 }
0x3083   :  { %v7111_v17 = vmul.f32 -1.442695, %v2917_v41  ;;  %v3062_v41 = vld [vmem:[#allocation4 + $0x10] sm:$0xff] }
0x3085   :  { %8736 = vpow2.f32 %v7111_v17  ;;  %v3068_v17 = vsub.f32 1.0, %v3062_v41 }
0x308f   :  { %v8737_v20 = vpop.eup %8736 }
0x3090   :  { %v2921_v49 = vadd.f32 1.0, %v8737_v20 }
0x3092   :  { %8738 = vrcp.f32 %v2921_v49 }
0x309c   :  { %v8739_v2 = vpop.eup %8738 }
0x309d   :  { %v2935_v51 = vsub.f32 1.0, %v8739_v2 }
0x30f3   :  { %v2926_v58 = vpop.permute.xlu0 %2925 }
0x30f4   :  { %v2928_v4 = vmul.f32 %v8739_v2, %v2926_v58 }
0x30f6   :  { %2930 = vrot.lane.b32.xlu1 %v2928_v4, %s9093_s10 }
0x30fa   :  { %2941 = vrot.lane.b32.xlu1 %v2838_v42, %s9096_s12 }
0x3168   :  { %v2931_v5 = vpop.permute.xlu1 %2930 }
0x3169   :  { %v2933_v27 = vadd.f32 %v2931_v5, %v2843_v38 }
0x316b   :  { %8740 = vtanh.f32 %v2933_v27 }
0x316c   :  { %v2942_v52 = vpop.permute.xlu1 %2941 }
0x316d   :  { %v2944_v24 = vmul.f32 %v8739_v2, %v2942_v52 }
0x3175   :  { %v8741_v29 = vpop.eup %8740 }
0x3176   :  { %2937 = vrot.lane.b32.xlu0 %v8741_v29, %s9095_s3  ;;  %v3075_v29 = vsel %vm395_vm9, %v9790_v55, %v9792_v33  ;;  %vm9988_vm9 = vmpackc.low %vm129_vm6, %vm129_vm6 }
0x31e8   :  { %v2938_v14 = vpop.permute.xlu0 %2937 }
0x31e9   :  { %v2940_v32 = vmul.f32 %v2938_v14, %v2935_v51 }
0x31eb   :  { %v2945_v36 = vadd.f32 %v2944_v24, %v2940_v32 }
0x31ed   :  { %2948 = vrot.lane.b32.xlu0 %v2945_v36, %s9095_s3 }
0x325f   :  { %v2949_v60 = vpop.permute.xlu0 %2948 }
0x3260   :  { %v2951_v3 = vmul.f32 %v2949_v60, %v2946_v61 }
0x3262   :  { %v2954_v46 = vadd.f32 %v2953_v25, %v2951_v3  ;;  %2955 = vst.msk [vmem:[#allocation2 + $0x8] sm:$0xff] %vm673_vm12, %v2951_v3 }
0x3263   :  { %2956 = vst.msk [vmem:[#allocation2 + $0x30] sm:$0xff] %vm675_vm13, %v2951_v3 }
0x3264   :  { %7941 = vmatmul.mubr.msk.f32.vlgmr.msra.gmra.mrb[34].mxu0 %vm129_vm6, %v2954_v46  ;;  %v3069_v49 = vmul.f32 %v3068_v17, %v2954_v46 }
0x3265   :  { %8476 = vmatpush3.bf16.msra.mxu0 %v9730_v15  ;;  %7962 = vmatprep.mubr.msk.f32.mxu0 %vm9090_vm0, %v11265_v1 }
0x3266   :  { %8477 = vmatprep.subr.bf16.mxu0 %v11267_v0 }
0x3269   :  { %8479 = vmatpush3.bf16.msra.mxu0 %v9733_v13 }
0x326a   :  { %8486 = vmatprep.subr.bf16.mxu0 %v11267_v0 }
0x3337   :  { %v3029_v47 = vpop.f32.mrb[34].mxu0 }
0x3338   :  { %v3030_v53 = vadd.f32 %v9751_v45, %v3029_v47  ;;  %v7942_v11 = vpop.f32.mrb[35].mxu0 }
0x333a   :  { %3041 = vrot.lane.b32.xlu1 %v3030_v53, %s9093_s10  ;;  %v3033_v19 = vadd.f32 %v3030_v53, %v2959_v50  ;;  %v3178_v53 = vld [vmem:[#allocation4 + $0x18] sm:$0xff] }
0x333b   :  { %v3184_v11 = vsub.f32 1.0, %v3178_v53 }
0x333c   :  { %v7113_v40 = vmul.f32 -1.442695, %v3033_v19 }
0x333e   :  { %8742 = vpow2.f32 %v7113_v40 }
0x3348   :  { %v8743_v62 = vpop.eup %8742 }
0x3349   :  { %v3037_v35 = vadd.f32 1.0, %v8743_v62 }
0x334b   :  { %8744 = vrcp.f32 %v3037_v35 }
0x3355   :  { %v8745_v18 = vpop.eup %8744 }
0x3356   :  { %v3051_v7 = vsub.f32 1.0, %v8745_v18 }
0x33ac   :  { %v3042_v12 = vpop.permute.xlu1 %3041 }
0x33ad   :  { %v3044_v37 = vmul.f32 %v8745_v18, %v3042_v12 }
0x33af   :  { %3046 = vrot.lane.b32.xlu0 %v3044_v37, %s9093_s10 }
0x33b3   :  { %3057 = vrot.lane.b32.xlu0 %v2954_v46, %s9096_s12 }
0x3421   :  { %v3047_v57 = vpop.permute.xlu0 %3046 }
0x3422   :  { %v3049_v59 = vadd.f32 %v3047_v57, %v2959_v50 }
0x3424   :  { %8746 = vtanh.f32 %v3049_v59 }
0x3425   :  { %v3058_v28 = vpop.permute.xlu0 %3057 }
0x3426   :  { %v3060_v48 = vmul.f32 %v8745_v18, %v3058_v28 }
0x342e   :  { %v8747_v42 = vpop.eup %8746 }
0x342f   :  { %3053 = vrot.lane.b32.xlu1 %v8747_v42, %s9095_s3 }
0x34a1   :  { %v3054_v39 = vpop.permute.xlu1 %3053 }
0x34a2   :  { %v3056_v56 = vmul.f32 %v3054_v39, %v3051_v7 }
0x34a4   :  { %v3061_v38 = vadd.f32 %v3060_v48, %v3056_v56 }
0x34a6   :  { %3064 = vrot.lane.b32.xlu1 %v3061_v38, %s9095_s3 }
0x3518   :  { %v3065_v20 = vpop.permute.xlu1 %3064 }
0x3519   :  { %v3067_v2 = vmul.f32 %v3065_v20, %v3062_v41 }
0x351b   :  { %v3070_v58 = vadd.f32 %v3069_v49, %v3067_v2  ;;  %3071 = vst.msk [vmem:[#allocation2 + $0x10] sm:$0xff] %vm673_vm12, %v3067_v2 }
0x351c   :  { %3072 = vst.msk [vmem:[#allocation2 + $0x28] sm:$0xff] %vm675_vm13, %v3067_v2 }
0x351d   :  { %7952 = vmatmul.mubr.msk.f32.vlgmr.msra.gmra.mrb[32].mxu1 %vm129_vm6, %v3070_v58  ;;  %v3185_v19 = vmul.f32 %v3184_v11, %v3070_v58 }
0x351e   :  { %8482 = vmatpush3.bf16.msra.mxu1 %v9730_v15  ;;  %7973 = vmatprep.mubr.msk.f32.mxu1 %vm9090_vm0, %v11265_v1 }
0x351f   :  { %8483 = vmatprep.subr.bf16.mxu1 %v11267_v0 }
0x3522   :  { %8485 = vmatpush3.bf16.msra.mxu1 %v9733_v13 }
0x3523   :  { %8492 = vmatprep.subr.bf16.mxu1 %v11267_v0 }
0x35f0   :  { %v3145_v4 = vpop.f32.mrb[32].mxu1 }
0x35f1   :  { %v3146_v5 = vadd.f32 %v9751_v45, %v3145_v4  ;;  %v7953_v27 = vpop.f32.mrb[33].mxu1  ;;  %v3294_v4 = vld [vmem:[#allocation4 + $0x20] sm:$0xff] }
0x35f3   :  { %3157 = vrot.lane.b32.xlu0 %v3146_v5, %s9093_s10  ;;  %v3149_v52 = vadd.f32 %v3146_v5, %v3075_v29  ;;  %v3300_v5 = vsub.f32 1.0, %v3294_v4 }
0x35f5   :  { %v7115_v51 = vmul.f32 -1.442695, %v3149_v52 }
0x35f7   :  { %8748 = vpow2.f32 %v7115_v51 }
0x3601   :  { %v8749_v14 = vpop.eup %8748 }
0x3602   :  { %v3153_v24 = vadd.f32 1.0, %v8749_v14 }
0x3604   :  { %8750 = vrcp.f32 %v3153_v24 }
0x360e   :  { %v8751_v32 = vpop.eup %8750 }
0x360f   :  { %v3167_v55 = vsub.f32 1.0, %v8751_v32 }
0x3665   :  { %v3158_v36 = vpop.permute.xlu0 %3157 }
0x3666   :  { %v3160_v61 = vmul.f32 %v8751_v32, %v3158_v36 }
0x3668   :  { %3162 = vrot.lane.b32.xlu1 %v3160_v61, %s9093_s10 }
0x366c   :  { %3173 = vrot.lane.b32.xlu1 %v3070_v58, %s9096_s12 }
0x36da   :  { %v3163_v26 = vpop.permute.xlu1 %3162 }
0x36db   :  { %v3165_v60 = vadd.f32 %v3163_v26, %v3075_v29 }
0x36dd   :  { %8752 = vtanh.f32 %v3165_v60 }
0x36de   :  { %v3174_v10 = vpop.permute.xlu1 %3173 }
0x36df   :  { %v3176_v3 = vmul.f32 %v8751_v32, %v3174_v10 }
0x36e7   :  { %v8753_v25 = vpop.eup %8752 }
0x36e8   :  { %3169 = vrot.lane.b32.xlu0 %v8753_v25, %s9095_s3 }
0x375a   :  { %v3170_v33 = vpop.permute.xlu0 %3169 }
0x375b   :  { %v3172_v46 = vmul.f32 %v3170_v33, %v3167_v55 }
0x375d   :  { %v3177_v47 = vadd.f32 %v3176_v3, %v3172_v46 }
0x375f   :  { %3180 = vrot.lane.b32.xlu0 %v3177_v47, %s9095_s3 }
0x37d1   :  { %v3181_v50 = vpop.permute.xlu0 %3180 }
0x37d2   :  { %v3183_v40 = vmul.f32 %v3181_v50, %v3178_v53  ;;  %v3410_v50 = vld [vmem:[#allocation4 + $0x28] sm:$0xff] }
0x37d4   :  { %v3186_v62 = vadd.f32 %v3185_v19, %v3183_v40  ;;  %3187 = vst.msk [vmem:[#allocation2 + $0x18] sm:$0xff] %vm673_vm12, %v3183_v40  ;;  %v3416_v19 = vsub.f32 1.0, %v3410_v50 }
0x37d5   :  { %3188 = vst.msk [vmem:[#allocation2 + $0x20] sm:$0xff] %vm675_vm13, %v3183_v40 }
0x37d6   :  { %7963 = vmatmul.mubr.msk.f32.vlgmr.msra.gmra.mrb[36].mxu0 %vm129_vm6, %v3186_v62  ;;  %v3301_v29 = vmul.f32 %v3300_v5, %v3186_v62  ;;  %v3526_v5 = vld [vmem:[#allocation4 + $0x30] sm:$0xff] }
0x37d7   :  { %8488 = vmatpush3.bf16.msra.mxu0 %v9730_v15  ;;  %7984 = vmatprep.mubr.msk.f32.mxu0 %vm9090_vm0, %v11265_v1 }
0x37d8   :  { %8489 = vmatprep.subr.bf16.mxu0 %v11267_v0 }
0x37db   :  { %8491 = vmatpush3.bf16.msra.mxu0 %v9733_v13 }
0x38a9   :  { %v3261_v35 = vpop.f32.mrb[36].mxu0 }
0x38aa   :  { %v3262_v18 = vadd.f32 %v9751_v45, %v3261_v35  ;;  %v7964_v12 = vpop.f32.mrb[37].mxu0 }
0x38ac   :  { %3273 = vrot.lane.b32.xlu1 %v3262_v18, %s9093_s10  ;;  %v3265_v37 = vadd.f32 %v3262_v18, %v9804_v22 }
0x38ae   :  { %v7117_v57 = vmul.f32 -1.442695, %v3265_v37 }
0x38b0   :  { %8754 = vpow2.f32 %v7117_v57 }
0x38ba   :  { %v8755_v59 = vpop.eup %8754 }
0x38bb   :  { %v3269_v42 = vadd.f32 1.0, %v8755_v59 }
0x38bd   :  { %8756 = vrcp.f32 %v3269_v42 }
0x38c7   :  { %v8757_v28 = vpop.eup %8756 }
0x38c8   :  { %v3283_v17 = vsub.f32 1.0, %v8757_v28 }
0x391e   :  { %v3274_v7 = vpop.permute.xlu1 %3273 }
0x391f   :  { %v3276_v39 = vmul.f32 %v8757_v28, %v3274_v7 }
0x3921   :  { %3278 = vrot.lane.b32.xlu0 %v3276_v39, %s9093_s10 }
0x3925   :  { %3289 = vrot.lane.b32.xlu0 %v3186_v62, %s9096_s12 }
0x3993   :  { %v3279_v48 = vpop.permute.xlu0 %3278 }
0x3994   :  { %v3281_v56 = vadd.f32 %v3279_v48, %v9804_v22 }
0x3996   :  { %8758 = vtanh.f32 %v3281_v56 }
0x3997   :  { %v3290_v41 = vpop.permute.xlu0 %3289 }
0x3998   :  { %v3292_v49 = vmul.f32 %v8757_v28, %v3290_v41 }
0x39a0   :  { %v8759_v38 = vpop.eup %8758 }
0x39a1   :  { %3285 = vrot.lane.b32.xlu1 %v8759_v38, %s9095_s3 }
0x3a13   :  { %v3286_v20 = vpop.permute.xlu1 %3285 }
0x3a14   :  { %v3288_v2 = vmul.f32 %v3286_v20, %v3283_v17 }
0x3a16   :  { %v3293_v58 = vadd.f32 %v3292_v49, %v3288_v2 }
0x3a18   :  { %3296 = vrot.lane.b32.xlu1 %v3293_v58, %s9095_s3 }
0x3a8a   :  { %v3297_v27 = vpop.permute.xlu1 %3296 }
0x3a8b   :  { %v3299_v52 = vmul.f32 %v3297_v27, %v3294_v4  ;;  %v3532_v27 = vsub.f32 1.0, %v3526_v5 }
0x3a8d   :  { %v3302_v51 = vadd.f32 %v3301_v29, %v3299_v52  ;;  %3303 = vst.msk [vmem:[#allocation2 + $0x20] sm:$0xff] %vm673_vm12, %v3299_v52 }
0x3a8e   :  { %3304 = vst.msk [vmem:[#allocation2 + $0x18] sm:$0xff] %vm675_vm13, %v3299_v52 }
0x3a8f   :  { %7974 = vmatmul.mubr.msk.f32.vlgmr.msra.gmra.mrb[34].mxu1 %vm129_vm6, %v3302_v51  ;;  %v3417_v62 = vmul.f32 %v3416_v19, %v3302_v51 }
0x3a90   :  { %8494 = vmatpush3.bf16.msra.mxu1 %v9730_v15  ;;  %7995 = vmatprep.mubr.msk.f32.mxu1 %vm9090_vm0, %v11265_v1 }
0x3a91   :  { %8495 = vmatprep.subr.bf16.mxu1 %v11267_v0 }
0x3a94   :  { %8497 = vmatpush3.bf16.msra.mxu1 %v9733_v13 }
0x3b62   :  { %v3377_v22 = vpop.f32.mrb[34].mxu1 }
0x3b63   :  { %v3378_v14 = vadd.f32 %v9751_v45, %v3377_v22  ;;  %v7975_v24 = vpop.f32.mrb[35].mxu1 }
0x3b65   :  { %3389 = vrot.lane.b32.xlu0 %v3378_v14, %s9093_s10  ;;  %v3381_v32 = vadd.f32 %v3378_v14, %v9798_v23 }
0x3b67   :  { %v7119_v36 = vmul.f32 -1.442695, %v3381_v32 }
0x3b69   :  { %8760 = vpow2.f32 %v7119_v36 }
0x3b73   :  { %v8761_v61 = vpop.eup %8760 }
0x3b74   :  { %v3385_v26 = vadd.f32 1.0, %v8761_v61 }
0x3b76   :  { %8762 = vrcp.f32 %v3385_v26 }
0x3b80   :  { %v8763_v15 = vpop.eup %8762 }
0x3b81   :  { %v3399_v3 = vsub.f32 1.0, %v8763_v15 }
0x3bd7   :  { %v3390_v60 = vpop.permute.xlu0 %3389 }
0x3bd8   :  { %v3392_v25 = vmul.f32 %v8763_v15, %v3390_v60 }
0x3bda   :  { %3394 = vrot.lane.b32.xlu1 %v3392_v25, %s9093_s10 }
0x3bde   :  { %3405 = vrot.lane.b32.xlu1 %v3302_v51, %s9096_s12 }
0x3c4c   :  { %v3395_v13 = vpop.permute.xlu1 %3394 }
0x3c4d   :  { %v3397_v10 = vadd.f32 %v3395_v13, %v9798_v23 }
0x3c4f   :  { %8764 = vtanh.f32 %v3397_v10 }
0x3c50   :  { %v3406_v33 = vpop.permute.xlu1 %3405 }
0x3c51   :  { %v3408_v47 = vmul.f32 %v8763_v15, %v3406_v33  ;;  %v3659_v33 = vld [vmem:[#allocation5 + $0x1b8] sm:$0xff] }
0x3c59   :  { %v8765_v55 = vpop.eup %8764 }
0x3c5a   :  { %3401 = vrot.lane.b32.xlu0 %v8765_v55, %s9095_s3  ;;  %v3658_v55 = vld [vmem:[#allocation5 + $0x1b0] sm:$0xff] }
0x3ccc   :  { %v3402_v46 = vpop.permute.xlu0 %3401 }
0x3ccd   :  { %v3404_v53 = vmul.f32 %v3402_v46, %v3399_v3  ;;  %v8498_v3 = vpack.c.bf16 %v3659_v33, %v3658_v55  ;;  %v3660_v46 = vld [vmem:[#allocation5 + $0x1c0] sm:$0xff] }
0x3ccf   :  { %v3409_v11 = vadd.f32 %v3408_v47, %v3404_v53  ;;  %v3661_v47 = vld [vmem:[#allocation5 + $0x1c8] sm:$0xff]  ;;  %8499 = vmatprep.subr.bf16.mxu0 %v8498_v3 }
0x3cd0   :  { %v8502_v53 = vpack.c.bf16 %v3661_v47, %v3660_v46 }
0x3cd1   :  { %3412 = vrot.lane.b32.xlu0 %v3409_v11, %s9095_s3 }
0x3d43   :  { %v3413_v40 = vpop.permute.xlu0 %3412 }
0x3d44   :  { %v3415_v35 = vmul.f32 %v3413_v40, %v3410_v50 }
0x3d46   :  { %v3418_v18 = vadd.f32 %v3417_v62, %v3415_v35  ;;  %3419 = vst.msk [vmem:[#allocation2 + $0x28] sm:$0xff] %vm673_vm12, %v3415_v35 }
0x3d47   :  { %3420 = vst.msk [vmem:[#allocation2 + $0x10] sm:$0xff] %vm675_vm13, %v3415_v35  ;;  %v3642_v35 = vld [vmem:[#allocation4 + $0x38] sm:$0xff] }
0x3d48   :  { %7985 = vmatmul.mubr.msk.f32.vlgmr.msra.gmra.mrb[38].mxu0 %vm129_vm6, %v3418_v18  ;;  %v3533_v52 = vmul.f32 %v3532_v27, %v3418_v18 }
0x3d49   :  { %8501 = vmatpush3.bf16.msra.mxu0 %v8498_v3 }
0x3d4a   :  { %8503 = vmatprep.subr.bf16.mxu0 %v8502_v53 }
0x3d4d   :  { %8505 = vmatpush3.bf16.msra.mxu0 %v8502_v53 }
0x3e1b   :  { %v3493_v23 = vpop.f32.mrb[38].mxu0 }
0x3e1c   :  { %v3494_v12 = vadd.f32 %v9751_v45, %v3493_v23  ;;  %v7986_v37 = vpop.f32.mrb[39].mxu0 }
0x3e1e   :  { %3505 = vrot.lane.b32.xlu1 %v3494_v12, %s9093_s10  ;;  %v3497_v57 = vadd.f32 %v3494_v12, %v9815_v44 }
0x3e20   :  { %v7121_v59 = vmul.f32 -1.442695, %v3497_v57  ;;  %v3652_v57 = vld [vmem:[#allocation2 + $0x10] sm:$0xff] }
0x3e22   :  { %8766 = vpow2.f32 %v7121_v59  ;;  %v3653_v59 = vld [vmem:[#allocation2 + $0x18] sm:$0xff] }
0x3e2c   :  { %v8767_v42 = vpop.eup %8766 }
0x3e2d   :  { %v3501_v28 = vadd.f32 1.0, %v8767_v42  ;;  %v3654_v42 = vld [vmem:[#allocation2 + $0x20] sm:$0xff] }
0x3e2f   :  { %8768 = vrcp.f32 %v3501_v28  ;;  %v3655_v28 = vld [vmem:[#allocation2 + $0x28] sm:$0xff] }
0x3e39   :  { %v8769_v7 = vpop.eup %8768 }
0x3e3a   :  { %v3515_v20 = vsub.f32 1.0, %v8769_v7 }
0x3e90   :  { %v3506_v39 = vpop.permute.xlu1 %3505 }
0x3e91   :  { %v3508_v48 = vmul.f32 %v8769_v7, %v3506_v39 }
0x3e93   :  { %3510 = vrot.lane.b32.xlu0 %v3508_v48, %s9093_s10  ;;  %v3796_v48 = vshra.s32 %v9248_v8, 2 }
0x3e95   :  { %vm3797_vm8 = vcmp.eq.s32.totalorder %v3796_v48, %v9267_v30 }
0x3e97   :  { %3521 = vrot.lane.b32.xlu0 %v3418_v18, %s9096_s12 }
0x3f05   :  { %v3511_v56 = vpop.permute.xlu0 %3510 }
0x3f06   :  { %v3513_v38 = vadd.f32 %v3511_v56, %v9815_v44  ;;  %v3802_v56 = vsub.s32 0, %v9267_v30 }
0x3f08   :  { %8770 = vtanh.f32 %v3513_v38  ;;  %v9943_v38 = vsel %vm3797_vm8, 1.0, %v11265_v1 }
0x3f09   :  { %v3522_v17 = vpop.permute.xlu0 %3521 }
0x3f0a   :  { %v3524_v2 = vmul.f32 %v8769_v7, %v3522_v17 }
0x3f12   :  { %v8771_v41 = vpop.eup %8770 }
0x3f13   :  { %3517 = vrot.lane.b32.xlu1 %v8771_v41, %s9095_s3  ;;  %v7124_v41 = vld [vmem:[%s11262_s4 + $0x88] ss:$0 sm:$0xff] }
0x3f85   :  { %v3518_v49 = vpop.permute.xlu1 %3517 }
0x3f86   :  { %v3520_v58 = vmul.f32 %v3518_v49, %v3515_v20  ;;  %v9949_v20 = vrot.slane %v9943_v38, %v3802_v56 }
0x3f88   :  { %v3525_v4 = vadd.f32 %v3524_v2, %v3520_v58  ;;  %11315 = vst [vmem:[#allocation12_spill] sm:$0xff] %v9949_v20 }
0x3f8a   :  { %3528 = vrot.lane.b32.xlu1 %v3525_v4, %s9095_s3 }
0x3ffc   :  { %v3529_v29 = vpop.permute.xlu1 %3528 }
0x3ffd   :  { %v3531_v51 = vmul.f32 %v3529_v29, %v3526_v5 }
0x3fff   :  { %v3534_v22 = vadd.f32 %v3533_v52, %v3531_v51  ;;  %3535 = vst.msk [vmem:[#allocation2 + $0x30] sm:$0xff] %vm673_vm12, %v3531_v51 }
0x4000   :  { %3536 = vst.msk [vmem:[#allocation2 + $0x8] sm:$0xff] %vm675_vm13, %v3531_v51 }
0x4001   :  { %7996 = vmatmul.mubr.msk.f32.vlgmr.msra.gmra.mrb[36].mxu1 %vm129_vm6, %v3534_v22 }
0x4006   :  { %v3656_v7 = vld [vmem:[#allocation2 + $0x30] sm:$0xff] }
0x4007   :  { %v3651_v37 = vld [vmem:[#allocation2 + $0x8] sm:$0xff] }
0x40d4   :  { %v3609_v44 = vpop.f32.mrb[36].mxu1 }
0x40d5   :  { %v3610_v14 = vadd.f32 %v9751_v45, %v3609_v44  ;;  %v7997_v24 = vpop.f32.mrb[37].mxu1 }
0x40d7   :  { %3621 = vrot.lane.b32.xlu0 %v3610_v14, %s9093_s10  ;;  %v3613_v32 = vadd.f32 %v3610_v14, %v9810_v34 }
0x40d9   :  { %v7123_v36 = vmul.f32 -1.442695, %v3613_v32 }
0x40db   :  { %8772 = vpow2.f32 %v7123_v36 }
0x40e5   :  { %v8773_v61 = vpop.eup %8772 }
0x40e6   :  { %v3617_v26 = vadd.f32 1.0, %v8773_v61 }
0x40e8   :  { %8774 = vrcp.f32 %v3617_v26 }
0x40f2   :  { %v8775_v15 = vpop.eup %8774 }
0x40f3   :  { %v3631_v50 = vsub.f32 1.0, %v8775_v15 }
0x4149   :  { %v3622_v60 = vpop.permute.xlu0 %3621 }
0x414a   :  { %v3624_v25 = vmul.f32 %v8775_v15, %v3622_v60 }
0x414c   :  { %3626 = vrot.lane.b32.xlu1 %v3624_v25, %s9093_s10 }
0x4150   :  { %3637 = vrot.lane.b32.xlu1 %v3534_v22, %s9096_s12 }
0x41be   :  { %v3627_v13 = vpop.permute.xlu1 %3626 }
0x41bf   :  { %v3629_v45 = vadd.f32 %v3627_v13, %v9810_v34 }
0x41c1   :  { %8776 = vtanh.f32 %v3629_v45 }
0x41c2   :  { %v3638_v11 = vpop.permute.xlu1 %3637 }
0x41c3   :  { %v3640_v40 = vmul.f32 %v8775_v15, %v3638_v11 }
0x41cb   :  { %v8777_v10 = vpop.eup %8776 }
0x41cc   :  { %3633 = vrot.lane.b32.xlu0 %v8777_v10, %s9095_s3 }
0x423e   :  { %v3634_v19 = vpop.permute.xlu0 %3633 }
0x423f   :  { %v3636_v62 = vmul.f32 %v3634_v19, %v3631_v50 }
0x4241   :  { %v3641_v34 = vadd.f32 %v3640_v40, %v3636_v62 }
0x4243   :  { %3644 = vrot.lane.b32.xlu0 %v3641_v34, %s9095_s3 }
0x42b5   :  { %v3645_v18 = vpop.permute.xlu0 %3644 }
0x42b6   :  { %v3647_v23 = vmul.f32 %v3645_v18, %v3642_v35 }
0x42b8   :  { %3648 = vst.msk [vmem:[#allocation2 + $0x38] sm:$0xff] %vm673_vm12, %v3647_v23 }
0x42b9   :  { %3649 = vst.msk [vmem:[#allocation2] sm:$0xff] %vm675_vm13, %v3647_v23 }
0x42bf   :  { %v3657_v39 = vld [vmem:[#allocation2 + $0x38] sm:$0xff] }
0x42c0   :  { %v3650_v12 = vld [vmem:[#allocation2] sm:$0xff] }
0x42c1   :  { %8006 = vmatprep.mubr.msk.f32.mxu0 %vm129_vm6, %v3650_v12 }
0x42c2   :  { %8007 = vmatmul.mubr.msk.f32.vlgmr.msra.gmra.mrb[40].mxu0 %vm129_vm6, %v3651_v37 }
0x42c3   :  { %8009 = vmatprep.mubr.msk.f32.mxu0 %vm129_vm6, %v3652_v57 }
0x42c6   :  { %8010 = vmatmul.mubr.msk.f32.gmra.mrb[42].mxu0 %vm129_vm6, %v3653_v59 }
0x42c7   :  { %8012 = vmatprep.mubr.msk.f32.mxu0 %vm129_vm6, %v3654_v42 }
0x42ca   :  { %8013 = vmatmul.mubr.msk.f32.gmra.mrb[44].mxu0 %vm129_vm6, %v3655_v28 }
0x42cb   :  { %8015 = vmatprep.mubr.msk.f32.mxu0 %vm129_vm6, %v3656_v7 }
0x42ce   :  { %8016 = vmatmul.mubr.msk.f32.gmra.mrb[46].mxu0 %vm129_vm6, %v3657_v39 }
0x4395   :  { %v8008_v17 = vpop.f32.mrb[40].mxu0 }
0x4396   :  { %v9951_v49 = vadd.f32 %v8008_v17, %v7124_v41  ;;  %v3757_v2 = vpop.f32.mrb[41].mxu0 }
0x4397   :  { %v9953_v58 = vadd.f32 %v7124_v41, %v3757_v2 }
0x4399   :  { %v8011_v4 = vpop.f32.mrb[42].mxu0  ;;  %v8593_v5 = vpack.i.bf16 %v9951_v49, %v9953_v58  ;;  %v3804_v27 = vmul.f32 %v9949_v20, %v9953_v58 }
0x439a   :  { %v9959_v29 = vadd.f32 %v8011_v4, %v7124_v41  ;;  %v3767_v52 = vpop.f32.mrb[43].mxu0 }
0x439b   :  { %v9961_v51 = vadd.f32 %v7124_v41, %v3767_v52  ;;  %8594 = vrot.lane.b32.xlu1 %v8593_v5, %s9095_s3  ;;  %8034 = vmatprep.mubr.msk.f32.mxu1 %vm129_vm6, %v3804_v27  ;;  %v3805_v27 = vmul.f32 %v9949_v20, %v9951_v49 }
0x439d   :  { %v8014_v22 = vpop.f32.mrb[44].mxu0  ;;  %v8598_v44 = vpack.i.bf16 %v9959_v29, %v9961_v51  ;;  %v3806_v52 = vmul.f32 %v9949_v20, %v9961_v51 }
0x439e   :  { %v9967_v14 = vadd.f32 %v8014_v22, %v7124_v41  ;;  %v3777_v24 = vpop.f32.mrb[45].mxu0  ;;  %v3807_v22 = vmul.f32 %v9949_v20, %v9959_v29 }
0x439f   :  { %v9969_v32 = vadd.f32 %v7124_v41, %v3777_v24  ;;  %8599 = vrot.lane.b32.xlu0 %v8598_v44, %s9095_s3  ;;  %v3814_v24 = vsub.s32 1, %v9267_v30 }
0x43a1   :  { %v8017_v36 = vpop.f32.mrb[46].mxu0  ;;  %v8603_v61 = vpack.i.bf16 %v9967_v14, %v9969_v32 }
0x43a2   :  { %v9974_v26 = vadd.f32 %v8017_v36, %v7124_v41  ;;  %v3787_v15 = vpop.f32.mrb[47].mxu0  ;;  %v3809_v36 = vmul.f32 %v9949_v20, %v9967_v14 }
0x43a3   :  { %v9976_v60 = vadd.f32 %v7124_v41, %v3787_v15  ;;  %8604 = vrot.lane.b32.xlu1 %v8603_v61, %s9095_s3  ;;  %v10028_v15 = vrot.slane %v9943_v38, %v3814_v24 }
0x43a5   :  { %v8608_v25 = vpack.i.bf16 %v9974_v26, %v9976_v60  ;;  %11318 = vst [vmem:[#allocation13_spill] sm:$0xff] %v10028_v15  ;;  %v3819_v55 = vmul.f32 %v10028_v15, %v9959_v29 }
0x43a7   :  { %8619 = vrot.lane.b32.xlu1 %v8598_v44, %s9093_s10  ;;  %8609 = vrot.lane.b32.xlu0 %v8608_v25, %s9095_s3  ;;  %v3808_v44 = vmul.f32 %v9949_v20, %v9969_v32 }
0x43ab   :  { %8614 = vrot.lane.b32.xlu0 %v8593_v5, %s9093_s10 }
0x43af   :  { %8624 = vrot.lane.b32.xlu0 %v8603_v61, %s9093_s10  ;;  %v3810_v61 = vmul.f32 %v9949_v20, %v9976_v60 }
0x43b3   :  { %8629 = vrot.lane.b32.xlu0 %v8608_v25, %s9093_s10  ;;  %v3811_v25 = vmul.f32 %v9949_v20, %v9974_v26 }
0x440d   :  { %v8595_v13 = vpop.permute.xlu1 %8594 }
0x440e   :  { %v8597_v45 = vunpack.i.h.bf16 %v8595_v13  ;;  %v8596_v10 = vunpack.i.l.bf16 %v8595_v13  ;;  %v3816_v13 = vmul.f32 %v10028_v15, %v9953_v58 }
0x4410   :  { %v8506_v33 = vpack.c.bf16 %v8597_v45, %v8596_v10  ;;  %v3817_v45 = vmul.f32 %v10028_v15, %v9951_v49  ;;  %v3818_v10 = vmul.f32 %v10028_v15, %v9961_v51 }
0x4411   :  { %v8600_v3 = vpop.permute.xlu0 %8599 }
0x4412   :  { %v8602_v46 = vunpack.i.h.bf16 %v8600_v3  ;;  %v8601_v47 = vunpack.i.l.bf16 %v8600_v3  ;;  %8508 = vmatprep.subr.msk.bf16.mxu1 %vm9988_vm9, %v8506_v33  ;;  %v3826_v3 = vsub.s32 2, %v9267_v30 }
0x4413   :  { %8511 = vmatpush3.bf16.xpose.msk.msra.mxu1 %vm9988_vm9, %v8506_v33  ;;  %v3820_v33 = vmul.f32 %v10028_v15, %v9969_v32 }
0x4414   :  { %v8512_v53 = vpack.c.bf16 %v8602_v46, %v8601_v47  ;;  %v3821_v46 = vmul.f32 %v10028_v15, %v9967_v14  ;;  %v3822_v47 = vmul.f32 %v10028_v15, %v9976_v60 }
0x4415   :  { %v8605_v11 = vpop.permute.xlu1 %8604 }
0x4416   :  { %v8607_v50 = vunpack.i.h.bf16 %v8605_v11  ;;  %v8606_v19 = vunpack.i.l.bf16 %v8605_v11  ;;  %8514 = vmatprep.subr.msk.bf16.mxu1 %vm9988_vm9, %v8512_v53  ;;  %v3823_v11 = vmul.f32 %v10028_v15, %v9974_v26 }
0x4418   :  { %v8518_v62 = vpack.c.bf16 %v8607_v50, %v8606_v19 }
0x4419   :  { %v8610_v40 = vpop.permute.xlu0 %8609  ;;  %v8620_v34 = vpop.permute.xlu1 %8619 }
0x441a   :  { %v8622_v35 = vunpack.i.h.bf16 %v8620_v34  ;;  %v8621_v18 = vunpack.i.l.bf16 %v8620_v34  ;;  %v8612_v12 = vunpack.i.h.bf16 %v8610_v40  ;;  %v8611_v37 = vunpack.i.l.bf16 %v8610_v40 }
0x441b   :  { %8517 = vmatpush3.bf16.xpose.msk.msra.mxu1 %vm9988_vm9, %v8512_v53  ;;  %v10056_v53 = vrot.slane %v9943_v38, %v3826_v3 }
0x441c   :  { %8520 = vmatprep.subr.msk.bf16.mxu1 %vm9988_vm9, %v8518_v62  ;;  %v8524_v7 = vpack.c.bf16 %v8612_v12, %v8611_v37  ;;  %v8534_v56 = vpack.c.bf16 %v8622_v35, %v8621_v18  ;;  %v3838_v35 = vsub.s32 3, %v9267_v30 }
0x441d   :  { %v8615_v23 = vpop.permute.xlu0 %8614  ;;  %11319 = vst [vmem:[#allocation14_spill] sm:$0xff] %v10056_v53  ;;  %v3828_v50 = vmul.f32 %v10056_v53, %v9953_v58  ;;  %v3829_v19 = vmul.f32 %v10056_v53, %v9951_v49  ;;  %v3830_v40 = vmul.f32 %v10056_v53, %v9961_v51  ;;  %v3832_v34 = vmul.f32 %v10056_v53, %v9969_v32 }
0x441e   :  { %v8617_v57 = vunpack.i.h.bf16 %v8615_v23  ;;  %v8616_v59 = vunpack.i.l.bf16 %v8615_v23  ;;  %v3833_v18 = vmul.f32 %v10056_v53, %v9967_v14  ;;  %v3834_v23 = vmul.f32 %v10056_v53, %v9976_v60 }
0x441f   :  { %v10084_v12 = vrot.slane %v9943_v38, %v3838_v35  ;;  %v3835_v37 = vmul.f32 %v10056_v53, %v9974_v26  ;;  %v3886_v35 = vsub.s32 7, %v9267_v30 }
0x4420   :  { %v8530_v42 = vpack.c.bf16 %v8617_v57, %v8616_v59 }
0x4421   :  { %v8625_v28 = vpop.permute.xlu0 %8624  ;;  %11320 = vst [vmem:[#allocation15_spill] sm:$0xff] %v10084_v12  ;;  %v3840_v57 = vmul.f32 %v10084_v12, %v9953_v58  ;;  %v3841_v59 = vmul.f32 %v10084_v12, %v9951_v49 }
0x4422   :  { %v8627_v39 = vunpack.i.h.bf16 %v8625_v28  ;;  %v8626_v48 = vunpack.i.l.bf16 %v8625_v28  ;;  %8531 = vmatprep.subr.bf16.mxu0 %v8530_v42  ;;  %v3843_v28 = vmul.f32 %v10084_v12, %v9959_v29 }
0x4423   :  { %8523 = vmatpush3.bf16.xpose.msk.msra.mxu1 %vm9988_vm9, %v8518_v62  ;;  %8533 = vmatpush3.bf16.msra.mxu0 %v8530_v42  ;;  %v3831_v62 = vmul.f32 %v10056_v53, %v9959_v29  ;;  %v3842_v42 = vmul.f32 %v10084_v12, %v9961_v51 }
0x4424   :  { %8526 = vmatprep.subr.msk.bf16.mxu1 %vm9988_vm9, %v8524_v7  ;;  %8535 = vmatprep.subr.bf16.mxu0 %v8534_v56  ;;  %v8538_v4 = vpack.c.bf16 %v8627_v39, %v8626_v48  ;;  %v3850_v39 = vsub.s32 4, %v9267_v30  ;;  %v3845_v48 = vmul.f32 %v10084_v12, %v9967_v14 }
0x4425   :  { %v8630_v41 = vpop.permute.xlu0 %8629 }
0x4426   :  { %v8632_v17 = vunpack.i.h.bf16 %v8630_v41  ;;  %v8631_v2 = vunpack.i.l.bf16 %v8630_v41  ;;  %v10112_v41 = vrot.slane %v9943_v38, %v3850_v39  ;;  %v4636_v39 = vand.u32 7, %v9383_v43 }
0x4427   :  { %8537 = vmatpush3.bf16.msra.mxu0 %v8534_v56  ;;  %v3846_v56 = vmul.f32 %v10084_v12, %v9976_v60 }
0x4428   :  { %8539 = vmatprep.subr.bf16.mxu0 %v8538_v4  ;;  %v8542_v5 = vpack.c.bf16 %v8632_v17, %v8631_v2  ;;  %11321 = vst [vmem:[#allocation16_spill] sm:$0xff] %v10112_v41  ;;  %v3847_v17 = vmul.f32 %v10084_v12, %v9974_v26  ;;  %v3852_v2 = vmul.f32 %v10112_v41, %v9953_v58 }
0x4429   :  { %v3858_v24 = vmul.f32 %v10112_v41, %v9976_v60 }
0x442b   :  { %8529 = vmatpush3.bf16.xpose.msk.msra.mxu1 %vm9988_vm9, %v8524_v7  ;;  %8541 = vmatpush3.bf16.msra.mxu0 %v8538_v4  ;;  %v3844_v7 = vmul.f32 %v10084_v12, %v9969_v32  ;;  %v3853_v4 = vmul.f32 %v10112_v41, %v9951_v49 }
0x442c   :  { %8543 = vmatprep.subr.bf16.mxu0 %v8542_v5  ;;  %8561 = vmatprep.subr.bf16.mxu1 %v11267_v0 }
0x442f   :  { %8545 = vmatpush3.bf16.msra.mxu0 %v8542_v5  ;;  %v3854_v5 = vmul.f32 %v10112_v41, %v9961_v51 }
0x4430   :  { %8546 = vmatprep.subr.bf16.mxu0 %v11267_v0 }
0x4432   :  { %8035 = vmatmul.mubr.msk.f32.vlgmr.msra.gmra.mrb[38].mxu1 %vm129_vm6, %v3805_v27  ;;  %v3855_v27 = vmul.f32 %v10112_v41, %v9959_v29 }
0x4433   :  { %8037 = vmatprep.mubr.msk.f32.mxu1 %vm129_vm6, %v3806_v52  ;;  %v3856_v52 = vmul.f32 %v10112_v41, %v9969_v32 }
0x4436   :  { %8038 = vmatmul.mubr.msk.f32.gmra.mrb[40].mxu1 %vm129_vm6, %v3807_v22  ;;  %v3862_v22 = vsub.s32 5, %v9267_v30 }
0x4437   :  { %8040 = vmatprep.mubr.msk.f32.mxu1 %vm129_vm6, %v3808_v44  ;;  %v3857_v44 = vmul.f32 %v10112_v41, %v9967_v14 }
0x443a   :  { %8041 = vmatmul.mubr.msk.f32.gmra.mrb[42].mxu1 %vm129_vm6, %v3809_v36  ;;  %v10140_v36 = vrot.slane %v9943_v38, %v3862_v22 }
0x443b   :  { %8043 = vmatprep.mubr.msk.f32.mxu1 %vm129_vm6, %v3810_v61  ;;  %v3859_v61 = vmul.f32 %v10112_v41, %v9974_v26 }
0x443c   :  { %11322 = vst [vmem:[#allocation17_spill] sm:$0xff] %v10140_v36  ;;  %v3869_v3 = vmul.f32 %v10140_v36, %v9967_v14 }
0x443e   :  { %8044 = vmatmul.mubr.msk.f32.gmra.mrb[44].mxu1 %vm129_vm6, %v3811_v25  ;;  %v3864_v25 = vmul.f32 %v10140_v36, %v9953_v58 }
0x443f   :  { %8046 = vmatprep.mubr.msk.f32.mxu1 %vm129_vm6, %v3816_v13  ;;  %v3865_v13 = vmul.f32 %v10140_v36, %v9951_v49 }
0x4442   :  { %8047 = vmatmul.mubr.msk.f32.gmra.mrb[46].mxu1 %vm129_vm6, %v3817_v45  ;;  %v3866_v45 = vmul.f32 %v10140_v36, %v9961_v51 }
0x4443   :  { %8049 = vmatprep.mubr.msk.f32.mxu1 %vm129_vm6, %v3818_v10  ;;  %v3867_v10 = vmul.f32 %v10140_v36, %v9959_v29 }
0x4446   :  { %8050 = vmatmul.mubr.msk.f32.gmra.mrb[48].mxu1 %vm129_vm6, %v3819_v55  ;;  %v3868_v55 = vmul.f32 %v10140_v36, %v9969_v32 }
0x4447   :  { %8052 = vmatprep.mubr.msk.f32.mxu1 %vm129_vm6, %v3820_v33  ;;  %v3874_v33 = vsub.s32 6, %v9267_v30 }
0x444a   :  { %8053 = vmatmul.mubr.msk.f32.gmra.mrb[50].mxu1 %vm129_vm6, %v3821_v46  ;;  %v3870_v46 = vmul.f32 %v10140_v36, %v9976_v60 }
0x444b   :  { %8055 = vmatprep.mubr.msk.f32.mxu1 %vm129_vm6, %v3822_v47  ;;  %v10168_v47 = vrot.slane %v9943_v38, %v3874_v33  ;;  %v4639_v33 = vand.u32 7, %v9482_v6 }
0x444d   :  { %11323 = vst [vmem:[#allocation18_spill] sm:$0xff] %v10168_v47 }
0x444e   :  { %8056 = vmatmul.mubr.msk.f32.gmra.mrb[52].mxu1 %vm129_vm6, %v3823_v11  ;;  %v3871_v11 = vmul.f32 %v10140_v36, %v9974_v26 }
0x444f   :  { %8058 = vmatprep.mubr.msk.f32.mxu1 %vm129_vm6, %v3828_v50  ;;  %v3876_v50 = vmul.f32 %v10168_v47, %v9953_v58 }
0x4452   :  { %8059 = vmatmul.mubr.msk.f32.gmra.mrb[54].mxu1 %vm129_vm6, %v3829_v19  ;;  %v3877_v19 = vmul.f32 %v10168_v47, %v9951_v49 }
0x4453   :  { %8061 = vmatprep.mubr.msk.f32.mxu1 %vm129_vm6, %v3830_v40  ;;  %v3878_v40 = vmul.f32 %v10168_v47, %v9961_v51 }
0x4456   :  { %8062 = vmatmul.mubr.msk.f32.gmra.mrb[56].mxu1 %vm129_vm6, %v3831_v62  ;;  %v3879_v62 = vmul.f32 %v10168_v47, %v9959_v29 }
0x4457   :  { %8064 = vmatprep.mubr.msk.f32.mxu1 %vm129_vm6, %v3832_v34  ;;  %v3880_v34 = vmul.f32 %v10168_v47, %v9969_v32 }
0x445a   :  { %8065 = vmatmul.mubr.msk.f32.gmra.mrb[58].mxu1 %vm129_vm6, %v3833_v18  ;;  %v3881_v18 = vmul.f32 %v10168_v47, %v9967_v14 }
0x445b   :  { %8067 = vmatprep.mubr.msk.f32.mxu1 %vm129_vm6, %v3834_v23  ;;  %v3882_v23 = vmul.f32 %v10168_v47, %v9976_v60 }
0x445e   :  { %8068 = vmatmul.mubr.msk.f32.gmra.mrb[60].mxu1 %vm129_vm6, %v3835_v37  ;;  %v10196_v37 = vrot.slane %v9943_v38, %v3886_v35 }
0x445f   :  { %8070 = vmatprep.mubr.msk.f32.mxu1 %vm129_vm6, %v3840_v57  ;;  %v3883_v57 = vmul.f32 %v10168_v47, %v9974_v26 }
0x4460   :  { %11324 = vst [vmem:[#allocation19_spill] sm:$0xff] %v10196_v37  ;;  %v3890_v38 = vmul.f32 %v10196_v37, %v9961_v51  ;;  %v3894_v51 = vmul.f32 %v10196_v37, %v9976_v60 }
0x4462   :  { %8071 = vmatmul.mubr.msk.f32.gmra.mrb[62].mxu1 %vm129_vm6, %v3841_v59  ;;  %v3888_v59 = vmul.f32 %v10196_v37, %v9953_v58  ;;  %v3892_v58 = vmul.f32 %v10196_v37, %v9969_v32  ;;  %v10230_v32 = vand.u32 7, %v9248_v8  ;;  %v4638_v8 = vand.u32 7, %v9452_v21 }
0x4463   :  { %8073 = vmatprep.mubr.msk.f32.mxu1 %vm129_vm6, %v3842_v42  ;;  %v3889_v42 = vmul.f32 %v10196_v37, %v9951_v49  ;;  %v3893_v49 = vmul.f32 %v10196_v37, %v9967_v14  ;;  %v4634_v14 = vand.u32 7, %v9309_v9 }
0x4464   :  { %vm4701_vm15 = vcmp.eq.s32.totalorder %v4636_v39, %v10230_v32  ;;  %vm4703_vm2 = vcmp.eq.s32.totalorder %v4638_v8, %v10230_v32  ;;  %vm4704_vm11 = vcmp.eq.s32.totalorder %v4639_v33, %v10230_v32 }
0x4465   :  { %vm4699_vm10 = vcmp.eq.s32.totalorder %v4634_v14, %v10230_v32 }
0x4466   :  { %8074 = vmatmul.mubr.msk.f32.gmra.mrb[64].mxu1 %vm129_vm6, %v3843_v28  ;;  %v3891_v28 = vmul.f32 %v10196_v37, %v9959_v29  ;;  %v3895_v29 = vmul.f32 %v10196_v37, %v9974_v26  ;;  %v4635_v26 = vand.u32 7, %v9349_v54 }
0x4467   :  { %8076 = vmatprep.mubr.msk.f32.mxu1 %vm129_vm6, %v3844_v7  ;;  %v4633_v7 = vand.u32 7, %v9267_v30 }
0x4468   :  { %vm4700_vm1 = vcmp.eq.s32.totalorder %v4635_v26, %v10230_v32 }
0x4469   :  { %vm4698_vm13 = vcmp.eq.s32.totalorder %v4633_v7, %v10230_v32  ;;  %v4581_v7 = vadd.s32 96, %v9267_v30 }
0x446a   :  { %8077 = vmatmul.mubr.msk.f32.gmra.mrb[66].mxu1 %vm129_vm6, %v3845_v48 }
0x446b   :  { %8079 = vmatprep.mubr.msk.f32.mxu1 %vm129_vm6, %v3846_v56 }
0x446e   :  { %8080 = vmatmul.mubr.msk.f32.gmra.mrb[68].mxu1 %vm129_vm6, %v3847_v17 }
0x446f   :  { %8082 = vmatprep.mubr.msk.f32.mxu1 %vm129_vm6, %v3852_v2 }
0x4472   :  { %8083 = vmatmul.mubr.msk.f32.gmra.mrb[70].mxu1 %vm129_vm6, %v3853_v4 }
0x4473   :  { %8085 = vmatprep.mubr.msk.f32.mxu1 %vm129_vm6, %v3854_v5 }
0x4476   :  { %8086 = vmatmul.mubr.msk.f32.gmra.mrb[72].mxu1 %vm129_vm6, %v3855_v27 }
0x4477   :  { %8088 = vmatprep.mubr.msk.f32.mxu1 %vm129_vm6, %v3856_v52  ;;  %v4637_v52 = vand.u32 7, %v9416_v31 }
0x4479   :  { %vm4702_vm3 = vcmp.eq.s32.totalorder %v4637_v52, %v10230_v32 }
0x447a   :  { %8089 = vmatmul.mubr.msk.f32.gmra.mrb[74].mxu1 %vm129_vm6, %v3857_v44  ;;  %v4578_v44 = vadd.s32 72, %v9267_v30 }
0x447b   :  { %8091 = vmatprep.mubr.msk.f32.mxu1 %vm129_vm6, %v3858_v24 }
0x447e   :  { %8092 = vmatmul.mubr.msk.f32.gmra.mrb[76].mxu1 %vm129_vm6, %v3859_v61 }
0x447f   :  { %8094 = vmatprep.mubr.msk.f32.mxu1 %vm129_vm6, %v3864_v25 }
0x4482   :  { %8095 = vmatmul.mubr.msk.f32.gmra.mrb[78].mxu1 %vm129_vm6, %v3865_v13  ;;  %v4640_v13 = vand.u32 7, %v9530_v16 }
0x4483   :  { %8097 = vmatprep.mubr.msk.f32.mxu1 %vm129_vm6, %v3866_v45  ;;  %v4577_v45 = vadd.s32 64, %v9267_v30 }
0x4484   :  { %vm4705_vm4 = vcmp.eq.s32.totalorder %v4640_v13, %v10230_v32 }
0x4486   :  { %8098 = vmatmul.mubr.msk.f32.gmra.mrb[80].mxu1 %vm129_vm6, %v3867_v10 }
0x4487   :  { %8100 = vmatprep.mubr.msk.f32.mxu1 %vm129_vm6, %v3868_v55 }
0x448a   :  { %8101 = vmatmul.mubr.msk.f32.gmra.mrb[82].mxu1 %vm129_vm6, %v3869_v3 }
0x448b   :  { %8103 = vmatprep.mubr.msk.f32.mxu1 %vm129_vm6, %v3870_v46 }
0x448e   :  { %8104 = vmatmul.mubr.msk.f32.gmra.mrb[84].mxu1 %vm129_vm6, %v3871_v11  ;;  %v4642_v11 = vand.u32 7, %v4578_v44 }
0x448f   :  { %8106 = vmatprep.mubr.msk.f32.mxu1 %vm129_vm6, %v3876_v50  ;;  %v4580_v50 = vadd.s32 88, %v9267_v30 }
0x4490   :  { %vm4707_vm8 = vcmp.eq.s32.totalorder %v4642_v11, %v10230_v32 }
0x4492   :  { %8107 = vmatmul.mubr.msk.f32.gmra.mrb[86].mxu1 %vm129_vm6, %v3877_v19 }
0x4493   :  { %8109 = vmatprep.mubr.msk.f32.mxu1 %vm129_vm6, %v3878_v40 }
0x4496   :  { %8110 = vmatmul.mubr.msk.f32.gmra.mrb[88].mxu1 %vm129_vm6, %v3879_v62  ;;  %v4641_v62 = vand.u32 7, %v4577_v45 }
0x4497   :  { %8112 = vmatprep.mubr.msk.f32.mxu1 %vm129_vm6, %v3880_v34 }
0x4498   :  { %vm4706_vm9 = vcmp.eq.s32.totalorder %v4641_v62, %v10230_v32 }
0x449a   :  { %8113 = vmatmul.mubr.msk.f32.gmra.mrb[90].mxu1 %vm129_vm6, %v3881_v18  ;;  %v4579_v18 = vadd.s32 80, %v9267_v30 }
0x449b   :  { %8115 = vmatprep.mubr.msk.f32.mxu1 %vm129_vm6, %v3882_v23 }
0x449c   :  { %v4643_v14 = vand.u32 7, %v4579_v18 }
0x449e   :  { %8116 = vmatmul.mubr.msk.f32.gmra.mrb[92].mxu1 %vm129_vm6, %v3883_v57 }
0x449f   :  { %8118 = vmatprep.mubr.msk.f32.mxu1 %vm129_vm6, %v3888_v59  ;;  %v4644_v59 = vand.u32 7, %v4580_v50 }
0x44a2   :  { %8119 = vmatmul.mubr.msk.f32.gmra.mrb[94].mxu1 %vm129_vm6, %v3889_v42 }
0x44a3   :  { %8121 = vmatprep.mubr.msk.f32.mxu1 %vm129_vm6, %v3890_v38 }
0x44a6   :  { %8122 = vmatmul.mubr.msk.f32.gmra.mrb[96].mxu1 %vm129_vm6, %v3891_v28 }
0x44a7   :  { %8124 = vmatprep.mubr.msk.f32.mxu1 %vm129_vm6, %v3892_v58  ;;  %v4582_v58 = vadd.s32 104, %v9267_v30 }
0x44a9   :  { %v4646_v8 = vand.u32 7, %v4582_v58 }
0x44aa   :  { %8125 = vmatmul.mubr.msk.f32.gmra.mrb[98].mxu1 %vm129_vm6, %v3893_v49 }
0x44ab   :  { %8127 = vmatprep.mubr.msk.f32.mxu1 %vm129_vm6, %v3894_v51 }
0x44ae   :  { %8128 = vmatmul.mubr.msk.f32.gmra.mrb[100].mxu1 %vm129_vm6, %v3895_v29 }
0x44af   :  { %8276 = vmatprep.mubr.msk.f32.mxu1 %vm9090_vm0, %v11265_v1 }
0x4505   :  { %v8036_v60 = vpop.f32.mrb[38].mxu1 }
0x4506   :  { %v4514_v48 = vmul.f32 0.5, %v8036_v60  ;;  %v4194_v56 = vpop.f32.mrb[39].mxu1 }
0x4507   :  { %v4513_v17 = vmul.f32 0.5, %v4194_v56 }
0x4508   :  { %v10238_v2 = vsel %vm4699_vm10, %v4514_v48, -1e+30  ;;  %vm4709_vm10 = vcmp.eq.s32.totalorder %v4644_v59, %v10230_v32  ;;  %v4584_v48 = vadd.s32 120, %v9267_v30 }
0x4509   :  { %v10241_v9 = vsel %vm4698_vm13, %v4513_v17, -1e+30  ;;  %v8039_v4 = vpop.f32.mrb[40].mxu1  ;;  %v4830_v43 = vsel %vm4826_vm14, %v10238_v2, -inf  ;;  %vm4708_vm13 = vcmp.eq.s32.totalorder %v4643_v14, %v10230_v32 }
0x450a   :  { %v4516_v5 = vmul.f32 0.5, %v8039_v4  ;;  %4831 = vmax.xlane.f32.xlu0 %v4830_v43  ;;  %v4204_v27 = vpop.f32.mrb[41].mxu1  ;;  %v4827_v54 = vsel %vm4826_vm14, %v10241_v9, -inf  ;;  %v4583_v4 = vadd.s32 112, %v9267_v30  ;;  %v4648_v44 = vand.u32 7, %v4584_v48 }
0x450b   :  { %v4515_v22 = vmul.f32 0.5, %v4204_v27  ;;  %4828 = vmax.xlane.f32.xlu1 %v4827_v54  ;;  %v4645_v54 = vand.u32 7, %v4581_v7 }
0x450c   :  { %v10250_v21 = vsel %vm4701_vm15, %v4516_v5, -1e+30  ;;  %vm4711_vm15 = vcmp.eq.s32.totalorder %v4646_v8, %v10230_v32 }
0x450d   :  { %v10254_v24 = vsel %vm4700_vm1, %v4515_v22, -1e+30  ;;  %v8042_v61 = vpop.f32.mrb[42].mxu1  ;;  %v4836_v25 = vsel %vm4826_vm14, %v10250_v21, -inf  ;;  %vm4710_vm1 = vcmp.eq.s32.totalorder %v4645_v54, %v10230_v32 }
0x450e   :  { %v4518_v10 = vmul.f32 0.5, %v8042_v61  ;;  %v4214_v31 = vpop.f32.mrb[43].mxu1  ;;  %v4833_v55 = vsel %vm4826_vm14, %v10254_v24, -inf  ;;  %v4586_v61 = vadd.s32 136, %v9267_v30 }
0x450f   :  { %v4517_v3 = vmul.f32 0.5, %v4214_v31  ;;  %4837 = vmax.xlane.f32.xlu1 %v4836_v25  ;;  %4834 = vmax.xlane.f32.xlu0 %v4833_v55 }
0x4510   :  { %v10264_v46 = vsel %vm4703_vm2, %v4518_v10, -1e+30  ;;  %v4647_v10 = vand.u32 7, %v4583_v4  ;;  %vm4713_vm2 = vcmp.eq.s32.totalorder %v4648_v44, %v10230_v32 }
0x4511   :  { %v10267_v16 = vsel %vm4702_vm3, %v4517_v3, -1e+30  ;;  %v8045_v19 = vpop.f32.mrb[44].mxu1  ;;  %v4842_v40 = vsel %vm4826_vm14, %v10264_v46, -inf  ;;  %v4585_v3 = vadd.s32 128, %v9267_v30 }
0x4512   :  { %v4520_v34 = vmul.f32 0.5, %v8045_v19  ;;  %v4224_v35 = vpop.f32.mrb[45].mxu1  ;;  %v4839_v6 = vsel %vm4826_vm14, %v10267_v16, -inf  ;;  %v4650_v19 = vand.u32 7, %v4586_v61  ;;  %vm4712_vm3 = vcmp.eq.s32.totalorder %v4647_v10, %v10230_v32 }
0x4513   :  { %v4519_v23 = vmul.f32 0.5, %v4224_v35  ;;  %4843 = vmax.xlane.f32.xlu1 %v4842_v40  ;;  %4840 = vmax.xlane.f32.xlu0 %v4839_v6  ;;  %v4588_v35 = vadd.s32 152, %v9267_v30  ;;  %v4649_v59 = vand.u32 7, %v4585_v3 }
0x4514   :  { %v10276_v57 = vsel %vm4705_vm4, %v4520_v34, -1e+30  ;;  %vm4715_vm4 = vcmp.eq.s32.totalorder %v4650_v19, %v10230_v32 }
0x4515   :  { %v10279_v42 = vsel %vm4704_vm11, %v4519_v23, -1e+30  ;;  %v8048_v38 = vpop.f32.mrb[46].mxu1  ;;  %v4848_v28 = vsel %vm4826_vm14, %v10276_v57, -inf  ;;  %v4652_v7 = vand.u32 7, %v4588_v35  ;;  %vm4714_vm11 = vcmp.eq.s32.totalorder %v4649_v59, %v10230_v32 }
0x4516   :  { %v4522_v49 = vmul.f32 0.5, %v8048_v38  ;;  %v4234_v51 = vpop.f32.mrb[47].mxu1  ;;  %v4845_v29 = vsel %vm4826_vm14, %v10279_v42, -inf  ;;  %v4587_v38 = vadd.s32 144, %v9267_v30  ;;  %v4593_v59 = vadd.s32 192, %v9267_v30 }
0x4517   :  { %v4521_v60 = vmul.f32 0.5, %v4234_v51  ;;  %4849 = vmax.xlane.f32.xlu1 %v4848_v28  ;;  %4846 = vmax.xlane.f32.xlu0 %v4845_v29 }
0x4518   :  { %v10288_v39 = vsel %vm4707_vm8, %v4522_v49, -1e+30  ;;  %v4590_v49 = vadd.s32 168, %v9267_v30  ;;  %v4651_v8 = vand.u32 7, %v4587_v38  ;;  %vm4717_vm8 = vcmp.eq.s32.totalorder %v4652_v7, %v10230_v32 }
0x4519   :  { %v10292_v56 = vsel %vm4706_vm9, %v4521_v60, -1e+30  ;;  %v8051_v26 = vpop.f32.mrb[48].mxu1  ;;  %v4854_v17 = vsel %vm4826_vm14, %v10288_v39, -inf  ;;  %v4589_v60 = vadd.s32 160, %v9267_v30 }
0x451a   :  { %v4524_v43 = vmul.f32 0.5, %v8051_v26  ;;  %v4244_v5 = vpop.f32.mrb[49].mxu1  ;;  %v4851_v27 = vsel %vm4826_vm14, %v10292_v56, -inf  ;;  %vm4716_vm9 = vcmp.eq.s32.totalorder %v4651_v8, %v10230_v32 }
0x451b   :  { %v4523_v52 = vmul.f32 0.5, %v4244_v5  ;;  %4855 = vmax.xlane.f32.xlu1 %v4854_v17  ;;  %4852 = vmax.xlane.f32.xlu0 %v4851_v27  ;;  %v4654_v5 = vand.u32 7, %v4590_v49  ;;  %v4592_v27 = vadd.s32 184, %v9267_v30  ;;  %v4653_v61 = vand.u32 7, %v4589_v60 }
0x451c   :  { %v10300_v22 = vsel %vm4709_vm10, %v4524_v43, -1e+30  ;;  %v4596_v49 = vadd.s32 216, %v9267_v30 }
0x451d   :  { %v10303_v25 = vsel %vm4708_vm13, %v4523_v52, -1e+30  ;;  %v8054_v13 = vpop.f32.mrb[50].mxu1  ;;  %v4860_v45 = vsel %vm4826_vm14, %v10300_v22, -inf  ;;  %vm4719_vm10 = vcmp.eq.s32.totalorder %v4654_v5, %v10230_v32  ;;  %v4656_v3 = vand.u32 7, %v4592_v27 }
0x451e   :  { %v4526_v31 = vmul.f32 0.5, %v8054_v13  ;;  %v4254_v55 = vpop.f32.mrb[51].mxu1  ;;  %v4857_v33 = vsel %vm4826_vm14, %v10303_v25, -inf  ;;  %vm4718_vm13 = vcmp.eq.s32.totalorder %v4653_v61, %v10230_v32 }
0x451f   :  { %v4525_v11 = vmul.f32 0.5, %v4254_v55  ;;  %4861 = vmax.xlane.f32.xlu1 %v4860_v45  ;;  %4858 = vmax.xlane.f32.xlu0 %v4857_v33 }
0x4520   :  { %v10312_v50 = vsel %vm4711_vm15, %v4526_v31, -1e+30  ;;  %v4591_v31 = vadd.s32 176, %v9267_v30  ;;  %vm4721_vm15 = vcmp.eq.s32.totalorder %v4656_v3, %v10230_v32 }
0x4521   :  { %v10315_v40 = vsel %vm4710_vm1, %v4525_v11, -1e+30  ;;  %v8057_v62 = vpop.f32.mrb[52].mxu1  ;;  %v4866_v34 = vsel %vm4826_vm14, %v10312_v50, -inf }
0x4522   :  { %v4528_v6 = vmul.f32 0.5, %v8057_v62  ;;  %v4264_v18 = vpop.f32.mrb[53].mxu1  ;;  %v4863_v23 = vsel %vm4826_vm14, %v10315_v40, -inf }
0x4523   :  { %v4527_v28 = vmul.f32 0.5, %v4264_v18  ;;  %4867 = vmax.xlane.f32.xlu1 %v4866_v34  ;;  %4864 = vmax.xlane.f32.xlu0 %v4863_v23  ;;  %v4594_v34 = vadd.s32 200, %v9267_v30  ;;  %v4655_v23 = vand.u32 7, %v4591_v31 }
0x4524   :  { %v10324_v58 = vsel %vm4713_vm2, %v4528_v6, -1e+30 }
0x4525   :  { %v10328_v51 = vsel %vm4712_vm3, %v4527_v28, -1e+30  ;;  %v8060_v29 = vpop.f32.mrb[54].mxu1  ;;  %v4872_v14 = vsel %vm4826_vm14, %v10324_v58, -inf  ;;  %v4658_v60 = vand.u32 7, %v4594_v34  ;;  %vm4720_vm1 = vcmp.eq.s32.totalorder %v4655_v23, %v10230_v32 }
0x4526   :  { %v4530_v48 = vmul.f32 0.5, %v8060_v29  ;;  %v4274_v26 = vpop.f32.mrb[55].mxu1  ;;  %v4869_v17 = vsel %vm4826_vm14, %v10328_v51, -inf }
0x4527   :  { %v4529_v4 = vmul.f32 0.5, %v4274_v26  ;;  %4873 = vmax.xlane.f32.xlu1 %v4872_v14  ;;  %4870 = vmax.xlane.f32.xlu0 %v4869_v17  ;;  %vm4723_vm2 = vcmp.eq.s32.totalorder %v4658_v60, %v10230_v32  ;;  %v4599_v60 = vadd.s32 240, %v9267_v30 }
0x4528   :  { %v10336_v43 = vsel %vm4715_vm4, %v4530_v48, -1e+30  ;;  %v4595_v48 = vadd.s32 208, %v9267_v30 }
0x4529   :  { %v10339_v54 = vsel %vm4714_vm11, %v4529_v4, -1e+30  ;;  %v8063_v52 = vpop.f32.mrb[56].mxu1  ;;  %v4878_v44 = vsel %vm4826_vm14, %v10336_v43, -inf  ;;  %v4657_v4 = vand.u32 7, %v4593_v59  ;;  %v4600_v59 = vadd.s32 248, %v9267_v30 }
0x452a   :  { %v4532_v13 = vmul.f32 0.5, %v8063_v52  ;;  %v4284_v45 = vpop.f32.mrb[57].mxu1  ;;  %v4875_v10 = vsel %vm4826_vm14, %v10339_v54, -inf  ;;  %v4660_v52 = vand.u32 7, %v4596_v49 }
0x452b   :  { %v4531_v55 = vmul.f32 0.5, %v4284_v45  ;;  %4879 = vmax.xlane.f32.xlu1 %v4878_v44  ;;  %4876 = vmax.xlane.f32.xlu0 %v4875_v10  ;;  %v4598_v44 = vadd.s32 232, %v9267_v30  ;;  %v4659_v10 = vand.u32 7, %v4595_v48  ;;  %vm4722_vm3 = vcmp.eq.s32.totalorder %v4657_v4, %v10230_v32 }
0x452c   :  { %v10348_v33 = vsel %vm4717_vm8, %v4532_v13, -1e+30  ;;  %vm4725_vm4 = vcmp.eq.s32.totalorder %v4660_v52, %v10230_v32  ;;  %v4664_v52 = vand.u32 7, %v4600_v59 }
0x452d   :  { %v10351_v11 = vsel %vm4716_vm9, %v4531_v55, -1e+30  ;;  %v8066_v19 = vpop.f32.mrb[58].mxu1  ;;  %v4884_v62 = vsel %vm4826_vm14, %v10348_v33, -inf  ;;  %vm4724_vm11 = vcmp.eq.s32.totalorder %v4659_v10, %v10230_v32 }
0x452e   :  { %v4534_v35 = vmul.f32 0.5, %v8066_v19  ;;  %v4294_v6 = vpop.f32.mrb[59].mxu1  ;;  %v4881_v18 = vsel %vm4826_vm14, %v10351_v11, -inf  ;;  %v4597_v19 = vadd.s32 224, %v9267_v30 }
0x452f   :  { %v4533_v38 = vmul.f32 0.5, %v4294_v6  ;;  %4885 = vmax.xlane.f32.xlu1 %v4884_v62  ;;  %4882 = vmax.xlane.f32.xlu0 %v4881_v18 }
0x4530   :  { %v10360_v28 = vsel %vm4719_vm10, %v4534_v35, -1e+30  ;;  %v4662_v35 = vand.u32 7, %v4598_v44  ;;  %v4601_v44 = vadd.s32 256, %v9267_v30  ;;  %vm4729_vm10 = vcmp.eq.s32.totalorder %v4664_v52, %v10230_v32 }
0x4531   :  { %v10364_v29 = vsel %vm4718_vm13, %v4533_v38, -1e+30  ;;  %v8069_v14 = vpop.f32.mrb[60].mxu1  ;;  %v4890_v7 = vsel %vm4826_vm14, %v10360_v28, -inf }
0x4532   :  { %v4536_v26 = vmul.f32 0.5, %v8069_v14  ;;  %v4304_v17 = vpop.f32.mrb[61].mxu1  ;;  %v4887_v8 = vsel %vm4826_vm14, %v10364_v29, -inf  ;;  %vm4727_vm8 = vcmp.eq.s32.totalorder %v4662_v35, %v10230_v32  ;;  %v4665_v59 = vand.u32 7, %v4601_v44 }
0x4533   :  { %v4535_v5 = vmul.f32 0.5, %v4304_v17  ;;  %4891 = vmax.xlane.f32.xlu1 %v4890_v7  ;;  %4888 = vmax.xlane.f32.xlu0 %v4887_v8  ;;  %v4661_v7 = vand.u32 7, %v4597_v19  ;;  %v4602_v17 = vadd.s32 264, %v9267_v30  ;;  %v4606_v44 = vadd.s32 296, %v9267_v30 }
0x4534   :  { %v10372_v27 = vsel %vm4721_vm15, %v4536_v26, -1e+30 }
0x4535   :  { %v10375_v61 = vsel %vm4720_vm1, %v4535_v5, -1e+30  ;;  %v8072_v13 = vpop.f32.mrb[62].mxu1  ;;  %v4896_v45 = vsel %vm4826_vm14, %v10372_v27, -inf  ;;  %vm4726_vm9 = vcmp.eq.s32.totalorder %v4661_v7, %v10230_v32  ;;  %v4666_v19 = vand.u32 7, %v4602_v17 }
0x4536   :  { %v4538_v31 = vmul.f32 0.5, %v8072_v13  ;;  %v4314_v55 = vpop.f32.mrb[63].mxu1  ;;  %v4893_v3 = vsel %vm4826_vm14, %v10375_v61, -inf  ;;  %v4603_v7 = vadd.s32 272, %v9267_v30  ;;  %vm4730_vm1 = vcmp.eq.s32.totalorder %v4665_v59, %v10230_v32 }
0x4537   :  { %v4537_v62 = vmul.f32 0.5, %v4314_v55  ;;  %4897 = vmax.xlane.f32.xlu1 %v4896_v45  ;;  %4894 = vmax.xlane.f32.xlu0 %v4893_v3  ;;  %vm4731_vm15 = vcmp.eq.s32.totalorder %v4666_v19, %v10230_v32 }
0x4538   :  { %v10384_v34 = vsel %vm4723_vm2, %v4538_v31, -1e+30  ;;  %v4663_v31 = vand.u32 7, %v4599_v60 }
0x4539   :  { %v10387_v6 = vsel %vm4722_vm3, %v4537_v62, -1e+30  ;;  %v8075_v18 = vpop.f32.mrb[64].mxu1  ;;  %v4902_v23 = vsel %vm4826_vm14, %v10384_v34, -inf  ;;  %v4604_v62 = vadd.s32 280, %v9267_v30 }
0x453a   :  { %v4540_v38 = vmul.f32 0.5, %v8075_v18  ;;  %v4324_v49 = vpop.f32.mrb[65].mxu1  ;;  %v4899_v14 = vsel %vm4826_vm14, %v10387_v6, -inf  ;;  %vm4728_vm13 = vcmp.eq.s32.totalorder %v4663_v31, %v10230_v32  ;;  %v4667_v31 = vand.u32 7, %v4603_v7 }
0x453b   :  { %v4539_v48 = vmul.f32 0.5, %v4324_v49  ;;  %4903 = vmax.xlane.f32.xlu1 %v4902_v23  ;;  %4900 = vmax.xlane.f32.xlu0 %v4899_v14  ;;  %v4668_v17 = vand.u32 7, %v4604_v62 }
0x453c   :  { %v10396_v26 = vsel %vm4725_vm4, %v4540_v38, -1e+30  ;;  %vm4732_vm3 = vcmp.eq.s32.totalorder %v4667_v31, %v10230_v32 }
0x453d   :  { %v10400_v8 = vsel %vm4724_vm11, %v4539_v48, -1e+30  ;;  %v8078_v4 = vpop.f32.mrb[66].mxu1  ;;  %v4908_v5 = vsel %vm4826_vm14, %v10396_v26, -inf  ;;  %vm4733_vm2 = vcmp.eq.s32.totalorder %v4668_v17, %v10230_v32 }
0x453e   :  { %v4542_v13 = vmul.f32 0.5, %v8078_v4  ;;  %v4334_v45 = vpop.f32.mrb[67].mxu1  ;;  %v4905_v10 = vsel %vm4826_vm14, %v10400_v8, -inf }
0x453f   :  { %v4541_v55 = vmul.f32 0.5, %v4334_v45  ;;  %4909 = vmax.xlane.f32.xlu1 %v4908_v5  ;;  %4906 = vmax.xlane.f32.xlu0 %v4905_v10 }
0x4540   :  { %v10408_v3 = vsel %vm4727_vm8, %v4542_v13, -1e+30 }
0x4541   :  { %v10411_v35 = vsel %vm4726_vm9, %v4541_v55, -1e+30  ;;  %v8081_v18 = vpop.f32.mrb[68].mxu1  ;;  %v4914_v23 = vsel %vm4826_vm14, %v10408_v3, -inf  ;;  %v4605_v55 = vadd.s32 288, %v9267_v30 }
0x4542   :  { %v4544_v38 = vmul.f32 0.5, %v8081_v18  ;;  %v4344_v49 = vpop.f32.mrb[69].mxu1  ;;  %v4911_v14 = vsel %vm4826_vm14, %v10411_v35, -inf  ;;  %v4608_v18 = vadd.s32 312, %v9267_v30 }
0x4543   :  { %v4543_v60 = vmul.f32 0.5, %v4344_v49  ;;  %4915 = vmax.xlane.f32.xlu1 %v4914_v23  ;;  %4912 = vmax.xlane.f32.xlu0 %v4911_v14  ;;  %v4670_v49 = vand.u32 7, %v4606_v44  ;;  %v4607_v14 = vadd.s32 304, %v9267_v30 }
0x4544   :  { %v10420_v48 = vsel %vm4729_vm10, %v4544_v38, -1e+30 }
0x4545   :  { %v10423_v4 = vsel %vm4728_vm13, %v4543_v60, -1e+30  ;;  %v8084_v5 = vpop.f32.mrb[70].mxu1  ;;  %v4920_v52 = vsel %vm4826_vm14, %v10420_v48, -inf  ;;  %vm4735_vm4 = vcmp.eq.s32.totalorder %v4670_v49, %v10230_v32 }
0x4546   :  { %v4546_v13 = vmul.f32 0.5, %v8084_v5  ;;  %v4354_v45 = vpop.f32.mrb[71].mxu1  ;;  %v4917_v10 = vsel %vm4826_vm14, %v10423_v4, -inf }
0x4547   :  { %v4545_v19 = vmul.f32 0.5, %v4354_v45  ;;  %4921 = vmax.xlane.f32.xlu1 %v4920_v52  ;;  %4918 = vmax.xlane.f32.xlu0 %v4917_v10  ;;  %v4669_v52 = vand.u32 7, %v4605_v55  ;;  %v4672_v45 = vand.u32 7, %v4608_v18  ;;  %v4610_v10 = vadd.s32 328, %v9267_v30 }
0x4548   :  { %v10432_v62 = vsel %vm4731_vm15, %v4546_v13, -1e+30  ;;  %v4609_v18 = vadd.s32 320, %v9267_v30 }
0x4549   :  { %v10436_v23 = vsel %vm4730_vm1, %v4545_v19, -1e+30  ;;  %v8087_v59 = vpop.f32.mrb[72].mxu1  ;;  %v4926_v38 = vsel %vm4826_vm14, %v10432_v62, -inf  ;;  %vm4734_vm11 = vcmp.eq.s32.totalorder %v4669_v52, %v10230_v32  ;;  %vm4737_vm8 = vcmp.eq.s32.totalorder %v4672_v45, %v10230_v32 }
0x454a   :  { %v4548_v7 = vmul.f32 0.5, %v8087_v59  ;;  %v4364_v60 = vpop.f32.mrb[73].mxu1  ;;  %v4923_v5 = vsel %vm4826_vm14, %v10436_v23, -inf  ;;  %v4671_v59 = vand.u32 7, %v4607_v14  ;;  %v4674_v49 = vand.u32 7, %v4610_v10 }
0x454b   :  { %v4547_v17 = vmul.f32 0.5, %v4364_v60  ;;  %4927 = vmax.xlane.f32.xlu1 %v4926_v38  ;;  %4924 = vmax.xlane.f32.xlu0 %v4923_v5  ;;  %v4612_v52 = vadd.s32 344, %v9267_v30 }
0x454c   :  { %v10444_v13 = vsel %vm4733_vm2, %v4548_v7, -1e+30  ;;  %vm4736_vm9 = vcmp.eq.s32.totalorder %v4671_v59, %v10230_v32  ;;  %vm4739_vm10 = vcmp.eq.s32.totalorder %v4674_v49, %v10230_v32 }
0x454d   :  { %v10447_v19 = vsel %vm4732_vm3, %v4547_v17, -1e+30  ;;  %v8090_v44 = vpop.f32.mrb[74].mxu1  ;;  %v4932_v31 = vsel %vm4826_vm14, %v10444_v13, -inf }
0x454e   :  { %v4550_v1 = vmul.f32 0.5, %v8090_v44  ;;  %v4374_v0 = vpop.f32.mrb[75].mxu1  ;;  %v4929_v55 = vsel %vm4826_vm14, %v10447_v19, -inf }
0x454f   :  { %v4549_v38 = vmul.f32 0.5, %v4374_v0  ;;  %4933 = vmax.xlane.f32.xlu1 %v4932_v31  ;;  %4930 = vmax.xlane.f32.xlu0 %v4929_v55  ;;  %v4611_v31 = vadd.s32 336, %v9267_v30 }
0x4550   :  { %v10456_v7 = vsel %vm4735_vm4, %v4550_v1, -1e+30  ;;  %v4673_v1 = vand.u32 7, %v4609_v18 }
0x4551   :  { %v10459_v60 = vsel %vm4734_vm11, %v4549_v38, -1e+30  ;;  %v8093_v14 = vpop.f32.mrb[76].mxu1  ;;  %v4938_v5 = vsel %vm4826_vm14, %v10456_v7, -inf }
0x4552   :  { %v4552_v17 = vmul.f32 0.5, %v8093_v14  ;;  %v4384_v44 = vpop.f32.mrb[77].mxu1  ;;  %v4935_v0 = vsel %vm4826_vm14, %v10459_v60, -inf  ;;  %v4676_v14 = vand.u32 7, %v4612_v52  ;;  %vm4738_vm13 = vcmp.eq.s32.totalorder %v4673_v1, %v10230_v32 }
0x4553   :  { %v4551_v45 = vmul.f32 0.5, %v4384_v44  ;;  %4939 = vmax.xlane.f32.xlu1 %v4938_v5  ;;  %4936 = vmax.xlane.f32.xlu0 %v4935_v0  ;;  %v4613_v0 = vadd.s32 352, %v9267_v30  ;;  %v4678_v1 = vand.u32 7, %v4614_v63 }
0x4554   :  { %v10468_v10 = vsel %vm4737_vm8, %v4552_v17, -1e+30  ;;  %v4675_v17 = vand.u32 7, %v4611_v31  ;;  %vm4741_vm15 = vcmp.eq.s32.totalorder %v4676_v14, %v10230_v32 }
0x4555   :  { %v10471_v59 = vsel %vm4736_vm9, %v4551_v45, -1e+30  ;;  %v8096_v55 = vpop.f32.mrb[78].mxu1  ;;  %v4944_v38 = vsel %vm4826_vm14, %v10468_v10, -inf  ;;  %vm4743_vm2 = vcmp.eq.s32.totalorder %v4678_v1, %v10230_v32 }
0x4556   :  { %11325 = vst [vmem:[#allocation20_spill] sm:$0xff] %v10471_v59  ;;  %v4554_v37 = vmul.f32 0.5, %v8096_v55  ;;  %v4394_v18 = vpop.f32.mrb[79].mxu1  ;;  %v4941_v5 = vsel %vm4826_vm14, %v10471_v59, -inf  ;;  %vm4740_vm1 = vcmp.eq.s32.totalorder %v4675_v17, %v10230_v32 }
0x4557   :  { %v4553_v44 = vmul.f32 0.5, %v4394_v18  ;;  %4945 = vmax.xlane.f32.xlu1 %v4944_v38  ;;  %4942 = vmax.xlane.f32.xlu0 %v4941_v5  ;;  %v4677_v18 = vand.u32 7, %v4613_v0  ;;  %v4616_v5 = vadd.s32 376, %v9267_v30 }
0x4558   :  { %v10479_v49 = vsel %vm4739_vm10, %v4554_v37, -1e+30 }
0x4559   :  { %v10482_v45 = vsel %vm4738_vm13, %v4553_v44, -1e+30  ;;  %v8099_v52 = vpop.f32.mrb[80].mxu1  ;;  %v4950_v55 = vsel %vm4826_vm14, %v10479_v49, -inf  ;;  %vm4742_vm3 = vcmp.eq.s32.totalorder %v4677_v18, %v10230_v32  ;;  %v4680_v0 = vand.u32 7, %v4616_v5 }
0x455a   :  { %11326 = vst [vmem:[#allocation21_spill] sm:$0xff] %v10482_v45  ;;  %v4556_v47 = vmul.f32 0.5, %v8099_v52  ;;  %v4404_v36 = vpop.f32.mrb[81].mxu1  ;;  %v4947_v31 = vsel %vm4826_vm14, %v10482_v45, -inf  ;;  %v4618_v18 = vadd.s32 392, %v9267_v30 }
0x455b   :  { %v4555_v37 = vmul.f32 0.5, %v4404_v36  ;;  %4951 = vmax.xlane.f32.xlu1 %v4950_v55  ;;  %4948 = vmax.xlane.f32.xlu0 %v4947_v31  ;;  %v4615_v31 = vadd.s32 368, %v9267_v30  ;;  %vm4745_vm4 = vcmp.eq.s32.totalorder %v4680_v0, %v10230_v32 }
0x455c   :  { %v10490_v38 = vsel %vm4741_vm15, %v4556_v47, -1e+30 }
0x455d   :  { %v10493_v14 = vsel %vm4740_vm1, %v4555_v37, -1e+30  ;;  %v8102_v44 = vpop.f32.mrb[82].mxu1  ;;  %v4956_v63 = vsel %vm4826_vm14, %v10490_v38, -inf }
0x455e   :  { %11327 = vst [vmem:[#allocation22_spill] sm:$0xff] %v10493_v14  ;;  %v4558_v17 = vmul.f32 0.5, %v8102_v44  ;;  %v4414_v52 = vpop.f32.mrb[83].mxu1  ;;  %v4953_v36 = vsel %vm4826_vm14, %v10493_v14, -inf  ;;  %v4620_v44 = vadd.s32 408, %v9267_v30 }
0x455f   :  { %v4557_v55 = vmul.f32 0.5, %v4414_v52  ;;  %4957 = vmax.xlane.f32.xlu1 %v4956_v63  ;;  %4954 = vmax.xlane.f32.xlu0 %v4953_v36  ;;  %v4619_v63 = vadd.s32 400, %v9267_v30 }
0x4560   :  { %v10500_v47 = vsel %vm4743_vm2, %v4558_v17, -1e+30  ;;  %v4679_v17 = vand.u32 7, %v4615_v31  ;;  %v4684_v52 = vand.u32 7, %v4620_v44  ;;  %v4624_v31 = vadd.s32 440, %v9267_v30 }
0x4561   :  { %11328 = vst [vmem:[#allocation23_spill] sm:$0xff] %v10500_v47  ;;  %v8105_v37 = vpop.f32.mrb[84].mxu1  ;;  %v4962_v1 = vsel %vm4826_vm14, %v10500_v47, -inf  ;;  %v10507_v12 = vsel %vm4742_vm3, %v4557_v55, -1e+30  ;;  %v4683_v55 = vand.u32 7, %v4619_v63 }
0x4562   :  { %v4424_v41 = vpop.f32.mrb[85].mxu1  ;;  %11329 = vst [vmem:[#allocation24_spill] sm:$0xff] %v10507_v12  ;;  %v4560_v53 = vmul.f32 0.5, %v8105_v37  ;;  %v4959_v15 = vsel %vm4826_vm14, %v10507_v12, -inf  ;;  %vm4744_vm11 = vcmp.eq.s32.totalorder %v4679_v17, %v10230_v32  ;;  %v4682_v37 = vand.u32 7, %v4618_v18 }
0x4563   :  { %4963 = vmax.xlane.f32.xlu0 %v4962_v1  ;;  %v4559_v14 = vmul.f32 0.5, %v4424_v41  ;;  %v4617_v1 = vadd.s32 384, %v9267_v30  ;;  %vm4749_vm8 = vcmp.eq.s32.totalorder %v4684_v52, %v10230_v32  ;;  %vm4748_vm9 = vcmp.eq.s32.totalorder %v4683_v55, %v10230_v32 }
0x4564   :  { %v10514_v20 = vsel %vm4745_vm4, %v4560_v53, -1e+30  ;;  %v4623_v53 = vadd.s32 432, %v9267_v30  ;;  %vm4747_vm10 = vcmp.eq.s32.totalorder %v4682_v37, %v10230_v32  ;;  %v4622_v52 = vadd.s32 424, %v9267_v30 }
0x4565   :  { %v8108_v5 = vpop.f32.mrb[86].mxu1  ;;  %11330 = vst [vmem:[#allocation25_spill] sm:$0xff] %v10514_v20  ;;  %v4968_v12 = vsel %vm4826_vm14, %v10514_v20, -inf  ;;  %v10523_v41 = vsel %vm4744_vm11, %v4559_v14, -1e+30  ;;  %v4681_v17 = vand.u32 7, %v4617_v1 }
0x4566   :  { %v4434_v36 = vpop.f32.mrb[87].mxu1  ;;  %11331 = vst [vmem:[#allocation26_spill] sm:$0xff] %v10523_v41  ;;  %v4688_v59 = vand.u32 7, %v4624_v31  ;;  %v4686_v1 = vand.u32 7, %v4622_v52 }
0x4567   :  { %4960 = vmax.xlane.f32.xlu0 %v4959_v15  ;;  %v4562_v15 = vmul.f32 0.5, %v8108_v5  ;;  %v4626_v5 = vadd.s32 456, %v9267_v30  ;;  %v4561_v37 = vmul.f32 0.5, %v4434_v36  ;;  %vm4746_vm13 = vcmp.eq.s32.totalorder %v4681_v17, %v10230_v32 }
0x4568   :  { %vm4753_vm15 = vcmp.eq.s32.totalorder %v4688_v59, %v10230_v32  ;;  %vm4751_vm2 = vcmp.eq.s32.totalorder %v4686_v1, %v10230_v32 }
0x4569   :  { %v8111_v0 = vpop.f32.mrb[88].mxu1  ;;  %v10537_v55 = vsel %vm4747_vm10, %v4562_v15, -1e+30  ;;  %v4690_v15 = vand.u32 7, %v4626_v5 }
0x456a   :  { %v4564_v44 = vmul.f32 0.5, %v8111_v0  ;;  %v4444_v45 = vpop.f32.mrb[89].mxu1  ;;  %11333 = vst [vmem:[#allocation28_spill] sm:$0xff] %v10537_v55  ;;  %v4974_v36 = vsel %vm4826_vm14, %v10537_v55, -inf }
0x456b   :  { %v4563_v63 = vmul.f32 0.5, %v4444_v45  ;;  %4969 = vmax.xlane.f32.xlu0 %v4968_v12  ;;  %v4965_v45 = vsel %vm4826_vm14, %v10523_v41, -inf  ;;  %v4687_v12 = vand.u32 7, %v4623_v53  ;;  %v4625_v41 = vadd.s32 448, %v9267_v30 }
0x456c   :  { %v10527_v18 = vsel %vm4749_vm8, %v4564_v44, -1e+30  ;;  %v4621_v44 = vadd.s32 416, %v9267_v30  ;;  %vm4755_vm3 = vcmp.eq.s32.totalorder %v4690_v15, %v10230_v32 }
0x456d   :  { %v8114_v0 = vpop.f32.mrb[90].mxu1  ;;  %v4980_v20 = vsel %vm4826_vm14, %v10527_v18, -inf  ;;  %v10532_v47 = vsel %vm4748_vm9, %v4563_v63, -1e+30  ;;  %vm4752_vm1 = vcmp.eq.s32.totalorder %v4687_v12, %v10230_v32 }
0x456e   :  { %11332 = vst [vmem:[#allocation27_spill] sm:$0xff] %v10532_v47  ;;  %4981 = vmax.xlane.f32.xlu1 %v4980_v20  ;;  %v4454_v14 = vpop.f32.mrb[91].mxu1  ;;  %v4977_v20 = vsel %vm4826_vm14, %v10532_v47, -inf  ;;  %v4566_v17 = vmul.f32 0.5, %v8114_v0  ;;  %v4685_v59 = vand.u32 7, %v4621_v44  ;;  %v4689_v44 = vand.u32 7, %v4625_v41 }
0x456f   :  { %4966 = vmax.xlane.f32.xlu0 %v4965_v45  ;;  %v10547_v45 = vsel %vm4746_vm13, %v4561_v37, -1e+30  ;;  %v4565_v1 = vmul.f32 0.5, %v4454_v14  ;;  %v4627_v14 = vadd.s32 464, %v9267_v30 }
0x4570   :  { %v4971_v5 = vsel %vm4826_vm14, %v10547_v45, -inf  ;;  %v10560_v37 = vsel %vm4751_vm2, %v4566_v17, -1e+30  ;;  %vm4750_vm4 = vcmp.eq.s32.totalorder %v4685_v59, %v10230_v32  ;;  %vm4754_vm11 = vcmp.eq.s32.totalorder %v4689_v44, %v10230_v32 }
0x4571   :  { %v8117_v31 = vpop.f32.mrb[92].mxu1  ;;  %v4986_v17 = vsel %vm4826_vm14, %v10560_v37, -inf  ;;  %v4630_v44 = vadd.s32 488, %v9267_v30 }
0x4572   :  { %v4568_v63 = vmul.f32 0.5, %v8117_v31  ;;  %4978 = vmax.xlane.f32.xlu1 %v4977_v20  ;;  %v4464_v53 = vpop.f32.mrb[93].mxu1 }
0x4573   :  { %v4567_v52 = vmul.f32 0.5, %v4464_v53  ;;  %4975 = vmax.xlane.f32.xlu0 %v4974_v36 }
0x4574   :  { %v10551_v47 = vsel %vm4753_vm15, %v4568_v63, -1e+30  ;;  %v4628_v63 = vadd.s32 472, %v9267_v30 }
0x4575   :  { %v8120_v31 = vpop.f32.mrb[94].mxu1  ;;  %v4992_v12 = vsel %vm4826_vm14, %v10551_v47, -inf  ;;  %v10555_v20 = vsel %vm4752_vm1, %v4567_v52, -1e+30 }
0x4576   :  { %11334 = vst [vmem:[#allocation29_spill] sm:$0xff] %v10555_v20  ;;  %v4570_v55 = vmul.f32 0.5, %v8120_v31  ;;  %4993 = vmax.xlane.f32.xlu1 %v4992_v12  ;;  %v4474_v0 = vpop.f32.mrb[95].mxu1  ;;  %v4989_v36 = vsel %vm4826_vm14, %v10555_v20, -inf  ;;  %v10570_v12 = vsel %vm4750_vm4, %v4565_v1, -1e+30 }
0x4577   :  { %4972 = vmax.xlane.f32.xlu0 %v4971_v5  ;;  %v4569_v15 = vmul.f32 0.5, %v4474_v0  ;;  %11336 = vst [vmem:[#allocation31_spill] sm:$0xff] %v10570_v12  ;;  %v4692_v41 = vand.u32 7, %v4628_v63  ;;  %v4983_v20 = vsel %vm4826_vm14, %v10570_v12, -inf  ;;  %v4691_v1 = vand.u32 7, %v4627_v14 }
0x4578   :  { %v10566_v52 = vsel %vm4755_vm3, %v4570_v55, -1e+30 }
0x4579   :  { %v8123_v53 = vpop.f32.mrb[96].mxu1  ;;  %11335 = vst [vmem:[#allocation30_spill] sm:$0xff] %v10566_v52  ;;  %v4998_v5 = vsel %vm4826_vm14, %v10566_v52, -inf  ;;  %v10576_v55 = vsel %vm4754_vm11, %v4569_v15, -1e+30  ;;  %vm4757_vm8 = vcmp.eq.s32.totalorder %v4692_v41, %v10230_v32  ;;  %vm4756_vm9 = vcmp.eq.s32.totalorder %v4691_v1, %v10230_v32 }
0x457a   :  { %4990 = vmax.xlane.f32.xlu1 %v4989_v36  ;;  %v4484_v31 = vpop.f32.mrb[97].mxu1  ;;  %11337 = vst [vmem:[#allocation32_spill] sm:$0xff] %v10576_v55  ;;  %v4572_v0 = vmul.f32 0.5, %v8123_v53  ;;  %v4629_v41 = vadd.s32 480, %v9267_v30 }
0x457b   :  { %4987 = vmax.xlane.f32.xlu0 %v4986_v17  ;;  %v4995_v17 = vsel %vm4826_vm14, %v10576_v55, -inf  ;;  %v4571_v15 = vmul.f32 0.5, %v4484_v31 }
0x457c   :  { %v10586_v52 = vsel %vm4757_vm8, %v4572_v0, -1e+30  ;;  %v4693_v0 = vand.u32 7, %v4629_v41 }
0x457d   :  { %v8126_v59 = vpop.f32.mrb[98].mxu1  ;;  %11338 = vst [vmem:[#allocation33_spill] sm:$0xff] %v10586_v52  ;;  %v5004_v14 = vsel %vm4826_vm14, %v10586_v52, -inf }
0x457e   :  { %4999 = vmax.xlane.f32.xlu1 %v4998_v5  ;;  %v4494_v36 = vpop.f32.mrb[99].mxu1  ;;  %v4694_v5 = vand.u32 7, %v4630_v44  ;;  %v4574_v12 = vmul.f32 0.5, %v8126_v59  ;;  %vm4758_vm13 = vcmp.eq.s32.totalorder %v4693_v0, %v10230_v32 }
0x457f   :  { %4984 = vmax.xlane.f32.xlu0 %v4983_v20  ;;  %v10594_v20 = vsel %vm4756_vm9, %v4571_v15, -1e+30  ;;  %v4573_v55 = vmul.f32 0.5, %v4494_v36 }
0x4580   :  { %11339 = vst [vmem:[#allocation34_spill] sm:$0xff] %v10594_v20  ;;  %vm4759_vm10 = vcmp.eq.s32.totalorder %v4694_v5, %v10230_v32  ;;  %v5001_v31 = vsel %vm4826_vm14, %v10594_v20, -inf }
0x4581   :  { %v10582_v63 = vpop.f32.mrb[100].mxu1  ;;  %v10604_v44 = vsel %vm4758_vm13, %v4573_v55, -1e+30 }
0x4582   :  { %4996 = vmax.xlane.f32.xlu1 %v4995_v17  ;;  %v10588_v53 = vpop.f32.mrb[101].mxu1  ;;  %v10599_v17 = vsel %vm4759_vm10, %v4574_v12, -1e+30  ;;  %11341 = vst [vmem:[#allocation36_spill] sm:$0xff] %v10604_v44  ;;  %v5007_v59 = vsel %vm4826_vm14, %v10604_v44, -inf }
0x4583   :  { %11340 = vst [vmem:[#allocation35_spill] sm:$0xff] %v10599_v17  ;;  %v5010_v1 = vsel %vm4826_vm14, %v10599_v17, -inf }
0x4586   :  { %5005 = vmax.xlane.f32.xlu1 %v5004_v14 }
0x458a   :  { %5002 = vmax.xlane.f32.xlu1 %v5001_v31 }
0x458e   :  { %5011 = vmax.xlane.f32.xlu1 %v5010_v1 }
0x4592   :  { %5008 = vmax.xlane.f32.xlu1 %v5007_v59 }
0x4597   :  { %v4832_v15 = vpop.xlane.xlu0 %4831 }
0x4598   :  { %v5020_v5 = vsub.f32 %v10238_v2, %v4832_v15  ;;  %v4829_v41 = vpop.xlane.xlu1 %4828 }
0x4599   :  { %v5019_v12 = vsub.f32 %v10241_v9, %v4829_v41 }
0x459a   :  { %v5085_v36 = vmul.f32 1.442695, %v5020_v5 }
0x459b   :  { %v5083_v14 = vmul.f32 1.442695, %v5019_v12 }
0x459c   :  { %8778 = vpow2.f32 %v5085_v36  ;;  %v4838_v0 = vpop.xlane.xlu1 %4837  ;;  %v4835_v31 = vpop.xlane.xlu0 %4834 }
0x459d   :  { %v5022_v20 = vsub.f32 %v10250_v21, %v4838_v0  ;;  %8780 = vpow2.f32 %v5083_v14  ;;  %v5021_v55 = vsub.f32 %v10254_v24, %v4835_v31 }
0x459f   :  { %v5089_v1 = vmul.f32 1.442695, %v5022_v20  ;;  %v5087_v59 = vmul.f32 1.442695, %v5021_v55 }
0x45a0   :  { %v4844_v17 = vpop.xlane.xlu1 %4843  ;;  %v4841_v44 = vpop.xlane.xlu0 %4840 }
0x45a1   :  { %8782 = vpow2.f32 %v5089_v1  ;;  %v5024_v2 = vsub.f32 %v10264_v46, %v4844_v17  ;;  %v5023_v41 = vsub.f32 %v10267_v16, %v4841_v44 }
0x45a2   :  { %8784 = vpow2.f32 %v5087_v59 }
0x45a3   :  { %v5093_v5 = vmul.f32 1.442695, %v5024_v2  ;;  %v5091_v46 = vmul.f32 1.442695, %v5023_v41 }
0x45a4   :  { %v4850_v15 = vpop.xlane.xlu1 %4849  ;;  %v4847_v52 = vpop.xlane.xlu0 %4846 }
0x45a5   :  { %8786 = vpow2.f32 %v5093_v5  ;;  %v5026_v17 = vsub.f32 %v10276_v57, %v4850_v15  ;;  %v5025_v55 = vsub.f32 %v10279_v42, %v4847_v52 }
0x45a6   :  { %v10613_v9 = vpop.eup %8778 }
0x45a7   :  { %v5214_v21 = vsel %vm4826_vm14, %v10613_v9, 0.0  ;;  %v10618_v12 = vpop.eup %8780  ;;  %v5097_v1 = vmul.f32 1.442695, %v5026_v17  ;;  %v5095_v15 = vmul.f32 1.442695, %v5025_v55 }
0x45a8   :  { %v4856_v24 = vpop.xlane.xlu1 %4855  ;;  %v4853_v20 = vpop.xlane.xlu0 %4852  ;;  %5215 = vadd.xlane.f32.xlu1 %v5214_v21  ;;  %v5211_v0 = vsel %vm4826_vm14, %v10618_v12, 0.0 }
0x45a9   :  { %v5028_v36 = vsub.f32 %v10288_v39, %v4856_v24  ;;  %v5027_v41 = vsub.f32 %v10292_v56, %v4853_v20 }
0x45ab   :  { %v5101_v14 = vmul.f32 1.442695, %v5028_v36  ;;  %v10624_v31 = vpop.eup %8782 }
0x45ac   :  { %v4862_v16 = vpop.xlane.xlu1 %4861  ;;  %v4859_v44 = vpop.xlane.xlu0 %4858  ;;  %5212 = vadd.xlane.f32.xlu1 %v5211_v0  ;;  %v5220_v39 = vsel %vm4826_vm14, %v10624_v31, 0.0 }
0x45ad   :  { %8788 = vpow2.f32 %v5101_v14  ;;  %v10629_v59 = vpop.eup %8784  ;;  %v5030_v17 = vsub.f32 %v10300_v22, %v4862_v16  ;;  %v5029_v16 = vsub.f32 %v10303_v25, %v4859_v44 }
0x45ae   :  { %8790 = vpow2.f32 %v5091_v46  ;;  %v5217_v42 = vsel %vm4826_vm14, %v10629_v59, 0.0  ;;  %v5099_v46 = vmul.f32 1.442695, %v5027_v41 }
0x45af   :  { %8792 = vpow2.f32 %v5097_v1  ;;  %v10635_v52 = vpop.eup %8786  ;;  %v5105_v22 = vmul.f32 1.442695, %v5030_v17 }
0x45b0   :  { %v4868_v57 = vpop.xlane.xlu1 %4867  ;;  %v4865_v2 = vpop.xlane.xlu0 %4864  ;;  %5221 = vadd.xlane.f32.xlu1 %v5220_v39  ;;  %8794 = vpow2.f32 %v5095_v15  ;;  %v5226_v56 = vsel %vm4826_vm14, %v10635_v52, 0.0 }
0x45b1   :  { %v5031_v5 = vsub.f32 %v10315_v40, %v4865_v2 }
0x45b3   :  { %v5107_v21 = vmul.f32 1.442695, %v5031_v5 }
0x45b4   :  { %v4874_v24 = vpop.xlane.xlu1 %4873  ;;  %v10637_v36 = vpop.xlane.xlu0 %4870  ;;  %5218 = vadd.xlane.f32.xlu1 %v5217_v42 }
0x45b5   :  { %8796 = vpow2.f32 %v5107_v21 }
0x45b6   :  { %8798 = vpow2.f32 %v5099_v46  ;;  %v5032_v46 = vsub.f32 %v10312_v50, %v4868_v57  ;;  %v5034_v57 = vsub.f32 %v10324_v58, %v4874_v24 }
0x45b7   :  { %v10640_v14 = vpop.eup %8788 }
0x45b8   :  { %v10644_v40 = vpop.eup %8790  ;;  %v4880_v20 = vpop.xlane.xlu1 %4879  ;;  %5227 = vadd.xlane.f32.xlu1 %v5226_v56  ;;  %v5238_v55 = vsel %vm4826_vm14, %v10640_v14, 0.0  ;;  %v5109_v50 = vmul.f32 1.442695, %v5032_v46 }
0x45b9   :  { %v4877_v0 = vpop.xlane.xlu0 %4876  ;;  %v5036_v1 = vsub.f32 %v10336_v43, %v4880_v20  ;;  %5239 = vadd.xlane.f32.xlu0 %v5238_v55  ;;  %v5223_v5 = vsel %vm4826_vm14, %v10644_v40, 0.0  ;;  %v10653_v41 = vpop.eup %8792 }
0x45ba   :  { %v5035_v39 = vsub.f32 %v10339_v54, %v4877_v0  ;;  %v5103_v54 = vmul.f32 1.442695, %v5029_v16  ;;  %v10657_v17 = vpop.eup %8794  ;;  %v5232_v56 = vsel %vm4826_vm14, %v10653_v41, 0.0 }
0x45bb   :  { %v5117_v2 = vmul.f32 1.442695, %v5036_v1 }
0x45bc   :  { %v5115_v15 = vmul.f32 1.442695, %v5035_v39  ;;  %v4886_v21 = vpop.xlane.xlu1 %4885  ;;  %5224 = vadd.xlane.f32.xlu1 %v5223_v5  ;;  %v5229_v39 = vsel %vm4826_vm14, %v10657_v17, 0.0  ;;  %v5033_v5 = vsub.f32 %v10328_v51, %v10637_v36 }
0x45bd   :  { %v4883_v42 = vpop.xlane.xlu0 %4882  ;;  %8800 = vpow2.f32 %v5117_v2  ;;  %v5038_v25 = vsub.f32 %v10348_v33, %v4886_v21 }
0x45be   :  { %v5037_v43 = vsub.f32 %v10351_v11, %v4883_v42  ;;  %8802 = vpow2.f32 %v5105_v22  ;;  %v5111_v51 = vmul.f32 1.442695, %v5033_v5 }
0x45bf   :  { %8804 = vpow2.f32 %v5115_v15  ;;  %v10662_v20 = vpop.eup %8796  ;;  %v5121_v1 = vmul.f32 1.442695, %v5038_v25  ;;  %v5113_v15 = vmul.f32 1.442695, %v5034_v57 }
0x45c0   :  { %v5119_v44 = vmul.f32 1.442695, %v5037_v43  ;;  %v4892_v0 = vpop.xlane.xlu1 %4891  ;;  %5233 = vadd.xlane.f32.xlu1 %v5232_v56  ;;  %v5247_v11 = vsel %vm4826_vm14, %v10662_v20, 0.0  ;;  %8806 = vpow2.f32 %v5103_v54  ;;  %v10672_v22 = vpop.eup %8798 }
0x45c1   :  { %v10664_v55 = vpop.xlane.xlu0 %4888  ;;  %5248 = vadd.xlane.f32.xlu0 %v5247_v11  ;;  %v5040_v33 = vsub.f32 %v10360_v28, %v4892_v0  ;;  %v5235_v21 = vsel %vm4826_vm14, %v10672_v22, 0.0 }
0x45c2   :  { %8808 = vpow2.f32 %v5119_v44 }
0x45c3   :  { %8810 = vpow2.f32 %v5109_v50  ;;  %v5125_v24 = vmul.f32 1.442695, %v5040_v33 }
0x45c4   :  { %v4898_v16 = vpop.xlane.xlu1 %4897  ;;  %5230 = vadd.xlane.f32.xlu1 %v5229_v39  ;;  %8812 = vpow2.f32 %v5121_v1 }
0x45c5   :  { %v10674_v2 = vpop.xlane.xlu0 %4894  ;;  %v5042_v28 = vsub.f32 %v10372_v27, %v4898_v16  ;;  %8814 = vpow2.f32 %v5113_v15 }
0x45c6   :  { %8816 = vpow2.f32 %v5125_v24 }
0x45c7   :  { %v10678_v58 = vpop.eup %8800  ;;  %v5129_v36 = vmul.f32 1.442695, %v5042_v28  ;;  %8818 = vpow2.f32 %v5111_v51  ;;  %v4631_v28 = vadd.s32 496, %v9267_v30 }
0x45c8   :  { %v10683_v42 = vpop.eup %8802  ;;  %v4904_v43 = vpop.xlane.xlu1 %4903  ;;  %5236 = vadd.xlane.f32.xlu1 %v5235_v21  ;;  %v5262_v46 = vsel %vm4826_vm14, %v10678_v58, 0.0 }
0x45c9   :  { %v10685_v54 = vpop.xlane.xlu0 %4900  ;;  %v10689_v25 = vpop.eup %8804  ;;  %5263 = vadd.xlane.f32.xlu0 %v5262_v46  ;;  %v5044_v27 = vsub.f32 %v10384_v34, %v4904_v43  ;;  %v5244_v44 = vsel %vm4826_vm14, %v10683_v42, 0.0  ;;  %8820 = vpow2.f32 %v5129_v36 }
0x45ca   :  { %v10694_v56 = vpop.eup %8806  ;;  %v5259_v50 = vsel %vm4826_vm14, %v10689_v25, 0.0 }
0x45cb   :  { %v5133_v1 = vmul.f32 1.442695, %v5044_v27  ;;  %v5241_v33 = vsel %vm4826_vm14, %v10694_v56, 0.0 }
0x45cc   :  { %v4910_v0 = vpop.xlane.xlu1 %4909  ;;  %5245 = vadd.xlane.f32.xlu1 %v5244_v44  ;;  %v10700_v57 = vpop.eup %8808 }
0x45cd   :  { %v10696_v11 = vpop.xlane.xlu0 %4906  ;;  %5260 = vadd.xlane.f32.xlu0 %v5259_v50  ;;  %v5046_v34 = vsub.f32 %v10396_v26, %v4910_v0  ;;  %v10705_v39 = vpop.eup %8810  ;;  %v5265_v5 = vsel %vm4826_vm14, %v10700_v57, 0.0  ;;  %v5039_v26 = vsub.f32 %v10364_v29, %v10664_v55  ;;  %8822 = vpow2.f32 %v5133_v1 }
0x45ce   :  { %v10711_v24 = vpop.eup %8812  ;;  %v5250_v46 = vsel %vm4826_vm14, %v10705_v39, 0.0  ;;  %v4632_v29 = vadd.s32 504, %v9267_v30  ;;  %v4695_v55 = vand.u32 7, %v4631_v28 }
0x45cf   :  { %11342 = vst [vmem:[#allocation37_spill] sm:$0xff] %v10711_v24  ;;  %v5137_v21 = vmul.f32 1.442695, %v5046_v34  ;;  %v10719_v51 = vpop.eup %8814  ;;  %v5268_v44 = vsel %vm4826_vm14, %v10711_v24, 0.0  ;;  %v5123_v50 = vmul.f32 1.442695, %v5039_v26 }
0x45d0   :  { %v4916_v16 = vpop.xlane.xlu1 %4915  ;;  %5242 = vadd.xlane.f32.xlu1 %v5241_v33  ;;  %v10725_v0 = vpop.eup %8816  ;;  %v5256_v33 = vsel %vm4826_vm14, %v10719_v51, 0.0  ;;  %vm4760_vm15 = vcmp.eq.s32.totalorder %v4695_v55, %v10230_v32 }
0x45d1   :  { %v10707_v15 = vpop.xlane.xlu0 %4912  ;;  %5266 = vadd.xlane.f32.xlu0 %v5265_v5  ;;  %v5048_v43 = vsub.f32 %v10408_v3, %v4916_v16  ;;  %v5041_v3 = vsub.f32 %v10375_v61, %v10674_v2  ;;  %8824 = vpow2.f32 %v5137_v21  ;;  %v10733_v16 = vpop.eup %8818  ;;  %v4575_v5 = vmul.f32 0.5, %v10588_v53 }
0x45d2   :  { %v5274_v30 = vsel %vm4826_vm14, %v10725_v0, 0.0  ;;  %v4696_v61 = vand.u32 7, %v4632_v29  ;;  %8826 = vpow2.f32 %v5123_v50  ;;  %v5043_v2 = vsub.f32 %v10387_v6, %v10685_v54 }
0x45d3   :  { %v5141_v1 = vmul.f32 1.442695, %v5048_v43  ;;  %v10740_v28 = vpop.eup %8820  ;;  %v5253_v21 = vsel %vm4826_vm14, %v10733_v16, 0.0  ;;  %v4576_v43 = vmul.f32 0.5, %v10582_v63 }
0x45d4   :  { %v4922_v36 = vpop.xlane.xlu1 %4921  ;;  %5251 = vadd.xlane.f32.xlu1 %v5250_v46  ;;  %v5280_v55 = vsel %vm4826_vm14, %v10740_v28, 0.0  ;;  %vm4761_vm1 = vcmp.eq.s32.totalorder %v4696_v61, %v10230_v32  ;;  %v5131_v6 = vmul.f32 1.442695, %v5043_v2 }
0x45d5   :  { %v10721_v27 = vpop.xlane.xlu0 %4918  ;;  %5269 = vadd.xlane.f32.xlu0 %v5268_v44  ;;  %v5050_v34 = vsub.f32 %v10420_v48, %v4922_v36  ;;  %v5127_v48 = vmul.f32 1.442695, %v5041_v3  ;;  %8828 = vpow2.f32 %v5141_v1  ;;  %v10749_v36 = vsel %vm4760_vm15, %v4575_v5, -1e+30 }
0x45d6   :  { %v5013_v3 = vsel %vm4826_vm14, %v10749_v36, -inf  ;;  %v10763_v1 = vsel %vm4761_vm1, %v4576_v43, -1e+30 }
0x45d7   :  { %v5145_v53 = vmul.f32 1.442695, %v5050_v34  ;;  %v10755_v50 = vpop.eup %8822  ;;  %8830 = vpow2.f32 %v5127_v48 }
0x45d8   :  { %v4928_v46 = vpop.xlane.xlu1 %4927  ;;  %5257 = vadd.xlane.f32.xlu1 %v5256_v33  ;;  %v5286_v32 = vsel %vm4826_vm14, %v10755_v50, 0.0 }
0x45d9   :  { %v10736_v24 = vpop.xlane.xlu0 %4924  ;;  %5275 = vadd.xlane.f32.xlu0 %v5274_v30  ;;  %v5052_v26 = vsub.f32 %v10432_v62, %v4928_v46  ;;  %v5045_v62 = vsub.f32 %v10400_v8, %v10696_v11  ;;  %8832 = vpow2.f32 %v5145_v53  ;;  %v5016_v30 = vsel %vm4826_vm14, %v10763_v1, -inf }
0x45da   :  { %8834 = vpow2.f32 %v5131_v6 }
0x45db   :  { %v5149_v63 = vmul.f32 1.442695, %v5052_v26  ;;  %v10769_v5 = vpop.eup %8824  ;;  %v5135_v8 = vmul.f32 1.442695, %v5045_v62 }
0x45dc   :  { %v4934_v44 = vpop.xlane.xlu1 %4933  ;;  %5254 = vadd.xlane.f32.xlu1 %v5253_v21  ;;  %v10776_v61 = vpop.eup %8826  ;;  %v5292_v53 = vsel %vm4826_vm14, %v10769_v5, 0.0 }
0x45dd   :  { %v10751_v29 = vpop.xlane.xlu0 %4930  ;;  %5281 = vadd.xlane.f32.xlu0 %v5280_v55  ;;  %v5054_v54 = vsub.f32 %v10444_v13, %v4934_v44  ;;  %v5047_v13 = vsub.f32 %v10411_v35, %v10707_v15  ;;  %8836 = vpow2.f32 %v5149_v63  ;;  %v5271_v43 = vsel %vm4826_vm14, %v10776_v61, 0.0 }
0x45de   :  { %8838 = vpow2.f32 %v5135_v8 }
0x45df   :  { %v5153_v11 = vmul.f32 1.442695, %v5054_v54  ;;  %v10782_v26 = vpop.eup %8828  ;;  %v5139_v35 = vmul.f32 1.442695, %v5047_v13 }
0x45e0   :  { %v4940_v34 = vpop.xlane.xlu1 %4939  ;;  %5014 = vmax.xlane.f32.xlu1 %v5013_v3  ;;  %v5298_v62 = vsel %vm4826_vm14, %v10782_v26, 0.0 }
0x45e1   :  { %v10765_v33 = vpop.xlane.xlu0 %4936  ;;  %5287 = vadd.xlane.f32.xlu0 %v5286_v32  ;;  %v5056_v46 = vsub.f32 %v10456_v7, %v4940_v34  ;;  %v5049_v7 = vsub.f32 %v10423_v4, %v10721_v27  ;;  %8840 = vpow2.f32 %v5153_v11  ;;  %v10789_v44 = vpop.eup %8830 }
0x45e2   :  { %8842 = vpow2.f32 %v5139_v35  ;;  %v5277_v3 = vsel %vm4826_vm14, %v10789_v44, 0.0 }
0x45e3   :  { %v5157_v15 = vmul.f32 1.442695, %v5056_v46  ;;  %v10795_v63 = vpop.eup %8832  ;;  %v5143_v4 = vmul.f32 1.442695, %v5049_v7 }
0x45e4   :  { %v4946_v48 = vpop.xlane.xlu1 %4945  ;;  %5017 = vmax.xlane.f32.xlu1 %v5016_v30  ;;  %v10802_v34 = vpop.eup %8834  ;;  %v5304_v13 = vsel %vm4826_vm14, %v10795_v63, 0.0 }
0x45e5   :  { %v10778_v2 = vpop.xlane.xlu0 %4942  ;;  %5293 = vadd.xlane.f32.xlu0 %v5292_v53  ;;  %v5058_v21 = vsub.f32 %v10468_v10, %v4946_v48  ;;  %v5051_v10 = vsub.f32 %v10436_v23, %v10736_v24  ;;  %8844 = vpow2.f32 %v5157_v15  ;;  %v5283_v30 = vsel %vm4826_vm14, %v10802_v34, 0.0 }
0x45e6   :  { %8846 = vpow2.f32 %v5143_v4 }
0x45e7   :  { %v5161_v27 = vmul.f32 1.442695, %v5058_v21  ;;  %v10808_v11 = vpop.eup %8836  ;;  %v5147_v23 = vmul.f32 1.442695, %v5051_v10 }
0x45e8   :  { %v4952_v55 = vpop.xlane.xlu1 %4951  ;;  %5272 = vadd.xlane.f32.xlu1 %v5271_v43  ;;  %v10815_v48 = vpop.eup %8838  ;;  %v5310_v35 = vsel %vm4826_vm14, %v10808_v11, 0.0 }
0x45e9   :  { %v10791_v6 = vpop.xlane.xlu0 %4948  ;;  %5299 = vadd.xlane.f32.xlu0 %v5298_v62  ;;  %v5060_v54 = vsub.f32 %v10479_v49, %v4952_v55  ;;  %v5053_v49 = vsub.f32 %v10447_v19, %v10751_v29  ;;  %8848 = vpow2.f32 %v5161_v27  ;;  %v5055_v19 = vsub.f32 %v10459_v60, %v10765_v33  ;;  %v11343_v29 = vld [vmem:[#allocation23_spill] sm:$0xff]  ;;  %v11344_v60 = vld [vmem:[#allocation20_spill] sm:$0xff] }
0x45ea   :  { %8850 = vpow2.f32 %v5147_v23  ;;  %v5289_v43 = vsel %vm4826_vm14, %v10815_v48, 0.0  ;;  %v5057_v33 = vsub.f32 %v11344_v60, %v10778_v2  ;;  %v11346_v2 = vld [vmem:[#allocation21_spill] sm:$0xff] }
0x45eb   :  { %v5165_v24 = vmul.f32 1.442695, %v5060_v54  ;;  %v10819_v7 = vpop.eup %8840  ;;  %v5151_v15 = vmul.f32 1.442695, %v5053_v49  ;;  %v5155_v27 = vmul.f32 1.442695, %v5055_v19 }
0x45ec   :  { %v4958_v32 = vpop.xlane.xlu1 %4957  ;;  %5278 = vadd.xlane.f32.xlu1 %v5277_v3  ;;  %v10826_v55 = vpop.eup %8842  ;;  %v5316_v4 = vsel %vm4826_vm14, %v10819_v7, 0.0 }
0x45ed   :  { %v10804_v8 = vpop.xlane.xlu0 %4954  ;;  %5305 = vadd.xlane.f32.xlu0 %v5304_v13  ;;  %v5062_v46 = vsub.f32 %v10490_v38, %v4958_v32  ;;  %8852 = vpow2.f32 %v5165_v24  ;;  %v5295_v3 = vsel %vm4826_vm14, %v10826_v55, 0.0  ;;  %v11345_v24 = vld [vmem:[#allocation25_spill] sm:$0xff] }
0x45ee   :  { %8854 = vpow2.f32 %v5151_v15 }
0x45ef   :  { %v5169_v38 = vmul.f32 1.442695, %v5062_v46  ;;  %v10830_v10 = vpop.eup %8844 }
0x45f0   :  { %5284 = vadd.xlane.f32.xlu1 %v5283_v30  ;;  %v10836_v32 = vpop.eup %8846  ;;  %v5322_v23 = vsel %vm4826_vm14, %v10830_v10, 0.0  ;;  %v5159_v30 = vmul.f32 1.442695, %v5057_v33 }
0x45f1   :  { %v4964_v53 = vpop.xlane.xlu0 %4963  ;;  %5311 = vadd.xlane.f32.xlu0 %v5310_v35  ;;  %8856 = vpow2.f32 %v5169_v38  ;;  %v5301_v19 = vsel %vm4826_vm14, %v10836_v32, 0.0 }
0x45f2   :  { %v5064_v21 = vsub.f32 %v11343_v29, %v4964_v53  ;;  %8858 = vpow2.f32 %v5155_v27  ;;  %v5059_v53 = vsub.f32 %v11346_v2, %v10791_v6  ;;  %v11348_v6 = vld [vmem:[#allocation22_spill] sm:$0xff] }
0x45f3   :  { %v10840_v49 = vpop.eup %8848  ;;  %v5061_v27 = vsub.f32 %v11348_v6, %v10804_v8 }
0x45f4   :  { %5290 = vadd.xlane.f32.xlu1 %v5289_v43  ;;  %v5173_v54 = vmul.f32 1.442695, %v5064_v21  ;;  %v10847_v38 = vpop.eup %8850  ;;  %v5328_v21 = vsel %vm4826_vm14, %v10840_v49, 0.0 }
0x45f5   :  { %v4961_v62 = vpop.xlane.xlu0 %4960  ;;  %5317 = vadd.xlane.f32.xlu0 %v5316_v4  ;;  %v5163_v4 = vmul.f32 1.442695, %v5059_v53  ;;  %v5167_v8 = vmul.f32 1.442695, %v5061_v27 }
0x45f6   :  { %8860 = vpow2.f32 %v5173_v54  ;;  %v5307_v54 = vsel %vm4826_vm14, %v10847_v38, 0.0 }
0x45f7   :  { %v10851_v43 = vpop.eup %8852  ;;  %8862 = vpow2.f32 %v5159_v30 }
0x45f8   :  { %5296 = vadd.xlane.f32.xlu1 %v5295_v3  ;;  %11347 = vst [vmem:[#allocation23_spill] sm:$0xff] %v10851_v43  ;;  %v10860_v3 = vpop.eup %8854 }
0x45f9   :  { %v4970_v13 = vpop.xlane.xlu0 %4969  ;;  %5323 = vadd.xlane.f32.xlu0 %v5322_v23  ;;  %v5334_v23 = vsel %vm4826_vm14, %v10851_v43, 0.0 }
0x45fa   :  { %v5066_v46 = vsub.f32 %v11345_v24, %v4970_v13 }
0x45fb   :  { %v4982_v15 = vpop.xlane.xlu1 %4981  ;;  %v10864_v24 = vpop.eup %8856 }
0x45fc   :  { %v5177_v35 = vmul.f32 1.442695, %v5066_v46  ;;  %5302 = vadd.xlane.f32.xlu1 %v5301_v19  ;;  %v5070_v60 = vsub.f32 %v10527_v18, %v4982_v15  ;;  %v11349_v46 = vld [vmem:[#allocation28_spill] sm:$0xff]  ;;  %v5313_v19 = vsel %vm4826_vm14, %v10860_v3, 0.0 }
0x45fd   :  { %v4967_v29 = vpop.xlane.xlu0 %4966  ;;  %5329 = vadd.xlane.f32.xlu0 %v5328_v21  ;;  %v11350_v18 = vld [vmem:[#allocation24_spill] sm:$0xff]  ;;  %v10870_v21 = vpop.eup %8858 }
0x45fe   :  { %8864 = vpow2.f32 %v5177_v35  ;;  %v5063_v2 = vsub.f32 %v11350_v18, %v4961_v62  ;;  %v5185_v53 = vmul.f32 1.442695, %v5070_v60  ;;  %v11352_v62 = vld [vmem:[#allocation26_spill] sm:$0xff] }
0x45ff   :  { %v10856_v33 = vpop.xlane.xlu1 %4978  ;;  %8866 = vpow2.f32 %v5163_v4  ;;  %v5065_v27 = vsub.f32 %v11352_v62, %v4967_v29  ;;  %v11354_v62 = vld [vmem:[#allocation30_spill] sm:$0xff] }
0x4600   :  { %5308 = vadd.xlane.f32.xlu1 %v5307_v54  ;;  %v5340_v54 = vsel %vm4826_vm14, %v10864_v24, 0.0  ;;  %v10874_v43 = vpop.eup %8860  ;;  %v5171_v4 = vmul.f32 1.442695, %v5063_v2 }
0x4601   :  { %v4976_v13 = vpop.xlane.xlu0 %4975  ;;  %5335 = vadd.xlane.f32.xlu0 %v5334_v23  ;;  %11351 = vst [vmem:[#allocation20_spill] sm:$0xff] %v10874_v43  ;;  %v5319_v23 = vsel %vm4826_vm14, %v10870_v21, 0.0  ;;  %v5346_v18 = vsel %vm4826_vm14, %v10874_v43, 0.0  ;;  %v5175_v29 = vmul.f32 1.442695, %v5065_v27 }
0x4602   :  { %v5068_v30 = vsub.f32 %v11349_v46, %v4976_v13  ;;  %v10880_v46 = vpop.eup %8862 }
0x4603   :  { %v4994_v15 = vpop.xlane.xlu1 %4993 }
0x4604   :  { %v5181_v35 = vmul.f32 1.442695, %v5068_v30  ;;  %5314 = vadd.xlane.f32.xlu1 %v5313_v19  ;;  %v5074_v60 = vsub.f32 %v10551_v47, %v4994_v15  ;;  %v5325_v19 = vsel %vm4826_vm14, %v10880_v46, 0.0 }
0x4605   :  { %v4973_v6 = vpop.xlane.xlu0 %4972  ;;  %5341 = vadd.xlane.f32.xlu0 %v5340_v54 }
0x4606   :  { %8868 = vpow2.f32 %v5181_v35  ;;  %v5067_v47 = vsub.f32 %v10547_v45, %v4973_v6  ;;  %v5193_v2 = vmul.f32 1.442695, %v5074_v60 }
0x4607   :  { %8870 = vpow2.f32 %v5167_v8  ;;  %v4991_v13 = vpop.xlane.xlu1 %4990 }
0x4608   :  { %8872 = vpow2.f32 %v5185_v53  ;;  %5320 = vadd.xlane.f32.xlu1 %v5319_v23  ;;  %v10884_v35 = vpop.eup %8864  ;;  %v5179_v6 = vmul.f32 1.442695, %v5067_v47  ;;  %v11358_v47 = vld [vmem:[#allocation31_spill] sm:$0xff] }
0x4609   :  { %v4988_v30 = vpop.xlane.xlu0 %4987  ;;  %11353 = vst [vmem:[#allocation25_spill] sm:$0xff] %v10884_v35  ;;  %5347 = vadd.xlane.f32.xlu0 %v5346_v18  ;;  %8874 = vpow2.f32 %v5171_v4  ;;  %v10890_v54 = vpop.eup %8866  ;;  %v5352_v43 = vsel %vm4826_vm14, %v10884_v35, 0.0 }
0x460a   :  { %v5072_v8 = vsub.f32 %v10560_v37, %v4988_v30  ;;  %v11355_v37 = vld [vmem:[#allocation27_spill] sm:$0xff]  ;;  %v5331_v18 = vsel %vm4826_vm14, %v10890_v54, 0.0 }
0x460b   :  { %v5000_v15 = vpop.xlane.xlu1 %4999  ;;  %v5069_v45 = vsub.f32 %v11355_v37, %v10856_v33 }
0x460c   :  { %v5189_v53 = vmul.f32 1.442695, %v5072_v8  ;;  %v5076_v23 = vsub.f32 %v11354_v62, %v5000_v15  ;;  %5326 = vadd.xlane.f32.xlu1 %v5325_v19  ;;  %v11359_v62 = vld [vmem:[#allocation33_spill] sm:$0xff] }
0x460d   :  { %5353 = vadd.xlane.f32.xlu0 %v5352_v43  ;;  %v4985_v60 = vpop.xlane.xlu0 %4984  ;;  %v5183_v33 = vmul.f32 1.442695, %v5069_v45 }
0x460e   :  { %8876 = vpow2.f32 %v5189_v53  ;;  %v5197_v27 = vmul.f32 1.442695, %v5076_v23  ;;  %v5071_v53 = vsub.f32 %v11358_v47, %v4985_v60 }
0x460f   :  { %8878 = vpow2.f32 %v5175_v29  ;;  %v4997_v30 = vpop.xlane.xlu1 %4996 }
0x4610   :  { %v10897_v4 = vpop.eup %8868  ;;  %8880 = vpow2.f32 %v5193_v2  ;;  %5332 = vadd.xlane.f32.xlu1 %v5331_v18  ;;  %v11360_v18 = vld [vmem:[#allocation29_spill] sm:$0xff] }
0x4611   :  { %11356 = vst [vmem:[#allocation21_spill] sm:$0xff] %v10897_v4  ;;  %v10901_v8 = vpop.eup %8870  ;;  %v5358_v43 = vsel %vm4826_vm14, %v10897_v4, 0.0  ;;  %8882 = vpow2.f32 %v5179_v6  ;;  %v5073_v45 = vsub.f32 %v11360_v18, %v4991_v13  ;;  %v5187_v6 = vmul.f32 1.442695, %v5071_v53  ;;  %v11362_v13 = vld [vmem:[#allocation32_spill] sm:$0xff]  ;;  %v11363_v18 = vld [vmem:[#allocation35_spill] sm:$0xff] }
0x4612   :  { %v10905_v29 = vpop.eup %8872  ;;  %5359 = vadd.xlane.f32.xlu0 %v5358_v43  ;;  %8884 = vpow2.f32 %v5197_v27  ;;  %v5337_v15 = vsel %vm4826_vm14, %v10901_v8, 0.0  ;;  %v5075_v53 = vsub.f32 %v11362_v13, %v4997_v30 }
0x4613   :  { %11357 = vst [vmem:[#allocation22_spill] sm:$0xff] %v10905_v29  ;;  %v5006_v2 = vpop.xlane.xlu1 %5005  ;;  %v10910_v19 = vpop.eup %8874  ;;  %v5364_v37 = vsel %vm4826_vm14, %v10905_v29, 0.0  ;;  %8886 = vpow2.f32 %v5183_v33  ;;  %v5191_v33 = vmul.f32 1.442695, %v5073_v45 }
0x4614   :  { %v5078_v23 = vsub.f32 %v11359_v62, %v5006_v2  ;;  %5338 = vadd.xlane.f32.xlu1 %v5337_v15  ;;  %v5343_v47 = vsel %vm4826_vm14, %v10910_v19, 0.0  ;;  %v5195_v45 = vmul.f32 1.442695, %v5075_v53  ;;  %v11367_v53 = vld [vmem:[#allocation36_spill] sm:$0xff] }
0x4616   :  { %5365 = vadd.xlane.f32.xlu0 %v5364_v37  ;;  %v5201_v43 = vmul.f32 1.442695, %v5078_v23 }
0x4617   :  { %v5003_v27 = vpop.xlane.xlu1 %5002 }
0x4618   :  { %v10916_v60 = vpop.eup %8876  ;;  %8888 = vpow2.f32 %v5201_v43  ;;  %5344 = vadd.xlane.f32.xlu1 %v5343_v47 }
0x4619   :  { %11361 = vst [vmem:[#allocation28_spill] sm:$0xff] %v10916_v60  ;;  %v10920_v4 = vpop.eup %8878  ;;  %v5370_v2 = vsel %vm4826_vm14, %v10916_v60, 0.0  ;;  %8890 = vpow2.f32 %v5187_v6  ;;  %v11365_v6 = vld [vmem:[#allocation34_spill] sm:$0xff] }
0x461a   :  { %v10924_v15 = vpop.eup %8880  ;;  %5371 = vadd.xlane.f32.xlu0 %v5370_v2  ;;  %v5349_v23 = vsel %vm4826_vm14, %v10920_v4, 0.0  ;;  %8892 = vpow2.f32 %v5191_v33  ;;  %v5077_v2 = vsub.f32 %v11365_v6, %v5003_v27 }
0x461b   :  { %v5012_v62 = vpop.xlane.xlu1 %5011  ;;  %v10929_v37 = vpop.eup %8882  ;;  %v5376_v43 = vsel %vm4826_vm14, %v10924_v15, 0.0 }
0x461c   :  { %v5080_v29 = vsub.f32 %v11363_v18, %v5012_v62  ;;  %5350 = vadd.xlane.f32.xlu1 %v5349_v23  ;;  %v10934_v47 = vpop.eup %8884  ;;  %v5355_v60 = vsel %vm4826_vm14, %v10929_v37, 0.0  ;;  %v5199_v33 = vmul.f32 1.442695, %v5077_v2 }
0x461d   :  { %11364 = vst [vmem:[#allocation24_spill] sm:$0xff] %v10934_v47  ;;  %v10939_v35 = vpop.eup %8886  ;;  %v5382_v62 = vsel %vm4826_vm14, %v10934_v47, 0.0 }
0x461e   :  { %5377 = vadd.xlane.f32.xlu0 %v5376_v43  ;;  %v5205_v30 = vmul.f32 1.442695, %v5080_v29  ;;  %v5361_v29 = vsel %vm4826_vm14, %v10939_v35, 0.0 }
0x461f   :  { %v5009_v13 = vpop.xlane.xlu1 %5008 }
0x4620   :  { %8894 = vpow2.f32 %v5205_v30  ;;  %5356 = vadd.xlane.f32.xlu1 %v5355_v60  ;;  %v5079_v18 = vsub.f32 %v11367_v53, %v5009_v13 }
0x4621   :  { %8896 = vpow2.f32 %v5195_v45 }
0x4622   :  { %5383 = vadd.xlane.f32.xlu0 %v5382_v62  ;;  %v10943_v23 = vpop.eup %8888  ;;  %8898 = vpow2.f32 %v5199_v33  ;;  %v5203_v60 = vmul.f32 1.442695, %v5079_v18 }
0x4623   :  { %11366 = vst [vmem:[#allocation26_spill] sm:$0xff] %v10943_v23  ;;  %v5388_v27 = vsel %vm4826_vm14, %v10943_v23, 0.0  ;;  %v10950_v43 = vpop.eup %8890 }
0x4624   :  { %5362 = vadd.xlane.f32.xlu1 %v5361_v29  ;;  %v5367_v6 = vsel %vm4826_vm14, %v10950_v43, 0.0  ;;  %v10954_v30 = vpop.eup %8892  ;;  %8900 = vpow2.f32 %v5203_v60 }
0x4625   :  { %v5373_v13 = vsel %vm4826_vm14, %v10954_v30, 0.0 }
0x4626   :  { %5389 = vadd.xlane.f32.xlu0 %v5388_v27 }
0x4628   :  { %5368 = vadd.xlane.f32.xlu1 %v5367_v6 }
0x462a   :  { %v10956_v45 = vpop.eup %8894 }
0x462b   :  { %11368 = vst [vmem:[#allocation30_spill] sm:$0xff] %v10956_v45  ;;  %v5394_v2 = vsel %vm4826_vm14, %v10956_v45, 0.0  ;;  %v10962_v62 = vpop.eup %8896 }
0x462c   :  { %5395 = vadd.xlane.f32.xlu0 %v5394_v2  ;;  %5374 = vadd.xlane.f32.xlu1 %v5373_v13  ;;  %v5379_v33 = vsel %vm4826_vm14, %v10962_v62, 0.0  ;;  %v10966_v53 = vpop.eup %8898 }
0x462d   :  { %11369 = vst [vmem:[#allocation27_spill] sm:$0xff] %v10966_v53  ;;  %v5385_v18 = vsel %vm4826_vm14, %v10966_v53, 0.0 }
0x462e   :  { %v10970_v29 = vpop.eup %8900 }
0x462f   :  { %11370 = vst [vmem:[#allocation31_spill] sm:$0xff] %v10970_v29  ;;  %v5391_v60 = vsel %vm4826_vm14, %v10970_v29, 0.0 }
0x4630   :  { %5380 = vadd.xlane.f32.xlu1 %v5379_v33 }
0x4634   :  { %5386 = vadd.xlane.f32.xlu1 %v5385_v18 }
0x4635   :  { %v5216_v27 = vpop.xlane.xlu1 %5215 }
0x4636   :  { %8902 = vrcp.f32 %v5216_v27 }
0x4638   :  { %5392 = vadd.xlane.f32.xlu1 %v5391_v60 }
0x4639   :  { %v5213_v6 = vpop.xlane.xlu1 %5212 }
0x463a   :  { %8904 = vrcp.f32 %v5213_v6 }
0x463d   :  { %v5222_v2 = vpop.xlane.xlu1 %5221 }
0x463e   :  { %8906 = vrcp.f32 %v5222_v2 }
0x4640   :  { %v8903_v45 = vpop.eup %8902 }
0x4641   :  { %v5219_v13 = vpop.xlane.xlu1 %5218  ;;  %v5468_v47 = vmul.f32 %v8903_v45, %v10613_v9 }
0x4642   :  { %8908 = vrcp.f32 %v5219_v13 }
0x4644   :  { %v8905_v33 = vpop.eup %8904 }
0x4645   :  { %v5228_v23 = vpop.xlane.xlu1 %5227  ;;  %v5467_v53 = vmul.f32 %v8905_v33, %v10618_v12 }
0x4646   :  { %8910 = vrcp.f32 %v5228_v23  ;;  %v5240_v13 = vpop.xlane.xlu0 %5239 }
0x4647   :  { %8146 = vmatprep.mubr.msk.f32.mxu0 %vm4826_vm14, %v5467_v53 }
0x4648   :  { %8147 = vmatmul.mubr.msk.f32.vlgmr.msra.gmra.mrb[48].mxu0 %vm4826_vm14, %v5468_v47  ;;  %v8907_v27 = vpop.eup %8906 }
0x4649   :  { %v5225_v18 = vpop.xlane.xlu1 %5224  ;;  %v5470_v29 = vmul.f32 %v8907_v27, %v10624_v31 }
0x464a   :  { %8912 = vrcp.f32 %v5225_v18 }
0x464c   :  { %v8909_v60 = vpop.eup %8908 }
0x464d   :  { %v5234_v6 = vpop.xlane.xlu1 %5233  ;;  %v5469_v2 = vmul.f32 %v8909_v60, %v10629_v59 }
0x464e   :  { %8914 = vrcp.f32 %v5234_v6  ;;  %v5249_v12 = vpop.xlane.xlu0 %5248 }
0x464f   :  { %8149 = vmatprep.mubr.msk.f32.mxu0 %vm4826_vm14, %v5469_v2 }
0x4650   :  { %8150 = vmatmul.mubr.msk.f32.gmra.mrb[50].mxu0 %vm4826_vm14, %v5470_v29  ;;  %v8911_v47 = vpop.eup %8910 }
0x4651   :  { %v5231_v9 = vpop.xlane.xlu1 %5230  ;;  %v5472_v59 = vmul.f32 %v8911_v47, %v10635_v52 }
0x4652   :  { %8916 = vrcp.f32 %v5231_v9 }
0x4653   :  { %8918 = vrcp.f32 %v5240_v13 }
0x4654   :  { %v8913_v23 = vpop.eup %8912 }
0x4655   :  { %v5237_v45 = vpop.xlane.xlu1 %5236  ;;  %v5471_v53 = vmul.f32 %v8913_v23, %v10644_v40 }
0x4656   :  { %8920 = vrcp.f32 %v5237_v45  ;;  %v5264_v33 = vpop.xlane.xlu0 %5263 }
0x4657   :  { %8152 = vmatprep.mubr.msk.f32.mxu0 %vm4826_vm14, %v5471_v53  ;;  %8922 = vrcp.f32 %v5249_v12 }
0x4658   :  { %8153 = vmatmul.mubr.msk.f32.gmra.mrb[52].mxu0 %vm4826_vm14, %v5472_v59  ;;  %v8915_v18 = vpop.eup %8914 }
0x4659   :  { %v5246_v31 = vpop.xlane.xlu1 %5245  ;;  %v5474_v40 = vmul.f32 %v8915_v18, %v10653_v41 }
0x465a   :  { %v5261_v29 = vpop.xlane.xlu0 %5260  ;;  %8924 = vrcp.f32 %v5246_v31 }
0x465c   :  { %v8917_v27 = vpop.eup %8916 }
0x465d   :  { %v5243_v60 = vpop.xlane.xlu1 %5242  ;;  %v5473_v6 = vmul.f32 %v8917_v27, %v10657_v17  ;;  %v8919_v13 = vpop.eup %8918 }
0x465e   :  { %8926 = vrcp.f32 %v5243_v60  ;;  %v5267_v2 = vpop.xlane.xlu0 %5266  ;;  %v5476_v12 = vmul.f32 %v8919_v13, %v10640_v14 }
0x465f   :  { %8155 = vmatprep.mubr.msk.f32.mxu0 %vm4826_vm14, %v5473_v6 }
0x4660   :  { %v8921_v52 = vpop.eup %8920  ;;  %8156 = vmatmul.mubr.msk.f32.gmra.mrb[54].mxu0 %vm4826_vm14, %v5474_v40 }
0x4661   :  { %v5252_v9 = vpop.xlane.xlu1 %5251  ;;  %v5475_v47 = vmul.f32 %v8921_v52, %v10672_v22  ;;  %v8923_v45 = vpop.eup %8922 }
0x4662   :  { %8928 = vrcp.f32 %v5252_v9  ;;  %v5270_v23 = vpop.xlane.xlu0 %5269  ;;  %v5479_v14 = vmul.f32 %v8923_v45, %v10662_v20 }
0x4663   :  { %8158 = vmatprep.mubr.msk.f32.mxu0 %vm4826_vm14, %v5475_v47  ;;  %8930 = vrcp.f32 %v5261_v29 }
0x4664   :  { %8159 = vmatmul.mubr.msk.f32.gmra.mrb[56].mxu0 %vm4826_vm14, %v5476_v12  ;;  %v8925_v53 = vpop.eup %8924 }
0x4665   :  { %v5258_v17 = vpop.xlane.xlu1 %5257  ;;  %v5478_v27 = vmul.f32 %v8925_v53, %v10683_v42 }
0x4666   :  { %v5276_v41 = vpop.xlane.xlu0 %5275  ;;  %8932 = vrcp.f32 %v5258_v17 }
0x4668   :  { %v8927_v59 = vpop.eup %8926 }
0x4669   :  { %v5255_v31 = vpop.xlane.xlu1 %5254  ;;  %v5477_v18 = vmul.f32 %v8927_v59, %v10694_v56 }
0x466a   :  { %8934 = vrcp.f32 %v5255_v31  ;;  %v5282_v22 = vpop.xlane.xlu0 %5281 }
0x466b   :  { %8161 = vmatprep.mubr.msk.f32.mxu0 %vm4826_vm14, %v5477_v18  ;;  %8936 = vrcp.f32 %v5264_v33 }
0x466c   :  { %v8929_v60 = vpop.eup %8928  ;;  %8162 = vmatmul.mubr.msk.f32.gmra.mrb[58].mxu0 %vm4826_vm14, %v5478_v27  ;;  %8938 = vrcp.f32 %v5267_v2  ;;  %v11371_v27 = vld [vmem:[#allocation37_spill] sm:$0xff] }
0x466d   :  { %8164 = vmatprep.mubr.msk.f32.mxu0 %vm4826_vm14, %v5479_v14  ;;  %v5015_v6 = vpop.xlane.xlu1 %5014  ;;  %v5480_v29 = vmul.f32 %v8929_v60, %v10705_v39  ;;  %8940 = vrcp.f32 %v5270_v23  ;;  %v8931_v52 = vpop.eup %8930 }
0x466e   :  { %v5081_v56 = vsub.f32 %v10749_v36, %v5015_v6  ;;  %v5288_v40 = vpop.xlane.xlu0 %5287  ;;  %v5483_v23 = vmul.f32 %v8931_v52, %v10689_v25 }
0x4670   :  { %v5207_v13 = vmul.f32 1.442695, %v5081_v56  ;;  %8165 = vmatmul.mubr.msk.f32.gmra.mrb[60].mxu0 %vm4826_vm14, %v5480_v29  ;;  %v8933_v33 = vpop.eup %8932 }
0x4671   :  { %v5018_v42 = vpop.xlane.xlu1 %5017  ;;  %v5482_v2 = vmul.f32 %v8933_v33, %v10719_v51 }
0x4672   :  { %8942 = vpow2.f32 %v5207_v13  ;;  %v5082_v20 = vsub.f32 %v10763_v1, %v5018_v42  ;;  %v5294_v9 = vpop.xlane.xlu0 %5293 }
0x4673   :  { %8944 = vrcp.f32 %v5276_v41 }
0x4674   :  { %v8935_v47 = vpop.eup %8934  ;;  %v5209_v12 = vmul.f32 1.442695, %v5082_v20 }
0x4675   :  { %v5273_v17 = vpop.xlane.xlu1 %5272  ;;  %v5481_v39 = vmul.f32 %v8935_v47, %v10733_v16  ;;  %v8937_v45 = vpop.eup %8936 }
0x4676   :  { %8946 = vpow2.f32 %v5209_v12  ;;  %v5300_v36 = vpop.xlane.xlu0 %5299  ;;  %v8939_v53 = vpop.eup %8938  ;;  %v5484_v16 = vmul.f32 %v8937_v45, %v10678_v58 }
0x4677   :  { %8948 = vrcp.f32 %v5273_v17  ;;  %8167 = vmatprep.mubr.msk.f32.mxu0 %vm4826_vm14, %v5481_v39  ;;  %v8941_v59 = vpop.eup %8940  ;;  %v5485_v51 = vmul.f32 %v8939_v53, %v10700_v57 }
0x4678   :  { %8168 = vmatmul.mubr.msk.f32.gmra.mrb[62].mxu0 %vm4826_vm14, %v5482_v2  ;;  %8950 = vrcp.f32 %v5282_v22  ;;  %v5486_v14 = vmul.f32 %v8941_v59, %v11371_v27 }
0x4679   :  { %8170 = vmatprep.mubr.msk.f32.mxu0 %vm4826_vm14, %v5483_v23  ;;  %v5279_v1 = vpop.xlane.xlu1 %5278 }
0x467a   :  { %8952 = vrcp.f32 %v5279_v1  ;;  %v5306_v41 = vpop.xlane.xlu0 %5305 }
0x467b   :  { %8954 = vrcp.f32 %v5288_v40 }
0x467c   :  { %v11012_v31 = vpop.eup %8942  ;;  %8171 = vmatmul.mubr.msk.f32.gmra.mrb[64].mxu0 %vm4826_vm14, %v5484_v16 }
0x467d   :  { %8173 = vmatprep.mubr.msk.f32.mxu0 %vm4826_vm14, %v5485_v51  ;;  %v5285_v25 = vpop.xlane.xlu1 %5284  ;;  %v5397_v18 = vsel %vm4826_vm14, %v11012_v31, 0.0  ;;  %v8945_v58 = vpop.eup %8944 }
0x467e   :  { %8956 = vrcp.f32 %v5285_v25  ;;  %v5312_v22 = vpop.xlane.xlu0 %5311  ;;  %5398 = vadd.xlane.f32.xlu1 %v5397_v18  ;;  %v5488_v42 = vmul.f32 %v8945_v58, %v10725_v0 }
0x467f   :  { %8958 = vrcp.f32 %v5294_v9 }
0x4680   :  { %v11019_v60 = vpop.eup %8946  ;;  %8174 = vmatmul.mubr.msk.f32.gmra.mrb[66].mxu0 %vm4826_vm14, %v5486_v14 }
0x4681   :  { %v8949_v57 = vpop.eup %8948  ;;  %v5291_v6 = vpop.xlane.xlu1 %5290  ;;  %v5400_v29 = vsel %vm4826_vm14, %v11019_v60, 0.0 }
0x4682   :  { %8960 = vrcp.f32 %v5291_v6  ;;  %v5318_v56 = vpop.xlane.xlu0 %5317  ;;  %5401 = vadd.xlane.f32.xlu0 %v5400_v29  ;;  %v5487_v40 = vmul.f32 %v8949_v57, %v10776_v61  ;;  %v8951_v13 = vpop.eup %8950 }
0x4683   :  { %8962 = vrcp.f32 %v5300_v36  ;;  %v5490_v12 = vmul.f32 %v8951_v13, %v10740_v28 }
0x4684   :  { %v8953_v52 = vpop.eup %8952  ;;  %8176 = vmatprep.mubr.msk.f32.mxu0 %vm4826_vm14, %v5487_v40 }
0x4685   :  { %8177 = vmatmul.mubr.msk.f32.gmra.mrb[68].mxu0 %vm4826_vm14, %v5488_v42  ;;  %v5297_v20 = vpop.xlane.xlu1 %5296  ;;  %v5489_v9 = vmul.f32 %v8953_v52, %v10789_v44  ;;  %v8955_v47 = vpop.eup %8954 }
0x4686   :  { %8964 = vrcp.f32 %v5297_v20  ;;  %v5324_v33 = vpop.xlane.xlu0 %5323  ;;  %v5492_v44 = vmul.f32 %v8955_v47, %v10755_v50 }
0x4687   :  { %8179 = vmatprep.mubr.msk.f32.mxu0 %vm4826_vm14, %v5489_v9  ;;  %8966 = vrcp.f32 %v5306_v41 }
0x4688   :  { %v8957_v61 = vpop.eup %8956 }
0x4689   :  { %8180 = vmatmul.mubr.msk.f32.gmra.mrb[70].mxu0 %vm4826_vm14, %v5490_v12  ;;  %v5303_v0 = vpop.xlane.xlu1 %5302  ;;  %v5491_v17 = vmul.f32 %v8957_v61, %v10802_v34  ;;  %v8959_v36 = vpop.eup %8958 }
0x468a   :  { %8968 = vrcp.f32 %v5303_v0  ;;  %v5330_v39 = vpop.xlane.xlu0 %5329  ;;  %v5494_v34 = vmul.f32 %v8959_v36, %v10769_v5 }
0x468b   :  { %8182 = vmatprep.mubr.msk.f32.mxu0 %vm4826_vm14, %v5491_v17  ;;  %8970 = vrcp.f32 %v5312_v22  ;;  %v11372_v17 = vld [vmem:[#allocation23_spill] sm:$0xff] }
0x468c   :  { %v8961_v2 = vpop.eup %8960 }
0x468d   :  { %8183 = vmatmul.mubr.msk.f32.gmra.mrb[72].mxu0 %vm4826_vm14, %v5492_v44  ;;  %v5309_v45 = vpop.xlane.xlu1 %5308  ;;  %v5493_v28 = vmul.f32 %v8961_v2, %v10815_v48  ;;  %v8963_v53 = vpop.eup %8962 }
0x468e   :  { %8972 = vrcp.f32 %v5309_v45  ;;  %v5336_v23 = vpop.xlane.xlu0 %5335  ;;  %v5496_v48 = vmul.f32 %v8963_v53, %v10782_v26 }
0x468f   :  { %8185 = vmatprep.mubr.msk.f32.mxu0 %vm4826_vm14, %v5493_v28  ;;  %8974 = vrcp.f32 %v5318_v56 }
0x4690   :  { %v8965_v1 = vpop.eup %8964 }
0x4691   :  { %8186 = vmatmul.mubr.msk.f32.gmra.mrb[74].mxu0 %vm4826_vm14, %v5494_v34  ;;  %v5315_v41 = vpop.xlane.xlu1 %5314  ;;  %v5495_v50 = vmul.f32 %v8965_v1, %v10826_v55  ;;  %v8967_v59 = vpop.eup %8966  ;;  %v11373_v1 = vld [vmem:[#allocation20_spill] sm:$0xff] }
0x4692   :  { %8976 = vrcp.f32 %v5315_v41  ;;  %v5342_v16 = vpop.xlane.xlu0 %5341  ;;  %v5498_v55 = vmul.f32 %v8967_v59, %v10795_v63  ;;  %v11374_v59 = vld [vmem:[#allocation25_spill] sm:$0xff] }
0x4693   :  { %8188 = vmatprep.mubr.msk.f32.mxu0 %vm4826_vm14, %v5495_v50  ;;  %8978 = vrcp.f32 %v5324_v33 }
0x4694   :  { %v8969_v51 = vpop.eup %8968 }
0x4695   :  { %8189 = vmatmul.mubr.msk.f32.gmra.mrb[76].mxu0 %vm4826_vm14, %v5496_v48  ;;  %v5321_v25 = vpop.xlane.xlu1 %5320  ;;  %v5497_v5 = vmul.f32 %v8969_v51, %v10836_v32  ;;  %v8971_v22 = vpop.eup %8970 }
0x4696   :  { %8980 = vrcp.f32 %v5321_v25  ;;  %v5348_v18 = vpop.xlane.xlu0 %5347  ;;  %v5500_v32 = vmul.f32 %v8971_v22, %v10808_v11  ;;  %v11375_v22 = vld [vmem:[#allocation21_spill] sm:$0xff] }
0x4697   :  { %8191 = vmatprep.mubr.msk.f32.mxu0 %vm4826_vm14, %v5497_v5  ;;  %8982 = vrcp.f32 %v5330_v39 }
0x4698   :  { %v8973_v27 = vpop.eup %8972 }
0x4699   :  { %8192 = vmatmul.mubr.msk.f32.gmra.mrb[78].mxu0 %vm4826_vm14, %v5498_v55  ;;  %v5327_v14 = vpop.xlane.xlu1 %5326  ;;  %v5499_v26 = vmul.f32 %v8973_v27, %v10847_v38  ;;  %v8975_v57 = vpop.eup %8974 }
0x469a   :  { %8984 = vrcp.f32 %v5327_v14  ;;  %v5354_v58 = vpop.xlane.xlu0 %5353  ;;  %v5502_v38 = vmul.f32 %v8975_v57, %v10819_v7 }
0x469b   :  { %8194 = vmatprep.mubr.msk.f32.mxu0 %vm4826_vm14, %v5499_v26  ;;  %8986 = vrcp.f32 %v5336_v23 }
0x469c   :  { %v8977_v6 = vpop.eup %8976 }
0x469d   :  { %8195 = vmatmul.mubr.msk.f32.gmra.mrb[80].mxu0 %vm4826_vm14, %v5500_v32  ;;  %v5333_v29 = vpop.xlane.xlu1 %5332  ;;  %v5501_v63 = vmul.f32 %v8977_v6, %v10860_v3  ;;  %v8979_v56 = vpop.eup %8978 }
0x469e   :  { %8988 = vrcp.f32 %v5333_v29  ;;  %v5504_v3 = vmul.f32 %v8979_v56, %v10830_v10  ;;  %v11377_v56 = vld [vmem:[#allocation28_spill] sm:$0xff] }
0x469f   :  { %8197 = vmatprep.mubr.msk.f32.mxu0 %vm4826_vm14, %v5501_v63  ;;  %v5360_v13 = vpop.xlane.xlu0 %5359  ;;  %8990 = vrcp.f32 %v5342_v16 }
0x46a0   :  { %v8981_v40 = vpop.eup %8980 }
0x46a1   :  { %8198 = vmatmul.mubr.msk.f32.gmra.mrb[82].mxu0 %vm4826_vm14, %v5502_v38  ;;  %v5339_v42 = vpop.xlane.xlu1 %5338  ;;  %v5503_v11 = vmul.f32 %v8981_v40, %v10870_v21  ;;  %v8983_v52 = vpop.eup %8982 }
0x46a2   :  { %8992 = vrcp.f32 %v5339_v42  ;;  %v5506_v21 = vmul.f32 %v8983_v52, %v10840_v49 }
0x46a3   :  { %8200 = vmatprep.mubr.msk.f32.mxu0 %vm4826_vm14, %v5503_v11  ;;  %8994 = vrcp.f32 %v5348_v18  ;;  %v5366_v33 = vpop.xlane.xlu0 %5365 }
0x46a4   :  { %v8985_v20 = vpop.eup %8984 }
0x46a5   :  { %8201 = vmatmul.mubr.msk.f32.gmra.mrb[84].mxu0 %vm4826_vm14, %v5504_v3  ;;  %v5345_v9 = vpop.xlane.xlu1 %5344  ;;  %v5505_v7 = vmul.f32 %v8985_v20, %v10880_v46  ;;  %v8987_v47 = vpop.eup %8986 }
0x46a6   :  { %8996 = vrcp.f32 %v5345_v9  ;;  %v5508_v46 = vmul.f32 %v8987_v47, %v11372_v17  ;;  %v11378_v9 = vld [vmem:[#allocation24_spill] sm:$0xff]  ;;  %v11379_v47 = vld [vmem:[#allocation27_spill] sm:$0xff] }
0x46a7   :  { %8203 = vmatprep.mubr.msk.f32.mxu0 %vm4826_vm14, %v5505_v7  ;;  %8998 = vrcp.f32 %v5354_v58  ;;  %v5372_v36 = vpop.xlane.xlu0 %5371 }
0x46a8   :  { %v8989_v12 = vpop.eup %8988 }
0x46a9   :  { %8204 = vmatmul.mubr.msk.f32.gmra.mrb[86].mxu0 %vm4826_vm14, %v5506_v21  ;;  %v5351_v61 = vpop.xlane.xlu1 %5350  ;;  %v5507_v10 = vmul.f32 %v8989_v12, %v10890_v54  ;;  %v8991_v0 = vpop.eup %8990 }
0x46aa   :  { %9000 = vrcp.f32 %v5351_v61  ;;  %v5510_v54 = vmul.f32 %v8991_v0, %v10864_v24  ;;  %v11382_v0 = vld [vmem:[#allocation30_spill] sm:$0xff] }
0x46ab   :  { %8206 = vmatprep.mubr.msk.f32.mxu0 %vm4826_vm14, %v5507_v10  ;;  %9002 = vrcp.f32 %v5360_v13  ;;  %v5378_v53 = vpop.xlane.xlu0 %5377  ;;  %v11381_v10 = vld [vmem:[#allocation31_spill] sm:$0xff] }
0x46ac   :  { %v8993_v39 = vpop.eup %8992 }
0x46ad   :  { %8207 = vmatmul.mubr.msk.f32.gmra.mrb[88].mxu0 %vm4826_vm14, %v5508_v46  ;;  %v5357_v44 = vpop.xlane.xlu1 %5356  ;;  %v5509_v49 = vmul.f32 %v8993_v39, %v10901_v8  ;;  %v8995_v2 = vpop.eup %8994  ;;  %v6259_v46 = vld [vmem:[#allocation5 + $0x1d0] sm:$0xff]  ;;  %v6260_v39 = vld [vmem:[#allocation5 + $0x1d8] sm:$0xff] }
0x46ae   :  { %9004 = vrcp.f32 %v5357_v44  ;;  %v5512_v8 = vmul.f32 %v8995_v2, %v11373_v1  ;;  %v11383_v44 = vmov 0.0|0.0   ;;  %v11384_v1 = vmov 0.0  }
0x46af   :  { %8209 = vmatprep.mubr.msk.f32.mxu0 %vm4826_vm14, %v5509_v49  ;;  %9006 = vrcp.f32 %v5366_v33  ;;  %v5384_v51 = vpop.xlane.xlu0 %5383 }
0x46b0   :  { %v8997_v45 = vpop.eup %8996 }
0x46b1   :  { %8210 = vmatmul.mubr.msk.f32.gmra.mrb[90].mxu0 %vm4826_vm14, %v5510_v54  ;;  %v5363_v28 = vpop.xlane.xlu1 %5362  ;;  %v5511_v23 = vmul.f32 %v8997_v45, %v10910_v19  ;;  %v8999_v34 = vpop.eup %8998 }
0x46b2   :  { %9008 = vrcp.f32 %v5363_v28  ;;  %v5514_v19 = vmul.f32 %v8999_v34, %v11374_v59  ;;  %v6262_v59 = vld [vmem:[#allocation5 + $0x1e8] sm:$0xff] }
0x46b3   :  { %8212 = vmatprep.mubr.msk.f32.mxu0 %vm4826_vm14, %v5511_v23  ;;  %9010 = vrcp.f32 %v5372_v36  ;;  %v5390_v26 = vpop.xlane.xlu0 %5389  ;;  %v8547_v36 = vpack.c.bf16 %v6260_v39, %v6259_v46 }
0x46b4   :  { %v9001_v41 = vpop.eup %9000 }
0x46b5   :  { %8213 = vmatmul.mubr.msk.f32.gmra.mrb[92].mxu0 %vm4826_vm14, %v5512_v8  ;;  %v5369_v50 = vpop.xlane.xlu1 %5368  ;;  %v5513_v24 = vmul.f32 %v9001_v41, %v10920_v4  ;;  %v9003_v16 = vpop.eup %9002 }
0x46b6   :  { %9012 = vrcp.f32 %v5369_v50  ;;  %v5516_v4 = vmul.f32 %v9003_v16, %v11375_v22  ;;  %8548 = vmatpush3.bf16.msra.mxu0 %v8547_v36  ;;  %v6261_v16 = vld [vmem:[#allocation5 + $0x1e0] sm:$0xff] }
0x46b7   :  { %8215 = vmatprep.mubr.msk.f32.mxu0 %vm4826_vm14, %v5513_v24  ;;  %9014 = vrcp.f32 %v5378_v53  ;;  %8549 = vmatprep.subr.bf16.mxu0 %v11383_v44 }
0x46b8   :  { %v9005_v48 = vpop.eup %9004 }
0x46b9   :  { %8216 = vmatmul.mubr.msk.f32.gmra.mrb[94].mxu0 %vm4826_vm14, %v5514_v19  ;;  %v5375_v25 = vpop.xlane.xlu1 %5374  ;;  %v5515_v5 = vmul.f32 %v9005_v48, %v10929_v37  ;;  %v9007_v18 = vpop.eup %9006  ;;  %v11376_v37 = vld [vmem:[#allocation22_spill] sm:$0xff]  ;;  %v8550_v19 = vpack.c.bf16 %v6262_v59, %v6261_v16 }
0x46ba   :  { %9016 = vrcp.f32 %v5375_v25  ;;  %v5518_v57 = vmul.f32 %v9007_v18, %v11376_v37  ;;  %v5396_v63 = vpop.xlane.xlu0 %5395 }
0x46bb   :  { %8218 = vmatprep.mubr.msk.f32.mxu0 %vm4826_vm14, %v5515_v5  ;;  %9018 = vrcp.f32 %v5384_v51  ;;  %8551 = vmatpush3.bf16.msra.mxu0 %v8550_v19  ;;  %v11386_v5 = vld [vmem:[#allocation13_spill] sm:$0xff] }
0x46bc   :  { %v9009_v55 = vpop.eup %9008  ;;  %8552 = vmatprep.subr.bf16.mxu0 %v11383_v44 }
0x46bd   :  { %8219 = vmatmul.mubr.msk.f32.gmra.mrb[96].mxu0 %vm4826_vm14, %v5516_v4  ;;  %v5381_v27 = vpop.xlane.xlu1 %5380  ;;  %v5517_v14 = vmul.f32 %v9009_v55, %v10939_v35  ;;  %v9011_v58 = vpop.eup %9010 }
0x46be   :  { %9020 = vrcp.f32 %v5381_v27  ;;  %v5520_v35 = vmul.f32 %v9011_v58, %v11377_v56 }
0x46bf   :  { %8221 = vmatprep.mubr.msk.f32.mxu0 %vm4826_vm14, %v5517_v14  ;;  %9022 = vrcp.f32 %v5390_v26 }
0x46c0   :  { %v9013_v32 = vpop.eup %9012 }
0x46c1   :  { %8222 = vmatmul.mubr.msk.f32.gmra.mrb[98].mxu0 %vm4826_vm14, %v5518_v57  ;;  %v5387_v6 = vpop.xlane.xlu1 %5386  ;;  %v5519_v29 = vmul.f32 %v9013_v32, %v10950_v43  ;;  %v9015_v38 = vpop.eup %9014 }
0x46c2   :  { %9024 = vrcp.f32 %v5387_v6  ;;  %v5522_v52 = vmul.f32 %v9015_v38, %v10924_v15  ;;  %v11380_v15 = vld [vmem:[#allocation26_spill] sm:$0xff] }
0x46c3   :  { %8224 = vmatprep.mubr.msk.f32.mxu0 %vm4826_vm14, %v5519_v29  ;;  %9026 = vrcp.f32 %v5396_v63 }
0x46c4   :  { %v9017_v40 = vpop.eup %9016 }
0x46c5   :  { %8225 = vmatmul.mubr.msk.f32.gmra.mrb[100].mxu0 %vm4826_vm14, %v5520_v35  ;;  %v5393_v13 = vpop.xlane.xlu1 %5392  ;;  %v5521_v42 = vmul.f32 %v9017_v40, %v10954_v30  ;;  %v9019_v11 = vpop.eup %9018 }
0x46c6   :  { %9028 = vrcp.f32 %v5393_v13  ;;  %v5524_v7 = vmul.f32 %v9019_v11, %v11378_v9 }
0x46c7   :  { %8227 = vmatprep.mubr.msk.f32.mxu0 %vm4826_vm14, %v5521_v42 }
0x46c8   :  { %v9021_v3 = vpop.eup %9020 }
0x46c9   :  { %8228 = vmatmul.mubr.msk.f32.gmra.mrb[102].mxu0 %vm4826_vm14, %v5522_v52  ;;  %v5523_v43 = vmul.f32 %v9021_v3, %v10962_v62  ;;  %v9023_v20 = vpop.eup %9022 }
0x46ca   :  { %v5526_v12 = vmul.f32 %v9023_v20, %v11380_v15  ;;  %v11387_v15 = vld [vmem:[#allocation14_spill] sm:$0xff] }
0x46cb   :  { %8230 = vmatprep.mubr.msk.f32.mxu0 %vm4826_vm14, %v5523_v43 }
0x46cc   :  { %v9025_v33 = vpop.eup %9024 }
0x46cd   :  { %8231 = vmatmul.mubr.msk.f32.gmra.mrb[104].mxu0 %vm4826_vm14, %v5524_v7  ;;  %v5525_v30 = vmul.f32 %v9025_v33, %v11379_v47  ;;  %v9027_v21 = vpop.eup %9026 }
0x46ce   :  { %v5528_v17 = vmul.f32 %v9027_v21, %v11382_v0 }
0x46cf   :  { %8233 = vmatprep.mubr.msk.f32.mxu0 %vm4826_vm14, %v5525_v30 }
0x46d0   :  { %v9029_v61 = vpop.eup %9028 }
0x46d1   :  { %8234 = vmatmul.mubr.msk.f32.gmra.mrb[106].mxu0 %vm4826_vm14, %v5526_v12  ;;  %v5527_v62 = vmul.f32 %v9029_v61, %v11381_v10 }
0x46d3   :  { %8236 = vmatprep.mubr.msk.f32.mxu0 %vm4826_vm14, %v5527_v62 }
0x46d5   :  { %8237 = vmatmul.mubr.msk.f32.gmra.mrb[108].mxu0 %vm4826_vm14, %v5528_v17 }
0x470b   :  { %v5399_v49 = vpop.xlane.xlu1 %5398 }
0x470c   :  { %9030 = vrcp.f32 %v5399_v49 }
0x470f   :  { %v5402_v2 = vpop.xlane.xlu0 %5401 }
0x4710   :  { %9032 = vrcp.f32 %v5402_v2 }
0x4716   :  { %v9031_v54 = vpop.eup %9030 }
0x4717   :  { %v5529_v45 = vmul.f32 %v9031_v54, %v11012_v31 }
0x4719   :  { %8239 = vmatprep.mubr.msk.f32.mxu0 %vm4826_vm14, %v5529_v45 }
0x471a   :  { %v9033_v28 = vpop.eup %9032 }
0x471b   :  { %v8148_v23 = vpop.f32.mrb[48].mxu0  ;;  %v5530_v53 = vmul.f32 %v9033_v28, %v11019_v60  ;;  %v11385_v60 = vld [vmem:[#allocation12_spill] sm:$0xff] }
0x471c   :  { %v5813_v34 = vpop.f32.mrb[49].mxu0  ;;  %v6133_v25 = vmul.f32 %v8148_v23, %v11385_v60 }
0x471d   :  { %8240 = vmatmul.mubr.msk.f32.gmra.mrb[110].mxu0 %vm4826_vm14, %v5530_v53  ;;  %v6132_v4 = vmul.f32 %v5813_v34, %v11385_v60  ;;  %vm6358_vm14 = vcmask 392192  }
0x471e   :  { %8250 = vmatprep.mubr.msk.f32.mxu0 %vm9090_vm0, %v11384_v1 }
0x4723   :  { %v8151_v8 = vpop.f32.mrb[50].mxu0 }
0x4724   :  { %v5823_v41 = vpop.f32.mrb[51].mxu0  ;;  %v6135_v58 = vmul.f32 %v8151_v8, %v11385_v60 }
0x4725   :  { %v6134_v32 = vmul.f32 %v5823_v41, %v11385_v60 }
0x472b   :  { %v8154_v50 = vpop.f32.mrb[52].mxu0 }
0x472c   :  { %v5833_v24 = vpop.f32.mrb[53].mxu0  ;;  %v6137_v35 = vmul.f32 %v8154_v50, %v11385_v60 }
0x472d   :  { %v6136_v13 = vmul.f32 %v5833_v24, %v11385_v60 }
0x4733   :  { %v8157_v31 = vpop.f32.mrb[54].mxu0 }
0x4734   :  { %v5843_v48 = vpop.f32.mrb[55].mxu0  ;;  %v6139_v43 = vmul.f32 %v8157_v31, %v11385_v60  ;;  %v11388_v31 = vld [vmem:[#allocation15_spill] sm:$0xff] }
0x4735   :  { %v6138_v7 = vmul.f32 %v5843_v48, %v11385_v60 }
0x4737   :  { %v8160_v51 = vpop.f32.mrb[56].mxu0 }
0x4738   :  { %v6141_v18 = vmul.f32 %v8160_v51, %v11386_v5  ;;  %v5853_v22 = vpop.f32.mrb[57].mxu0 }
0x4739   :  { %v6140_v55 = vmul.f32 %v5853_v22, %v11386_v5 }
0x473a   :  { %v6149_v27 = vadd.f32 %v6141_v18, %v6133_v25 }
0x473b   :  { %v6148_v14 = vadd.f32 %v6140_v55, %v6132_v4 }
0x473f   :  { %v8163_v26 = vpop.f32.mrb[58].mxu0 }
0x4740   :  { %v6143_v37 = vmul.f32 %v8163_v26, %v11386_v5  ;;  %v5863_v57 = vpop.f32.mrb[59].mxu0 }
0x4741   :  { %v6142_v6 = vmul.f32 %v5863_v57, %v11386_v5 }
0x4742   :  { %v6151_v29 = vadd.f32 %v6143_v37, %v6135_v58 }
0x4743   :  { %v6150_v63 = vadd.f32 %v6142_v6, %v6134_v32  ;;  %v8166_v56 = vpop.f32.mrb[60].mxu0 }
0x4744   :  { %v6145_v38 = vmul.f32 %v8166_v56, %v11386_v5  ;;  %v5873_v40 = vpop.f32.mrb[61].mxu0 }
0x4745   :  { %v6144_v42 = vmul.f32 %v5873_v40, %v11386_v5 }
0x4746   :  { %v6153_v11 = vadd.f32 %v6145_v38, %v6137_v35 }
0x4747   :  { %v6152_v52 = vadd.f32 %v6144_v42, %v6136_v13  ;;  %v11389_v42 = vld [vmem:[#allocation16_spill] sm:$0xff] }
0x474b   :  { %v8169_v3 = vpop.f32.mrb[62].mxu0 }
0x474c   :  { %v6147_v20 = vmul.f32 %v8169_v3, %v11386_v5  ;;  %v5883_v9 = vpop.f32.mrb[63].mxu0 }
0x474d   :  { %v6146_v33 = vmul.f32 %v5883_v9, %v11386_v5 }
0x474e   :  { %v6155_v47 = vadd.f32 %v6147_v20, %v6139_v43 }
0x474f   :  { %v6154_v30 = vadd.f32 %v6146_v33, %v6138_v7  ;;  %v8172_v21 = vpop.f32.mrb[64].mxu0 }
0x4750   :  { %v6157_v12 = vmul.f32 %v8172_v21, %v11387_v15  ;;  %v5893_v61 = vpop.f32.mrb[65].mxu0 }
0x4751   :  { %v6156_v10 = vmul.f32 %v5893_v61, %v11387_v15 }
0x4752   :  { %v6165_v62 = vadd.f32 %v6157_v12, %v6149_v27 }
0x4753   :  { %v6164_v0 = vadd.f32 %v6156_v10, %v6148_v14  ;;  %v8175_v17 = vpop.f32.mrb[66].mxu0 }
0x4754   :  { %v6159_v46 = vmul.f32 %v8175_v17, %v11387_v15  ;;  %v5903_v39 = vpop.f32.mrb[67].mxu0 }
0x4755   :  { %v6158_v36 = vmul.f32 %v5903_v39, %v11387_v15 }
0x4756   :  { %v6167_v49 = vadd.f32 %v6159_v46, %v6151_v29 }
0x4757   :  { %v6166_v2 = vadd.f32 %v6158_v36, %v6150_v63 }
0x4758   :  { %v8178_v54 = vpop.f32.mrb[68].mxu0 }
0x4759   :  { %v6161_v45 = vmul.f32 %v8178_v54, %v11387_v15  ;;  %v5913_v28 = vpop.f32.mrb[69].mxu0 }
0x475a   :  { %v6160_v23 = vmul.f32 %v5913_v28, %v11387_v15 }
0x475b   :  { %v6169_v53 = vadd.f32 %v6161_v45, %v6153_v11  ;;  %v11390_v45 = vld [vmem:[#allocation17_spill] sm:$0xff] }
0x475c   :  { %v6168_v34 = vadd.f32 %v6160_v23, %v6152_v52  ;;  %v8181_v8 = vpop.f32.mrb[70].mxu0 }
0x475d   :  { %v6163_v41 = vmul.f32 %v8181_v8, %v11387_v15  ;;  %v5923_v50 = vpop.f32.mrb[71].mxu0 }
0x475e   :  { %v6162_v24 = vmul.f32 %v5923_v50, %v11387_v15 }
0x475f   :  { %v6171_v16 = vadd.f32 %v6163_v41, %v6155_v47 }
0x4760   :  { %v6170_v59 = vadd.f32 %v6162_v24, %v6154_v30  ;;  %v8184_v19 = vpop.f32.mrb[72].mxu0 }
0x4761   :  { %v6173_v48 = vmul.f32 %v8184_v19, %v11388_v31  ;;  %v5933_v51 = vpop.f32.mrb[73].mxu0 }
0x4762   :  { %v6172_v60 = vmul.f32 %v5933_v51, %v11388_v31 }
0x4763   :  { %v6181_v25 = vadd.f32 %v6173_v48, %v6165_v62 }
0x4764   :  { %v6180_v5 = vadd.f32 %v6172_v60, %v6164_v0  ;;  %v8187_v18 = vpop.f32.mrb[74].mxu0 }
0x4765   :  { %v6175_v22 = vmul.f32 %v8187_v18, %v11388_v31  ;;  %v5943_v4 = vpop.f32.mrb[75].mxu0 }
0x4766   :  { %v6174_v55 = vmul.f32 %v5943_v4, %v11388_v31 }
0x4767   :  { %v6183_v27 = vadd.f32 %v6175_v22, %v6167_v49 }
0x4768   :  { %v6182_v14 = vadd.f32 %v6174_v55, %v6166_v2  ;;  %v8190_v26 = vpop.f32.mrb[76].mxu0 }
0x4769   :  { %v6177_v58 = vmul.f32 %v8190_v26, %v11388_v31  ;;  %v5953_v37 = vpop.f32.mrb[77].mxu0 }
0x476a   :  { %v6176_v57 = vmul.f32 %v5953_v37, %v11388_v31 }
0x476b   :  { %v6185_v32 = vadd.f32 %v6177_v58, %v6169_v53  ;;  %v11391_v58 = vld [vmem:[#allocation18_spill] sm:$0xff] }
0x476c   :  { %v6184_v6 = vadd.f32 %v6176_v57, %v6168_v34  ;;  %v8193_v29 = vpop.f32.mrb[78].mxu0 }
0x476d   :  { %v6179_v63 = vmul.f32 %v8193_v29, %v11388_v31  ;;  %v5963_v56 = vpop.f32.mrb[79].mxu0 }
0x476e   :  { %v6178_v35 = vmul.f32 %v5963_v56, %v11388_v31 }
0x476f   :  { %v6187_v38 = vadd.f32 %v6179_v63, %v6171_v16 }
0x4770   :  { %v6186_v40 = vadd.f32 %v6178_v35, %v6170_v59  ;;  %v8196_v13 = vpop.f32.mrb[80].mxu0 }
0x4771   :  { %v6189_v11 = vmul.f32 %v8196_v13, %v11389_v42  ;;  %v5973_v52 = vpop.f32.mrb[81].mxu0 }
0x4772   :  { %v6188_v3 = vmul.f32 %v5973_v52, %v11389_v42 }
0x4773   :  { %v6197_v43 = vadd.f32 %v6189_v11, %v6181_v25 }
0x4774   :  { %v6196_v20 = vadd.f32 %v6188_v3, %v6180_v5  ;;  %v8199_v9 = vpop.f32.mrb[82].mxu0 }
0x4775   :  { %v6191_v7 = vmul.f32 %v8199_v9, %v11389_v42  ;;  %v5983_v33 = vpop.f32.mrb[83].mxu0 }
0x4776   :  { %v6190_v47 = vmul.f32 %v5983_v33, %v11389_v42 }
0x4777   :  { %v6199_v30 = vadd.f32 %v6191_v7, %v6183_v27 }
0x4778   :  { %v6198_v21 = vadd.f32 %v6190_v47, %v6182_v14  ;;  %v8202_v15 = vpop.f32.mrb[84].mxu0 }
0x4779   :  { %v6193_v12 = vmul.f32 %v8202_v15, %v11389_v42  ;;  %v5993_v61 = vpop.f32.mrb[85].mxu0 }
0x477a   :  { %v6192_v10 = vmul.f32 %v5993_v61, %v11389_v42 }
0x477b   :  { %v6201_v62 = vadd.f32 %v6193_v12, %v6185_v32  ;;  %v11392_v12 = vld [vmem:[#allocation19_spill] sm:$0xff] }
0x477c   :  { %v6200_v0 = vadd.f32 %v6192_v10, %v6184_v6  ;;  %v8205_v17 = vpop.f32.mrb[86].mxu0 }
0x477d   :  { %v6195_v46 = vmul.f32 %v8205_v17, %v11389_v42  ;;  %v6003_v39 = vpop.f32.mrb[87].mxu0 }
0x477e   :  { %v6194_v36 = vmul.f32 %v6003_v39, %v11389_v42 }
0x477f   :  { %v6203_v49 = vadd.f32 %v6195_v46, %v6187_v38 }
0x4780   :  { %v6202_v2 = vadd.f32 %v6194_v36, %v6186_v40  ;;  %v8208_v54 = vpop.f32.mrb[88].mxu0 }
0x4781   :  { %v6205_v28 = vmul.f32 %v8208_v54, %v11390_v45  ;;  %v6013_v23 = vpop.f32.mrb[89].mxu0 }
0x4782   :  { %v6204_v53 = vmul.f32 %v6013_v23, %v11390_v45 }
0x4783   :  { %v6213_v34 = vadd.f32 %v6205_v28, %v6197_v43 }
0x4784   :  { %v6212_v8 = vadd.f32 %v6204_v53, %v6196_v20  ;;  %v8211_v41 = vpop.f32.mrb[90].mxu0 }
0x4785   :  { %v6207_v50 = vmul.f32 %v8211_v41, %v11390_v45  ;;  %v6023_v24 = vpop.f32.mrb[91].mxu0 }
0x4786   :  { %v6206_v16 = vmul.f32 %v6023_v24, %v11390_v45 }
0x4787   :  { %v6215_v59 = vadd.f32 %v6207_v50, %v6199_v30 }
0x4788   :  { %v6214_v19 = vadd.f32 %v6206_v16, %v6198_v21  ;;  %v8214_v31 = vpop.f32.mrb[92].mxu0 }
0x4789   :  { %v6209_v48 = vmul.f32 %v8214_v31, %v11390_v45  ;;  %v6033_v51 = vpop.f32.mrb[93].mxu0 }
0x478a   :  { %v6208_v60 = vmul.f32 %v6033_v51, %v11390_v45 }
0x478b   :  { %v6217_v25 = vadd.f32 %v6209_v48, %v6201_v62 }
0x478c   :  { %v6216_v5 = vadd.f32 %v6208_v60, %v6200_v0  ;;  %v8217_v18 = vpop.f32.mrb[94].mxu0 }
0x478d   :  { %v6211_v22 = vmul.f32 %v8217_v18, %v11390_v45  ;;  %v6043_v4 = vpop.f32.mrb[95].mxu0 }
0x478e   :  { %v6210_v55 = vmul.f32 %v6043_v4, %v11390_v45  ;;  %v6347_v4 = vld [vmem:[#allocation5 + $0x60] sm:$0xff] }
0x478f   :  { %v6219_v27 = vadd.f32 %v6211_v22, %v6203_v49 }
0x4790   :  { %v6218_v14 = vadd.f32 %v6210_v55, %v6202_v2  ;;  %v8220_v26 = vpop.f32.mrb[96].mxu0  ;;  %v6348_v55 = vld [vmem:[#allocation5 + $0x68] sm:$0xff] }
0x4791   :  { %v6221_v37 = vmul.f32 %v8220_v26, %v11391_v58  ;;  %v6053_v57 = vpop.f32.mrb[97].mxu0  ;;  %v6350_v26 = vld [vmem:[#allocation5 + $0x78] sm:$0xff] }
0x4792   :  { %v6220_v32 = vmul.f32 %v6053_v57, %v11391_v58  ;;  %v6352_v57 = vld [vmem:[#allocation5 + $0x88] sm:$0xff] }
0x4793   :  { %v6229_v6 = vadd.f32 %v6221_v37, %v6213_v34  ;;  %v6351_v37 = vld [vmem:[#allocation5 + $0x80] sm:$0xff] }
0x4794   :  { %v6228_v29 = vadd.f32 %v6220_v32, %v6212_v8  ;;  %v8223_v63 = vpop.f32.mrb[98].mxu0  ;;  %v8559_v32 = vpack.c.bf16 %v6352_v57, %v6351_v37  ;;  %v7284_v37 = vld [vmem:[%s11262_s4 + $0x48] ss:$0 sm:$0xff] }
0x4795   :  { %v6223_v56 = vmul.f32 %v8223_v63, %v11391_v58  ;;  %v6063_v35 = vpop.f32.mrb[99].mxu0  ;;  %v6435_v63 = vld [vmem:[#allocation5 + $0xa0] sm:$0xff] }
0x4796   :  { %v6222_v38 = vmul.f32 %v6063_v35, %v11391_v58  ;;  %v6436_v35 = vld [vmem:[#allocation5 + $0xa8] sm:$0xff] }
0x4797   :  { %v6231_v40 = vadd.f32 %v6223_v56, %v6215_v59 }
0x4798   :  { %v6230_v13 = vadd.f32 %v6222_v38, %v6214_v19  ;;  %v8226_v42 = vpop.f32.mrb[100].mxu0  ;;  %v8565_v38 = vpack.c.bf16 %v6436_v35, %v6435_v63 }
0x4799   :  { %v6225_v11 = vmul.f32 %v8226_v42, %v11391_v58  ;;  %v6073_v52 = vpop.f32.mrb[101].mxu0 }
0x479a   :  { %v6224_v3 = vmul.f32 %v6073_v52, %v11391_v58  ;;  %v7046_v52 = vld [vmem:[%s11262_s4 + $0x10] ss:$0 sm:$0xff] }
0x479b   :  { %v6233_v43 = vadd.f32 %v6225_v11, %v6217_v25 }
0x479c   :  { %v6232_v20 = vadd.f32 %v6224_v3, %v6216_v5  ;;  %v8229_v9 = vpop.f32.mrb[102].mxu0  ;;  %v11393_v3 = vld [vmem:[#allocation11_spill] sm:$0xff] }
0x479d   :  { %v6227_v7 = vmul.f32 %v8229_v9, %v11391_v58  ;;  %v6083_v33 = vpop.f32.mrb[103].mxu0 }
0x479e   :  { %v6226_v47 = vmul.f32 %v6083_v33, %v11391_v58  ;;  %v6516_v33 = vld [vmem:[#allocation5 + $0xb0] sm:$0xff] }
0x479f   :  { %v6235_v30 = vadd.f32 %v6227_v7, %v6219_v27  ;;  %v6349_v27 = vld [vmem:[#allocation5 + $0x70] sm:$0xff] }
0x47a0   :  { %v6234_v21 = vadd.f32 %v6226_v47, %v6218_v14  ;;  %v8232_v15 = vpop.f32.mrb[104].mxu0  ;;  %v8553_v14 = vpack.c.bf16 %v6348_v55, %v6347_v4  ;;  %v8556_v58 = vpack.c.bf16 %v6350_v26, %v6349_v27  ;;  %v6517_v47 = vld [vmem:[#allocation5 + $0xb8] sm:$0xff]  ;;  %v6920_v55 = vld [vmem:[#allocation5 + $0x100] sm:$0xf] }
0x47a1   :  { %v6237_v61 = vmul.f32 %v8232_v15, %v11392_v12  ;;  %v6093_v10 = vpop.f32.mrb[105].mxu0  ;;  %v7280_v27 = vld [vmem:[%s11262_s4 + $0x38] ss:$0 sm:$0xff] }
0x47a2   :  { %v6236_v62 = vmul.f32 %v6093_v10, %v11392_v12 }
0x47a3   :  { %v6245_v0 = vadd.f32 %v6237_v61, %v6229_v6  ;;  %v6433_v6 = vld [vmem:[#allocation5 + $0x90] sm:$0xff] }
0x47a4   :  { %v6244_v17 = vadd.f32 %v6236_v62, %v6228_v29  ;;  %v8235_v46 = vpop.f32.mrb[106].mxu0  ;;  %v6434_v29 = vld [vmem:[#allocation5 + $0x98] sm:$0xff]  ;;  %v6518_v62 = vld [vmem:[#allocation5 + $0xc0] sm:$0xff] }
0x47a5   :  { %v6239_v39 = vmul.f32 %v8235_v46, %v11392_v12  ;;  %v6103_v36 = vpop.f32.mrb[107].mxu0  ;;  %v8562_v56 = vpack.c.bf16 %v6434_v29, %v6433_v6  ;;  %v7274_v46 = vld [vmem:[%s11262_s4 + $0x20] ss:$0 sm:$0xff] }
0x47a6   :  { %v6252_v49 = vadd.f32 %v6245_v0, %v6244_v17  ;;  %v6238_v2 = vmul.f32 %v6103_v36, %v11392_v12  ;;  %v6519_v0 = vld [vmem:[#allocation5 + $0xc8] sm:$0xff] }
0x47a7   :  { %v6247_v54 = vadd.f32 %v6239_v39, %v6231_v40  ;;  %8563 = vmatpush3.bf16.msra.mxu1 %v8562_v56  ;;  %v7270_v40 = vld [vmem:[%s11262_s4 + $0x90] ss:$0 sm:$0xff]  ;;  %v8571_v17 = vpack.c.bf16 %v6519_v0, %v6518_v62 }
0x47a8   :  { %v6246_v45 = vadd.f32 %v6238_v2, %v6230_v13  ;;  %v8238_v28 = vpop.f32.mrb[108].mxu0  ;;  %8564 = vmatprep.subr.bf16.mxu1 %v11383_v44 }
0x47a9   :  { %v6241_v23 = vmul.f32 %v8238_v28, %v11392_v12  ;;  %v6113_v53 = vpop.f32.mrb[109].mxu0  ;;  %v6762_v28 = vld [vmem:[#allocation5 + $0xe8] sm:$0xff] }
0x47aa   :  { %v6253_v34 = vadd.f32 %v6252_v49, %v6246_v45  ;;  %v6240_v8 = vmul.f32 %v6113_v53, %v11392_v12  ;;  %v6600_v45 = vld [vmem:[#allocation5 + $0xd8] sm:$0xff]  ;;  %v6763_v53 = vld [vmem:[#allocation5 + $0xf0] sm:$0xff] }
0x47ab   :  { %v6249_v41 = vadd.f32 %v6241_v23, %v6233_v43  ;;  %8566 = vmatpush3.bf16.msra.mxu1 %v8565_v38  ;;  %v389_v43 = vadd.f32 %v7046_v52, %v11393_v3 }
0x47ac   :  { %v6248_v50 = vadd.f32 %v6240_v8, %v6232_v20  ;;  %v6254_v24 = vadd.f32 %v6253_v34, %v6247_v54  ;;  %8573 = vmatprep.subr.bf16.mxu1 %v11383_v44  ;;  %v6599_v54 = vld [vmem:[#allocation5 + $0xd0] sm:$0xff]  ;;  %v8577_v34 = vpack.c.bf16 %v6763_v53, %v6762_v28 }
0x47ad   :  { %v392_v20 = vmax.f32 %v389_v43, 0.0  ;;  %v8574_v23 = vpack.c.bf16 %v6600_v45, %v6599_v54 }
0x47ae   :  { %v6255_v16 = vadd.f32 %v6254_v24, %v6248_v50 }
0x47b0   :  { %v6256_v59 = vadd.f32 %v6255_v16, %v6249_v41  ;;  %v6680_v16 = vld [vmem:[#allocation5 + $0xe0] sm:$0xff] }
0x47f0   :  { %v8241_v19 = vpop.f32.mrb[110].mxu0 }
0x47f1   :  { %v6243_v31 = vmul.f32 %v8241_v19, %v11392_v12  ;;  %v6123_v48 = vpop.f32.mrb[111].mxu0 }
0x47f2   :  { %v6242_v51 = vmul.f32 %v6123_v48, %v11392_v12 }
0x47f3   :  { %v6251_v60 = vadd.f32 %v6243_v31, %v6235_v30  ;;  %v8568_v30 = vpack.c.bf16 %v6517_v47, %v6516_v33  ;;  %v7282_v31 = vld [vmem:[%s11262_s4 + $0x40] ss:$0 sm:$0xff] }
0x47f4   :  { %v6250_v25 = vadd.f32 %v6242_v51, %v6234_v21  ;;  %v7272_v21 = vld [vmem:[%s11262_s4 + $0x18] ss:$0 sm:$0xff] }
0x47f6   :  { %v6257_v5 = vadd.f32 %v6256_v59, %v6250_v25  ;;  %v7278_v59 = vld [vmem:[%s11262_s4 + $0x30] ss:$0 sm:$0xff] }
0x47f8   :  { %v6258_v18 = vadd.f32 %v6257_v5, %v6251_v60 }
0x47fa   :  { %v6264_v22 = vmul.f32 0.125, %v6258_v18 }
0x47fc   :  { %8251 = vmatmul.mubr.msk.f32.vlgmr.msra.gmra.mrb[112].mxu0 %vm129_vm6, %v6264_v22  ;;  %v6840_v22 = vld [vmem:[#allocation5 + $0xf8] sm:$0xff] }
0x47fd   :  { %8265 = vmatprep.mubr.msk.f32.mxu0 %vm9090_vm0, %v11384_v1  ;;  %8554 = vmatpush3.bf16.msra.mxu0 %v8553_v14 }
0x47fe   :  { %8555 = vmatprep.subr.bf16.mxu0 %v11383_v44 }
0x4801   :  { %8557 = vmatpush3.bf16.msra.mxu0 %v8556_v58 }
0x4802   :  { %8558 = vmatprep.subr.bf16.mxu0 %v11383_v44 }
0x4805   :  { %8560 = vmatpush3.bf16.msra.mxu0 %v8559_v32 }
0x4806   :  { %8567 = vmatprep.subr.bf16.mxu0 %v11383_v44 }
0x48cf   :  { %v6338_v13 = vpop.f32.mrb[112].mxu0 }
0x48d0   :  { %v6339_v42 = vadd.f32 %v7270_v40, %v6338_v13  ;;  %v8252_v11 = vpop.f32.mrb[113].mxu0 }
0x48d2   :  { %6343 = vrot.lane.b32.xlu1 %v6339_v42, %s9097_s0 }
0x4944   :  { %v6344_v9 = vpop.permute.xlu1 %6343 }
0x4945   :  { %v6346_v7 = vsel %vm673_vm12, %v392_v20, %v6344_v9 }
0x4946   :  { %8266 = vmatmul.mubr.msk.f32.vlgmr.msra.gmra.mrb[114].mxu0 %vm6358_vm14, %v6346_v7 }
0x4947   :  { %8287 = vmatprep.mubr.msk.f32.mxu0 %vm9090_vm0, %v11384_v1  ;;  %8569 = vmatpush3.bf16.msra.mxu0 %v8568_v30 }
0x4948   :  { %8570 = vmatprep.subr.bf16.mxu0 %v11383_v44 }
0x494b   :  { %8572 = vmatpush3.bf16.msra.mxu0 %v8571_v17 }
0x494c   :  { %8576 = vmatprep.subr.bf16.mxu0 %v11383_v44  ;;  %v7276_v44 = vld [vmem:[%s11262_s4 + $0x28] ss:$0 sm:$0xff] }
0x4a19   :  { %v6428_v15 = vpop.f32.mrb[114].mxu0 }
0x4a1a   :  { %v6429_v12 = vadd.f32 %v7272_v21, %v6428_v15  ;;  %v8267_v61 = vpop.f32.mrb[115].mxu0 }
0x4a1c   :  { %v6432_v10 = vmax.f32 %v6429_v12, 0.0 }
0x4a1e   :  { %8277 = vmatmul.mubr.msk.f32.vlgmr.msra.gmra.mrb[102].mxu1 %vm129_vm6, %v6432_v10 }
0x4a1f   :  { %8294 = vmatprep.mubr.msk.f32.mxu1 %vm9090_vm0, %v11384_v1  ;;  %8575 = vmatpush3.bf16.msra.mxu1 %v8574_v23 }
0x4a20   :  { %8297 = vmatprep.subr.mxu1 %v11384_v1 }
0x4af1   :  { %v6511_v39 = vpop.f32.mrb[102].mxu1 }
0x4af2   :  { %v6512_v36 = vadd.f32 %v7274_v46, %v6511_v39  ;;  %v8278_v49 = vpop.f32.mrb[103].mxu1 }
0x4af4   :  { %v6515_v2 = vmax.f32 %v6512_v36, 0.0 }
0x4af6   :  { %8288 = vmatmul.mubr.msk.f32.vlgmr.msra.gmra.mrb[116].mxu0 %vm129_vm6, %v6515_v2  ;;  %vm6686_vm6 = vcmask 64512  }
0x4af7   :  { %8306 = vmatprep.mubr.msk.f32.mxu0 %vm9090_vm0, %v11384_v1  ;;  %8578 = vmatpush3.bf16.msra.mxu0 %v8577_v34 }
0x4af8   :  { %8314 = vmatprep.subr.mxu0 %v11384_v1 }
0x4bc9   :  { %v6594_v8 = vpop.f32.mrb[116].mxu0 }
0x4bca   :  { %v6595_v41 = vadd.f32 %v7276_v44, %v6594_v8  ;;  %v8289_v50 = vpop.f32.mrb[117].mxu0 }
0x4bcc   :  { %v6598_v24 = vmax.f32 %v6595_v41, 0.0 }
0x4bce   :  { %8295 = vmatmul.mubr.msk.f32.vlgmr.msra.gmra.mrb[104].mxu1 %vm673_vm12, %v6598_v24  ;;  %8307 = vmatmul.mubr.msk.f32.vlgmr.msra.gmra.mrb[118].mxu0 %vm673_vm12, %v6598_v24  ;;  %vm6760_vm12 = vcmask 58368  }
0x4bcf   :  { %8299 = vmatprep.mubr.msk.f32.mxu1 %vm9090_vm0, %v11384_v1  ;;  %8316 = vmatprep.mubr.msk.f32.mxu0 %vm9090_vm0, %v11384_v1 }
0x4bd0   :  { %8298 = vmatpush3.msra.mxu1 %v6680_v16  ;;  %8315 = vmatpush3.msk.msra.mxu0 %vm440_vm5, %v6920_v55 }
0x4bd1   :  { %8309 = vmatprep.subr.mxu1 %v11384_v1 }
0x4ca1   :  { %v6675_v19 = vpop.f32.mrb[104].mxu1  ;;  %v6835_v48 = vpop.f32.mrb[118].mxu0 }
0x4ca2   :  { %v6676_v51 = vadd.f32 %v7278_v59, %v6675_v19  ;;  %v8296_v60 = vpop.f32.mrb[105].mxu1  ;;  %v8308_v25 = vpop.f32.mrb[119].mxu0  ;;  %v6836_v18 = vadd.f32 %v7282_v31, %v6835_v48 }
0x4ca4   :  { %v6679_v5 = vmax.f32 %v6676_v51, 0.0  ;;  %v6839_v4 = vmax.f32 %v6836_v18, 0.0 }
0x4ca6   :  { %8300 = vmatmul.mubr.msk.f32.vlgmr.msra.gmra.mrb[106].mxu1 %vm6686_vm6, %v6679_v5 }
0x4ca7   :  { %8310 = vmatpush3.msra.mxu1 %v6840_v22  ;;  %8311 = vmatprep.mubr.msk.f32.mxu1 %vm9090_vm0, %v11384_v1 }
0x4caa   :  { %8312 = vmatmul.mubr.msk.f32.vlgmr.msra.gmra.mrb[108].mxu1 %vm6686_vm6, %v6839_v4 }
0x4d79   :  { %v6756_v14 = vpop.f32.mrb[106].mxu1 }
0x4d7a   :  { %v6757_v26 = vadd.f32 %v7280_v27, %v6756_v14  ;;  %v8301_v58 = vpop.f32.mrb[107].mxu1 }
0x4d7c   :  { %6761 = vst.msk [vmem:[#allocation8] sm:$0x3] %vm6760_vm12, %v6757_v26 }
0x4d7d   :  { %v6915_v57 = vpop.f32.mrb[108].mxu1 }
0x4d7e   :  { %v6916_v1 = vadd.f32 %v7284_v37, %v6915_v57  ;;  %v8313_v32 = vpop.f32.mrb[109].mxu1 }
0x4d80   :  { %v6919_v6 = vmax.f32 %v6916_v1, 0.0 }
0x4d82   :  { %8317 = vmatmul.mubr.msk.f32.vlgmr.msra.gmra.mrb[120].mxu0 %vm415_vm7, %v6919_v6 }
0x4d83   :  { %9071 = shalt.err (!%p9068_p12)
}
0x4d84   :  { %s9072_s7 = scalar_lea.hbm %s11263_s5, 32 }
0x4d85   :  { %p9073_p13 = scmp.ne.s32.totalorder %s11263_s5, %s9072_s7  ;;  %p9076_p0 = scmp.lt.u32.totalorder %s9072_s7, %s11263_s5 }
0x4d87   :  { %p9078_p1 = pnand %p9076_p0, %p9073_p13 }
0x4d89   :  { %9081 = shalt.err (!%p9078_p1)
}
0x4d8a   :  { %7023 = dma.vmem_to_hbm [thread:$0]  %s7021_s28, 32, %s11263_s5, [#allocation7]   ;;  %v7286_v29 = vld [vmem:[%s11262_s4 + $0x50] ss:$0 sm:$0xff]  ;;  %vm7012_vm0 = vcmask 1024  }
0x4e55   :  { %v6998_v63 = vpop.f32.mrb[120].mxu0 }
0x4e56   :  { %v6999_v56 = vadd.f32 %v7286_v29, %v6998_v63  ;;  %v8318_v35 = vpop.f32.mrb[121].mxu0 }
0x4e58   :  { %v7003_v38 = vand.u32 2147483647, %v6999_v56  ;;  %v7002_v3 = vmax.f32 %v6999_v56, 0.0 }
0x4e5a   :  { %v7004_v40 = vsub.f32 0.0, %v7003_v38 }
0x4e5c   :  { %v7005_v13 = vmul.f32 1.442695, %v7004_v40 }
0x4e5e   :  { %9034 = vpow2.f32 %v7005_v13 }
0x4e68   :  { %v9035_v42 = vpop.eup %9034 }
0x4e69   :  { %v7007_v11 = vadd.f32 1.0, %v9035_v42 }
0x4e6b   :  { %9036 = vlog2.f32 %v7007_v11 }
0x4e75   :  { %v9037_v52 = vpop.eup %9036 }
0x4e76   :  { %v7009_v43 = vmul.f32 0.6931472, %v9037_v52 }
0x4e78   :  { %v7010_v20 = vadd.f32 %v7009_v43, %v7002_v3 }
0x4e7a   :  { %v7011_v9 = vadd.f32 1.0, %v7010_v20 }
0x4e7c   :  { %7013 = vst.msk [vmem:[%s11264_s6] sm:$0x3] %vm7012_vm0, %v7011_v9 }
0x4e7d   :  { %9084 = dma.done.wait [#allocation7], 32  }
0x4e7e   :  { %9085 = vsyncadd [#allocation7], 4294967264 }
0x4e7f   :  { %7031 = vsyncpa [#allocation6], 1 }
0x4e80   :  { %7032 = vsyncpa [#allocation7], 1 }

</bundles_post_ra>
